<compile_context>
chip_gen: v5e
topology: v5e:2x2
jax: 0.10.0
libtpu: 0.0.40
codegen_flags: <defaults>
</compile_context>

<pallas_src>
import functools

import jax
import jax.numpy as jnp
from jax.experimental import pallas as pl
from jax.experimental.pallas import tpu as pltpu


# ----------------------------------------------------------------------------
# small helpers
# ----------------------------------------------------------------------------
def _cdiv(a, b):
    return -(-a // b)


def _round_up(x, m):
    return (x + m - 1) // m * m


def _choose_tm(M, target=512):
    """Row-tile: <= target, >= 2 blocks when possible, 16-aligned or full-M."""
    if M <= 16:
        return M                      # block equals full dim -> always legal
    if M <= target:
        return min(target, _round_up(_cdiv(M, 2), 16))
    return target


# ----------------------------------------------------------------------------
# Pallas kernels
# ----------------------------------------------------------------------------
def _mm_stats_kernel(a_ref, w_ref, o_ref, sum_ref, sq_ref, *, m_total, tm):
    """bf16 x bf16 -> f32 MXU matmul; bf16 output + per-block BN partial stats."""
    y = jnp.dot(a_ref[...], w_ref[...], preferred_element_type=jnp.float32)
    o_ref[...] = y.astype(o_ref.dtype)
    if m_total % tm != 0:
        # mask padded rows of the last (partial) block so they don't pollute BN stats
        rows = jax.lax.broadcasted_iota(jnp.int32, (tm, 1), 0) + pl.program_id(0) * tm
        y = jnp.where(rows < m_total, y, 0.0)
    sum_ref[...] = jnp.sum(y, axis=0, keepdims=True)[None]        # (1, 1, N)
    sq_ref[...] = jnp.sum(y * y, axis=0, keepdims=True)[None]     # (1, 1, N)


def _mm_bias_kernel(a_ref, w_ref, b_ref, o_ref, *, act):
    """matmul + bias (+ optional fused sigmoid on the EUP)."""
    y = jnp.dot(a_ref[...], w_ref[...], preferred_element_type=jnp.float32)
    y = y + b_ref[...]
    if act == "sigmoid":
        y = jax.nn.sigmoid(y)
    o_ref[...] = y.astype(o_ref.dtype)


def _bn_relu_kernel(x_ref, s_ref, t_ref, o_ref):
    """BatchNorm (precomputed per-channel scale/shift, f32 math) + ReLU."""
    xv = x_ref[...].astype(jnp.float32)
    o_ref[...] = jnp.maximum(xv * s_ref[...] + t_ref[...], 0.0).astype(o_ref.dtype)


# ----------------------------------------------------------------------------
# Pallas wrappers
# ----------------------------------------------------------------------------
def pallas_matmul_stats(a, w, out_dtype=jnp.bfloat16, target_tm=512):
    """a: [M, K] bf16, w: [K, N] bf16 -> (y [M, N] out_dtype, sum [N] f32, sumsq [N] f32)."""
    M, K = a.shape
    N = w.shape[1]
    if K < 8:                                   # guard degenerate contracting dims
        a = jnp.pad(a, ((0, 0), (0, 8 - K)))
        w = jnp.pad(w, ((0, 8 - K), (0, 0)))
        K = 8
    tm = _choose_tm(M, target_tm)
    nblk = _cdiv(M, tm)
    kernel = functools.partial(_mm_stats_kernel, m_total=M, tm=tm)
    y, ssum, ssq = pl.pallas_call(
        kernel,
        out_shape=(
            jax.ShapeDtypeStruct((M, N), out_dtype),
            jax.ShapeDtypeStruct((nblk, 1, N), jnp.float32),
            jax.ShapeDtypeStruct((nblk, 1, N), jnp.float32),
        ),
        grid=(nblk,),
        in_specs=[
            pl.BlockSpec((tm, K), lambda i: (i, 0)),
            pl.BlockSpec((K, N), lambda i: (0, 0)),
        ],
        out_specs=(
            pl.BlockSpec((tm, N), lambda i: (i, 0)),
            pl.BlockSpec((1, 1, N), lambda i: (i, 0, 0)),
            pl.BlockSpec((1, 1, N), lambda i: (i, 0, 0)),
        ),
        compiler_params=pltpu.CompilerParams(dimension_semantics=("parallel",)),
    )(a, w)
    return y, jnp.sum(ssum, axis=(0, 1)), jnp.sum(ssq, axis=(0, 1))


def pallas_matmul_bias(a, w, b, act=None, out_dtype=jnp.float32, target_tm=512):
    """a: [M, K] bf16, w: [K, N] bf16, b: [N] f32 -> [M, N] out_dtype."""
    M, K = a.shape
    N = w.shape[1]
    if K < 8:
        a = jnp.pad(a, ((0, 0), (0, 8 - K)))
        w = jnp.pad(w, ((0, 8 - K), (0, 0)))
        K = 8
    tm = _choose_tm(M, target_tm)
    nblk = _cdiv(M, tm)
    kernel = functools.partial(_mm_bias_kernel, act=act)
    return pl.pallas_call(
        kernel,
        out_shape=jax.ShapeDtypeStruct((M, N), out_dtype),
        grid=(nblk,),
        in_specs=[
            pl.BlockSpec((tm, K), lambda i: (i, 0)),
            pl.BlockSpec((K, N), lambda i: (0, 0)),
            pl.BlockSpec((1, N), lambda i: (0, 0)),
        ],
        out_specs=pl.BlockSpec((tm, N), lambda i: (i, 0)),
        compiler_params=pltpu.CompilerParams(dimension_semantics=("parallel",)),
    )(a, w, b.reshape(1, N).astype(jnp.float32))


def pallas_scale_shift_relu(x, scale, shift, target_tm=512):
    """x: [M, N] bf16, scale/shift: [N] f32 -> relu(x*scale + shift) bf16."""
    M, N = x.shape
    tm = _choose_tm(M, target_tm)
    nblk = _cdiv(M, tm)
    return pl.pallas_call(
        _bn_relu_kernel,
        out_shape=jax.ShapeDtypeStruct((M, N), x.dtype),
        grid=(nblk,),
        in_specs=[
            pl.BlockSpec((tm, N), lambda i: (i, 0)),
            pl.BlockSpec((1, N), lambda i: (0, 0)),
            pl.BlockSpec((1, N), lambda i: (0, 0)),
        ],
        out_specs=pl.BlockSpec((tm, N), lambda i: (i, 0)),
        compiler_params=pltpu.CompilerParams(dimension_semantics=("parallel",)),
    )(x, scale.reshape(1, N).astype(jnp.float32), shift.reshape(1, N).astype(jnp.float32))


# ----------------------------------------------------------------------------
# Plain-JAX glue (im2col, pooling, resize, norm)
# ----------------------------------------------------------------------------
def im2col(x, k, stride, padding):
    """x: NHWC -> ([B*Ho*Wo, k*k*C], Ho, Wo). Patch channel order is (ki, kj, cin);
    weights are initialized directly in the matching matmul layout."""
    B, H, W, C = x.shape
    if k == 1 and stride == 1 and padding == 0:
        return x.reshape(B * H * W, C), H, W
    xp = jnp.pad(x, ((0, 0), (padding, padding), (padding, padding), (0, 0)))
    Ho = (H + 2 * padding - k) // stride + 1
    Wo = (W + 2 * padding - k) // stride + 1
    cols = []
    for di in range(k):
        for dj in range(k):
            cols.append(
                xp[:, di:di + (Ho - 1) * stride + 1:stride,
                      dj:dj + (Wo - 1) * stride + 1:stride, :]
            )
    patches = jnp.concatenate(cols, axis=-1)          # [B, Ho, Wo, k*k*C]
    return patches.reshape(B * Ho * Wo, k * k * C), Ho, Wo


def conv2d_bias(x, w, b, k, stride, padding, act=None, out_dtype=jnp.float32):
    """x: NHWC bf16, w: [Cin*k*k, Cout] bf16, b: [Cout] f32 -> NHWC."""
    B = x.shape[0]
    patches, Ho, Wo = im2col(x, k, stride, padding)
    y = pallas_matmul_bias(patches, w, b, act=act, out_dtype=out_dtype)
    return y.reshape(B, Ho, Wo, -1)


def basic_layer(x, w, k, stride, padding, eps=1e-5):
    """Conv2d(bias=False) + BatchNorm2d(affine=False, training mode) + ReLU (fused)."""
    B = x.shape[0]
    cout = w.shape[1]
    patches, Ho, Wo = im2col(x, k, stride, padding)
    M = patches.shape[0]
    y, ssum, ssq = pallas_matmul_stats(patches, w)       # bf16 conv out, f32 stats
    mean = ssum / M
    var = jnp.maximum(ssq / M - mean * mean, 0.0)        # biased variance (f32)
    scale = jax.lax.rsqrt(var + eps)
    shift = -mean * scale
    out = pallas_scale_shift_relu(y, scale, shift)
    return out.reshape(B, Ho, Wo, cout)


def instance_norm(x, eps=1e-5):                          # x: [B, H, W, 1] f32
    m = jnp.mean(x, axis=(1, 2), keepdims=True)
    v = jnp.mean((x - m) ** 2, axis=(1, 2), keepdims=True)
    return (x - m) / jnp.sqrt(v + eps)


def avg_pool(x, k):                                      # x: NHWC
    B, H, W, C = x.shape
    xr = x.reshape(B, H // k, k, W // k, k, C).astype(jnp.float32)
    return xr.mean(axis=(2, 4)).astype(x.dtype)


def unfold2d(x, ws):                                     # x: NHWC -> NHW(C*ws*ws)
    B, H, W, C = x.shape
    x = x.reshape(B, H // ws, ws, W // ws, ws, C)
    x = x.transpose(0, 1, 3, 5, 2, 4)                    # [B, H/ws, W/ws, C, ws, ws]
    return x.reshape(B, H // ws, W // ws, C * ws * ws)


def bilinear_resize(x, oh, ow):                          # NHWC, align_corners=False
    B, H, W, C = x.shape
    if H == oh and W == ow:
        return x

    def coords(o, n):
        src = (jnp.arange(o, dtype=jnp.float32) + 0.5) * (n / o) - 0.5
        src = jnp.maximum(src, 0.0)
        i0 = jnp.minimum(jnp.floor(src).astype(jnp.int32), n - 1)
        i1 = jnp.minimum(i0 + 1, n - 1)
        lam = src - i0.astype(jnp.float32)
        return i0, i1, lam

    y0, y1, wy = coords(oh, H)
    x0, x1, wx = coords(ow, W)
    xf = x.astype(jnp.float32)
    # interpolate along W first (2 gathers), then along H (2 gathers)
    left = jnp.take(xf, x0, axis=2)
    right = jnp.take(xf, x1, axis=2)
    wx = wx[None, None, :, None]
    horiz = left * (1.0 - wx) + right * wx               # [B, H, ow, C]
    top = jnp.take(horiz, y0, axis=1)
    bot = jnp.take(horiz, y1, axis=1)
    wy = wy[None, :, None, None]
    return (top * (1.0 - wy) + bot * wy).astype(x.dtype)


# ----------------------------------------------------------------------------
# Parameters (deterministic init; conv weights stored pre-transposed / bf16 as
# [Cin*k*k, Cout] — the exact matmul layout — cast/reshape done once here)
# ----------------------------------------------------------------------------
def init_params(key):
    keys = iter(jax.random.split(key, 64))

    def conv_w(cout, cin, k):
        std = (2.0 / (cout * k * k)) ** 0.5              # kaiming, fan_out, relu
        w = jax.random.normal(next(keys), (cin * k * k, cout), jnp.float32) * std
        return w.astype(jnp.bfloat16)

    def bias(c):
        return jax.random.normal(next(keys), (c,), jnp.float32) * 0.01

    p = {}
    # block1
    p['b1_0'] = conv_w(4, 1, 3);   p['b1_1'] = conv_w(8, 4, 3)
    p['b1_2'] = conv_w(8, 8, 3);   p['b1_3'] = conv_w(24, 8, 3)
    # skip1
    p['skip1_w'] = conv_w(24, 1, 1); p['skip1_b'] = bias(24)
    # block2
    p['b2_0'] = conv_w(24, 24, 3); p['b2_1'] = conv_w(24, 24, 3)
    # block3
    p['b3_0'] = conv_w(64, 24, 3); p['b3_1'] = conv_w(64, 64, 3)
    p['b3_2'] = conv_w(64, 64, 1)
    # block4
    p['b4_0'] = conv_w(64, 64, 3); p['b4_1'] = conv_w(64, 64, 3)
    p['b4_2'] = conv_w(64, 64, 3)
    # block5
    p['b5_0'] = conv_w(128, 64, 3);  p['b5_1'] = conv_w(128, 128, 3)
    p['b5_2'] = conv_w(128, 128, 3); p['b5_3'] = conv_w(64, 128, 1)
    # block_fusion
    p['bf_0'] = conv_w(64, 64, 3); p['bf_1'] = conv_w(64, 64, 3)
    p['bf_2_w'] = conv_w(64, 64, 1); p['bf_2_b'] = bias(64)
    # heatmap head
    p['hh_0'] = conv_w(64, 64, 1); p['hh_1'] = conv_w(64, 64, 1)
    p['hh_2_w'] = conv_w(1, 64, 1); p['hh_2_b'] = bias(1)
    # keypoint head
    p['kh_0'] = conv_w(64, 64, 1); p['kh_1'] = conv_w(64, 64, 1)
    p['kh_2'] = conv_w(64, 64, 1)
    p['kh_3_w'] = conv_w(65, 64, 1); p['kh_3_b'] = bias(65)
    # NOTE: fine_matcher is never used in forward(), so it is omitted.
    return p


# ----------------------------------------------------------------------------
# xfeatComplex forward (zero_lk_branch == 0 path)
# ----------------------------------------------------------------------------
def xfeat_forward(params, y):
    """y: [B, C, H, W] NCHW -> (feats [B,64,H/8,W/8],
                                keypoints [B,65,H/8,W/8],
                                heatmap [B,1,H/8,W/8]) all NCHW, float32."""
    # enable_grad == 0: torch.no_grad() only affects autograd, values identical
    x = jnp.mean(y, axis=1, keepdims=True)               # [B, 1, H, W] f32
    x = x.transpose(0, 2, 3, 1)                          # NHWC [B, H, W, 1]
    x = instance_norm(x).astype(jnp.bfloat16)            # bf16 activations onward

    # block1
    h = basic_layer(x, params['b1_0'], 3, 1, 1)
    h = basic_layer(h, params['b1_1'], 3, 2, 1)
    h = basic_layer(h, params['b1_2'], 3, 1, 1)
    x1 = basic_layer(h, params['b1_3'], 3, 2, 1)

    # skip1: AvgPool2d(4,4) + Conv2d(1,24,1)
    s = avg_pool(x, 4)
    s = conv2d_bias(s, params['skip1_w'], params['skip1_b'], 1, 1, 0,
                    out_dtype=jnp.bfloat16)

    # block2
    h = basic_layer(x1 + s, params['b2_0'], 3, 1, 1)
    x2 = basic_layer(h, params['b2_1'], 3, 1, 1)

    # block3
    h = basic_layer(x2, params['b3_0'], 3, 2, 1)
    h = basic_layer(h, params['b3_1'], 3, 1, 1)
    x3 = basic_layer(h, params['b3_2'], 1, 1, 0)

    # block4
    h = basic_layer(x3, params['b4_0'], 3, 2, 1)
    h = basic_layer(h, params['b4_1'], 3, 1, 1)
    x4 = basic_layer(h, params['b4_2'], 3, 1, 1)

    # block5
    h = basic_layer(x4, params['b5_0'], 3, 2, 1)
    h = basic_layer(h, params['b5_1'], 3, 1, 1)
    h = basic_layer(h, params['b5_2'], 3, 1, 1)
    x5 = basic_layer(h, params['b5_3'], 1, 1, 0)

    Ho, Wo = x3.shape[1], x3.shape[2]
    x4u = bilinear_resize(x4, Ho, Wo)
    x5u = bilinear_resize(x5, Ho, Wo)

    # block_fusion
    h = basic_layer(x3 + x4u + x5u, params['bf_0'], 3, 1, 1)
    h = basic_layer(h, params['bf_1'], 3, 1, 1)
    feats = conv2d_bias(h, params['bf_2_w'], params['bf_2_b'], 1, 1, 0,
                        out_dtype=jnp.float32)

    # heatmap head (bias + sigmoid fused in the final matmul epilogue)
    h = basic_layer(feats.astype(jnp.bfloat16), params['hh_0'], 1, 1, 0)
    h = basic_layer(h, params['hh_1'], 1, 1, 0)
    heatmap = conv2d_bias(h, params['hh_2_w'], params['hh_2_b'], 1, 1, 0,
                          act="sigmoid", out_dtype=jnp.float32)

    # keypoint head on unfolded (ws=8) normalized input
    u = unfold2d(x, 8)
    h = basic_layer(u, params['kh_0'], 1, 1, 0)
    h = basic_layer(h, params['kh_1'], 1, 1, 0)
    h = basic_layer(h, params['kh_2'], 1, 1, 0)
    kp = conv2d_bias(h, params['kh_3_w'], params['kh_3_b'], 1, 1, 0,
                     out_dtype=jnp.float32)

    # back to NCHW
    return (
        feats.transpose(0, 3, 1, 2),
        kp.transpose(0, 3, 1, 2),
        heatmap.transpose(0, 3, 1, 2),
    )


if __name__ == "__main__":
    key = jax.random.PRNGKey(0)
    kp_key, kx_key = jax.random.split(key)
    params = init_params(kp_key)

    B, C, H, W = 2, 3, 32, 32
    y = jax.random.normal(kx_key, (B, C, H, W), jnp.float32)

    feats, keypoints, heatmap = jax.jit(xfeat_forward)(params, y)
    jax.block_until_ready((feats, keypoints, heatmap))

    assert feats.shape == (B, 64, H // 8, W // 8)
    assert keypoints.shape == (B, 65, H // 8, W // 8)
    assert heatmap.shape == (B, 1, H // 8, W // 8)
    assert bool(jnp.all(jnp.isfinite(feats)))
    assert bool(jnp.all((heatmap >= 0) & (heatmap <= 1)))

    print("KERNEL_OK")
</pallas_src>

<mosaic_0001>
module attributes {stable_mosaic.version = 11 : i64} {
  func.func @_mm_stats_kernel(%arg0: i32, %arg1: memref<512x9xbf16, #tpu.memory_space<vmem>>, %arg2: memref<9x4xbf16, #tpu.memory_space<vmem>>, %arg3: memref<512x4xbf16, #tpu.memory_space<vmem>>, %arg4: memref<1x1x4xf32, #tpu.memory_space<vmem>>, %arg5: memref<1x1x4xf32, #tpu.memory_space<vmem>>) attributes {dimension_semantics = [#tpu.dimension_semantics<parallel>], iteration_bounds = array<i64: 4>, scalar_prefetch = 0 : i64, scratch_operands = 0 : i64, tpu.core_type = #tpu.core_type<tc>, window_params = [{transform_indices = @transform_0, window_bounds = array<i64: 512, 9>}, {pipeline_mode = #tpu.pipeline_mode<synchronous>, transform_indices = @transform_1, window_bounds = array<i64: 9, 4>}, {transform_indices = @transform_2, window_bounds = array<i64: 512, 4>}, {transform_indices = @transform_3, window_bounds = array<i64: 1, 1, 4>}, {transform_indices = @transform_4, window_bounds = array<i64: 1, 1, 4>}]} {
    %c0 = arith.constant 0 : index
    %c0_0 = arith.constant 0 : index
    %0 = vector.load %arg1[%c0, %c0_0] : memref<512x9xbf16, #tpu.memory_space<vmem>>, vector<512x9xbf16>
    %c0_1 = arith.constant 0 : index
    %c0_2 = arith.constant 0 : index
    %1 = vector.load %arg2[%c0_1, %c0_2] : memref<9x4xbf16, #tpu.memory_space<vmem>>, vector<9x4xbf16>
    %cst = arith.constant dense<0.000000e+00> : vector<512x4xf32>
    %2 = tpu.matmul %0, %1, %cst {dimension_numbers = #tpu.dot_dimension_numbers<[1], [0], [0], [1], [0, 0, 1, 1], [], []>} : vector<512x9xbf16>, vector<9x4xbf16>, vector<512x4xf32> -> vector<512x4xf32>
    %3 = arith.truncf %2 : vector<512x4xf32> to vector<512x4xbf16>
    %c0_3 = arith.constant 0 : index
    %c0_4 = arith.constant 0 : index
    %4 = vector.load %arg3[%c0_3, %c0_4] : memref<512x4xbf16, #tpu.memory_space<vmem>>, vector<512x4xbf16>
    tpu.vector_store %arg3[%c0_3, %c0_4], %3 {strides = array<i32>} : memref<512x4xbf16, #tpu.memory_space<vmem>>, vector<512x4xbf16>,
    %cst_5 = arith.constant dense<0.000000e+00> : vector<4xf32>
    %5 = vector.multi_reduction <add>, %2, %cst_5 [0] : vector<512x4xf32> to vector<4xf32>
    %6 = vector.shape_cast %5 : vector<4xf32> to vector<1x4xf32>
    %7 = vector.shape_cast %6 : vector<1x4xf32> to vector<1x1x4xf32>
    %c0_6 = arith.constant 0 : index
    %c0_7 = arith.constant 0 : index
    %c0_8 = arith.constant 0 : index
    %8 = vector.load %arg4[%c0_6, %c0_7, %c0_8] : memref<1x1x4xf32, #tpu.memory_space<vmem>>, vector<1x1x4xf32>
    tpu.vector_store %arg4[%c0_6, %c0_7, %c0_8], %7 {strides = array<i32>} : memref<1x1x4xf32, #tpu.memory_space<vmem>>, vector<1x1x4xf32>,
    %9 = arith.mulf %2, %2 : vector<512x4xf32>
    %cst_9 = arith.constant dense<0.000000e+00> : vector<4xf32>
    %10 = vector.multi_reduction <add>, %9, %cst_9 [0] : vector<512x4xf32> to vector<4xf32>
    %11 = vector.shape_cast %10 : vector<4xf32> to vector<1x4xf32>
    %12 = vector.shape_cast %11 : vector<1x4xf32> to vector<1x1x4xf32>
    %c0_10 = arith.constant 0 : index
    %c0_11 = arith.constant 0 : index
    %c0_12 = arith.constant 0 : index
    %13 = vector.load %arg5[%c0_10, %c0_11, %c0_12] : memref<1x1x4xf32, #tpu.memory_space<vmem>>, vector<1x1x4xf32>
    tpu.vector_store %arg5[%c0_10, %c0_11, %c0_12], %12 {strides = array<i32>} : memref<1x1x4xf32, #tpu.memory_space<vmem>>, vector<1x1x4xf32>,
    return
  }
  func.func @transform_0(%arg0: i32) -> (i32, i32) {
    %c0_i32 = arith.constant 0 : i32
    %c0_i32_0 = arith.constant 0 : i32
    return %arg0, %c0_i32 : i32, i32
  }
  func.func @transform_1(%arg0: i32) -> (i32, i32) {
    %c0_i32 = arith.constant 0 : i32
    %c0_i32_0 = arith.constant 0 : i32
    %c0_i32_1 = arith.constant 0 : i32
    return %c0_i32, %c0_i32_0 : i32, i32
  }
  func.func @transform_2(%arg0: i32) -> (i32, i32) {
    %c0_i32 = arith.constant 0 : i32
    %c0_i32_0 = arith.constant 0 : i32
    return %arg0, %c0_i32 : i32, i32
  }
  func.func @transform_3(%arg0: i32) -> (i32, i32, i32) {
    %c0_i32 = arith.constant 0 : i32
    %c0_i32_0 = arith.constant 0 : i32
    %c0_i32_1 = arith.constant 0 : i32
    return %arg0, %c0_i32, %c0_i32_0 : i32, i32, i32
  }
  func.func @transform_4(%arg0: i32) -> (i32, i32, i32) {
    %c0_i32 = arith.constant 0 : i32
    %c0_i32_0 = arith.constant 0 : i32
    %c0_i32_1 = arith.constant 0 : i32
    return %arg0, %c0_i32, %c0_i32_0 : i32, i32, i32
  }
}

module attributes {stable_mosaic.version = 11 : i64} {
  func.func @_bn_relu_kernel(%arg0: i32, %arg1: memref<512x4xbf16, #tpu.memory_space<vmem>>, %arg2: memref<1x4xf32, #tpu.memory_space<vmem>>, %arg3: memref<1x4xf32, #tpu.memory_space<vmem>>, %arg4: memref<512x4xbf16, #tpu.memory_space<vmem>>) attributes {dimension_semantics = [#tpu.dimension_semantics<parallel>], iteration_bounds = array<i64: 4>, scalar_prefetch = 0 : i64, scratch_operands = 0 : i64, tpu.core_type = #tpu.core_type<tc>, window_params = [{transform_indices = @transform_0, window_bounds = array<i64: 512, 4>}, {pipeline_mode = #tpu.pipeline_mode<synchronous>, transform_indices = @transform_1, window_bounds = array<i64: 1, 4>}, {pipeline_mode = #tpu.pipeline_mode<synchronous>, transform_indices = @transform_2, window_bounds = array<i64: 1, 4>}, {transform_indices = @transform_3, window_bounds = array<i64: 512, 4>}]} {
    %c0 = arith.constant 0 : index
    %c0_0 = arith.constant 0 : index
    %0 = vector.load %arg1[%c0, %c0_0] : memref<512x4xbf16, #tpu.memory_space<vmem>>, vector<512x4xbf16>
    %1 = arith.extf %0 : vector<512x4xbf16> to vector<512x4xf32>
    %c0_1 = arith.constant 0 : index
    %c0_2 = arith.constant 0 : index
    %2 = vector.load %arg2[%c0_1, %c0_2] : memref<1x4xf32, #tpu.memory_space<vmem>>, vector<1x4xf32>
    %3 = vector.broadcast %2 : vector<1x4xf32> to vector<512x4xf32>
    %4 = arith.mulf %1, %3 : vector<512x4xf32>
    %c0_3 = arith.constant 0 : index
    %c0_4 = arith.constant 0 : index
    %5 = vector.load %arg3[%c0_3, %c0_4] : memref<1x4xf32, #tpu.memory_space<vmem>>, vector<1x4xf32>
    %6 = vector.broadcast %5 : vector<1x4xf32> to vector<512x4xf32>
    %7 = arith.addf %4, %6 : vector<512x4xf32>
    %cst = arith.constant 0.000000e+00 : f32
    %8 = vector.broadcast %cst : f32 to vector<512x4xf32>
    %9 = arith.maximumf %7, %8 : vector<512x4xf32>
    %10 = arith.truncf %9 : vector<512x4xf32> to vector<512x4xbf16>
    %c0_5 = arith.constant 0 : index
    %c0_6 = arith.constant 0 : index
    %11 = vector.load %arg4[%c0_5, %c0_6] : memref<512x4xbf16, #tpu.memory_space<vmem>>, vector<512x4xbf16>
    tpu.vector_store %arg4[%c0_5, %c0_6], %10 {strides = array<i32>} : memref<512x4xbf16, #tpu.memory_space<vmem>>, vector<512x4xbf16>,
    return
  }
  func.func @transform_0(%arg0: i32) -> (i32, i32) {
    %c0_i32 = arith.constant 0 : i32
    %c0_i32_0 = arith.constant 0 : i32
    return %arg0, %c0_i32 : i32, i32
  }
  func.func @transform_1(%arg0: i32) -> (i32, i32) {
    %c0_i32 = arith.constant 0 : i32
    %c0_i32_0 = arith.constant 0 : i32
    %c0_i32_1 = arith.constant 0 : i32
    return %c0_i32, %c0_i32_0 : i32, i32
  }
  func.func @transform_2(%arg0: i32) -> (i32, i32) {
    %c0_i32 = arith.constant 0 : i32
    %c0_i32_0 = arith.constant 0 : i32
    %c0_i32_1 = arith.constant 0 : i32
    return %c0_i32, %c0_i32_0 : i32, i32
  }
  func.func @transform_3(%arg0: i32) -> (i32, i32) {
    %c0_i32 = arith.constant 0 : i32
    %c0_i32_0 = arith.constant 0 : i32
    return %arg0, %c0_i32 : i32, i32
  }
}

module attributes {stable_mosaic.version = 11 : i64} {
  func.func @_mm_stats_kernel(%arg0: i32, %arg1: memref<256x36xbf16, #tpu.memory_space<vmem>>, %arg2: memref<36x8xbf16, #tpu.memory_space<vmem>>, %arg3: memref<256x8xbf16, #tpu.memory_space<vmem>>, %arg4: memref<1x1x8xf32, #tpu.memory_space<vmem>>, %arg5: memref<1x1x8xf32, #tpu.memory_space<vmem>>) attributes {dimension_semantics = [#tpu.dimension_semantics<parallel>], iteration_bounds = array<i64: 2>, scalar_prefetch = 0 : i64, scratch_operands = 0 : i64, tpu.core_type = #tpu.core_type<tc>, window_params = [{transform_indices = @transform_0, window_bounds = array<i64: 256, 36>}, {pipeline_mode = #tpu.pipeline_mode<synchronous>, transform_indices = @transform_1, window_bounds = array<i64: 36, 8>}, {transform_indices = @transform_2, window_bounds = array<i64: 256, 8>}, {transform_indices = @transform_3, window_bounds = array<i64: 1, 1, 8>}, {transform_indices = @transform_4, window_bounds = array<i64: 1, 1, 8>}]} {
    %c0 = arith.constant 0 : index
    %c0_0 = arith.constant 0 : index
    %0 = vector.load %arg1[%c0, %c0_0] : memref<256x36xbf16, #tpu.memory_space<vmem>>, vector<256x36xbf16>
    %c0_1 = arith.constant 0 : index
    %c0_2 = arith.constant 0 : index
    %1 = vector.load %arg2[%c0_1, %c0_2] : memref<36x8xbf16, #tpu.memory_space<vmem>>, vector<36x8xbf16>
    %cst = arith.constant dense<0.000000e+00> : vector<256x8xf32>
    %2 = tpu.matmul %0, %1, %cst {dimension_numbers = #tpu.dot_dimension_numbers<[1], [0], [0], [1], [0, 0, 1, 1], [], []>} : vector<256x36xbf16>, vector<36x8xbf16>, vector<256x8xf32> -> vector<256x8xf32>
    %3 = arith.truncf %2 : vector<256x8xf32> to vector<256x8xbf16>
    %c0_3 = arith.constant 0 : index
    %c0_4 = arith.constant 0 : index
    %4 = vector.load %arg3[%c0_3, %c0_4] : memref<256x8xbf16, #tpu.memory_space<vmem>>, vector<256x8xbf16>
    tpu.vector_store %arg3[%c0_3, %c0_4], %3 {strides = array<i32>} : memref<256x8xbf16, #tpu.memory_space<vmem>>, vector<256x8xbf16>,
    %cst_5 = arith.constant dense<0.000000e+00> : vector<8xf32>
    %5 = vector.multi_reduction <add>, %2, %cst_5 [0] : vector<256x8xf32> to vector<8xf32>
    %6 = vector.shape_cast %5 : vector<8xf32> to vector<1x8xf32>
    %7 = vector.shape_cast %6 : vector<1x8xf32> to vector<1x1x8xf32>
    %c0_6 = arith.constant 0 : index
    %c0_7 = arith.constant 0 : index
    %c0_8 = arith.constant 0 : index
    %8 = vector.load %arg4[%c0_6, %c0_7, %c0_8] : memref<1x1x8xf32, #tpu.memory_space<vmem>>, vector<1x1x8xf32>
    tpu.vector_store %arg4[%c0_6, %c0_7, %c0_8], %7 {strides = array<i32>} : memref<1x1x8xf32, #tpu.memory_space<vmem>>, vector<1x1x8xf32>,
    %9 = arith.mulf %2, %2 : vector<256x8xf32>
    %cst_9 = arith.constant dense<0.000000e+00> : vector<8xf32>
    %10 = vector.multi_reduction <add>, %9, %cst_9 [0] : vector<256x8xf32> to vector<8xf32>
    %11 = vector.shape_cast %10 : vector<8xf32> to vector<1x8xf32>
    %12 = vector.shape_cast %11 : vector<1x8xf32> to vector<1x1x8xf32>
    %c0_10 = arith.constant 0 : index
    %c0_11 = arith.constant 0 : index
    %c0_12 = arith.constant 0 : index
    %13 = vector.load %arg5[%c0_10, %c0_11, %c0_12] : memref<1x1x8xf32, #tpu.memory_space<vmem>>, vector<1x1x8xf32>
    tpu.vector_store %arg5[%c0_10, %c0_11, %c0_12], %12 {strides = array<i32>} : memref<1x1x8xf32, #tpu.memory_space<vmem>>, vector<1x1x8xf32>,
    return
  }
  func.func @transform_0(%arg0: i32) -> (i32, i32) {
    %c0_i32 = arith.constant 0 : i32
    %c0_i32_0 = arith.constant 0 : i32
    return %arg0, %c0_i32 : i32, i32
  }
  func.func @transform_1(%arg0: i32) -> (i32, i32) {
    %c0_i32 = arith.constant 0 : i32
    %c0_i32_0 = arith.constant 0 : i32
    %c0_i32_1 = arith.constant 0 : i32
    return %c0_i32, %c0_i32_0 : i32, i32
  }
  func.func @transform_2(%arg0: i32) -> (i32, i32) {
    %c0_i32 = arith.constant 0 : i32
    %c0_i32_0 = arith.constant 0 : i32
    return %arg0, %c0_i32 : i32, i32
  }
  func.func @transform_3(%arg0: i32) -> (i32, i32, i32) {
    %c0_i32 = arith.constant 0 : i32
    %c0_i32_0 = arith.constant 0 : i32
    %c0_i32_1 = arith.constant 0 : i32
    return %arg0, %c0_i32, %c0_i32_0 : i32, i32, i32
  }
  func.func @transform_4(%arg0: i32) -> (i32, i32, i32) {
    %c0_i32 = arith.constant 0 : i32
    %c0_i32_0 = arith.constant 0 : i32
    %c0_i32_1 = arith.constant 0 : i32
    return %arg0, %c0_i32, %c0_i32_0 : i32, i32, i32
  }
}

module attributes {stable_mosaic.version = 11 : i64} {
  func.func @_bn_relu_kernel(%arg0: i32, %arg1: memref<256x8xbf16, #tpu.memory_space<vmem>>, %arg2: memref<1x8xf32, #tpu.memory_space<vmem>>, %arg3: memref<1x8xf32, #tpu.memory_space<vmem>>, %arg4: memref<256x8xbf16, #tpu.memory_space<vmem>>) attributes {dimension_semantics = [#tpu.dimension_semantics<parallel>], iteration_bounds = array<i64: 2>, scalar_prefetch = 0 : i64, scratch_operands = 0 : i64, tpu.core_type = #tpu.core_type<tc>, window_params = [{transform_indices = @transform_0, window_bounds = array<i64: 256, 8>}, {pipeline_mode = #tpu.pipeline_mode<synchronous>, transform_indices = @transform_1, window_bounds = array<i64: 1, 8>}, {pipeline_mode = #tpu.pipeline_mode<synchronous>, transform_indices = @transform_2, window_bounds = array<i64: 1, 8>}, {transform_indices = @transform_3, window_bounds = array<i64: 256, 8>}]} {
    %c0 = arith.constant 0 : index
    %c0_0 = arith.constant 0 : index
    %0 = vector.load %arg1[%c0, %c0_0] : memref<256x8xbf16, #tpu.memory_space<vmem>>, vector<256x8xbf16>
    %1 = arith.extf %0 : vector<256x8xbf16> to vector<256x8xf32>
    %c0_1 = arith.constant 0 : index
    %c0_2 = arith.constant 0 : index
    %2 = vector.load %arg2[%c0_1, %c0_2] : memref<1x8xf32, #tpu.memory_space<vmem>>, vector<1x8xf32>
    %3 = vector.broadcast %2 : vector<1x8xf32> to vector<256x8xf32>
    %4 = arith.mulf %1, %3 : vector<256x8xf32>
    %c0_3 = arith.constant 0 : index
    %c0_4 = arith.constant 0 : index
    %5 = vector.load %arg3[%c0_3, %c0_4] : memref<1x8xf32, #tpu.memory_space<vmem>>, vector<1x8xf32>
    %6 = vector.broadcast %5 : vector<1x8xf32> to vector<256x8xf32>
    %7 = arith.addf %4, %6 : vector<256x8xf32>
    %cst = arith.constant 0.000000e+00 : f32
    %8 = vector.broadcast %cst : f32 to vector<256x8xf32>
    %9 = arith.maximumf %7, %8 : vector<256x8xf32>
    %10 = arith.truncf %9 : vector<256x8xf32> to vector<256x8xbf16>
    %c0_5 = arith.constant 0 : index
    %c0_6 = arith.constant 0 : index
    %11 = vector.load %arg4[%c0_5, %c0_6] : memref<256x8xbf16, #tpu.memory_space<vmem>>, vector<256x8xbf16>
    tpu.vector_store %arg4[%c0_5, %c0_6], %10 {strides = array<i32>} : memref<256x8xbf16, #tpu.memory_space<vmem>>, vector<256x8xbf16>,
    return
  }
  func.func @transform_0(%arg0: i32) -> (i32, i32) {
    %c0_i32 = arith.constant 0 : i32
    %c0_i32_0 = arith.constant 0 : i32
    return %arg0, %c0_i32 : i32, i32
  }
  func.func @transform_1(%arg0: i32) -> (i32, i32) {
    %c0_i32 = arith.constant 0 : i32
    %c0_i32_0 = arith.constant 0 : i32
    %c0_i32_1 = arith.constant 0 : i32
    return %c0_i32, %c0_i32_0 : i32, i32
  }
  func.func @transform_2(%arg0: i32) -> (i32, i32) {
    %c0_i32 = arith.constant 0 : i32
    %c0_i32_0 = arith.constant 0 : i32
    %c0_i32_1 = arith.constant 0 : i32
    return %c0_i32, %c0_i32_0 : i32, i32
  }
  func.func @transform_3(%arg0: i32) -> (i32, i32) {
    %c0_i32 = arith.constant 0 : i32
    %c0_i32_0 = arith.constant 0 : i32
    return %arg0, %c0_i32 : i32, i32
  }
}

module attributes {stable_mosaic.version = 11 : i64} {
  func.func @_mm_stats_kernel(%arg0: i32, %arg1: memref<256x72xbf16, #tpu.memory_space<vmem>>, %arg2: memref<72x8xbf16, #tpu.memory_space<vmem>>, %arg3: memref<256x8xbf16, #tpu.memory_space<vmem>>, %arg4: memref<1x1x8xf32, #tpu.memory_space<vmem>>, %arg5: memref<1x1x8xf32, #tpu.memory_space<vmem>>) attributes {dimension_semantics = [#tpu.dimension_semantics<parallel>], iteration_bounds = array<i64: 2>, scalar_prefetch = 0 : i64, scratch_operands = 0 : i64, tpu.core_type = #tpu.core_type<tc>, window_params = [{transform_indices = @transform_0, window_bounds = array<i64: 256, 72>}, {pipeline_mode = #tpu.pipeline_mode<synchronous>, transform_indices = @transform_1, window_bounds = array<i64: 72, 8>}, {transform_indices = @transform_2, window_bounds = array<i64: 256, 8>}, {transform_indices = @transform_3, window_bounds = array<i64: 1, 1, 8>}, {transform_indices = @transform_4, window_bounds = array<i64: 1, 1, 8>}]} {
    %c0 = arith.constant 0 : index
    %c0_0 = arith.constant 0 : index
    %0 = vector.load %arg1[%c0, %c0_0] : memref<256x72xbf16, #tpu.memory_space<vmem>>, vector<256x72xbf16>
    %c0_1 = arith.constant 0 : index
    %c0_2 = arith.constant 0 : index
    %1 = vector.load %arg2[%c0_1, %c0_2] : memref<72x8xbf16, #tpu.memory_space<vmem>>, vector<72x8xbf16>
    %cst = arith.constant dense<0.000000e+00> : vector<256x8xf32>
    %2 = tpu.matmul %0, %1, %cst {dimension_numbers = #tpu.dot_dimension_numbers<[1], [0], [0], [1], [0, 0, 1, 1], [], []>} : vector<256x72xbf16>, vector<72x8xbf16>, vector<256x8xf32> -> vector<256x8xf32>
    %3 = arith.truncf %2 : vector<256x8xf32> to vector<256x8xbf16>
    %c0_3 = arith.constant 0 : index
    %c0_4 = arith.constant 0 : index
    %4 = vector.load %arg3[%c0_3, %c0_4] : memref<256x8xbf16, #tpu.memory_space<vmem>>, vector<256x8xbf16>
    tpu.vector_store %arg3[%c0_3, %c0_4], %3 {strides = array<i32>} : memref<256x8xbf16, #tpu.memory_space<vmem>>, vector<256x8xbf16>,
    %cst_5 = arith.constant dense<0.000000e+00> : vector<8xf32>
    %5 = vector.multi_reduction <add>, %2, %cst_5 [0] : vector<256x8xf32> to vector<8xf32>
    %6 = vector.shape_cast %5 : vector<8xf32> to vector<1x8xf32>
    %7 = vector.shape_cast %6 : vector<1x8xf32> to vector<1x1x8xf32>
    %c0_6 = arith.constant 0 : index
    %c0_7 = arith.constant 0 : index
    %c0_8 = arith.constant 0 : index
    %8 = vector.load %arg4[%c0_6, %c0_7, %c0_8] : memref<1x1x8xf32, #tpu.memory_space<vmem>>, vector<1x1x8xf32>
    tpu.vector_store %arg4[%c0_6, %c0_7, %c0_8], %7 {strides = array<i32>} : memref<1x1x8xf32, #tpu.memory_space<vmem>>, vector<1x1x8xf32>,
    %9 = arith.mulf %2, %2 : vector<256x8xf32>
    %cst_9 = arith.constant dense<0.000000e+00> : vector<8xf32>
    %10 = vector.multi_reduction <add>, %9, %cst_9 [0] : vector<256x8xf32> to vector<8xf32>
    %11 = vector.shape_cast %10 : vector<8xf32> to vector<1x8xf32>
    %12 = vector.shape_cast %11 : vector<1x8xf32> to vector<1x1x8xf32>
    %c0_10 = arith.constant 0 : index
    %c0_11 = arith.constant 0 : index
    %c0_12 = arith.constant 0 : index
    %13 = vector.load %arg5[%c0_10, %c0_11, %c0_12] : memref<1x1x8xf32, #tpu.memory_space<vmem>>, vector<1x1x8xf32>
    tpu.vector_store %arg5[%c0_10, %c0_11, %c0_12], %12 {strides = array<i32>} : memref<1x1x8xf32, #tpu.memory_space<vmem>>, vector<1x1x8xf32>,
    return
  }
  func.func @transform_0(%arg0: i32) -> (i32, i32) {
    %c0_i32 = arith.constant 0 : i32
    %c0_i32_0 = arith.constant 0 : i32
    return %arg0, %c0_i32 : i32, i32
  }
  func.func @transform_1(%arg0: i32) -> (i32, i32) {
    %c0_i32 = arith.constant 0 : i32
    %c0_i32_0 = arith.constant 0 : i32
    %c0_i32_1 = arith.constant 0 : i32
    return %c0_i32, %c0_i32_0 : i32, i32
  }
  func.func @transform_2(%arg0: i32) -> (i32, i32) {
    %c0_i32 = arith.constant 0 : i32
    %c0_i32_0 = arith.constant 0 : i32
    return %arg0, %c0_i32 : i32, i32
  }
  func.func @transform_3(%arg0: i32) -> (i32, i32, i32) {
    %c0_i32 = arith.constant 0 : i32
    %c0_i32_0 = arith.constant 0 : i32
    %c0_i32_1 = arith.constant 0 : i32
    return %arg0, %c0_i32, %c0_i32_0 : i32, i32, i32
  }
  func.func @transform_4(%arg0: i32) -> (i32, i32, i32) {
    %c0_i32 = arith.constant 0 : i32
    %c0_i32_0 = arith.constant 0 : i32
    %c0_i32_1 = arith.constant 0 : i32
    return %arg0, %c0_i32, %c0_i32_0 : i32, i32, i32
  }
}

module attributes {stable_mosaic.version = 11 : i64} {
  func.func @_mm_stats_kernel(%arg0: i32, %arg1: memref<64x72xbf16, #tpu.memory_space<vmem>>, %arg2: memref<72x24xbf16, #tpu.memory_space<vmem>>, %arg3: memref<64x24xbf16, #tpu.memory_space<vmem>>, %arg4: memref<1x1x24xf32, #tpu.memory_space<vmem>>, %arg5: memref<1x1x24xf32, #tpu.memory_space<vmem>>) attributes {dimension_semantics = [#tpu.dimension_semantics<parallel>], iteration_bounds = array<i64: 2>, scalar_prefetch = 0 : i64, scratch_operands = 0 : i64, tpu.core_type = #tpu.core_type<tc>, window_params = [{transform_indices = @transform_0, window_bounds = array<i64: 64, 72>}, {pipeline_mode = #tpu.pipeline_mode<synchronous>, transform_indices = @transform_1, window_bounds = array<i64: 72, 24>}, {transform_indices = @transform_2, window_bounds = array<i64: 64, 24>}, {transform_indices = @transform_3, window_bounds = array<i64: 1, 1, 24>}, {transform_indices = @transform_4, window_bounds = array<i64: 1, 1, 24>}]} {
    %c0 = arith.constant 0 : index
    %c0_0 = arith.constant 0 : index
    %0 = vector.load %arg1[%c0, %c0_0] : memref<64x72xbf16, #tpu.memory_space<vmem>>, vector<64x72xbf16>
    %c0_1 = arith.constant 0 : index
    %c0_2 = arith.constant 0 : index
    %1 = vector.load %arg2[%c0_1, %c0_2] : memref<72x24xbf16, #tpu.memory_space<vmem>>, vector<72x24xbf16>
    %cst = arith.constant dense<0.000000e+00> : vector<64x24xf32>
    %2 = tpu.matmul %0, %1, %cst {dimension_numbers = #tpu.dot_dimension_numbers<[1], [0], [0], [1], [0, 0, 1, 1], [], []>} : vector<64x72xbf16>, vector<72x24xbf16>, vector<64x24xf32> -> vector<64x24xf32>
    %3 = arith.truncf %2 : vector<64x24xf32> to vector<64x24xbf16>
    %c0_3 = arith.constant 0 : index
    %c0_4 = arith.constant 0 : index
    %4 = vector.load %arg3[%c0_3, %c0_4] : memref<64x24xbf16, #tpu.memory_space<vmem>>, vector<64x24xbf16>
    tpu.vector_store %arg3[%c0_3, %c0_4], %3 {strides = array<i32>} : memref<64x24xbf16, #tpu.memory_space<vmem>>, vector<64x24xbf16>,
    %cst_5 = arith.constant dense<0.000000e+00> : vector<24xf32>
    %5 = vector.multi_reduction <add>, %2, %cst_5 [0] : vector<64x24xf32> to vector<24xf32>
    %6 = vector.shape_cast %5 : vector<24xf32> to vector<1x24xf32>
    %7 = vector.shape_cast %6 : vector<1x24xf32> to vector<1x1x24xf32>
    %c0_6 = arith.constant 0 : index
    %c0_7 = arith.constant 0 : index
    %c0_8 = arith.constant 0 : index
    %8 = vector.load %arg4[%c0_6, %c0_7, %c0_8] : memref<1x1x24xf32, #tpu.memory_space<vmem>>, vector<1x1x24xf32>
    tpu.vector_store %arg4[%c0_6, %c0_7, %c0_8], %7 {strides = array<i32>} : memref<1x1x24xf32, #tpu.memory_space<vmem>>, vector<1x1x24xf32>,
    %9 = arith.mulf %2, %2 : vector<64x24xf32>
    %cst_9 = arith.constant dense<0.000000e+00> : vector<24xf32>
    %10 = vector.multi_reduction <add>, %9, %cst_9 [0] : vector<64x24xf32> to vector<24xf32>
    %11 = vector.shape_cast %10 : vector<24xf32> to vector<1x24xf32>
    %12 = vector.shape_cast %11 : vector<1x24xf32> to vector<1x1x24xf32>
    %c0_10 = arith.constant 0 : index
    %c0_11 = arith.constant 0 : index
    %c0_12 = arith.constant 0 : index
    %13 = vector.load %arg5[%c0_10, %c0_11, %c0_12] : memref<1x1x24xf32, #tpu.memory_space<vmem>>, vector<1x1x24xf32>
    tpu.vector_store %arg5[%c0_10, %c0_11, %c0_12], %12 {strides = array<i32>} : memref<1x1x24xf32, #tpu.memory_space<vmem>>, vector<1x1x24xf32>,
    return
  }
  func.func @transform_0(%arg0: i32) -> (i32, i32) {
    %c0_i32 = arith.constant 0 : i32
    %c0_i32_0 = arith.constant 0 : i32
    return %arg0, %c0_i32 : i32, i32
  }
  func.func @transform_1(%arg0: i32) -> (i32, i32) {
    %c0_i32 = arith.constant 0 : i32
    %c0_i32_0 = arith.constant 0 : i32
    %c0_i32_1 = arith.constant 0 : i32
    return %c0_i32, %c0_i32_0 : i32, i32
  }
  func.func @transform_2(%arg0: i32) -> (i32, i32) {
    %c0_i32 = arith.constant 0 : i32
    %c0_i32_0 = arith.constant 0 : i32
    return %arg0, %c0_i32 : i32, i32
  }
  func.func @transform_3(%arg0: i32) -> (i32, i32, i32) {
    %c0_i32 = arith.constant 0 : i32
    %c0_i32_0 = arith.constant 0 : i32
    %c0_i32_1 = arith.constant 0 : i32
    return %arg0, %c0_i32, %c0_i32_0 : i32, i32, i32
  }
  func.func @transform_4(%arg0: i32) -> (i32, i32, i32) {
    %c0_i32 = arith.constant 0 : i32
    %c0_i32_0 = arith.constant 0 : i32
    %c0_i32_1 = arith.constant 0 : i32
    return %arg0, %c0_i32, %c0_i32_0 : i32, i32, i32
  }
}

module attributes {stable_mosaic.version = 11 : i64} {
  func.func @_bn_relu_kernel(%arg0: i32, %arg1: memref<64x24xbf16, #tpu.memory_space<vmem>>, %arg2: memref<1x24xf32, #tpu.memory_space<vmem>>, %arg3: memref<1x24xf32, #tpu.memory_space<vmem>>, %arg4: memref<64x24xbf16, #tpu.memory_space<vmem>>) attributes {dimension_semantics = [#tpu.dimension_semantics<parallel>], iteration_bounds = array<i64: 2>, scalar_prefetch = 0 : i64, scratch_operands = 0 : i64, tpu.core_type = #tpu.core_type<tc>, window_params = [{transform_indices = @transform_0, window_bounds = array<i64: 64, 24>}, {pipeline_mode = #tpu.pipeline_mode<synchronous>, transform_indices = @transform_1, window_bounds = array<i64: 1, 24>}, {pipeline_mode = #tpu.pipeline_mode<synchronous>, transform_indices = @transform_2, window_bounds = array<i64: 1, 24>}, {transform_indices = @transform_3, window_bounds = array<i64: 64, 24>}]} {
    %c0 = arith.constant 0 : index
    %c0_0 = arith.constant 0 : index
    %0 = vector.load %arg1[%c0, %c0_0] : memref<64x24xbf16, #tpu.memory_space<vmem>>, vector<64x24xbf16>
    %1 = arith.extf %0 : vector<64x24xbf16> to vector<64x24xf32>
    %c0_1 = arith.constant 0 : index
    %c0_2 = arith.constant 0 : index
    %2 = vector.load %arg2[%c0_1, %c0_2] : memref<1x24xf32, #tpu.memory_space<vmem>>, vector<1x24xf32>
    %3 = vector.broadcast %2 : vector<1x24xf32> to vector<64x24xf32>
    %4 = arith.mulf %1, %3 : vector<64x24xf32>
    %c0_3 = arith.constant 0 : index
    %c0_4 = arith.constant 0 : index
    %5 = vector.load %arg3[%c0_3, %c0_4] : memref<1x24xf32, #tpu.memory_space<vmem>>, vector<1x24xf32>
    %6 = vector.broadcast %5 : vector<1x24xf32> to vector<64x24xf32>
    %7 = arith.addf %4, %6 : vector<64x24xf32>
    %cst = arith.constant 0.000000e+00 : f32
    %8 = vector.broadcast %cst : f32 to vector<64x24xf32>
    %9 = arith.maximumf %7, %8 : vector<64x24xf32>
    %10 = arith.truncf %9 : vector<64x24xf32> to vector<64x24xbf16>
    %c0_5 = arith.constant 0 : index
    %c0_6 = arith.constant 0 : index
    %11 = vector.load %arg4[%c0_5, %c0_6] : memref<64x24xbf16, #tpu.memory_space<vmem>>, vector<64x24xbf16>
    tpu.vector_store %arg4[%c0_5, %c0_6], %10 {strides = array<i32>} : memref<64x24xbf16, #tpu.memory_space<vmem>>, vector<64x24xbf16>,
    return
  }
  func.func @transform_0(%arg0: i32) -> (i32, i32) {
    %c0_i32 = arith.constant 0 : i32
    %c0_i32_0 = arith.constant 0 : i32
    return %arg0, %c0_i32 : i32, i32
  }
  func.func @transform_1(%arg0: i32) -> (i32, i32) {
    %c0_i32 = arith.constant 0 : i32
    %c0_i32_0 = arith.constant 0 : i32
    %c0_i32_1 = arith.constant 0 : i32
    return %c0_i32, %c0_i32_0 : i32, i32
  }
  func.func @transform_2(%arg0: i32) -> (i32, i32) {
    %c0_i32 = arith.constant 0 : i32
    %c0_i32_0 = arith.constant 0 : i32
    %c0_i32_1 = arith.constant 0 : i32
    return %c0_i32, %c0_i32_0 : i32, i32
  }
  func.func @transform_3(%arg0: i32) -> (i32, i32) {
    %c0_i32 = arith.constant 0 : i32
    %c0_i32_0 = arith.constant 0 : i32
    return %arg0, %c0_i32 : i32, i32
  }
}

module attributes {stable_mosaic.version = 11 : i64} {
  func.func @_mm_bias_kernel(%arg0: i32, %arg1: memref<64x8xbf16, #tpu.memory_space<vmem>>, %arg2: memref<8x24xbf16, #tpu.memory_space<vmem>>, %arg3: memref<1x24xf32, #tpu.memory_space<vmem>>, %arg4: memref<64x24xbf16, #tpu.memory_space<vmem>>) attributes {dimension_semantics = [#tpu.dimension_semantics<parallel>], iteration_bounds = array<i64: 2>, scalar_prefetch = 0 : i64, scratch_operands = 0 : i64, tpu.core_type = #tpu.core_type<tc>, window_params = [{transform_indices = @transform_0, window_bounds = array<i64: 64, 8>}, {pipeline_mode = #tpu.pipeline_mode<synchronous>, transform_indices = @transform_1, window_bounds = array<i64: 8, 24>}, {pipeline_mode = #tpu.pipeline_mode<synchronous>, transform_indices = @transform_2, window_bounds = array<i64: 1, 24>}, {transform_indices = @transform_3, window_bounds = array<i64: 64, 24>}]} {
    %c0 = arith.constant 0 : index
    %c0_0 = arith.constant 0 : index
    %0 = vector.load %arg1[%c0, %c0_0] : memref<64x8xbf16, #tpu.memory_space<vmem>>, vector<64x8xbf16>
    %c0_1 = arith.constant 0 : index
    %c0_2 = arith.constant 0 : index
    %1 = vector.load %arg2[%c0_1, %c0_2] : memref<8x24xbf16, #tpu.memory_space<vmem>>, vector<8x24xbf16>
    %cst = arith.constant dense<0.000000e+00> : vector<64x24xf32>
    %2 = tpu.matmul %0, %1, %cst {dimension_numbers = #tpu.dot_dimension_numbers<[1], [0], [0], [1], [0, 0, 1, 1], [], []>} : vector<64x8xbf16>, vector<8x24xbf16>, vector<64x24xf32> -> vector<64x24xf32>
    %c0_3 = arith.constant 0 : index
    %c0_4 = arith.constant 0 : index
    %3 = vector.load %arg3[%c0_3, %c0_4] : memref<1x24xf32, #tpu.memory_space<vmem>>, vector<1x24xf32>
    %4 = vector.broadcast %3 : vector<1x24xf32> to vector<64x24xf32>
    %5 = arith.addf %2, %4 : vector<64x24xf32>
    %6 = arith.truncf %5 : vector<64x24xf32> to vector<64x24xbf16>
    %c0_5 = arith.constant 0 : index
    %c0_6 = arith.constant 0 : index
    %7 = vector.load %arg4[%c0_5, %c0_6] : memref<64x24xbf16, #tpu.memory_space<vmem>>, vector<64x24xbf16>
    tpu.vector_store %arg4[%c0_5, %c0_6], %6 {strides = array<i32>} : memref<64x24xbf16, #tpu.memory_space<vmem>>, vector<64x24xbf16>,
    return
  }
  func.func @transform_0(%arg0: i32) -> (i32, i32) {
    %c0_i32 = arith.constant 0 : i32
    %c0_i32_0 = arith.constant 0 : i32
    return %arg0, %c0_i32 : i32, i32
  }
  func.func @transform_1(%arg0: i32) -> (i32, i32) {
    %c0_i32 = arith.constant 0 : i32
    %c0_i32_0 = arith.constant 0 : i32
    %c0_i32_1 = arith.constant 0 : i32
    return %c0_i32, %c0_i32_0 : i32, i32
  }
  func.func @transform_2(%arg0: i32) -> (i32, i32) {
    %c0_i32 = arith.constant 0 : i32
    %c0_i32_0 = arith.constant 0 : i32
    %c0_i32_1 = arith.constant 0 : i32
    return %c0_i32, %c0_i32_0 : i32, i32
  }
  func.func @transform_3(%arg0: i32) -> (i32, i32) {
    %c0_i32 = arith.constant 0 : i32
    %c0_i32_0 = arith.constant 0 : i32
    return %arg0, %c0_i32 : i32, i32
  }
}

module attributes {stable_mosaic.version = 11 : i64} {
  func.func @_mm_stats_kernel(%arg0: i32, %arg1: memref<64x216xbf16, #tpu.memory_space<vmem>>, %arg2: memref<216x24xbf16, #tpu.memory_space<vmem>>, %arg3: memref<64x24xbf16, #tpu.memory_space<vmem>>, %arg4: memref<1x1x24xf32, #tpu.memory_space<vmem>>, %arg5: memref<1x1x24xf32, #tpu.memory_space<vmem>>) attributes {dimension_semantics = [#tpu.dimension_semantics<parallel>], iteration_bounds = array<i64: 2>, scalar_prefetch = 0 : i64, scratch_operands = 0 : i64, tpu.core_type = #tpu.core_type<tc>, window_params = [{transform_indices = @transform_0, window_bounds = array<i64: 64, 216>}, {pipeline_mode = #tpu.pipeline_mode<synchronous>, transform_indices = @transform_1, window_bounds = array<i64: 216, 24>}, {transform_indices = @transform_2, window_bounds = array<i64: 64, 24>}, {transform_indices = @transform_3, window_bounds = array<i64: 1, 1, 24>}, {transform_indices = @transform_4, window_bounds = array<i64: 1, 1, 24>}]} {
    %c0 = arith.constant 0 : index
    %c0_0 = arith.constant 0 : index
    %0 = vector.load %arg1[%c0, %c0_0] : memref<64x216xbf16, #tpu.memory_space<vmem>>, vector<64x216xbf16>
    %c0_1 = arith.constant 0 : index
    %c0_2 = arith.constant 0 : index
    %1 = vector.load %arg2[%c0_1, %c0_2] : memref<216x24xbf16, #tpu.memory_space<vmem>>, vector<216x24xbf16>
    %cst = arith.constant dense<0.000000e+00> : vector<64x24xf32>
    %2 = tpu.matmul %0, %1, %cst {dimension_numbers = #tpu.dot_dimension_numbers<[1], [0], [0], [1], [0, 0, 1, 1], [], []>} : vector<64x216xbf16>, vector<216x24xbf16>, vector<64x24xf32> -> vector<64x24xf32>
    %3 = arith.truncf %2 : vector<64x24xf32> to vector<64x24xbf16>
    %c0_3 = arith.constant 0 : index
    %c0_4 = arith.constant 0 : index
    %4 = vector.load %arg3[%c0_3, %c0_4] : memref<64x24xbf16, #tpu.memory_space<vmem>>, vector<64x24xbf16>
    tpu.vector_store %arg3[%c0_3, %c0_4], %3 {strides = array<i32>} : memref<64x24xbf16, #tpu.memory_space<vmem>>, vector<64x24xbf16>,
    %cst_5 = arith.constant dense<0.000000e+00> : vector<24xf32>
    %5 = vector.multi_reduction <add>, %2, %cst_5 [0] : vector<64x24xf32> to vector<24xf32>
    %6 = vector.shape_cast %5 : vector<24xf32> to vector<1x24xf32>
    %7 = vector.shape_cast %6 : vector<1x24xf32> to vector<1x1x24xf32>
    %c0_6 = arith.constant 0 : index
    %c0_7 = arith.constant 0 : index
    %c0_8 = arith.constant 0 : index
    %8 = vector.load %arg4[%c0_6, %c0_7, %c0_8] : memref<1x1x24xf32, #tpu.memory_space<vmem>>, vector<1x1x24xf32>
    tpu.vector_store %arg4[%c0_6, %c0_7, %c0_8], %7 {strides = array<i32>} : memref<1x1x24xf32, #tpu.memory_space<vmem>>, vector<1x1x24xf32>,
    %9 = arith.mulf %2, %2 : vector<64x24xf32>
    %cst_9 = arith.constant dense<0.000000e+00> : vector<24xf32>
    %10 = vector.multi_reduction <add>, %9, %cst_9 [0] : vector<64x24xf32> to vector<24xf32>
    %11 = vector.shape_cast %10 : vector<24xf32> to vector<1x24xf32>
    %12 = vector.shape_cast %11 : vector<1x24xf32> to vector<1x1x24xf32>
    %c0_10 = arith.constant 0 : index
    %c0_11 = arith.constant 0 : index
    %c0_12 = arith.constant 0 : index
    %13 = vector.load %arg5[%c0_10, %c0_11, %c0_12] : memref<1x1x24xf32, #tpu.memory_space<vmem>>, vector<1x1x24xf32>
    tpu.vector_store %arg5[%c0_10, %c0_11, %c0_12], %12 {strides = array<i32>} : memref<1x1x24xf32, #tpu.memory_space<vmem>>, vector<1x1x24xf32>,
    return
  }
  func.func @transform_0(%arg0: i32) -> (i32, i32) {
    %c0_i32 = arith.constant 0 : i32
    %c0_i32_0 = arith.constant 0 : i32
    return %arg0, %c0_i32 : i32, i32
  }
  func.func @transform_1(%arg0: i32) -> (i32, i32) {
    %c0_i32 = arith.constant 0 : i32
    %c0_i32_0 = arith.constant 0 : i32
    %c0_i32_1 = arith.constant 0 : i32
    return %c0_i32, %c0_i32_0 : i32, i32
  }
  func.func @transform_2(%arg0: i32) -> (i32, i32) {
    %c0_i32 = arith.constant 0 : i32
    %c0_i32_0 = arith.constant 0 : i32
    return %arg0, %c0_i32 : i32, i32
  }
  func.func @transform_3(%arg0: i32) -> (i32, i32, i32) {
    %c0_i32 = arith.constant 0 : i32
    %c0_i32_0 = arith.constant 0 : i32
    %c0_i32_1 = arith.constant 0 : i32
    return %arg0, %c0_i32, %c0_i32_0 : i32, i32, i32
  }
  func.func @transform_4(%arg0: i32) -> (i32, i32, i32) {
    %c0_i32 = arith.constant 0 : i32
    %c0_i32_0 = arith.constant 0 : i32
    %c0_i32_1 = arith.constant 0 : i32
    return %arg0, %c0_i32, %c0_i32_0 : i32, i32, i32
  }
}

module attributes {stable_mosaic.version = 11 : i64} {
  func.func @_bn_relu_kernel(%arg0: i32, %arg1: memref<16x64xbf16, #tpu.memory_space<vmem>>, %arg2: memref<1x64xf32, #tpu.memory_space<vmem>>, %arg3: memref<1x64xf32, #tpu.memory_space<vmem>>, %arg4: memref<16x64xbf16, #tpu.memory_space<vmem>>) attributes {dimension_semantics = [#tpu.dimension_semantics<parallel>], iteration_bounds = array<i64: 2>, scalar_prefetch = 0 : i64, scratch_operands = 0 : i64, tpu.core_type = #tpu.core_type<tc>, window_params = [{transform_indices = @transform_0, window_bounds = array<i64: 16, 64>}, {pipeline_mode = #tpu.pipeline_mode<synchronous>, transform_indices = @transform_1, window_bounds = array<i64: 1, 64>}, {pipeline_mode = #tpu.pipeline_mode<synchronous>, transform_indices = @transform_2, window_bounds = array<i64: 1, 64>}, {transform_indices = @transform_3, window_bounds = array<i64: 16, 64>}]} {
    %c0 = arith.constant 0 : index
    %c0_0 = arith.constant 0 : index
    %0 = vector.load %arg1[%c0, %c0_0] : memref<16x64xbf16, #tpu.memory_space<vmem>>, vector<16x64xbf16>
    %1 = arith.extf %0 : vector<16x64xbf16> to vector<16x64xf32>
    %c0_1 = arith.constant 0 : index
    %c0_2 = arith.constant 0 : index
    %2 = vector.load %arg2[%c0_1, %c0_2] : memref<1x64xf32, #tpu.memory_space<vmem>>, vector<1x64xf32>
    %3 = vector.broadcast %2 : vector<1x64xf32> to vector<16x64xf32>
    %4 = arith.mulf %1, %3 : vector<16x64xf32>
    %c0_3 = arith.constant 0 : index
    %c0_4 = arith.constant 0 : index
    %5 = vector.load %arg3[%c0_3, %c0_4] : memref<1x64xf32, #tpu.memory_space<vmem>>, vector<1x64xf32>
    %6 = vector.broadcast %5 : vector<1x64xf32> to vector<16x64xf32>
    %7 = arith.addf %4, %6 : vector<16x64xf32>
    %cst = arith.constant 0.000000e+00 : f32
    %8 = vector.broadcast %cst : f32 to vector<16x64xf32>
    %9 = arith.maximumf %7, %8 : vector<16x64xf32>
    %10 = arith.truncf %9 : vector<16x64xf32> to vector<16x64xbf16>
    %c0_5 = arith.constant 0 : index
    %c0_6 = arith.constant 0 : index
    %11 = vector.load %arg4[%c0_5, %c0_6] : memref<16x64xbf16, #tpu.memory_space<vmem>>, vector<16x64xbf16>
    tpu.vector_store %arg4[%c0_5, %c0_6], %10 {strides = array<i32>} : memref<16x64xbf16, #tpu.memory_space<vmem>>, vector<16x64xbf16>,
    return
  }
  func.func @transform_0(%arg0: i32) -> (i32, i32) {
    %c0_i32 = arith.constant 0 : i32
    %c0_i32_0 = arith.constant 0 : i32
    return %arg0, %c0_i32 : i32, i32
  }
  func.func @transform_1(%arg0: i32) -> (i32, i32) {
    %c0_i32 = arith.constant 0 : i32
    %c0_i32_0 = arith.constant 0 : i32
    %c0_i32_1 = arith.constant 0 : i32
    return %c0_i32, %c0_i32_0 : i32, i32
  }
  func.func @transform_2(%arg0: i32) -> (i32, i32) {
    %c0_i32 = arith.constant 0 : i32
    %c0_i32_0 = arith.constant 0 : i32
    %c0_i32_1 = arith.constant 0 : i32
    return %c0_i32, %c0_i32_0 : i32, i32
  }
  func.func @transform_3(%arg0: i32) -> (i32, i32) {
    %c0_i32 = arith.constant 0 : i32
    %c0_i32_0 = arith.constant 0 : i32
    return %arg0, %c0_i32 : i32, i32
  }
}

module attributes {stable_mosaic.version = 11 : i64} {
  func.func @_mm_stats_kernel(%arg0: i32, %arg1: memref<16x216xbf16, #tpu.memory_space<vmem>>, %arg2: memref<216x64xbf16, #tpu.memory_space<vmem>>, %arg3: memref<16x64xbf16, #tpu.memory_space<vmem>>, %arg4: memref<1x1x64xf32, #tpu.memory_space<vmem>>, %arg5: memref<1x1x64xf32, #tpu.memory_space<vmem>>) attributes {dimension_semantics = [#tpu.dimension_semantics<parallel>], iteration_bounds = array<i64: 2>, scalar_prefetch = 0 : i64, scratch_operands = 0 : i64, tpu.core_type = #tpu.core_type<tc>, window_params = [{transform_indices = @transform_0, window_bounds = array<i64: 16, 216>}, {pipeline_mode = #tpu.pipeline_mode<synchronous>, transform_indices = @transform_1, window_bounds = array<i64: 216, 64>}, {transform_indices = @transform_2, window_bounds = array<i64: 16, 64>}, {transform_indices = @transform_3, window_bounds = array<i64: 1, 1, 64>}, {transform_indices = @transform_4, window_bounds = array<i64: 1, 1, 64>}]} {
    %c0 = arith.constant 0 : index
    %c0_0 = arith.constant 0 : index
    %0 = vector.load %arg1[%c0, %c0_0] : memref<16x216xbf16, #tpu.memory_space<vmem>>, vector<16x216xbf16>
    %c0_1 = arith.constant 0 : index
    %c0_2 = arith.constant 0 : index
    %1 = vector.load %arg2[%c0_1, %c0_2] : memref<216x64xbf16, #tpu.memory_space<vmem>>, vector<216x64xbf16>
    %cst = arith.constant dense<0.000000e+00> : vector<16x64xf32>
    %2 = tpu.matmul %0, %1, %cst {dimension_numbers = #tpu.dot_dimension_numbers<[1], [0], [0], [1], [0, 0, 1, 1], [], []>} : vector<16x216xbf16>, vector<216x64xbf16>, vector<16x64xf32> -> vector<16x64xf32>
    %3 = arith.truncf %2 : vector<16x64xf32> to vector<16x64xbf16>
    %c0_3 = arith.constant 0 : index
    %c0_4 = arith.constant 0 : index
    %4 = vector.load %arg3[%c0_3, %c0_4] : memref<16x64xbf16, #tpu.memory_space<vmem>>, vector<16x64xbf16>
    tpu.vector_store %arg3[%c0_3, %c0_4], %3 {strides = array<i32>} : memref<16x64xbf16, #tpu.memory_space<vmem>>, vector<16x64xbf16>,
    %cst_5 = arith.constant dense<0.000000e+00> : vector<64xf32>
    %5 = vector.multi_reduction <add>, %2, %cst_5 [0] : vector<16x64xf32> to vector<64xf32>
    %6 = vector.shape_cast %5 : vector<64xf32> to vector<1x64xf32>
    %7 = vector.shape_cast %6 : vector<1x64xf32> to vector<1x1x64xf32>
    %c0_6 = arith.constant 0 : index
    %c0_7 = arith.constant 0 : index
    %c0_8 = arith.constant 0 : index
    %8 = vector.load %arg4[%c0_6, %c0_7, %c0_8] : memref<1x1x64xf32, #tpu.memory_space<vmem>>, vector<1x1x64xf32>
    tpu.vector_store %arg4[%c0_6, %c0_7, %c0_8], %7 {strides = array<i32>} : memref<1x1x64xf32, #tpu.memory_space<vmem>>, vector<1x1x64xf32>,
    %9 = arith.mulf %2, %2 : vector<16x64xf32>
    %cst_9 = arith.constant dense<0.000000e+00> : vector<64xf32>
    %10 = vector.multi_reduction <add>, %9, %cst_9 [0] : vector<16x64xf32> to vector<64xf32>
    %11 = vector.shape_cast %10 : vector<64xf32> to vector<1x64xf32>
    %12 = vector.shape_cast %11 : vector<1x64xf32> to vector<1x1x64xf32>
    %c0_10 = arith.constant 0 : index
    %c0_11 = arith.constant 0 : index
    %c0_12 = arith.constant 0 : index
    %13 = vector.load %arg5[%c0_10, %c0_11, %c0_12] : memref<1x1x64xf32, #tpu.memory_space<vmem>>, vector<1x1x64xf32>
    tpu.vector_store %arg5[%c0_10, %c0_11, %c0_12], %12 {strides = array<i32>} : memref<1x1x64xf32, #tpu.memory_space<vmem>>, vector<1x1x64xf32>,
    return
  }
  func.func @transform_0(%arg0: i32) -> (i32, i32) {
    %c0_i32 = arith.constant 0 : i32
    %c0_i32_0 = arith.constant 0 : i32
    return %arg0, %c0_i32 : i32, i32
  }
  func.func @transform_1(%arg0: i32) -> (i32, i32) {
    %c0_i32 = arith.constant 0 : i32
    %c0_i32_0 = arith.constant 0 : i32
    %c0_i32_1 = arith.constant 0 : i32
    return %c0_i32, %c0_i32_0 : i32, i32
  }
  func.func @transform_2(%arg0: i32) -> (i32, i32) {
    %c0_i32 = arith.constant 0 : i32
    %c0_i32_0 = arith.constant 0 : i32
    return %arg0, %c0_i32 : i32, i32
  }
  func.func @transform_3(%arg0: i32) -> (i32, i32, i32) {
    %c0_i32 = arith.constant 0 : i32
    %c0_i32_0 = arith.constant 0 : i32
    %c0_i32_1 = arith.constant 0 : i32
    return %arg0, %c0_i32, %c0_i32_0 : i32, i32, i32
  }
  func.func @transform_4(%arg0: i32) -> (i32, i32, i32) {
    %c0_i32 = arith.constant 0 : i32
    %c0_i32_0 = arith.constant 0 : i32
    %c0_i32_1 = arith.constant 0 : i32
    return %arg0, %c0_i32, %c0_i32_0 : i32, i32, i32
  }
}

module attributes {stable_mosaic.version = 11 : i64} {
  func.func @_mm_stats_kernel(%arg0: i32, %arg1: memref<16x576xbf16, #tpu.memory_space<vmem>>, %arg2: memref<576x64xbf16, #tpu.memory_space<vmem>>, %arg3: memref<16x64xbf16, #tpu.memory_space<vmem>>, %arg4: memref<1x1x64xf32, #tpu.memory_space<vmem>>, %arg5: memref<1x1x64xf32, #tpu.memory_space<vmem>>) attributes {dimension_semantics = [#tpu.dimension_semantics<parallel>], iteration_bounds = array<i64: 2>, scalar_prefetch = 0 : i64, scratch_operands = 0 : i64, tpu.core_type = #tpu.core_type<tc>, window_params = [{transform_indices = @transform_0, window_bounds = array<i64: 16, 576>}, {pipeline_mode = #tpu.pipeline_mode<synchronous>, transform_indices = @transform_1, window_bounds = array<i64: 576, 64>}, {transform_indices = @transform_2, window_bounds = array<i64: 16, 64>}, {transform_indices = @transform_3, window_bounds = array<i64: 1, 1, 64>}, {transform_indices = @transform_4, window_bounds = array<i64: 1, 1, 64>}]} {
    %c0 = arith.constant 0 : index
    %c0_0 = arith.constant 0 : index
    %0 = vector.load %arg1[%c0, %c0_0] : memref<16x576xbf16, #tpu.memory_space<vmem>>, vector<16x576xbf16>
    %c0_1 = arith.constant 0 : index
    %c0_2 = arith.constant 0 : index
    %1 = vector.load %arg2[%c0_1, %c0_2] : memref<576x64xbf16, #tpu.memory_space<vmem>>, vector<576x64xbf16>
    %cst = arith.constant dense<0.000000e+00> : vector<16x64xf32>
    %2 = tpu.matmul %0, %1, %cst {dimension_numbers = #tpu.dot_dimension_numbers<[1], [0], [0], [1], [0, 0, 1, 1], [], []>} : vector<16x576xbf16>, vector<576x64xbf16>, vector<16x64xf32> -> vector<16x64xf32>
    %3 = arith.truncf %2 : vector<16x64xf32> to vector<16x64xbf16>
    %c0_3 = arith.constant 0 : index
    %c0_4 = arith.constant 0 : index
    %4 = vector.load %arg3[%c0_3, %c0_4] : memref<16x64xbf16, #tpu.memory_space<vmem>>, vector<16x64xbf16>
    tpu.vector_store %arg3[%c0_3, %c0_4], %3 {strides = array<i32>} : memref<16x64xbf16, #tpu.memory_space<vmem>>, vector<16x64xbf16>,
    %cst_5 = arith.constant dense<0.000000e+00> : vector<64xf32>
    %5 = vector.multi_reduction <add>, %2, %cst_5 [0] : vector<16x64xf32> to vector<64xf32>
    %6 = vector.shape_cast %5 : vector<64xf32> to vector<1x64xf32>
    %7 = vector.shape_cast %6 : vector<1x64xf32> to vector<1x1x64xf32>
    %c0_6 = arith.constant 0 : index
    %c0_7 = arith.constant 0 : index
    %c0_8 = arith.constant 0 : index
    %8 = vector.load %arg4[%c0_6, %c0_7, %c0_8] : memref<1x1x64xf32, #tpu.memory_space<vmem>>, vector<1x1x64xf32>
    tpu.vector_store %arg4[%c0_6, %c0_7, %c0_8], %7 {strides = array<i32>} : memref<1x1x64xf32, #tpu.memory_space<vmem>>, vector<1x1x64xf32>,
    %9 = arith.mulf %2, %2 : vector<16x64xf32>
    %cst_9 = arith.constant dense<0.000000e+00> : vector<64xf32>
    %10 = vector.multi_reduction <add>, %9, %cst_9 [0] : vector<16x64xf32> to vector<64xf32>
    %11 = vector.shape_cast %10 : vector<64xf32> to vector<1x64xf32>
    %12 = vector.shape_cast %11 : vector<1x64xf32> to vector<1x1x64xf32>
    %c0_10 = arith.constant 0 : index
    %c0_11 = arith.constant 0 : index
    %c0_12 = arith.constant 0 : index
    %13 = vector.load %arg5[%c0_10, %c0_11, %c0_12] : memref<1x1x64xf32, #tpu.memory_space<vmem>>, vector<1x1x64xf32>
    tpu.vector_store %arg5[%c0_10, %c0_11, %c0_12], %12 {strides = array<i32>} : memref<1x1x64xf32, #tpu.memory_space<vmem>>, vector<1x1x64xf32>,
    return
  }
  func.func @transform_0(%arg0: i32) -> (i32, i32) {
    %c0_i32 = arith.constant 0 : i32
    %c0_i32_0 = arith.constant 0 : i32
    return %arg0, %c0_i32 : i32, i32
  }
  func.func @transform_1(%arg0: i32) -> (i32, i32) {
    %c0_i32 = arith.constant 0 : i32
    %c0_i32_0 = arith.constant 0 : i32
    %c0_i32_1 = arith.constant 0 : i32
    return %c0_i32, %c0_i32_0 : i32, i32
  }
  func.func @transform_2(%arg0: i32) -> (i32, i32) {
    %c0_i32 = arith.constant 0 : i32
    %c0_i32_0 = arith.constant 0 : i32
    return %arg0, %c0_i32 : i32, i32
  }
  func.func @transform_3(%arg0: i32) -> (i32, i32, i32) {
    %c0_i32 = arith.constant 0 : i32
    %c0_i32_0 = arith.constant 0 : i32
    %c0_i32_1 = arith.constant 0 : i32
    return %arg0, %c0_i32, %c0_i32_0 : i32, i32, i32
  }
  func.func @transform_4(%arg0: i32) -> (i32, i32, i32) {
    %c0_i32 = arith.constant 0 : i32
    %c0_i32_0 = arith.constant 0 : i32
    %c0_i32_1 = arith.constant 0 : i32
    return %arg0, %c0_i32, %c0_i32_0 : i32, i32, i32
  }
}

module attributes {stable_mosaic.version = 11 : i64} {
  func.func @_mm_stats_kernel(%arg0: i32, %arg1: memref<16x64xbf16, #tpu.memory_space<vmem>>, %arg2: memref<64x64xbf16, #tpu.memory_space<vmem>>, %arg3: memref<16x64xbf16, #tpu.memory_space<vmem>>, %arg4: memref<1x1x64xf32, #tpu.memory_space<vmem>>, %arg5: memref<1x1x64xf32, #tpu.memory_space<vmem>>) attributes {dimension_semantics = [#tpu.dimension_semantics<parallel>], iteration_bounds = array<i64: 2>, scalar_prefetch = 0 : i64, scratch_operands = 0 : i64, tpu.core_type = #tpu.core_type<tc>, window_params = [{transform_indices = @transform_0, window_bounds = array<i64: 16, 64>}, {pipeline_mode = #tpu.pipeline_mode<synchronous>, transform_indices = @transform_1, window_bounds = array<i64: 64, 64>}, {transform_indices = @transform_2, window_bounds = array<i64: 16, 64>}, {transform_indices = @transform_3, window_bounds = array<i64: 1, 1, 64>}, {transform_indices = @transform_4, window_bounds = array<i64: 1, 1, 64>}]} {
    %c0 = arith.constant 0 : index
    %c0_0 = arith.constant 0 : index
    %0 = vector.load %arg1[%c0, %c0_0] : memref<16x64xbf16, #tpu.memory_space<vmem>>, vector<16x64xbf16>
    %c0_1 = arith.constant 0 : index
    %c0_2 = arith.constant 0 : index
    %1 = vector.load %arg2[%c0_1, %c0_2] : memref<64x64xbf16, #tpu.memory_space<vmem>>, vector<64x64xbf16>
    %cst = arith.constant dense<0.000000e+00> : vector<16x64xf32>
    %2 = tpu.matmul %0, %1, %cst {dimension_numbers = #tpu.dot_dimension_numbers<[1], [0], [0], [1], [0, 0, 1, 1], [], []>} : vector<16x64xbf16>, vector<64x64xbf16>, vector<16x64xf32> -> vector<16x64xf32>
    %3 = arith.truncf %2 : vector<16x64xf32> to vector<16x64xbf16>
    %c0_3 = arith.constant 0 : index
    %c0_4 = arith.constant 0 : index
    %4 = vector.load %arg3[%c0_3, %c0_4] : memref<16x64xbf16, #tpu.memory_space<vmem>>, vector<16x64xbf16>
    tpu.vector_store %arg3[%c0_3, %c0_4], %3 {strides = array<i32>} : memref<16x64xbf16, #tpu.memory_space<vmem>>, vector<16x64xbf16>,
    %cst_5 = arith.constant dense<0.000000e+00> : vector<64xf32>
    %5 = vector.multi_reduction <add>, %2, %cst_5 [0] : vector<16x64xf32> to vector<64xf32>
    %6 = vector.shape_cast %5 : vector<64xf32> to vector<1x64xf32>
    %7 = vector.shape_cast %6 : vector<1x64xf32> to vector<1x1x64xf32>
    %c0_6 = arith.constant 0 : index
    %c0_7 = arith.constant 0 : index
    %c0_8 = arith.constant 0 : index
    %8 = vector.load %arg4[%c0_6, %c0_7, %c0_8] : memref<1x1x64xf32, #tpu.memory_space<vmem>>, vector<1x1x64xf32>
    tpu.vector_store %arg4[%c0_6, %c0_7, %c0_8], %7 {strides = array<i32>} : memref<1x1x64xf32, #tpu.memory_space<vmem>>, vector<1x1x64xf32>,
    %9 = arith.mulf %2, %2 : vector<16x64xf32>
    %cst_9 = arith.constant dense<0.000000e+00> : vector<64xf32>
    %10 = vector.multi_reduction <add>, %9, %cst_9 [0] : vector<16x64xf32> to vector<64xf32>
    %11 = vector.shape_cast %10 : vector<64xf32> to vector<1x64xf32>
    %12 = vector.shape_cast %11 : vector<1x64xf32> to vector<1x1x64xf32>
    %c0_10 = arith.constant 0 : index
    %c0_11 = arith.constant 0 : index
    %c0_12 = arith.constant 0 : index
    %13 = vector.load %arg5[%c0_10, %c0_11, %c0_12] : memref<1x1x64xf32, #tpu.memory_space<vmem>>, vector<1x1x64xf32>
    tpu.vector_store %arg5[%c0_10, %c0_11, %c0_12], %12 {strides = array<i32>} : memref<1x1x64xf32, #tpu.memory_space<vmem>>, vector<1x1x64xf32>,
    return
  }
  func.func @transform_0(%arg0: i32) -> (i32, i32) {
    %c0_i32 = arith.constant 0 : i32
    %c0_i32_0 = arith.constant 0 : i32
    return %arg0, %c0_i32 : i32, i32
  }
  func.func @transform_1(%arg0: i32) -> (i32, i32) {
    %c0_i32 = arith.constant 0 : i32
    %c0_i32_0 = arith.constant 0 : i32
    %c0_i32_1 = arith.constant 0 : i32
    return %c0_i32, %c0_i32_0 : i32, i32
  }
  func.func @transform_2(%arg0: i32) -> (i32, i32) {
    %c0_i32 = arith.constant 0 : i32
    %c0_i32_0 = arith.constant 0 : i32
    return %arg0, %c0_i32 : i32, i32
  }
  func.func @transform_3(%arg0: i32) -> (i32, i32, i32) {
    %c0_i32 = arith.constant 0 : i32
    %c0_i32_0 = arith.constant 0 : i32
    %c0_i32_1 = arith.constant 0 : i32
    return %arg0, %c0_i32, %c0_i32_0 : i32, i32, i32
  }
  func.func @transform_4(%arg0: i32) -> (i32, i32, i32) {
    %c0_i32 = arith.constant 0 : i32
    %c0_i32_0 = arith.constant 0 : i32
    %c0_i32_1 = arith.constant 0 : i32
    return %arg0, %c0_i32, %c0_i32_0 : i32, i32, i32
  }
}

module attributes {stable_mosaic.version = 11 : i64} {
  func.func @_mm_stats_kernel(%arg0: i32, %arg1: memref<8x576xbf16, #tpu.memory_space<vmem>>, %arg2: memref<576x64xbf16, #tpu.memory_space<vmem>>, %arg3: memref<8x64xbf16, #tpu.memory_space<vmem>>, %arg4: memref<1x1x64xf32, #tpu.memory_space<vmem>>, %arg5: memref<1x1x64xf32, #tpu.memory_space<vmem>>) attributes {dimension_semantics = [#tpu.dimension_semantics<parallel>], iteration_bounds = array<i64: 1>, scalar_prefetch = 0 : i64, scratch_operands = 0 : i64, tpu.core_type = #tpu.core_type<tc>, window_params = [{transform_indices = @transform_0, window_bounds = array<i64: 8, 576>}, {pipeline_mode = #tpu.pipeline_mode<synchronous>, transform_indices = @transform_1, window_bounds = array<i64: 576, 64>}, {transform_indices = @transform_2, window_bounds = array<i64: 8, 64>}, {transform_indices = @transform_3, window_bounds = array<i64: 1, 1, 64>}, {transform_indices = @transform_4, window_bounds = array<i64: 1, 1, 64>}]} {
    %c0 = arith.constant 0 : index
    %c0_0 = arith.constant 0 : index
    %0 = vector.load %arg1[%c0, %c0_0] : memref<8x576xbf16, #tpu.memory_space<vmem>>, vector<8x576xbf16>
    %c0_1 = arith.constant 0 : index
    %c0_2 = arith.constant 0 : index
    %1 = vector.load %arg2[%c0_1, %c0_2] : memref<576x64xbf16, #tpu.memory_space<vmem>>, vector<576x64xbf16>
    %cst = arith.constant dense<0.000000e+00> : vector<8x64xf32>
    %2 = tpu.matmul %0, %1, %cst {dimension_numbers = #tpu.dot_dimension_numbers<[1], [0], [0], [1], [0, 0, 1, 1], [], []>} : vector<8x576xbf16>, vector<576x64xbf16>, vector<8x64xf32> -> vector<8x64xf32>
    %3 = arith.truncf %2 : vector<8x64xf32> to vector<8x64xbf16>
    %c0_3 = arith.constant 0 : index
    %c0_4 = arith.constant 0 : index
    %4 = vector.load %arg3[%c0_3, %c0_4] : memref<8x64xbf16, #tpu.memory_space<vmem>>, vector<8x64xbf16>
    tpu.vector_store %arg3[%c0_3, %c0_4], %3 {strides = array<i32>} : memref<8x64xbf16, #tpu.memory_space<vmem>>, vector<8x64xbf16>,
    %cst_5 = arith.constant dense<0.000000e+00> : vector<64xf32>
    %5 = vector.multi_reduction <add>, %2, %cst_5 [0] : vector<8x64xf32> to vector<64xf32>
    %6 = vector.shape_cast %5 : vector<64xf32> to vector<1x64xf32>
    %7 = vector.shape_cast %6 : vector<1x64xf32> to vector<1x1x64xf32>
    %c0_6 = arith.constant 0 : index
    %c0_7 = arith.constant 0 : index
    %c0_8 = arith.constant 0 : index
    %8 = vector.load %arg4[%c0_6, %c0_7, %c0_8] : memref<1x1x64xf32, #tpu.memory_space<vmem>>, vector<1x1x64xf32>
    tpu.vector_store %arg4[%c0_6, %c0_7, %c0_8], %7 {strides = array<i32>} : memref<1x1x64xf32, #tpu.memory_space<vmem>>, vector<1x1x64xf32>,
    %9 = arith.mulf %2, %2 : vector<8x64xf32>
    %cst_9 = arith.constant dense<0.000000e+00> : vector<64xf32>
    %10 = vector.multi_reduction <add>, %9, %cst_9 [0] : vector<8x64xf32> to vector<64xf32>
    %11 = vector.shape_cast %10 : vector<64xf32> to vector<1x64xf32>
    %12 = vector.shape_cast %11 : vector<1x64xf32> to vector<1x1x64xf32>
    %c0_10 = arith.constant 0 : index
    %c0_11 = arith.constant 0 : index
    %c0_12 = arith.constant 0 : index
    %13 = vector.load %arg5[%c0_10, %c0_11, %c0_12] : memref<1x1x64xf32, #tpu.memory_space<vmem>>, vector<1x1x64xf32>
    tpu.vector_store %arg5[%c0_10, %c0_11, %c0_12], %12 {strides = array<i32>} : memref<1x1x64xf32, #tpu.memory_space<vmem>>, vector<1x1x64xf32>,
    return
  }
  func.func @transform_0(%arg0: i32) -> (i32, i32) {
    %c0_i32 = arith.constant 0 : i32
    %c0_i32_0 = arith.constant 0 : i32
    return %arg0, %c0_i32 : i32, i32
  }
  func.func @transform_1(%arg0: i32) -> (i32, i32) {
    %c0_i32 = arith.constant 0 : i32
    %c0_i32_0 = arith.constant 0 : i32
    %c0_i32_1 = arith.constant 0 : i32
    return %c0_i32, %c0_i32_0 : i32, i32
  }
  func.func @transform_2(%arg0: i32) -> (i32, i32) {
    %c0_i32 = arith.constant 0 : i32
    %c0_i32_0 = arith.constant 0 : i32
    return %arg0, %c0_i32 : i32, i32
  }
  func.func @transform_3(%arg0: i32) -> (i32, i32, i32) {
    %c0_i32 = arith.constant 0 : i32
    %c0_i32_0 = arith.constant 0 : i32
    %c0_i32_1 = arith.constant 0 : i32
    return %arg0, %c0_i32, %c0_i32_0 : i32, i32, i32
  }
  func.func @transform_4(%arg0: i32) -> (i32, i32, i32) {
    %c0_i32 = arith.constant 0 : i32
    %c0_i32_0 = arith.constant 0 : i32
    %c0_i32_1 = arith.constant 0 : i32
    return %arg0, %c0_i32, %c0_i32_0 : i32, i32, i32
  }
}

module attributes {stable_mosaic.version = 11 : i64} {
  func.func @_bn_relu_kernel(%arg0: i32, %arg1: memref<8x64xbf16, #tpu.memory_space<vmem>>, %arg2: memref<1x64xf32, #tpu.memory_space<vmem>>, %arg3: memref<1x64xf32, #tpu.memory_space<vmem>>, %arg4: memref<8x64xbf16, #tpu.memory_space<vmem>>) attributes {dimension_semantics = [#tpu.dimension_semantics<parallel>], iteration_bounds = array<i64: 1>, scalar_prefetch = 0 : i64, scratch_operands = 0 : i64, tpu.core_type = #tpu.core_type<tc>, window_params = [{transform_indices = @transform_0, window_bounds = array<i64: 8, 64>}, {pipeline_mode = #tpu.pipeline_mode<synchronous>, transform_indices = @transform_1, window_bounds = array<i64: 1, 64>}, {pipeline_mode = #tpu.pipeline_mode<synchronous>, transform_indices = @transform_2, window_bounds = array<i64: 1, 64>}, {transform_indices = @transform_3, window_bounds = array<i64: 8, 64>}]} {
    %c0 = arith.constant 0 : index
    %c0_0 = arith.constant 0 : index
    %0 = vector.load %arg1[%c0, %c0_0] : memref<8x64xbf16, #tpu.memory_space<vmem>>, vector<8x64xbf16>
    %1 = arith.extf %0 : vector<8x64xbf16> to vector<8x64xf32>
    %c0_1 = arith.constant 0 : index
    %c0_2 = arith.constant 0 : index
    %2 = vector.load %arg2[%c0_1, %c0_2] : memref<1x64xf32, #tpu.memory_space<vmem>>, vector<1x64xf32>
    %3 = vector.broadcast %2 : vector<1x64xf32> to vector<8x64xf32>
    %4 = arith.mulf %1, %3 : vector<8x64xf32>
    %c0_3 = arith.constant 0 : index
    %c0_4 = arith.constant 0 : index
    %5 = vector.load %arg3[%c0_3, %c0_4] : memref<1x64xf32, #tpu.memory_space<vmem>>, vector<1x64xf32>
    %6 = vector.broadcast %5 : vector<1x64xf32> to vector<8x64xf32>
    %7 = arith.addf %4, %6 : vector<8x64xf32>
    %cst = arith.constant 0.000000e+00 : f32
    %8 = vector.broadcast %cst : f32 to vector<8x64xf32>
    %9 = arith.maximumf %7, %8 : vector<8x64xf32>
    %10 = arith.truncf %9 : vector<8x64xf32> to vector<8x64xbf16>
    %c0_5 = arith.constant 0 : index
    %c0_6 = arith.constant 0 : index
    %11 = vector.load %arg4[%c0_5, %c0_6] : memref<8x64xbf16, #tpu.memory_space<vmem>>, vector<8x64xbf16>
    tpu.vector_store %arg4[%c0_5, %c0_6], %10 {strides = array<i32>} : memref<8x64xbf16, #tpu.memory_space<vmem>>, vector<8x64xbf16>,
    return
  }
  func.func @transform_0(%arg0: i32) -> (i32, i32) {
    %c0_i32 = arith.constant 0 : i32
    %c0_i32_0 = arith.constant 0 : i32
    return %arg0, %c0_i32 : i32, i32
  }
  func.func @transform_1(%arg0: i32) -> (i32, i32) {
    %c0_i32 = arith.constant 0 : i32
    %c0_i32_0 = arith.constant 0 : i32
    %c0_i32_1 = arith.constant 0 : i32
    return %c0_i32, %c0_i32_0 : i32, i32
  }
  func.func @transform_2(%arg0: i32) -> (i32, i32) {
    %c0_i32 = arith.constant 0 : i32
    %c0_i32_0 = arith.constant 0 : i32
    %c0_i32_1 = arith.constant 0 : i32
    return %c0_i32, %c0_i32_0 : i32, i32
  }
  func.func @transform_3(%arg0: i32) -> (i32, i32) {
    %c0_i32 = arith.constant 0 : i32
    %c0_i32_0 = arith.constant 0 : i32
    return %arg0, %c0_i32 : i32, i32
  }
}

module attributes {stable_mosaic.version = 11 : i64} {
  func.func @_mm_stats_kernel(%arg0: i32, %arg1: memref<2x576xbf16, #tpu.memory_space<vmem>>, %arg2: memref<576x128xbf16, #tpu.memory_space<vmem>>, %arg3: memref<2x128xbf16, #tpu.memory_space<vmem>>, %arg4: memref<1x1x128xf32, #tpu.memory_space<vmem>>, %arg5: memref<1x1x128xf32, #tpu.memory_space<vmem>>) attributes {dimension_semantics = [#tpu.dimension_semantics<parallel>], iteration_bounds = array<i64: 1>, scalar_prefetch = 0 : i64, scratch_operands = 0 : i64, tpu.core_type = #tpu.core_type<tc>, window_params = [{transform_indices = @transform_0, window_bounds = array<i64: 2, 576>}, {pipeline_mode = #tpu.pipeline_mode<synchronous>, transform_indices = @transform_1, window_bounds = array<i64: 576, 128>}, {transform_indices = @transform_2, window_bounds = array<i64: 2, 128>}, {transform_indices = @transform_3, window_bounds = array<i64: 1, 1, 128>}, {transform_indices = @transform_4, window_bounds = array<i64: 1, 1, 128>}]} {
    %c0 = arith.constant 0 : index
    %c0_0 = arith.constant 0 : index
    %0 = vector.load %arg1[%c0, %c0_0] : memref<2x576xbf16, #tpu.memory_space<vmem>>, vector<2x576xbf16>
    %c0_1 = arith.constant 0 : index
    %c0_2 = arith.constant 0 : index
    %1 = vector.load %arg2[%c0_1, %c0_2] : memref<576x128xbf16, #tpu.memory_space<vmem>>, vector<576x128xbf16>
    %cst = arith.constant dense<0.000000e+00> : vector<2x128xf32>
    %2 = tpu.matmul %0, %1, %cst {dimension_numbers = #tpu.dot_dimension_numbers<[1], [0], [0], [1], [0, 0, 1, 1], [], []>} : vector<2x576xbf16>, vector<576x128xbf16>, vector<2x128xf32> -> vector<2x128xf32>
    %3 = arith.truncf %2 : vector<2x128xf32> to vector<2x128xbf16>
    %c0_3 = arith.constant 0 : index
    %c0_4 = arith.constant 0 : index
    %4 = vector.load %arg3[%c0_3, %c0_4] : memref<2x128xbf16, #tpu.memory_space<vmem>>, vector<2x128xbf16>
    tpu.vector_store %arg3[%c0_3, %c0_4], %3 {strides = array<i32>} : memref<2x128xbf16, #tpu.memory_space<vmem>>, vector<2x128xbf16>,
    %cst_5 = arith.constant dense<0.000000e+00> : vector<128xf32>
    %5 = vector.multi_reduction <add>, %2, %cst_5 [0] : vector<2x128xf32> to vector<128xf32>
    %6 = vector.shape_cast %5 : vector<128xf32> to vector<1x128xf32>
    %7 = vector.shape_cast %6 : vector<1x128xf32> to vector<1x1x128xf32>
    %c0_6 = arith.constant 0 : index
    %c0_7 = arith.constant 0 : index
    %c0_8 = arith.constant 0 : index
    %8 = vector.load %arg4[%c0_6, %c0_7, %c0_8] : memref<1x1x128xf32, #tpu.memory_space<vmem>>, vector<1x1x128xf32>
    tpu.vector_store %arg4[%c0_6, %c0_7, %c0_8], %7 {strides = array<i32>} : memref<1x1x128xf32, #tpu.memory_space<vmem>>, vector<1x1x128xf32>,
    %9 = arith.mulf %2, %2 : vector<2x128xf32>
    %cst_9 = arith.constant dense<0.000000e+00> : vector<128xf32>
    %10 = vector.multi_reduction <add>, %9, %cst_9 [0] : vector<2x128xf32> to vector<128xf32>
    %11 = vector.shape_cast %10 : vector<128xf32> to vector<1x128xf32>
    %12 = vector.shape_cast %11 : vector<1x128xf32> to vector<1x1x128xf32>
    %c0_10 = arith.constant 0 : index
    %c0_11 = arith.constant 0 : index
    %c0_12 = arith.constant 0 : index
    %13 = vector.load %arg5[%c0_10, %c0_11, %c0_12] : memref<1x1x128xf32, #tpu.memory_space<vmem>>, vector<1x1x128xf32>
    tpu.vector_store %arg5[%c0_10, %c0_11, %c0_12], %12 {strides = array<i32>} : memref<1x1x128xf32, #tpu.memory_space<vmem>>, vector<1x1x128xf32>,
    return
  }
  func.func @transform_0(%arg0: i32) -> (i32, i32) {
    %c0_i32 = arith.constant 0 : i32
    %c0_i32_0 = arith.constant 0 : i32
    return %arg0, %c0_i32 : i32, i32
  }
  func.func @transform_1(%arg0: i32) -> (i32, i32) {
    %c0_i32 = arith.constant 0 : i32
    %c0_i32_0 = arith.constant 0 : i32
    %c0_i32_1 = arith.constant 0 : i32
    return %c0_i32, %c0_i32_0 : i32, i32
  }
  func.func @transform_2(%arg0: i32) -> (i32, i32) {
    %c0_i32 = arith.constant 0 : i32
    %c0_i32_0 = arith.constant 0 : i32
    return %arg0, %c0_i32 : i32, i32
  }
  func.func @transform_3(%arg0: i32) -> (i32, i32, i32) {
    %c0_i32 = arith.constant 0 : i32
    %c0_i32_0 = arith.constant 0 : i32
    %c0_i32_1 = arith.constant 0 : i32
    return %arg0, %c0_i32, %c0_i32_0 : i32, i32, i32
  }
  func.func @transform_4(%arg0: i32) -> (i32, i32, i32) {
    %c0_i32 = arith.constant 0 : i32
    %c0_i32_0 = arith.constant 0 : i32
    %c0_i32_1 = arith.constant 0 : i32
    return %arg0, %c0_i32, %c0_i32_0 : i32, i32, i32
  }
}

module attributes {stable_mosaic.version = 11 : i64} {
  func.func @_bn_relu_kernel(%arg0: i32, %arg1: memref<2x128xbf16, #tpu.memory_space<vmem>>, %arg2: memref<1x128xf32, #tpu.memory_space<vmem>>, %arg3: memref<1x128xf32, #tpu.memory_space<vmem>>, %arg4: memref<2x128xbf16, #tpu.memory_space<vmem>>) attributes {dimension_semantics = [#tpu.dimension_semantics<parallel>], iteration_bounds = array<i64: 1>, scalar_prefetch = 0 : i64, scratch_operands = 0 : i64, tpu.core_type = #tpu.core_type<tc>, window_params = [{transform_indices = @transform_0, window_bounds = array<i64: 2, 128>}, {pipeline_mode = #tpu.pipeline_mode<synchronous>, transform_indices = @transform_1, window_bounds = array<i64: 1, 128>}, {pipeline_mode = #tpu.pipeline_mode<synchronous>, transform_indices = @transform_2, window_bounds = array<i64: 1, 128>}, {transform_indices = @transform_3, window_bounds = array<i64: 2, 128>}]} {
    %c0 = arith.constant 0 : index
    %c0_0 = arith.constant 0 : index
    %0 = vector.load %arg1[%c0, %c0_0] : memref<2x128xbf16, #tpu.memory_space<vmem>>, vector<2x128xbf16>
    %1 = arith.extf %0 : vector<2x128xbf16> to vector<2x128xf32>
    %c0_1 = arith.constant 0 : index
    %c0_2 = arith.constant 0 : index
    %2 = vector.load %arg2[%c0_1, %c0_2] : memref<1x128xf32, #tpu.memory_space<vmem>>, vector<1x128xf32>
    %3 = vector.broadcast %2 : vector<1x128xf32> to vector<2x128xf32>
    %4 = arith.mulf %1, %3 : vector<2x128xf32>
    %c0_3 = arith.constant 0 : index
    %c0_4 = arith.constant 0 : index
    %5 = vector.load %arg3[%c0_3, %c0_4] : memref<1x128xf32, #tpu.memory_space<vmem>>, vector<1x128xf32>
    %6 = vector.broadcast %5 : vector<1x128xf32> to vector<2x128xf32>
    %7 = arith.addf %4, %6 : vector<2x128xf32>
    %cst = arith.constant 0.000000e+00 : f32
    %8 = vector.broadcast %cst : f32 to vector<2x128xf32>
    %9 = arith.maximumf %7, %8 : vector<2x128xf32>
    %10 = arith.truncf %9 : vector<2x128xf32> to vector<2x128xbf16>
    %c0_5 = arith.constant 0 : index
    %c0_6 = arith.constant 0 : index
    %11 = vector.load %arg4[%c0_5, %c0_6] : memref<2x128xbf16, #tpu.memory_space<vmem>>, vector<2x128xbf16>
    tpu.vector_store %arg4[%c0_5, %c0_6], %10 {strides = array<i32>} : memref<2x128xbf16, #tpu.memory_space<vmem>>, vector<2x128xbf16>,
    return
  }
  func.func @transform_0(%arg0: i32) -> (i32, i32) {
    %c0_i32 = arith.constant 0 : i32
    %c0_i32_0 = arith.constant 0 : i32
    return %arg0, %c0_i32 : i32, i32
  }
  func.func @transform_1(%arg0: i32) -> (i32, i32) {
    %c0_i32 = arith.constant 0 : i32
    %c0_i32_0 = arith.constant 0 : i32
    %c0_i32_1 = arith.constant 0 : i32
    return %c0_i32, %c0_i32_0 : i32, i32
  }
  func.func @transform_2(%arg0: i32) -> (i32, i32) {
    %c0_i32 = arith.constant 0 : i32
    %c0_i32_0 = arith.constant 0 : i32
    %c0_i32_1 = arith.constant 0 : i32
    return %c0_i32, %c0_i32_0 : i32, i32
  }
  func.func @transform_3(%arg0: i32) -> (i32, i32) {
    %c0_i32 = arith.constant 0 : i32
    %c0_i32_0 = arith.constant 0 : i32
    return %arg0, %c0_i32 : i32, i32
  }
}

module attributes {stable_mosaic.version = 11 : i64} {
  func.func @_mm_stats_kernel(%arg0: i32, %arg1: memref<2x1152xbf16, #tpu.memory_space<vmem>>, %arg2: memref<1152x128xbf16, #tpu.memory_space<vmem>>, %arg3: memref<2x128xbf16, #tpu.memory_space<vmem>>, %arg4: memref<1x1x128xf32, #tpu.memory_space<vmem>>, %arg5: memref<1x1x128xf32, #tpu.memory_space<vmem>>) attributes {dimension_semantics = [#tpu.dimension_semantics<parallel>], iteration_bounds = array<i64: 1>, scalar_prefetch = 0 : i64, scratch_operands = 0 : i64, tpu.core_type = #tpu.core_type<tc>, window_params = [{transform_indices = @transform_0, window_bounds = array<i64: 2, 1152>}, {pipeline_mode = #tpu.pipeline_mode<synchronous>, transform_indices = @transform_1, window_bounds = array<i64: 1152, 128>}, {transform_indices = @transform_2, window_bounds = array<i64: 2, 128>}, {transform_indices = @transform_3, window_bounds = array<i64: 1, 1, 128>}, {transform_indices = @transform_4, window_bounds = array<i64: 1, 1, 128>}]} {
    %c0 = arith.constant 0 : index
    %c0_0 = arith.constant 0 : index
    %0 = vector.load %arg1[%c0, %c0_0] : memref<2x1152xbf16, #tpu.memory_space<vmem>>, vector<2x1152xbf16>
    %c0_1 = arith.constant 0 : index
    %c0_2 = arith.constant 0 : index
    %1 = vector.load %arg2[%c0_1, %c0_2] : memref<1152x128xbf16, #tpu.memory_space<vmem>>, vector<1152x128xbf16>
    %cst = arith.constant dense<0.000000e+00> : vector<2x128xf32>
    %2 = tpu.matmul %0, %1, %cst {dimension_numbers = #tpu.dot_dimension_numbers<[1], [0], [0], [1], [0, 0, 1, 1], [], []>} : vector<2x1152xbf16>, vector<1152x128xbf16>, vector<2x128xf32> -> vector<2x128xf32>
    %3 = arith.truncf %2 : vector<2x128xf32> to vector<2x128xbf16>
    %c0_3 = arith.constant 0 : index
    %c0_4 = arith.constant 0 : index
    %4 = vector.load %arg3[%c0_3, %c0_4] : memref<2x128xbf16, #tpu.memory_space<vmem>>, vector<2x128xbf16>
    tpu.vector_store %arg3[%c0_3, %c0_4], %3 {strides = array<i32>} : memref<2x128xbf16, #tpu.memory_space<vmem>>, vector<2x128xbf16>,
    %cst_5 = arith.constant dense<0.000000e+00> : vector<128xf32>
    %5 = vector.multi_reduction <add>, %2, %cst_5 [0] : vector<2x128xf32> to vector<128xf32>
    %6 = vector.shape_cast %5 : vector<128xf32> to vector<1x128xf32>
    %7 = vector.shape_cast %6 : vector<1x128xf32> to vector<1x1x128xf32>
    %c0_6 = arith.constant 0 : index
    %c0_7 = arith.constant 0 : index
    %c0_8 = arith.constant 0 : index
    %8 = vector.load %arg4[%c0_6, %c0_7, %c0_8] : memref<1x1x128xf32, #tpu.memory_space<vmem>>, vector<1x1x128xf32>
    tpu.vector_store %arg4[%c0_6, %c0_7, %c0_8], %7 {strides = array<i32>} : memref<1x1x128xf32, #tpu.memory_space<vmem>>, vector<1x1x128xf32>,
    %9 = arith.mulf %2, %2 : vector<2x128xf32>
    %cst_9 = arith.constant dense<0.000000e+00> : vector<128xf32>
    %10 = vector.multi_reduction <add>, %9, %cst_9 [0] : vector<2x128xf32> to vector<128xf32>
    %11 = vector.shape_cast %10 : vector<128xf32> to vector<1x128xf32>
    %12 = vector.shape_cast %11 : vector<1x128xf32> to vector<1x1x128xf32>
    %c0_10 = arith.constant 0 : index
    %c0_11 = arith.constant 0 : index
    %c0_12 = arith.constant 0 : index
    %13 = vector.load %arg5[%c0_10, %c0_11, %c0_12] : memref<1x1x128xf32, #tpu.memory_space<vmem>>, vector<1x1x128xf32>
    tpu.vector_store %arg5[%c0_10, %c0_11, %c0_12], %12 {strides = array<i32>} : memref<1x1x128xf32, #tpu.memory_space<vmem>>, vector<1x1x128xf32>,
    return
  }
  func.func @transform_0(%arg0: i32) -> (i32, i32) {
    %c0_i32 = arith.constant 0 : i32
    %c0_i32_0 = arith.constant 0 : i32
    return %arg0, %c0_i32 : i32, i32
  }
  func.func @transform_1(%arg0: i32) -> (i32, i32) {
    %c0_i32 = arith.constant 0 : i32
    %c0_i32_0 = arith.constant 0 : i32
    %c0_i32_1 = arith.constant 0 : i32
    return %c0_i32, %c0_i32_0 : i32, i32
  }
  func.func @transform_2(%arg0: i32) -> (i32, i32) {
    %c0_i32 = arith.constant 0 : i32
    %c0_i32_0 = arith.constant 0 : i32
    return %arg0, %c0_i32 : i32, i32
  }
  func.func @transform_3(%arg0: i32) -> (i32, i32, i32) {
    %c0_i32 = arith.constant 0 : i32
    %c0_i32_0 = arith.constant 0 : i32
    %c0_i32_1 = arith.constant 0 : i32
    return %arg0, %c0_i32, %c0_i32_0 : i32, i32, i32
  }
  func.func @transform_4(%arg0: i32) -> (i32, i32, i32) {
    %c0_i32 = arith.constant 0 : i32
    %c0_i32_0 = arith.constant 0 : i32
    %c0_i32_1 = arith.constant 0 : i32
    return %arg0, %c0_i32, %c0_i32_0 : i32, i32, i32
  }
}

module attributes {stable_mosaic.version = 11 : i64} {
  func.func @_mm_stats_kernel(%arg0: i32, %arg1: memref<2x128xbf16, #tpu.memory_space<vmem>>, %arg2: memref<128x64xbf16, #tpu.memory_space<vmem>>, %arg3: memref<2x64xbf16, #tpu.memory_space<vmem>>, %arg4: memref<1x1x64xf32, #tpu.memory_space<vmem>>, %arg5: memref<1x1x64xf32, #tpu.memory_space<vmem>>) attributes {dimension_semantics = [#tpu.dimension_semantics<parallel>], iteration_bounds = array<i64: 1>, scalar_prefetch = 0 : i64, scratch_operands = 0 : i64, tpu.core_type = #tpu.core_type<tc>, window_params = [{transform_indices = @transform_0, window_bounds = array<i64: 2, 128>}, {pipeline_mode = #tpu.pipeline_mode<synchronous>, transform_indices = @transform_1, window_bounds = array<i64: 128, 64>}, {transform_indices = @transform_2, window_bounds = array<i64: 2, 64>}, {transform_indices = @transform_3, window_bounds = array<i64: 1, 1, 64>}, {transform_indices = @transform_4, window_bounds = array<i64: 1, 1, 64>}]} {
    %c0 = arith.constant 0 : index
    %c0_0 = arith.constant 0 : index
    %0 = vector.load %arg1[%c0, %c0_0] : memref<2x128xbf16, #tpu.memory_space<vmem>>, vector<2x128xbf16>
    %c0_1 = arith.constant 0 : index
    %c0_2 = arith.constant 0 : index
    %1 = vector.load %arg2[%c0_1, %c0_2] : memref<128x64xbf16, #tpu.memory_space<vmem>>, vector<128x64xbf16>
    %cst = arith.constant dense<0.000000e+00> : vector<2x64xf32>
    %2 = tpu.matmul %0, %1, %cst {dimension_numbers = #tpu.dot_dimension_numbers<[1], [0], [0], [1], [0, 0, 1, 1], [], []>} : vector<2x128xbf16>, vector<128x64xbf16>, vector<2x64xf32> -> vector<2x64xf32>
    %3 = arith.truncf %2 : vector<2x64xf32> to vector<2x64xbf16>
    %c0_3 = arith.constant 0 : index
    %c0_4 = arith.constant 0 : index
    %4 = vector.load %arg3[%c0_3, %c0_4] : memref<2x64xbf16, #tpu.memory_space<vmem>>, vector<2x64xbf16>
    tpu.vector_store %arg3[%c0_3, %c0_4], %3 {strides = array<i32>} : memref<2x64xbf16, #tpu.memory_space<vmem>>, vector<2x64xbf16>,
    %cst_5 = arith.constant dense<0.000000e+00> : vector<64xf32>
    %5 = vector.multi_reduction <add>, %2, %cst_5 [0] : vector<2x64xf32> to vector<64xf32>
    %6 = vector.shape_cast %5 : vector<64xf32> to vector<1x64xf32>
    %7 = vector.shape_cast %6 : vector<1x64xf32> to vector<1x1x64xf32>
    %c0_6 = arith.constant 0 : index
    %c0_7 = arith.constant 0 : index
    %c0_8 = arith.constant 0 : index
    %8 = vector.load %arg4[%c0_6, %c0_7, %c0_8] : memref<1x1x64xf32, #tpu.memory_space<vmem>>, vector<1x1x64xf32>
    tpu.vector_store %arg4[%c0_6, %c0_7, %c0_8], %7 {strides = array<i32>} : memref<1x1x64xf32, #tpu.memory_space<vmem>>, vector<1x1x64xf32>,
    %9 = arith.mulf %2, %2 : vector<2x64xf32>
    %cst_9 = arith.constant dense<0.000000e+00> : vector<64xf32>
    %10 = vector.multi_reduction <add>, %9, %cst_9 [0] : vector<2x64xf32> to vector<64xf32>
    %11 = vector.shape_cast %10 : vector<64xf32> to vector<1x64xf32>
    %12 = vector.shape_cast %11 : vector<1x64xf32> to vector<1x1x64xf32>
    %c0_10 = arith.constant 0 : index
    %c0_11 = arith.constant 0 : index
    %c0_12 = arith.constant 0 : index
    %13 = vector.load %arg5[%c0_10, %c0_11, %c0_12] : memref<1x1x64xf32, #tpu.memory_space<vmem>>, vector<1x1x64xf32>
    tpu.vector_store %arg5[%c0_10, %c0_11, %c0_12], %12 {strides = array<i32>} : memref<1x1x64xf32, #tpu.memory_space<vmem>>, vector<1x1x64xf32>,
    return
  }
  func.func @transform_0(%arg0: i32) -> (i32, i32) {
    %c0_i32 = arith.constant 0 : i32
    %c0_i32_0 = arith.constant 0 : i32
    return %arg0, %c0_i32 : i32, i32
  }
  func.func @transform_1(%arg0: i32) -> (i32, i32) {
    %c0_i32 = arith.constant 0 : i32
    %c0_i32_0 = arith.constant 0 : i32
    %c0_i32_1 = arith.constant 0 : i32
    return %c0_i32, %c0_i32_0 : i32, i32
  }
  func.func @transform_2(%arg0: i32) -> (i32, i32) {
    %c0_i32 = arith.constant 0 : i32
    %c0_i32_0 = arith.constant 0 : i32
    return %arg0, %c0_i32 : i32, i32
  }
  func.func @transform_3(%arg0: i32) -> (i32, i32, i32) {
    %c0_i32 = arith.constant 0 : i32
    %c0_i32_0 = arith.constant 0 : i32
    %c0_i32_1 = arith.constant 0 : i32
    return %arg0, %c0_i32, %c0_i32_0 : i32, i32, i32
  }
  func.func @transform_4(%arg0: i32) -> (i32, i32, i32) {
    %c0_i32 = arith.constant 0 : i32
    %c0_i32_0 = arith.constant 0 : i32
    %c0_i32_1 = arith.constant 0 : i32
    return %arg0, %c0_i32, %c0_i32_0 : i32, i32, i32
  }
}

module attributes {stable_mosaic.version = 11 : i64} {
  func.func @_bn_relu_kernel(%arg0: i32, %arg1: memref<2x64xbf16, #tpu.memory_space<vmem>>, %arg2: memref<1x64xf32, #tpu.memory_space<vmem>>, %arg3: memref<1x64xf32, #tpu.memory_space<vmem>>, %arg4: memref<2x64xbf16, #tpu.memory_space<vmem>>) attributes {dimension_semantics = [#tpu.dimension_semantics<parallel>], iteration_bounds = array<i64: 1>, scalar_prefetch = 0 : i64, scratch_operands = 0 : i64, tpu.core_type = #tpu.core_type<tc>, window_params = [{transform_indices = @transform_0, window_bounds = array<i64: 2, 64>}, {pipeline_mode = #tpu.pipeline_mode<synchronous>, transform_indices = @transform_1, window_bounds = array<i64: 1, 64>}, {pipeline_mode = #tpu.pipeline_mode<synchronous>, transform_indices = @transform_2, window_bounds = array<i64: 1, 64>}, {transform_indices = @transform_3, window_bounds = array<i64: 2, 64>}]} {
    %c0 = arith.constant 0 : index
    %c0_0 = arith.constant 0 : index
    %0 = vector.load %arg1[%c0, %c0_0] : memref<2x64xbf16, #tpu.memory_space<vmem>>, vector<2x64xbf16>
    %1 = arith.extf %0 : vector<2x64xbf16> to vector<2x64xf32>
    %c0_1 = arith.constant 0 : index
    %c0_2 = arith.constant 0 : index
    %2 = vector.load %arg2[%c0_1, %c0_2] : memref<1x64xf32, #tpu.memory_space<vmem>>, vector<1x64xf32>
    %3 = vector.broadcast %2 : vector<1x64xf32> to vector<2x64xf32>
    %4 = arith.mulf %1, %3 : vector<2x64xf32>
    %c0_3 = arith.constant 0 : index
    %c0_4 = arith.constant 0 : index
    %5 = vector.load %arg3[%c0_3, %c0_4] : memref<1x64xf32, #tpu.memory_space<vmem>>, vector<1x64xf32>
    %6 = vector.broadcast %5 : vector<1x64xf32> to vector<2x64xf32>
    %7 = arith.addf %4, %6 : vector<2x64xf32>
    %cst = arith.constant 0.000000e+00 : f32
    %8 = vector.broadcast %cst : f32 to vector<2x64xf32>
    %9 = arith.maximumf %7, %8 : vector<2x64xf32>
    %10 = arith.truncf %9 : vector<2x64xf32> to vector<2x64xbf16>
    %c0_5 = arith.constant 0 : index
    %c0_6 = arith.constant 0 : index
    %11 = vector.load %arg4[%c0_5, %c0_6] : memref<2x64xbf16, #tpu.memory_space<vmem>>, vector<2x64xbf16>
    tpu.vector_store %arg4[%c0_5, %c0_6], %10 {strides = array<i32>} : memref<2x64xbf16, #tpu.memory_space<vmem>>, vector<2x64xbf16>,
    return
  }
  func.func @transform_0(%arg0: i32) -> (i32, i32) {
    %c0_i32 = arith.constant 0 : i32
    %c0_i32_0 = arith.constant 0 : i32
    return %arg0, %c0_i32 : i32, i32
  }
  func.func @transform_1(%arg0: i32) -> (i32, i32) {
    %c0_i32 = arith.constant 0 : i32
    %c0_i32_0 = arith.constant 0 : i32
    %c0_i32_1 = arith.constant 0 : i32
    return %c0_i32, %c0_i32_0 : i32, i32
  }
  func.func @transform_2(%arg0: i32) -> (i32, i32) {
    %c0_i32 = arith.constant 0 : i32
    %c0_i32_0 = arith.constant 0 : i32
    %c0_i32_1 = arith.constant 0 : i32
    return %c0_i32, %c0_i32_0 : i32, i32
  }
  func.func @transform_3(%arg0: i32) -> (i32, i32) {
    %c0_i32 = arith.constant 0 : i32
    %c0_i32_0 = arith.constant 0 : i32
    return %arg0, %c0_i32 : i32, i32
  }
}

module attributes {stable_mosaic.version = 11 : i64} {
  func.func @_mm_bias_kernel(%arg0: i32, %arg1: memref<16x64xbf16, #tpu.memory_space<vmem>>, %arg2: memref<64x64xbf16, #tpu.memory_space<vmem>>, %arg3: memref<1x64xf32, #tpu.memory_space<vmem>>, %arg4: memref<16x64xf32, #tpu.memory_space<vmem>>) attributes {dimension_semantics = [#tpu.dimension_semantics<parallel>], iteration_bounds = array<i64: 2>, scalar_prefetch = 0 : i64, scratch_operands = 0 : i64, tpu.core_type = #tpu.core_type<tc>, window_params = [{transform_indices = @transform_0, window_bounds = array<i64: 16, 64>}, {pipeline_mode = #tpu.pipeline_mode<synchronous>, transform_indices = @transform_1, window_bounds = array<i64: 64, 64>}, {pipeline_mode = #tpu.pipeline_mode<synchronous>, transform_indices = @transform_2, window_bounds = array<i64: 1, 64>}, {transform_indices = @transform_3, window_bounds = array<i64: 16, 64>}]} {
    %c0 = arith.constant 0 : index
    %c0_0 = arith.constant 0 : index
    %0 = vector.load %arg1[%c0, %c0_0] : memref<16x64xbf16, #tpu.memory_space<vmem>>, vector<16x64xbf16>
    %c0_1 = arith.constant 0 : index
    %c0_2 = arith.constant 0 : index
    %1 = vector.load %arg2[%c0_1, %c0_2] : memref<64x64xbf16, #tpu.memory_space<vmem>>, vector<64x64xbf16>
    %cst = arith.constant dense<0.000000e+00> : vector<16x64xf32>
    %2 = tpu.matmul %0, %1, %cst {dimension_numbers = #tpu.dot_dimension_numbers<[1], [0], [0], [1], [0, 0, 1, 1], [], []>} : vector<16x64xbf16>, vector<64x64xbf16>, vector<16x64xf32> -> vector<16x64xf32>
    %c0_3 = arith.constant 0 : index
    %c0_4 = arith.constant 0 : index
    %3 = vector.load %arg3[%c0_3, %c0_4] : memref<1x64xf32, #tpu.memory_space<vmem>>, vector<1x64xf32>
    %4 = vector.broadcast %3 : vector<1x64xf32> to vector<16x64xf32>
    %5 = arith.addf %2, %4 : vector<16x64xf32>
    %c0_5 = arith.constant 0 : index
    %c0_6 = arith.constant 0 : index
    %6 = vector.load %arg4[%c0_5, %c0_6] : memref<16x64xf32, #tpu.memory_space<vmem>>, vector<16x64xf32>
    tpu.vector_store %arg4[%c0_5, %c0_6], %5 {strides = array<i32>} : memref<16x64xf32, #tpu.memory_space<vmem>>, vector<16x64xf32>,
    return
  }
  func.func @transform_0(%arg0: i32) -> (i32, i32) {
    %c0_i32 = arith.constant 0 : i32
    %c0_i32_0 = arith.constant 0 : i32
    return %arg0, %c0_i32 : i32, i32
  }
  func.func @transform_1(%arg0: i32) -> (i32, i32) {
    %c0_i32 = arith.constant 0 : i32
    %c0_i32_0 = arith.constant 0 : i32
    %c0_i32_1 = arith.constant 0 : i32
    return %c0_i32, %c0_i32_0 : i32, i32
  }
  func.func @transform_2(%arg0: i32) -> (i32, i32) {
    %c0_i32 = arith.constant 0 : i32
    %c0_i32_0 = arith.constant 0 : i32
    %c0_i32_1 = arith.constant 0 : i32
    return %c0_i32, %c0_i32_0 : i32, i32
  }
  func.func @transform_3(%arg0: i32) -> (i32, i32) {
    %c0_i32 = arith.constant 0 : i32
    %c0_i32_0 = arith.constant 0 : i32
    return %arg0, %c0_i32 : i32, i32
  }
}

module attributes {stable_mosaic.version = 11 : i64} {
  func.func @_mm_bias_kernel(%arg0: i32, %arg1: memref<16x64xbf16, #tpu.memory_space<vmem>>, %arg2: memref<64x1xbf16, #tpu.memory_space<vmem>>, %arg3: memref<1x1xf32, #tpu.memory_space<vmem>>, %arg4: memref<16x1xf32, #tpu.memory_space<vmem>>) attributes {dimension_semantics = [#tpu.dimension_semantics<parallel>], iteration_bounds = array<i64: 2>, scalar_prefetch = 0 : i64, scratch_operands = 0 : i64, tpu.core_type = #tpu.core_type<tc>, window_params = [{transform_indices = @transform_0, window_bounds = array<i64: 16, 64>}, {pipeline_mode = #tpu.pipeline_mode<synchronous>, transform_indices = @transform_1, window_bounds = array<i64: 64, 1>}, {pipeline_mode = #tpu.pipeline_mode<synchronous>, transform_indices = @transform_2, window_bounds = array<i64: 1, 1>}, {transform_indices = @transform_3, window_bounds = array<i64: 16, 1>}]} {
    %c0 = arith.constant 0 : index
    %c0_0 = arith.constant 0 : index
    %0 = vector.load %arg1[%c0, %c0_0] : memref<16x64xbf16, #tpu.memory_space<vmem>>, vector<16x64xbf16>
    %c0_1 = arith.constant 0 : index
    %c0_2 = arith.constant 0 : index
    %1 = vector.load %arg2[%c0_1, %c0_2] : memref<64x1xbf16, #tpu.memory_space<vmem>>, vector<64x1xbf16>
    %cst = arith.constant dense<0.000000e+00> : vector<16x1xf32>
    %2 = tpu.matmul %0, %1, %cst {dimension_numbers = #tpu.dot_dimension_numbers<[1], [0], [0], [1], [0, 0, 1, 1], [], []>} : vector<16x64xbf16>, vector<64x1xbf16>, vector<16x1xf32> -> vector<16x1xf32>
    %c0_3 = arith.constant 0 : index
    %c0_4 = arith.constant 0 : index
    %3 = vector.load %arg3[%c0_3, %c0_4] : memref<1x1xf32, #tpu.memory_space<vmem>>, vector<1x1xf32>
    %4 = vector.broadcast %3 : vector<1x1xf32> to vector<16x1xf32>
    %5 = arith.addf %2, %4 : vector<16x1xf32>
    %6 = arith.negf %5 : vector<16x1xf32>
    %7 = math.exp %6 : vector<16x1xf32>
    %cst_5 = arith.constant 1.000000e+00 : f32
    %8 = vector.broadcast %cst_5 : f32 to vector<16x1xf32>
    %9 = arith.addf %8, %7 : vector<16x1xf32>
    %10 = arith.divf %8, %9 : vector<16x1xf32>
    %c0_6 = arith.constant 0 : index
    %c0_7 = arith.constant 0 : index
    %11 = vector.load %arg4[%c0_6, %c0_7] : memref<16x1xf32, #tpu.memory_space<vmem>>, vector<16x1xf32>
    tpu.vector_store %arg4[%c0_6, %c0_7], %10 {strides = array<i32>} : memref<16x1xf32, #tpu.memory_space<vmem>>, vector<16x1xf32>,
    return
  }
  func.func @transform_0(%arg0: i32) -> (i32, i32) {
    %c0_i32 = arith.constant 0 : i32
    %c0_i32_0 = arith.constant 0 : i32
    return %arg0, %c0_i32 : i32, i32
  }
  func.func @transform_1(%arg0: i32) -> (i32, i32) {
    %c0_i32 = arith.constant 0 : i32
    %c0_i32_0 = arith.constant 0 : i32
    %c0_i32_1 = arith.constant 0 : i32
    return %c0_i32, %c0_i32_0 : i32, i32
  }
  func.func @transform_2(%arg0: i32) -> (i32, i32) {
    %c0_i32 = arith.constant 0 : i32
    %c0_i32_0 = arith.constant 0 : i32
    %c0_i32_1 = arith.constant 0 : i32
    return %c0_i32, %c0_i32_0 : i32, i32
  }
  func.func @transform_3(%arg0: i32) -> (i32, i32) {
    %c0_i32 = arith.constant 0 : i32
    %c0_i32_0 = arith.constant 0 : i32
    return %arg0, %c0_i32 : i32, i32
  }
}

module attributes {stable_mosaic.version = 11 : i64} {
  func.func @_mm_bias_kernel(%arg0: i32, %arg1: memref<16x64xbf16, #tpu.memory_space<vmem>>, %arg2: memref<64x65xbf16, #tpu.memory_space<vmem>>, %arg3: memref<1x65xf32, #tpu.memory_space<vmem>>, %arg4: memref<16x65xf32, #tpu.memory_space<vmem>>) attributes {dimension_semantics = [#tpu.dimension_semantics<parallel>], iteration_bounds = array<i64: 2>, scalar_prefetch = 0 : i64, scratch_operands = 0 : i64, tpu.core_type = #tpu.core_type<tc>, window_params = [{transform_indices = @transform_0, window_bounds = array<i64: 16, 64>}, {pipeline_mode = #tpu.pipeline_mode<synchronous>, transform_indices = @transform_1, window_bounds = array<i64: 64, 65>}, {pipeline_mode = #tpu.pipeline_mode<synchronous>, transform_indices = @transform_2, window_bounds = array<i64: 1, 65>}, {transform_indices = @transform_3, window_bounds = array<i64: 16, 65>}]} {
    %c0 = arith.constant 0 : index
    %c0_0 = arith.constant 0 : index
    %0 = vector.load %arg1[%c0, %c0_0] : memref<16x64xbf16, #tpu.memory_space<vmem>>, vector<16x64xbf16>
    %c0_1 = arith.constant 0 : index
    %c0_2 = arith.constant 0 : index
    %1 = vector.load %arg2[%c0_1, %c0_2] : memref<64x65xbf16, #tpu.memory_space<vmem>>, vector<64x65xbf16>
    %cst = arith.constant dense<0.000000e+00> : vector<16x65xf32>
    %2 = tpu.matmul %0, %1, %cst {dimension_numbers = #tpu.dot_dimension_numbers<[1], [0], [0], [1], [0, 0, 1, 1], [], []>} : vector<16x64xbf16>, vector<64x65xbf16>, vector<16x65xf32> -> vector<16x65xf32>
    %c0_3 = arith.constant 0 : index
    %c0_4 = arith.constant 0 : index
    %3 = vector.load %arg3[%c0_3, %c0_4] : memref<1x65xf32, #tpu.memory_space<vmem>>, vector<1x65xf32>
    %4 = vector.broadcast %3 : vector<1x65xf32> to vector<16x65xf32>
    %5 = arith.addf %2, %4 : vector<16x65xf32>
    %c0_5 = arith.constant 0 : index
    %c0_6 = arith.constant 0 : index
    %6 = vector.load %arg4[%c0_5, %c0_6] : memref<16x65xf32, #tpu.memory_space<vmem>>, vector<16x65xf32>
    tpu.vector_store %arg4[%c0_5, %c0_6], %5 {strides = array<i32>} : memref<16x65xf32, #tpu.memory_space<vmem>>, vector<16x65xf32>,
    return
  }
  func.func @transform_0(%arg0: i32) -> (i32, i32) {
    %c0_i32 = arith.constant 0 : i32
    %c0_i32_0 = arith.constant 0 : i32
    return %arg0, %c0_i32 : i32, i32
  }
  func.func @transform_1(%arg0: i32) -> (i32, i32) {
    %c0_i32 = arith.constant 0 : i32
    %c0_i32_0 = arith.constant 0 : i32
    %c0_i32_1 = arith.constant 0 : i32
    return %c0_i32, %c0_i32_0 : i32, i32
  }
  func.func @transform_2(%arg0: i32) -> (i32, i32) {
    %c0_i32 = arith.constant 0 : i32
    %c0_i32_0 = arith.constant 0 : i32
    %c0_i32_1 = arith.constant 0 : i32
    return %c0_i32, %c0_i32_0 : i32, i32
  }
  func.func @transform_3(%arg0: i32) -> (i32, i32) {
    %c0_i32 = arith.constant 0 : i32
    %c0_i32_0 = arith.constant 0 : i32
    return %arg0, %c0_i32 : i32, i32
  }
}

</mosaic_0001>

<bundles_post_ra>
// kernel: xfeat_forward.51
= control target key start
LH: loop header
LB: loop body
LE: loop exit
PB: predicated region body
PF: predicated region fallthrough
CT: control target
= control target key end

     0   :  { %s895_s12 = smov 0   ;;  %s1221_s0 = inlined_call_operand.vmem [shape: bf16[2048,4], index: 0, kind: input, shape index: {}]   ;;  %s1222_s1 = inlined_call_operand.vmem [shape: f32[1,4], index: 1, kind: input, shape index: {}]   ;;  %s1223_s2 = inlined_call_operand.vmem [shape: f32[1,4], index: 2, kind: input, shape index: {}]   ;;  %s1224_s3 = inlined_call_operand.vmem [shape: bf16[2048,4], index: 3, kind: output, shape index: {}]  }
   0x1 LB: > { %s687_s13 = sadd.s32 4294967295, %s873_s12   ;;  %p691_p0 = scmp.ge.s32.totalorder %s873_s12, 1  ;;  %s873_s12 = sphi %s895_s12, %s13_s12  }
   0x2   : > { %p138_p1 = scmp.lt.s32.totalorder %s873_s12, 5 }
   0x4   : > { %p139_p2 = pnand %p691_p0, %p138_p1 }
   0x5   : > { %s692_s14 = sshll.u32 (!%p139_p2), %s687_s13, 6 }
   0x6   : > { %142 = sbr.rel (%p139_p2) target bundleno = 103 (0x67), region = 32  ;;  %p163_p3 = scmp.lt.s32.totalorder (!%p139_p2), %s692_s14, 255 }
   0xb   : > { %s1226_s14 = smov (!%p163_p3, %s692_s14), 255  ;;  %v916_v0 = vld [vmem:[%s1222_s1] ss:$0 sm:$0xff]  ;;  %vm566_vm0 = vcmask 27648  }
   0xc   : > { %s693_s15 = sshll.u32 %s1226_s14, 2  ;;  %v924_v5 = vld [vmem:[%s1223_s2] ss:$0 sm:$0xff] }
   0xd   : > { %s911_s18 = scalar_lea.vmem %s1221_s0, %s693_s15  ;;  %s948_s25 = scalar_lea.vmem %s1224_s3, %s693_s15 }
   0xe   : > { %v699_v1 = vld [vmem:[%s911_s18] sm:$0xff]   ;;  %v826_v2 = vld [vmem:[%s911_s18 + $0x8] sm:$0xff]   ;;  %v827_v3 = vld [vmem:[%s911_s18 + $0x10] sm:$0xff]  }
   0xf   : > { %v700_v4 = vunpack.c.l.bf16 %v699_v1  ;;  %v701_v6 = vunpack.c.h.bf16 %v699_v1  ;;  %v704_v7 = vunpack.c.l.bf16 %v826_v2  ;;  %v705_v8 = vunpack.c.h.bf16 %v826_v2  ;;  %v828_v9 = vld [vmem:[%s911_s18 + $0x18] sm:$0xff]   ;;  %v829_v38 = vld [vmem:[%s911_s18 + $0x20] sm:$0xff]   ;;  %v830_v39 = vld [vmem:[%s911_s18 + $0x28] sm:$0xff]  }
  0x10   : > { %v708_v10 = vunpack.c.l.bf16 %v827_v3  ;;  %v709_v11 = vunpack.c.h.bf16 %v827_v3  ;;  %v712_v12 = vunpack.c.l.bf16 %v828_v9  ;;  %v713_v13 = vunpack.c.h.bf16 %v828_v9  ;;  %v831_v44 = vld [vmem:[%s911_s18 + $0x30] sm:$0xff]   ;;  %v832_v45 = vld [vmem:[%s911_s18 + $0x38] sm:$0xff]  }
  0x11   : > { %v306_v14 = vmul.f32 %v916_v0, %v700_v4  ;;  %v307_v15 = vmul.f32 %v916_v0, %v701_v6  ;;  %v308_v16 = vmul.f32 %v916_v0, %v704_v7  ;;  %v309_v17 = vmul.f32 %v916_v0, %v705_v8 }
  0x12   : > { %v310_v18 = vmul.f32 %v916_v0, %v708_v10  ;;  %v311_v19 = vmul.f32 %v916_v0, %v709_v11  ;;  %v312_v20 = vmul.f32 %v916_v0, %v712_v12  ;;  %v313_v21 = vmul.f32 %v916_v0, %v713_v13  ;;  %v833_v12 = vld [vmem:[%s911_s18 + $0x40] sm:$0xff]   ;;  %v834_v13 = vld [vmem:[%s911_s18 + $0x48] sm:$0xff]  }
  0x13   : > { %v374_v22 = vadd.f32 %v924_v5, %v306_v14  ;;  %v375_v23 = vadd.f32 %v924_v5, %v307_v15  ;;  %v376_v24 = vadd.f32 %v924_v5, %v308_v16  ;;  %v377_v25 = vadd.f32 %v924_v5, %v309_v17 }
  0x14   : > { %v378_v26 = vadd.f32 %v924_v5, %v310_v18  ;;  %v379_v27 = vadd.f32 %v924_v5, %v311_v19  ;;  %v380_v28 = vadd.f32 %v924_v5, %v312_v20  ;;  %v381_v29 = vadd.f32 %v924_v5, %v313_v21 }
  0x15   : > { %v438_v30 = vmax.f32 %v374_v22, 0.0  ;;  %v439_v31 = vmax.f32 %v375_v23, 0.0  ;;  %v440_v32 = vmax.f32 %v376_v24, 0.0  ;;  %v441_v33 = vmax.f32 %v377_v25, 0.0 }
  0x16   : > { %v442_v34 = vmax.f32 %v378_v26, 0.0  ;;  %v443_v35 = vmax.f32 %v379_v27, 0.0  ;;  %v444_v36 = vmax.f32 %v380_v28, 0.0  ;;  %v445_v37 = vmax.f32 %v381_v29, 0.0  ;;  %v835_v26 = vld [vmem:[%s911_s18 + $0x50] sm:$0xff]   ;;  %v836_v27 = vld [vmem:[%s911_s18 + $0x58] sm:$0xff]  }
  0x17   : > { %v502_v40 = vpack.c.bf16 %v438_v30, %v438_v30  ;;  %v503_v41 = vpack.c.bf16 %v439_v31, %v439_v31  ;;  %v504_v42 = vpack.c.bf16 %v440_v32, %v440_v32  ;;  %v505_v43 = vpack.c.bf16 %v441_v33, %v441_v33 }
  0x18   : > { %v506_v46 = vpack.c.bf16 %v442_v34, %v442_v34  ;;  %v507_v47 = vpack.c.bf16 %v443_v35, %v443_v35  ;;  %v508_v48 = vpack.c.bf16 %v444_v36, %v444_v36  ;;  %v509_v49 = vpack.c.bf16 %v445_v37, %v445_v37 }
  0x19   : > { %567 = vst.msk [vmem:[%s948_s25] sm:$0xf] %vm566_vm0, %v502_v40  ;;  %v716_v50 = vunpack.c.l.bf16 %v829_v38  ;;  %v717_v51 = vunpack.c.h.bf16 %v829_v38  ;;  %v720_v52 = vunpack.c.l.bf16 %v830_v39  ;;  %v721_v53 = vunpack.c.h.bf16 %v830_v39 }
  0x1a   : > { %568 = vst.msk [vmem:[%s948_s25 + $0x4] sm:$0xf] %vm566_vm0, %v503_v41  ;;  %v724_v54 = vunpack.c.l.bf16 %v831_v44  ;;  %v725_v55 = vunpack.c.h.bf16 %v831_v44  ;;  %v728_v56 = vunpack.c.l.bf16 %v832_v45  ;;  %v729_v57 = vunpack.c.h.bf16 %v832_v45 }
  0x1b   : > { %569 = vst.msk [vmem:[%s948_s25 + $0x8] sm:$0xf] %vm566_vm0, %v504_v42  ;;  %v314_v58 = vmul.f32 %v916_v0, %v716_v50  ;;  %v315_v59 = vmul.f32 %v916_v0, %v717_v51  ;;  %v316_v60 = vmul.f32 %v916_v0, %v720_v52  ;;  %v317_v61 = vmul.f32 %v916_v0, %v721_v53 }
  0x1c   : > { %570 = vst.msk [vmem:[%s948_s25 + $0xc] sm:$0xf] %vm566_vm0, %v505_v43  ;;  %v318_v62 = vmul.f32 %v916_v0, %v724_v54  ;;  %v319_v63 = vmul.f32 %v916_v0, %v725_v55  ;;  %v320_v1 = vmul.f32 %v916_v0, %v728_v56  ;;  %v321_v2 = vmul.f32 %v916_v0, %v729_v57  ;;  %v837_v56 = vld [vmem:[%s911_s18 + $0x60] sm:$0xff]   ;;  %v838_v57 = vld [vmem:[%s911_s18 + $0x68] sm:$0xff]  }
  0x1d   : > { %571 = vst.msk [vmem:[%s948_s25 + $0x10] sm:$0xf] %vm566_vm0, %v506_v46  ;;  %v382_v3 = vadd.f32 %v924_v5, %v314_v58  ;;  %v383_v4 = vadd.f32 %v924_v5, %v315_v59  ;;  %v384_v6 = vadd.f32 %v924_v5, %v316_v60  ;;  %v385_v7 = vadd.f32 %v924_v5, %v317_v61 }
  0x1e   : > { %572 = vst.msk [vmem:[%s948_s25 + $0x14] sm:$0xf] %vm566_vm0, %v507_v47  ;;  %v386_v8 = vadd.f32 %v924_v5, %v318_v62  ;;  %v387_v9 = vadd.f32 %v924_v5, %v319_v63  ;;  %v388_v10 = vadd.f32 %v924_v5, %v320_v1  ;;  %v389_v11 = vadd.f32 %v924_v5, %v321_v2 }
  0x1f   : > { %573 = vst.msk [vmem:[%s948_s25 + $0x18] sm:$0xf] %vm566_vm0, %v508_v48  ;;  %v446_v14 = vmax.f32 %v382_v3, 0.0  ;;  %v447_v15 = vmax.f32 %v383_v4, 0.0  ;;  %v448_v16 = vmax.f32 %v384_v6, 0.0  ;;  %v449_v17 = vmax.f32 %v385_v7, 0.0 }
  0x20   : > { %574 = vst.msk [vmem:[%s948_s25 + $0x1c] sm:$0xf] %vm566_vm0, %v509_v49  ;;  %v450_v18 = vmax.f32 %v386_v8, 0.0  ;;  %v451_v19 = vmax.f32 %v387_v9, 0.0  ;;  %v452_v20 = vmax.f32 %v388_v10, 0.0  ;;  %v453_v21 = vmax.f32 %v389_v11, 0.0 }
  0x21   : > { %v510_v22 = vpack.c.bf16 %v446_v14, %v446_v14  ;;  %v511_v23 = vpack.c.bf16 %v447_v15, %v447_v15  ;;  %v512_v24 = vpack.c.bf16 %v448_v16, %v448_v16  ;;  %v513_v25 = vpack.c.bf16 %v449_v17, %v449_v17  ;;  %v839_v8 = vld [vmem:[%s911_s18 + $0x70] sm:$0xff]   ;;  %v840_v9 = vld [vmem:[%s911_s18 + $0x78] sm:$0xff]  }
  0x22   : > { %v514_v28 = vpack.c.bf16 %v450_v18, %v450_v18  ;;  %v515_v29 = vpack.c.bf16 %v451_v19, %v451_v19  ;;  %v516_v30 = vpack.c.bf16 %v452_v20, %v452_v20  ;;  %v517_v31 = vpack.c.bf16 %v453_v21, %v453_v21 }
  0x23   : > { %575 = vst.msk [vmem:[%s948_s25 + $0x20] sm:$0xf] %vm566_vm0, %v510_v22  ;;  %v732_v32 = vunpack.c.l.bf16 %v833_v12  ;;  %v733_v33 = vunpack.c.h.bf16 %v833_v12  ;;  %v736_v34 = vunpack.c.l.bf16 %v834_v13  ;;  %v737_v35 = vunpack.c.h.bf16 %v834_v13 }
  0x24   : > { %576 = vst.msk [vmem:[%s948_s25 + $0x24] sm:$0xf] %vm566_vm0, %v511_v23  ;;  %v740_v36 = vunpack.c.l.bf16 %v835_v26  ;;  %v741_v37 = vunpack.c.h.bf16 %v835_v26  ;;  %v744_v38 = vunpack.c.l.bf16 %v836_v27  ;;  %v745_v39 = vunpack.c.h.bf16 %v836_v27 }
  0x25   : > { %577 = vst.msk [vmem:[%s948_s25 + $0x28] sm:$0xf] %vm566_vm0, %v512_v24  ;;  %v322_v40 = vmul.f32 %v916_v0, %v732_v32  ;;  %v323_v41 = vmul.f32 %v916_v0, %v733_v33  ;;  %v324_v42 = vmul.f32 %v916_v0, %v736_v34  ;;  %v325_v43 = vmul.f32 %v916_v0, %v737_v35 }
  0x26   : > { %578 = vst.msk [vmem:[%s948_s25 + $0x2c] sm:$0xf] %vm566_vm0, %v513_v25  ;;  %v326_v44 = vmul.f32 %v916_v0, %v740_v36  ;;  %v327_v45 = vmul.f32 %v916_v0, %v741_v37  ;;  %v328_v46 = vmul.f32 %v916_v0, %v744_v38  ;;  %v329_v47 = vmul.f32 %v916_v0, %v745_v39  ;;  %v841_v38 = vld [vmem:[%s911_s18 + $0x80] sm:$0xff]   ;;  %v842_v39 = vld [vmem:[%s911_s18 + $0x88] sm:$0xff]  }
  0x27   : > { %579 = vst.msk [vmem:[%s948_s25 + $0x30] sm:$0xf] %vm566_vm0, %v514_v28  ;;  %v390_v48 = vadd.f32 %v924_v5, %v322_v40  ;;  %v391_v49 = vadd.f32 %v924_v5, %v323_v41  ;;  %v392_v50 = vadd.f32 %v924_v5, %v324_v42  ;;  %v393_v51 = vadd.f32 %v924_v5, %v325_v43 }
  0x28   : > { %580 = vst.msk [vmem:[%s948_s25 + $0x34] sm:$0xf] %vm566_vm0, %v515_v29  ;;  %v394_v52 = vadd.f32 %v924_v5, %v326_v44  ;;  %v395_v53 = vadd.f32 %v924_v5, %v327_v45  ;;  %v396_v54 = vadd.f32 %v924_v5, %v328_v46  ;;  %v397_v55 = vadd.f32 %v924_v5, %v329_v47 }
  0x29   : > { %581 = vst.msk [vmem:[%s948_s25 + $0x38] sm:$0xf] %vm566_vm0, %v516_v30  ;;  %v454_v58 = vmax.f32 %v390_v48, 0.0  ;;  %v455_v59 = vmax.f32 %v391_v49, 0.0  ;;  %v456_v60 = vmax.f32 %v392_v50, 0.0  ;;  %v457_v61 = vmax.f32 %v393_v51, 0.0 }
  0x2a   : > { %582 = vst.msk [vmem:[%s948_s25 + $0x3c] sm:$0xf] %vm566_vm0, %v517_v31  ;;  %v458_v62 = vmax.f32 %v394_v52, 0.0  ;;  %v459_v63 = vmax.f32 %v395_v53, 0.0  ;;  %v460_v1 = vmax.f32 %v396_v54, 0.0  ;;  %v461_v2 = vmax.f32 %v397_v55, 0.0 }
  0x2b   : > { %v518_v3 = vpack.c.bf16 %v454_v58, %v454_v58  ;;  %v519_v4 = vpack.c.bf16 %v455_v59, %v455_v59  ;;  %v520_v6 = vpack.c.bf16 %v456_v60, %v456_v60  ;;  %v521_v7 = vpack.c.bf16 %v457_v61, %v457_v61  ;;  %v843_v52 = vld [vmem:[%s911_s18 + $0x90] sm:$0xff]   ;;  %v844_v53 = vld [vmem:[%s911_s18 + $0x98] sm:$0xff]  }
  0x2c   : > { %v522_v10 = vpack.c.bf16 %v458_v62, %v458_v62  ;;  %v523_v11 = vpack.c.bf16 %v459_v63, %v459_v63  ;;  %v524_v12 = vpack.c.bf16 %v460_v1, %v460_v1  ;;  %v525_v13 = vpack.c.bf16 %v461_v2, %v461_v2 }
  0x2d   : > { %583 = vst.msk [vmem:[%s948_s25 + $0x40] sm:$0xf] %vm566_vm0, %v518_v3  ;;  %v748_v14 = vunpack.c.l.bf16 %v837_v56  ;;  %v749_v15 = vunpack.c.h.bf16 %v837_v56  ;;  %v752_v16 = vunpack.c.l.bf16 %v838_v57  ;;  %v753_v17 = vunpack.c.h.bf16 %v838_v57 }
  0x2e   : > { %584 = vst.msk [vmem:[%s948_s25 + $0x44] sm:$0xf] %vm566_vm0, %v519_v4  ;;  %v756_v18 = vunpack.c.l.bf16 %v839_v8  ;;  %v757_v19 = vunpack.c.h.bf16 %v839_v8  ;;  %v760_v20 = vunpack.c.l.bf16 %v840_v9  ;;  %v761_v21 = vunpack.c.h.bf16 %v840_v9 }
  0x2f   : > { %585 = vst.msk [vmem:[%s948_s25 + $0x48] sm:$0xf] %vm566_vm0, %v520_v6  ;;  %v330_v22 = vmul.f32 %v916_v0, %v748_v14  ;;  %v331_v23 = vmul.f32 %v916_v0, %v749_v15  ;;  %v332_v24 = vmul.f32 %v916_v0, %v752_v16  ;;  %v333_v25 = vmul.f32 %v916_v0, %v753_v17 }
  0x30   : > { %586 = vst.msk [vmem:[%s948_s25 + $0x4c] sm:$0xf] %vm566_vm0, %v521_v7  ;;  %v334_v26 = vmul.f32 %v916_v0, %v756_v18  ;;  %v335_v27 = vmul.f32 %v916_v0, %v757_v19  ;;  %v336_v28 = vmul.f32 %v916_v0, %v760_v20  ;;  %v337_v29 = vmul.f32 %v916_v0, %v761_v21  ;;  %v845_v20 = vld [vmem:[%s911_s18 + $0xa0] sm:$0xff]   ;;  %v846_v21 = vld [vmem:[%s911_s18 + $0xa8] sm:$0xff]  }
  0x31   : > { %587 = vst.msk [vmem:[%s948_s25 + $0x50] sm:$0xf] %vm566_vm0, %v522_v10  ;;  %v398_v30 = vadd.f32 %v924_v5, %v330_v22  ;;  %v399_v31 = vadd.f32 %v924_v5, %v331_v23  ;;  %v400_v32 = vadd.f32 %v924_v5, %v332_v24  ;;  %v401_v33 = vadd.f32 %v924_v5, %v333_v25 }
  0x32   : > { %588 = vst.msk [vmem:[%s948_s25 + $0x54] sm:$0xf] %vm566_vm0, %v523_v11  ;;  %v402_v34 = vadd.f32 %v924_v5, %v334_v26  ;;  %v403_v35 = vadd.f32 %v924_v5, %v335_v27  ;;  %v404_v36 = vadd.f32 %v924_v5, %v336_v28  ;;  %v405_v37 = vadd.f32 %v924_v5, %v337_v29 }
  0x33   : > { %589 = vst.msk [vmem:[%s948_s25 + $0x58] sm:$0xf] %vm566_vm0, %v524_v12  ;;  %v462_v40 = vmax.f32 %v398_v30, 0.0  ;;  %v463_v41 = vmax.f32 %v399_v31, 0.0  ;;  %v464_v42 = vmax.f32 %v400_v32, 0.0  ;;  %v465_v43 = vmax.f32 %v401_v33, 0.0 }
  0x34   : > { %590 = vst.msk [vmem:[%s948_s25 + $0x5c] sm:$0xf] %vm566_vm0, %v525_v13  ;;  %v466_v44 = vmax.f32 %v402_v34, 0.0  ;;  %v467_v45 = vmax.f32 %v403_v35, 0.0  ;;  %v468_v46 = vmax.f32 %v404_v36, 0.0  ;;  %v469_v47 = vmax.f32 %v405_v37, 0.0 }
  0x35   : > { %v526_v48 = vpack.c.bf16 %v462_v40, %v462_v40  ;;  %v527_v49 = vpack.c.bf16 %v463_v41, %v463_v41  ;;  %v528_v50 = vpack.c.bf16 %v464_v42, %v464_v42  ;;  %v529_v51 = vpack.c.bf16 %v465_v43, %v465_v43  ;;  %v847_v34 = vld [vmem:[%s911_s18 + $0xb0] sm:$0xff]   ;;  %v848_v35 = vld [vmem:[%s911_s18 + $0xb8] sm:$0xff]  }
  0x36   : > { %v530_v54 = vpack.c.bf16 %v466_v44, %v466_v44  ;;  %v531_v55 = vpack.c.bf16 %v467_v45, %v467_v45  ;;  %v532_v56 = vpack.c.bf16 %v468_v46, %v468_v46  ;;  %v533_v57 = vpack.c.bf16 %v469_v47, %v469_v47 }
  0x37   : > { %591 = vst.msk [vmem:[%s948_s25 + $0x60] sm:$0xf] %vm566_vm0, %v526_v48  ;;  %v764_v58 = vunpack.c.l.bf16 %v841_v38  ;;  %v765_v59 = vunpack.c.h.bf16 %v841_v38  ;;  %v768_v60 = vunpack.c.l.bf16 %v842_v39  ;;  %v769_v61 = vunpack.c.h.bf16 %v842_v39 }
  0x38   : > { %592 = vst.msk [vmem:[%s948_s25 + $0x64] sm:$0xf] %vm566_vm0, %v527_v49  ;;  %v772_v62 = vunpack.c.l.bf16 %v843_v52  ;;  %v773_v63 = vunpack.c.h.bf16 %v843_v52  ;;  %v776_v1 = vunpack.c.l.bf16 %v844_v53  ;;  %v777_v2 = vunpack.c.h.bf16 %v844_v53 }
  0x39   : > { %593 = vst.msk [vmem:[%s948_s25 + $0x68] sm:$0xf] %vm566_vm0, %v528_v50  ;;  %v338_v3 = vmul.f32 %v916_v0, %v764_v58  ;;  %v339_v4 = vmul.f32 %v916_v0, %v765_v59  ;;  %v340_v6 = vmul.f32 %v916_v0, %v768_v60  ;;  %v341_v7 = vmul.f32 %v916_v0, %v769_v61 }
  0x3a   : > { %594 = vst.msk [vmem:[%s948_s25 + $0x6c] sm:$0xf] %vm566_vm0, %v529_v51  ;;  %v342_v8 = vmul.f32 %v916_v0, %v772_v62  ;;  %v343_v9 = vmul.f32 %v916_v0, %v773_v63  ;;  %v344_v10 = vmul.f32 %v916_v0, %v776_v1  ;;  %v345_v11 = vmul.f32 %v916_v0, %v777_v2  ;;  %v849_v1 = vld [vmem:[%s911_s18 + $0xc0] sm:$0xff]   ;;  %v850_v2 = vld [vmem:[%s911_s18 + $0xc8] sm:$0xff]  }
  0x3b   : > { %595 = vst.msk [vmem:[%s948_s25 + $0x70] sm:$0xf] %vm566_vm0, %v530_v54  ;;  %v406_v12 = vadd.f32 %v924_v5, %v338_v3  ;;  %v407_v13 = vadd.f32 %v924_v5, %v339_v4  ;;  %v408_v14 = vadd.f32 %v924_v5, %v340_v6  ;;  %v409_v15 = vadd.f32 %v924_v5, %v341_v7 }
  0x3c   : > { %596 = vst.msk [vmem:[%s948_s25 + $0x74] sm:$0xf] %vm566_vm0, %v531_v55  ;;  %v410_v16 = vadd.f32 %v924_v5, %v342_v8  ;;  %v411_v17 = vadd.f32 %v924_v5, %v343_v9  ;;  %v412_v18 = vadd.f32 %v924_v5, %v344_v10  ;;  %v413_v19 = vadd.f32 %v924_v5, %v345_v11 }
  0x3d   : > { %597 = vst.msk [vmem:[%s948_s25 + $0x78] sm:$0xf] %vm566_vm0, %v532_v56  ;;  %v470_v22 = vmax.f32 %v406_v12, 0.0  ;;  %v471_v23 = vmax.f32 %v407_v13, 0.0  ;;  %v472_v24 = vmax.f32 %v408_v14, 0.0  ;;  %v473_v25 = vmax.f32 %v409_v15, 0.0 }
  0x3e   : > { %598 = vst.msk [vmem:[%s948_s25 + $0x7c] sm:$0xf] %vm566_vm0, %v533_v57  ;;  %v474_v26 = vmax.f32 %v410_v16, 0.0  ;;  %v475_v27 = vmax.f32 %v411_v17, 0.0  ;;  %v476_v28 = vmax.f32 %v412_v18, 0.0  ;;  %v477_v29 = vmax.f32 %v413_v19, 0.0 }
  0x3f   : > { %v534_v30 = vpack.c.bf16 %v470_v22, %v470_v22  ;;  %v535_v31 = vpack.c.bf16 %v471_v23, %v471_v23  ;;  %v536_v32 = vpack.c.bf16 %v472_v24, %v472_v24  ;;  %v537_v33 = vpack.c.bf16 %v473_v25, %v473_v25  ;;  %v851_v16 = vld [vmem:[%s911_s18 + $0xd0] sm:$0xff]   ;;  %v852_v17 = vld [vmem:[%s911_s18 + $0xd8] sm:$0xff]  }
  0x40   : > { %v538_v36 = vpack.c.bf16 %v474_v26, %v474_v26  ;;  %v539_v37 = vpack.c.bf16 %v475_v27, %v475_v27  ;;  %v540_v38 = vpack.c.bf16 %v476_v28, %v476_v28  ;;  %v541_v39 = vpack.c.bf16 %v477_v29, %v477_v29 }
  0x41   : > { %599 = vst.msk [vmem:[%s948_s25 + $0x80] sm:$0xf] %vm566_vm0, %v534_v30  ;;  %v780_v40 = vunpack.c.l.bf16 %v845_v20  ;;  %v781_v41 = vunpack.c.h.bf16 %v845_v20  ;;  %v784_v42 = vunpack.c.l.bf16 %v846_v21  ;;  %v785_v43 = vunpack.c.h.bf16 %v846_v21 }
  0x42   : > { %600 = vst.msk [vmem:[%s948_s25 + $0x84] sm:$0xf] %vm566_vm0, %v535_v31  ;;  %v788_v44 = vunpack.c.l.bf16 %v847_v34  ;;  %v789_v45 = vunpack.c.h.bf16 %v847_v34  ;;  %v792_v46 = vunpack.c.l.bf16 %v848_v35  ;;  %v793_v47 = vunpack.c.h.bf16 %v848_v35 }
  0x43   : > { %601 = vst.msk [vmem:[%s948_s25 + $0x88] sm:$0xf] %vm566_vm0, %v536_v32  ;;  %v346_v48 = vmul.f32 %v916_v0, %v780_v40  ;;  %v347_v49 = vmul.f32 %v916_v0, %v781_v41  ;;  %v348_v50 = vmul.f32 %v916_v0, %v784_v42  ;;  %v349_v51 = vmul.f32 %v916_v0, %v785_v43 }
  0x44   : > { %602 = vst.msk [vmem:[%s948_s25 + $0x8c] sm:$0xf] %vm566_vm0, %v537_v33  ;;  %v350_v52 = vmul.f32 %v916_v0, %v788_v44  ;;  %v351_v53 = vmul.f32 %v916_v0, %v789_v45  ;;  %v352_v54 = vmul.f32 %v916_v0, %v792_v46  ;;  %v353_v55 = vmul.f32 %v916_v0, %v793_v47  ;;  %v853_v46 = vld [vmem:[%s911_s18 + $0xe0] sm:$0xff]   ;;  %v854_v47 = vld [vmem:[%s911_s18 + $0xe8] sm:$0xff]  }
  0x45   : > { %603 = vst.msk [vmem:[%s948_s25 + $0x90] sm:$0xf] %vm566_vm0, %v538_v36  ;;  %v414_v56 = vadd.f32 %v924_v5, %v346_v48  ;;  %v415_v57 = vadd.f32 %v924_v5, %v347_v49  ;;  %v416_v58 = vadd.f32 %v924_v5, %v348_v50  ;;  %v417_v59 = vadd.f32 %v924_v5, %v349_v51 }
  0x46   : > { %604 = vst.msk [vmem:[%s948_s25 + $0x94] sm:$0xf] %vm566_vm0, %v539_v37  ;;  %v418_v60 = vadd.f32 %v924_v5, %v350_v52  ;;  %v419_v61 = vadd.f32 %v924_v5, %v351_v53  ;;  %v420_v62 = vadd.f32 %v924_v5, %v352_v54  ;;  %v421_v63 = vadd.f32 %v924_v5, %v353_v55 }
  0x47   : > { %605 = vst.msk [vmem:[%s948_s25 + $0x98] sm:$0xf] %vm566_vm0, %v540_v38  ;;  %v478_v3 = vmax.f32 %v414_v56, 0.0  ;;  %v479_v4 = vmax.f32 %v415_v57, 0.0  ;;  %v480_v6 = vmax.f32 %v416_v58, 0.0  ;;  %v481_v7 = vmax.f32 %v417_v59, 0.0 }
  0x48   : > { %606 = vst.msk [vmem:[%s948_s25 + $0x9c] sm:$0xf] %vm566_vm0, %v541_v39  ;;  %v482_v8 = vmax.f32 %v418_v60, 0.0  ;;  %v483_v9 = vmax.f32 %v419_v61, 0.0  ;;  %v484_v10 = vmax.f32 %v420_v62, 0.0  ;;  %v485_v11 = vmax.f32 %v421_v63, 0.0 }
  0x49   : > { %v542_v12 = vpack.c.bf16 %v478_v3, %v478_v3  ;;  %v543_v13 = vpack.c.bf16 %v479_v4, %v479_v4  ;;  %v544_v14 = vpack.c.bf16 %v480_v6, %v480_v6  ;;  %v545_v15 = vpack.c.bf16 %v481_v7, %v481_v7  ;;  %v855_v60 = vld [vmem:[%s911_s18 + $0xf0] sm:$0xff]   ;;  %v856_v61 = vld [vmem:[%s911_s18 + $0xf8] sm:$0xff]  }
  0x4a   : > { %v546_v18 = vpack.c.bf16 %v482_v8, %v482_v8  ;;  %v547_v19 = vpack.c.bf16 %v483_v9, %v483_v9  ;;  %v548_v20 = vpack.c.bf16 %v484_v10, %v484_v10  ;;  %v549_v21 = vpack.c.bf16 %v485_v11, %v485_v11 }
  0x4b   : > { %607 = vst.msk [vmem:[%s948_s25 + $0xa0] sm:$0xf] %vm566_vm0, %v542_v12  ;;  %v796_v22 = vunpack.c.l.bf16 %v849_v1  ;;  %v797_v23 = vunpack.c.h.bf16 %v849_v1  ;;  %v800_v24 = vunpack.c.l.bf16 %v850_v2  ;;  %v801_v25 = vunpack.c.h.bf16 %v850_v2 }
  0x4c   : > { %608 = vst.msk [vmem:[%s948_s25 + $0xa4] sm:$0xf] %vm566_vm0, %v543_v13  ;;  %v804_v26 = vunpack.c.l.bf16 %v851_v16  ;;  %v805_v27 = vunpack.c.h.bf16 %v851_v16  ;;  %v808_v28 = vunpack.c.l.bf16 %v852_v17  ;;  %v809_v29 = vunpack.c.h.bf16 %v852_v17 }
  0x4d   : > { %609 = vst.msk [vmem:[%s948_s25 + $0xa8] sm:$0xf] %vm566_vm0, %v544_v14  ;;  %v354_v30 = vmul.f32 %v916_v0, %v796_v22  ;;  %v355_v31 = vmul.f32 %v916_v0, %v797_v23  ;;  %v356_v32 = vmul.f32 %v916_v0, %v800_v24  ;;  %v357_v33 = vmul.f32 %v916_v0, %v801_v25 }
  0x4e   : > { %610 = vst.msk [vmem:[%s948_s25 + $0xac] sm:$0xf] %vm566_vm0, %v545_v15  ;;  %v358_v34 = vmul.f32 %v916_v0, %v804_v26  ;;  %v359_v35 = vmul.f32 %v916_v0, %v805_v27  ;;  %v360_v36 = vmul.f32 %v916_v0, %v808_v28  ;;  %v361_v37 = vmul.f32 %v916_v0, %v809_v29 }
  0x4f   : > { %611 = vst.msk [vmem:[%s948_s25 + $0xb0] sm:$0xf] %vm566_vm0, %v546_v18  ;;  %v422_v38 = vadd.f32 %v924_v5, %v354_v30  ;;  %v423_v39 = vadd.f32 %v924_v5, %v355_v31  ;;  %v424_v40 = vadd.f32 %v924_v5, %v356_v32  ;;  %v425_v41 = vadd.f32 %v924_v5, %v357_v33 }
  0x50   : > { %612 = vst.msk [vmem:[%s948_s25 + $0xb4] sm:$0xf] %vm566_vm0, %v547_v19  ;;  %v426_v42 = vadd.f32 %v924_v5, %v358_v34  ;;  %v427_v43 = vadd.f32 %v924_v5, %v359_v35  ;;  %v428_v44 = vadd.f32 %v924_v5, %v360_v36  ;;  %v429_v45 = vadd.f32 %v924_v5, %v361_v37 }
  0x51   : > { %613 = vst.msk [vmem:[%s948_s25 + $0xb8] sm:$0xf] %vm566_vm0, %v548_v20  ;;  %v486_v48 = vmax.f32 %v422_v38, 0.0  ;;  %v487_v49 = vmax.f32 %v423_v39, 0.0  ;;  %v488_v50 = vmax.f32 %v424_v40, 0.0  ;;  %v489_v51 = vmax.f32 %v425_v41, 0.0 }
  0x52   : > { %614 = vst.msk [vmem:[%s948_s25 + $0xbc] sm:$0xf] %vm566_vm0, %v549_v21  ;;  %v490_v52 = vmax.f32 %v426_v42, 0.0  ;;  %v491_v53 = vmax.f32 %v427_v43, 0.0  ;;  %v492_v54 = vmax.f32 %v428_v44, 0.0  ;;  %v493_v55 = vmax.f32 %v429_v45, 0.0 }
  0x53   : > { %v550_v56 = vpack.c.bf16 %v486_v48, %v486_v48  ;;  %v551_v57 = vpack.c.bf16 %v487_v49, %v487_v49  ;;  %v552_v58 = vpack.c.bf16 %v488_v50, %v488_v50  ;;  %v553_v59 = vpack.c.bf16 %v489_v51, %v489_v51 }
  0x54   : > { %v554_v62 = vpack.c.bf16 %v490_v52, %v490_v52  ;;  %v555_v63 = vpack.c.bf16 %v491_v53, %v491_v53  ;;  %v556_v1 = vpack.c.bf16 %v492_v54, %v492_v54  ;;  %v557_v2 = vpack.c.bf16 %v493_v55, %v493_v55 }
  0x55   : > { %615 = vst.msk [vmem:[%s948_s25 + $0xc0] sm:$0xf] %vm566_vm0, %v550_v56  ;;  %v812_v3 = vunpack.c.l.bf16 %v853_v46  ;;  %v813_v4 = vunpack.c.h.bf16 %v853_v46  ;;  %v816_v6 = vunpack.c.l.bf16 %v854_v47  ;;  %v817_v7 = vunpack.c.h.bf16 %v854_v47 }
  0x56   : > { %616 = vst.msk [vmem:[%s948_s25 + $0xc4] sm:$0xf] %vm566_vm0, %v551_v57  ;;  %v820_v8 = vunpack.c.l.bf16 %v855_v60  ;;  %v821_v9 = vunpack.c.h.bf16 %v855_v60  ;;  %v824_v10 = vunpack.c.l.bf16 %v856_v61  ;;  %v825_v11 = vunpack.c.h.bf16 %v856_v61 }
  0x57   : > { %617 = vst.msk [vmem:[%s948_s25 + $0xc8] sm:$0xf] %vm566_vm0, %v552_v58  ;;  %v362_v12 = vmul.f32 %v916_v0, %v812_v3  ;;  %v363_v13 = vmul.f32 %v916_v0, %v813_v4  ;;  %v364_v14 = vmul.f32 %v916_v0, %v816_v6  ;;  %v365_v15 = vmul.f32 %v916_v0, %v817_v7 }
  0x58   : > { %618 = vst.msk [vmem:[%s948_s25 + $0xcc] sm:$0xf] %vm566_vm0, %v553_v59  ;;  %v366_v16 = vmul.f32 %v916_v0, %v820_v8  ;;  %v367_v17 = vmul.f32 %v916_v0, %v821_v9  ;;  %v368_v18 = vmul.f32 %v916_v0, %v824_v10  ;;  %v369_v19 = vmul.f32 %v916_v0, %v825_v11 }
  0x59   : > { %619 = vst.msk [vmem:[%s948_s25 + $0xd0] sm:$0xf] %vm566_vm0, %v554_v62  ;;  %v430_v20 = vadd.f32 %v924_v5, %v362_v12  ;;  %v431_v21 = vadd.f32 %v924_v5, %v363_v13  ;;  %v432_v22 = vadd.f32 %v924_v5, %v364_v14  ;;  %v433_v23 = vadd.f32 %v924_v5, %v365_v15 }
  0x5a   : > { %620 = vst.msk [vmem:[%s948_s25 + $0xd4] sm:$0xf] %vm566_vm0, %v555_v63  ;;  %v434_v24 = vadd.f32 %v924_v5, %v366_v16  ;;  %v435_v25 = vadd.f32 %v924_v5, %v367_v17  ;;  %v436_v26 = vadd.f32 %v924_v5, %v368_v18  ;;  %v437_v0 = vadd.f32 %v924_v5, %v369_v19 }
  0x5b   : > { %621 = vst.msk [vmem:[%s948_s25 + $0xd8] sm:$0xf] %vm566_vm0, %v556_v1  ;;  %v494_v27 = vmax.f32 %v430_v20, 0.0  ;;  %v495_v28 = vmax.f32 %v431_v21, 0.0  ;;  %v496_v29 = vmax.f32 %v432_v22, 0.0  ;;  %v497_v30 = vmax.f32 %v433_v23, 0.0 }
  0x5c   : > { %622 = vst.msk [vmem:[%s948_s25 + $0xdc] sm:$0xf] %vm566_vm0, %v557_v2  ;;  %v498_v31 = vmax.f32 %v434_v24, 0.0  ;;  %v499_v32 = vmax.f32 %v435_v25, 0.0  ;;  %v500_v35 = vmax.f32 %v436_v26, 0.0  ;;  %v501_v37 = vmax.f32 %v437_v0, 0.0 }
  0x5d   : > { %v558_v33 = vpack.c.bf16 %v494_v27, %v494_v27  ;;  %v559_v34 = vpack.c.bf16 %v495_v28, %v495_v28  ;;  %v560_v5 = vpack.c.bf16 %v496_v29, %v496_v29  ;;  %v561_v36 = vpack.c.bf16 %v497_v30, %v497_v30 }
  0x5e   : > { %v562_v38 = vpack.c.bf16 %v498_v31, %v498_v31  ;;  %v563_v39 = vpack.c.bf16 %v499_v32, %v499_v32  ;;  %v564_v40 = vpack.c.bf16 %v500_v35, %v500_v35  ;;  %v565_v41 = vpack.c.bf16 %v501_v37, %v501_v37 }
  0x5f   : > { %623 = vst.msk [vmem:[%s948_s25 + $0xe0] sm:$0xf] %vm566_vm0, %v558_v33 }
  0x60   : > { %624 = vst.msk [vmem:[%s948_s25 + $0xe4] sm:$0xf] %vm566_vm0, %v559_v34 }
  0x61   : > { %625 = vst.msk [vmem:[%s948_s25 + $0xe8] sm:$0xf] %vm566_vm0, %v560_v5 }
  0x62   : > { %626 = vst.msk [vmem:[%s948_s25 + $0xec] sm:$0xf] %vm566_vm0, %v561_v36 }
  0x63   : > { %627 = vst.msk [vmem:[%s948_s25 + $0xf0] sm:$0xf] %vm566_vm0, %v562_v38 }
  0x64   : > { %628 = vst.msk [vmem:[%s948_s25 + $0xf4] sm:$0xf] %vm566_vm0, %v563_v39 }
  0x65   : > { %629 = vst.msk [vmem:[%s948_s25 + $0xf8] sm:$0xf] %vm566_vm0, %v564_v40 }
  0x66   : > { %630 = vst.msk [vmem:[%s948_s25 + $0xfc] sm:$0xf] %vm566_vm0, %v565_v41 }
  0x67 PF: > { %s13_s12 = sadd.s32 1, %s873_s12  }
  0x68   : > { %p10_p4 = scmp.ge.s32.totalorder %s13_s12, 6  }
  0x6a   :  { %12 = sbr.rel (!%p10_p4) target bundleno = 1 (0x1), region = 62 }

// kernel: xfeat_forward.50
= control target key start
LH: loop header
LB: loop body
LE: loop exit
PB: predicated region body
PF: predicated region fallthrough
CT: control target
= control target key end

     0   :  { %s1546_s15 = smov 0   ;;  %s2295_s0 = inlined_call_operand.vmem [shape: bf16[2048,9], index: 0, kind: input, shape index: {}]   ;;  %s2296_s1 = inlined_call_operand.vmem [shape: bf16[9,4], index: 1, kind: input, shape index: {}]   ;;  %s2297_s2 = inlined_call_operand.vmem [shape: bf16[2048,4], index: 2, kind: output, shape index: {0}]   ;;  %s2298_s3 = inlined_call_operand.vmem [shape: f32[4,1,4], index: 3, kind: output, shape index: {1}]   ;;  %s2299_s4 = inlined_call_operand.vmem [shape: f32[4,1,4], index: 4, kind: output, shape index: {2}]  }
   0x1 LB: > { %s1552_s16 = sadd.s32 4294967295, %s1518_s15   ;;  %p1296_p0 = scmp.ge.s32.totalorder %s1518_s15, 1  ;;  %s1518_s15 = sphi %s1546_s15, %s15_s15  }
   0x2   : > { %p168_p1 = scmp.lt.s32.totalorder %s1518_s15, 5 }
   0x4   : > { %p169_p2 = pnand %p1296_p0, %p168_p1 }
   0x5   : > { %s1297_s21 = sshll.u32 (!%p169_p2), %s1552_s16, 6  ;;  %p212_p4 = scmp.lt.s32.totalorder (!%p169_p2), %s1552_s16, 3 }
   0x6   : > { %172 = sbr.rel (%p169_p2) target bundleno = 380 (0x17c), region = 28  ;;  %p201_p3 = scmp.lt.s32.totalorder (!%p169_p2), %s1297_s21, 255 }
   0xb   : > { %v1431_v0 = vld [vmem:[%s2296_s1] sm:$0xf]  ;;  %v1499_v1 = vld [vmem:[%s2296_s1] sm:$0x10]  ;;  %vm547_vm0 = vcmask 1043456   ;;  %vm548_vm1 = vcmask 1044480  }
   0xc   : > { %v1432_v2 = vor.u32 %v1499_v1, %v1431_v0  ;;  %v1520_v3 = vmov 65535   ;;  %s2301_s21 = smov (!%p201_p3, %s1297_s21), 255  ;;  %vm450_vm2 = vcmask 72704   ;;  %vm787_vm3 = vcmask 27648   ;;  %s2303_s16 = smov (!%p212_p4, %s1552_s16), 3 }
   0xd   : > { %v549_v4 = vsel %vm547_vm0, 4294967295, %v1520_v3  ;;  %s1298_s22 = sshll.u32 %s2301_s21, 2  ;;  %vm852_vm4 = vcmask 31744   ;;  %s214_s5 = scalar_lea.vmem %s2298_s3, %s2303_s16  ;;  %vm986_vm5 = vcmask 24576  }
   0xe   : > { %v550_v5 = vsel %vm548_vm1, %v549_v4, 0  ;;  %s1571_s25 = scalar_lea.vmem %s2295_s0, %s1298_s22  ;;  %s1634_s28 = scalar_lea.vmem %s2297_s2, %s1298_s22 }
   0xf   : > { %v552_v6 = vand.u32 %v1432_v2, %v550_v5  ;;  %v1467_v7 = vld [vmem:[%s1571_s25] sm:$0xff]  ;;  %v1468_v9 = vld [vmem:[%s1571_s25 + $0x8] sm:$0xff]  ;;  %v1469_v12 = vld [vmem:[%s1571_s25 + $0x10] sm:$0xff]  ;;  %s217_s8 = scalar_lea.vmem %s2299_s4, %s2303_s16 }
  0x10   : > { %v1475_v8 = vld [vmem:[%s1571_s25 + $0x40] sm:$0xff]  ;;  %v1476_v10 = vld [vmem:[%s1571_s25 + $0x48] sm:$0xff]  ;;  %v1477_v13 = vld [vmem:[%s1571_s25 + $0x50] sm:$0xff] }
  0x11   : > { %561 = vmatpush.bf16.msra.mxu0 %v552_v6  ;;  %1500 = vmatpush.bf16.msra.mxu1 %v552_v6  ;;  %v1483_v11 = vld [vmem:[%s1571_s25 + $0x80] sm:$0xff]  ;;  %v1484_v14 = vld [vmem:[%s1571_s25 + $0x88] sm:$0xff]  ;;  %v1470_v15 = vld [vmem:[%s1571_s25 + $0x18] sm:$0xff] }
  0x12   : > { %1501 = vmatpush.bf16.msra.mxu2 %v552_v6  ;;  %1502 = vmatpush.bf16.msra.mxu3 %v552_v6  ;;  %v1478_v16 = vld [vmem:[%s1571_s25 + $0x58] sm:$0xff]  ;;  %v1485_v17 = vld [vmem:[%s1571_s25 + $0x90] sm:$0xff]  ;;  %v1491_v18 = vld [vmem:[%s1571_s25 + $0xc0] sm:$0xff] }
  0x13   : > { %v1471_v19 = vld [vmem:[%s1571_s25 + $0x20] sm:$0xff]  ;;  %v1486_v21 = vld [vmem:[%s1571_s25 + $0x98] sm:$0xff]  ;;  %v1492_v22 = vld [vmem:[%s1571_s25 + $0xc8] sm:$0xff] }
  0x14   : > { %1433 = vmatmul.msk.bf16.vlgmr.msra.gmra.mxu0 %vm450_vm2, %v1467_v7  ;;  %1441 = vmatmul.msk.bf16.vlgmr.msra.gmra.mxu1 %vm450_vm2, %v1475_v8  ;;  %v1479_v20 = vld [vmem:[%s1571_s25 + $0x60] sm:$0xff]  ;;  %v1472_v23 = vld [vmem:[%s1571_s25 + $0x28] sm:$0xff]  ;;  %v1493_v26 = vld [vmem:[%s1571_s25 + $0xd0] sm:$0xff] }
  0x15   : > { %1449 = vmatmul.msk.bf16.vlgmr.msra.gmra.mxu2 %vm450_vm2, %v1483_v11  ;;  %1457 = vmatmul.msk.bf16.vlgmr.msra.gmra.mxu3 %vm450_vm2, %v1491_v18  ;;  %v1480_v24 = vld [vmem:[%s1571_s25 + $0x68] sm:$0xff]  ;;  %v1487_v25 = vld [vmem:[%s1571_s25 + $0xa0] sm:$0xff]  ;;  %v1473_v27 = vld [vmem:[%s1571_s25 + $0x30] sm:$0xff] }
  0x16   : > { %v1481_v28 = vld [vmem:[%s1571_s25 + $0x70] sm:$0xff]  ;;  %v1488_v29 = vld [vmem:[%s1571_s25 + $0xa8] sm:$0xff]  ;;  %v1494_v30 = vld [vmem:[%s1571_s25 + $0xd8] sm:$0xff] }
  0x17   : > { %v1474_v31 = vld [vmem:[%s1571_s25 + $0x38] sm:$0xff]  ;;  %v1489_v33 = vld [vmem:[%s1571_s25 + $0xb0] sm:$0xff]  ;;  %v1495_v34 = vld [vmem:[%s1571_s25 + $0xe0] sm:$0xff] }
  0x18   : > { %v1482_v32 = vld [vmem:[%s1571_s25 + $0x78] sm:$0xff]  ;;  %v1496_v40 = vld [vmem:[%s1571_s25 + $0xe8] sm:$0xff]  ;;  %v1497_v61 = vld [vmem:[%s1571_s25 + $0xf0] sm:$0xff] }
  0x19   : > { %v1490_v39 = vld [vmem:[%s1571_s25 + $0xb8] sm:$0xff] }
  0x24   : > { %1434 = vmatmul.msk.bf16.gmra.mxu0 %vm450_vm2, %v1468_v9  ;;  %1442 = vmatmul.msk.bf16.gmra.mxu1 %vm450_vm2, %v1476_v10 }
  0x25   : > { %1450 = vmatmul.msk.bf16.gmra.mxu2 %vm450_vm2, %v1484_v14  ;;  %1458 = vmatmul.msk.bf16.gmra.mxu3 %vm450_vm2, %v1492_v22 }
  0x34   : > { %1435 = vmatmul.msk.bf16.gmra.mxu0 %vm450_vm2, %v1469_v12  ;;  %1443 = vmatmul.msk.bf16.gmra.mxu1 %vm450_vm2, %v1477_v13 }
  0x35   : > { %1451 = vmatmul.msk.bf16.gmra.mxu2 %vm450_vm2, %v1485_v17  ;;  %1459 = vmatmul.msk.bf16.gmra.mxu3 %vm450_vm2, %v1493_v26 }
  0x44   : > { %1436 = vmatmul.msk.bf16.gmra.mxu0 %vm450_vm2, %v1470_v15  ;;  %1444 = vmatmul.msk.bf16.gmra.mxu1 %vm450_vm2, %v1478_v16 }
  0x45   : > { %1452 = vmatmul.msk.bf16.gmra.mxu2 %vm450_vm2, %v1486_v21  ;;  %1460 = vmatmul.msk.bf16.gmra.mxu3 %vm450_vm2, %v1494_v30 }
  0x54   : > { %1437 = vmatmul.msk.bf16.gmra.mxu0 %vm450_vm2, %v1471_v19  ;;  %1445 = vmatmul.msk.bf16.gmra.mxu1 %vm450_vm2, %v1479_v20  ;;  %v1498_v20 = vld [vmem:[%s1571_s25 + $0xf8] sm:$0xff] }
  0x55   : > { %1453 = vmatmul.msk.bf16.gmra.mxu2 %vm450_vm2, %v1487_v25  ;;  %1461 = vmatmul.msk.bf16.gmra.mxu3 %vm450_vm2, %v1495_v34 }
  0x64   : > { %1438 = vmatmul.msk.bf16.gmra.mxu0 %vm450_vm2, %v1472_v23  ;;  %1446 = vmatmul.msk.bf16.gmra.mxu1 %vm450_vm2, %v1480_v24 }
  0x65   : > { %1454 = vmatmul.msk.bf16.gmra.mxu2 %vm450_vm2, %v1488_v29  ;;  %1462 = vmatmul.msk.bf16.gmra.mxu3 %vm450_vm2, %v1496_v40 }
  0x74   : > { %1439 = vmatmul.msk.bf16.gmra.mxu0 %vm450_vm2, %v1473_v27  ;;  %1447 = vmatmul.msk.bf16.gmra.mxu1 %vm450_vm2, %v1481_v28 }
  0x75   : > { %1455 = vmatmul.msk.bf16.gmra.mxu2 %vm450_vm2, %v1489_v33  ;;  %1463 = vmatmul.msk.bf16.gmra.mxu3 %vm450_vm2, %v1497_v61 }
  0x84   : > { %1440 = vmatmul.msk.bf16.gmra.mxu0 %vm450_vm2, %v1474_v31  ;;  %1448 = vmatmul.msk.bf16.gmra.mxu1 %vm450_vm2, %v1482_v32 }
  0x85   : > { %1456 = vmatmul.msk.bf16.gmra.mxu2 %vm450_vm2, %v1490_v39  ;;  %1464 = vmatmul.msk.bf16.gmra.mxu3 %vm450_vm2, %v1498_v20 }
  0x91   : > { %v563_v35 = vpop.f32.mrf.mxu0  ;;  %v1636_v36 = vpop.f32.mrf.mxu1 }
  0x92   : > { %v723_v37 = vpack.c.bf16 %v563_v35, %v563_v35  ;;  %v739_v38 = vpack.c.bf16 %v1636_v36, %v1636_v36  ;;  %v988_v41 = vmul.f32 %v563_v35, %v563_v35  ;;  %v853_v42 = vsel %vm852_vm4, %v563_v35, 0.0 }
  0x94   : > { %788 = vst.msk [vmem:[%s1634_s28] sm:$0xf] %vm787_vm3, %v723_v37  ;;  %v1052_v50 = vsel %vm852_vm4, %v988_v41, 0.0 }
  0x95   : > { %804 = vst.msk [vmem:[%s1634_s28 + $0x40] sm:$0xf] %vm787_vm3, %v739_v38 }
  0x98   : > { %v1677_v5 = vpop.f32.mrf.mxu2  ;;  %v1756_v40 = vpop.f32.mrf.mxu3 }
  0x99   : > { %v565_v43 = vpop.f32.mrf.mxu0  ;;  %v1649_v44 = vpop.f32.mrf.mxu1  ;;  %v755_v9 = vpack.c.bf16 %v1677_v5, %v1677_v5 }
  0x9a   : > { %v724_v45 = vpack.c.bf16 %v565_v43, %v565_v43  ;;  %v854_v46 = vsel %vm852_vm4, %v565_v43, 0.0  ;;  %v989_v47 = vmul.f32 %v565_v43, %v565_v43  ;;  %v740_v48 = vpack.c.bf16 %v1649_v44, %v1649_v44 }
  0x9b   : > { %v855_v49 = vadd.f32 %v854_v46, %v853_v42  ;;  %820 = vst.msk [vmem:[%s1634_s28 + $0x80] sm:$0xf] %vm787_vm3, %v755_v9  ;;  %v771_v42 = vpack.c.bf16 %v1756_v40, %v1756_v40 }
  0x9c   : > { %789 = vst.msk [vmem:[%s1634_s28 + $0x4] sm:$0xf] %vm787_vm3, %v724_v45  ;;  %v1053_v51 = vsel %vm852_vm4, %v989_v47, 0.0 }
  0x9d   : > { %v1054_v52 = vadd.f32 %v1053_v51, %v1052_v50  ;;  %805 = vst.msk [vmem:[%s1634_s28 + $0x44] sm:$0xf] %vm787_vm3, %v740_v48 }
  0x9e   : > { %836 = vst.msk [vmem:[%s1634_s28 + $0xc0] sm:$0xf] %vm787_vm3, %v771_v42 }
  0xa0   : > { %v1693_v16 = vpop.f32.mrf.mxu2 }
  0xa1   : > { %v568_v53 = vpop.f32.mrf.mxu0  ;;  %v1660_v54 = vpop.f32.mrf.mxu1  ;;  %v756_v18 = vpack.c.bf16 %v1693_v16, %v1693_v16 }
  0xa2   : > { %v725_v55 = vpack.c.bf16 %v568_v53, %v568_v53  ;;  %v856_v56 = vsel %vm852_vm4, %v568_v53, 0.0  ;;  %v990_v57 = vmul.f32 %v568_v53, %v568_v53  ;;  %v741_v58 = vpack.c.bf16 %v1660_v54, %v1660_v54 }
  0xa3   : > { %v857_v59 = vadd.f32 %v856_v56, %v855_v49  ;;  %821 = vst.msk [vmem:[%s1634_s28 + $0x84] sm:$0xf] %vm787_vm3, %v756_v18  ;;  %v1780_v49 = vpop.f32.mrf.mxu3 }
  0xa4   : > { %790 = vst.msk [vmem:[%s1634_s28 + $0x8] sm:$0xf] %vm787_vm3, %v725_v55  ;;  %v1055_v60 = vsel %vm852_vm4, %v990_v57, 0.0  ;;  %v772_v51 = vpack.c.bf16 %v1780_v49, %v1780_v49 }
  0xa5   : > { %v1056_v62 = vadd.f32 %v1055_v60, %v1054_v52  ;;  %806 = vst.msk [vmem:[%s1634_s28 + $0x48] sm:$0xf] %vm787_vm3, %v741_v58 }
  0xa6   : > { %837 = vst.msk [vmem:[%s1634_s28 + $0xc4] sm:$0xf] %vm787_vm3, %v772_v51 }
  0xa8   : > { %v1718_v26 = vpop.f32.mrf.mxu2 }
  0xa9   : > { %v570_v63 = vpop.f32.mrf.mxu0  ;;  %v1672_v0 = vpop.f32.mrf.mxu1  ;;  %v757_v27 = vpack.c.bf16 %v1718_v26, %v1718_v26 }
  0xaa   : > { %v726_v1 = vpack.c.bf16 %v570_v63, %v570_v63  ;;  %v858_v2 = vsel %vm852_vm4, %v570_v63, 0.0  ;;  %v991_v3 = vmul.f32 %v570_v63, %v570_v63  ;;  %v742_v4 = vpack.c.bf16 %v1672_v0, %v1672_v0 }
  0xab   : > { %v859_v6 = vadd.f32 %v858_v2, %v857_v59  ;;  %822 = vst.msk [vmem:[%s1634_s28 + $0x88] sm:$0xf] %vm787_vm3, %v757_v27  ;;  %v1804_v58 = vpop.f32.mrf.mxu3 }
  0xac   : > { %791 = vst.msk [vmem:[%s1634_s28 + $0xc] sm:$0xf] %vm787_vm3, %v726_v1  ;;  %v1057_v7 = vsel %vm852_vm4, %v991_v3, 0.0  ;;  %v773_v60 = vpack.c.bf16 %v1804_v58, %v1804_v58 }
  0xad   : > { %v1058_v8 = vadd.f32 %v1057_v7, %v1056_v62  ;;  %807 = vst.msk [vmem:[%s1634_s28 + $0x4c] sm:$0xf] %vm787_vm3, %v742_v4 }
  0xae   : > { %838 = vst.msk [vmem:[%s1634_s28 + $0xc8] sm:$0xf] %vm787_vm3, %v773_v60 }
  0xb0   : > { %v1736_v32 = vpop.f32.mrf.mxu2 }
  0xb1   : > { %v573_v10 = vpop.f32.mrf.mxu0  ;;  %v1688_v11 = vpop.f32.mrf.mxu1  ;;  %v758_v33 = vpack.c.bf16 %v1736_v32, %v1736_v32 }
  0xb2   : > { %v727_v12 = vpack.c.bf16 %v573_v10, %v573_v10  ;;  %v860_v13 = vsel %vm852_vm4, %v573_v10, 0.0  ;;  %v992_v14 = vmul.f32 %v573_v10, %v573_v10  ;;  %v743_v15 = vpack.c.bf16 %v1688_v11, %v1688_v11 }
  0xb3   : > { %v1695_v17 = vadd.f32 %v860_v13, %v859_v6  ;;  %823 = vst.msk [vmem:[%s1634_s28 + $0x8c] sm:$0xf] %vm787_vm3, %v758_v33  ;;  %v1828_v3 = vpop.f32.mrf.mxu3 }
  0xb4   : > { %792 = vst.msk [vmem:[%s1634_s28 + $0x10] sm:$0xf] %vm787_vm3, %v727_v12  ;;  %v1059_v19 = vsel %vm852_vm4, %v992_v14, 0.0  ;;  %v774_v6 = vpack.c.bf16 %v1828_v3, %v1828_v3 }
  0xb5   : > { %v1703_v21 = vadd.f32 %v1059_v19, %v1058_v8  ;;  %808 = vst.msk [vmem:[%s1634_s28 + $0x50] sm:$0xf] %vm787_vm3, %v743_v15 }
  0xb6   : > { %839 = vst.msk [vmem:[%s1634_s28 + $0xcc] sm:$0xf] %vm787_vm3, %v774_v6 }
  0xb8   : > { %v1754_v39 = vpop.f32.mrf.mxu2 }
  0xb9   : > { %v1710_v22 = vpop.f32.mrf.mxu0  ;;  %v1712_v23 = vpop.f32.mrf.mxu1  ;;  %v759_v41 = vpack.c.bf16 %v1754_v39, %v1754_v39 }
  0xba   : > { %v728_v24 = vpack.c.bf16 %v1710_v22, %v1710_v22  ;;  %v744_v25 = vpack.c.bf16 %v1712_v23, %v1712_v23  ;;  %v993_v18 = vmul.f32 %v1710_v22, %v1710_v22 }
  0xbb   : > { %824 = vst.msk [vmem:[%s1634_s28 + $0x90] sm:$0xf] %vm787_vm3, %v759_v41  ;;  %v1848_v13 = vpop.f32.mrf.mxu3 }
  0xbc   : > { %793 = vst.msk [vmem:[%s1634_s28 + $0x14] sm:$0xf] %vm787_vm3, %v728_v24  ;;  %v775_v33 = vpack.c.bf16 %v1848_v13, %v1848_v13 }
  0xbd   : > { %809 = vst.msk [vmem:[%s1634_s28 + $0x54] sm:$0xf] %vm787_vm3, %v744_v25 }
  0xbe   : > { %840 = vst.msk [vmem:[%s1634_s28 + $0xd0] sm:$0xf] %vm787_vm3, %v775_v33 }
  0xc0   : > { %v1778_v48 = vpop.f32.mrf.mxu2 }
  0xc1   : > { %v1728_v28 = vpop.f32.mrf.mxu0  ;;  %v1730_v29 = vpop.f32.mrf.mxu1  ;;  %v760_v50 = vpack.c.bf16 %v1778_v48, %v1778_v48 }
  0xc2   : > { %v729_v30 = vpack.c.bf16 %v1728_v28, %v1728_v28  ;;  %v745_v31 = vpack.c.bf16 %v1730_v29, %v1730_v29 }
  0xc3   : > { %825 = vst.msk [vmem:[%s1634_s28 + $0x94] sm:$0xf] %vm787_vm3, %v760_v50  ;;  %v1862_v25 = vpop.f32.mrf.mxu3 }
  0xc4   : > { %794 = vst.msk [vmem:[%s1634_s28 + $0x18] sm:$0xf] %vm787_vm3, %v729_v30  ;;  %v862_v30 = vsel %vm852_vm4, %v1710_v22, 0.0  ;;  %v864_v22 = vsel %vm852_vm4, %v1728_v28, 0.0 }
  0xc5   : > { %810 = vst.msk [vmem:[%s1634_s28 + $0x58] sm:$0xf] %vm787_vm3, %v745_v31  ;;  %v994_v31 = vmul.f32 %v1728_v28, %v1728_v28  ;;  %v863_v42 = vadd.f32 %v862_v30, %v1695_v17 }
  0xc8   : > { %v1802_v57 = vpop.f32.mrf.mxu2 }
  0xc9   : > { %v1746_v34 = vpop.f32.mrf.mxu0  ;;  %v1748_v35 = vpop.f32.mrf.mxu1  ;;  %v761_v59 = vpack.c.bf16 %v1802_v57, %v1802_v57 }
  0xca   : > { %v730_v37 = vpack.c.bf16 %v1746_v34, %v1746_v34  ;;  %v746_v38 = vpack.c.bf16 %v1748_v35, %v1748_v35  ;;  %v866_v50 = vsel %vm852_vm4, %v1746_v34, 0.0 }
  0xcb   : > { %826 = vst.msk [vmem:[%s1634_s28 + $0x98] sm:$0xf] %vm787_vm3, %v761_v59 }
  0xcc   : > { %795 = vst.msk [vmem:[%s1634_s28 + $0x1c] sm:$0xf] %vm787_vm3, %v730_v37  ;;  %v995_v37 = vmul.f32 %v1746_v34, %v1746_v34 }
  0xcd   : > { %811 = vst.msk [vmem:[%s1634_s28 + $0x5c] sm:$0xf] %vm787_vm3, %v746_v38  ;;  %v1061_v38 = vsel %vm852_vm4, %v993_v18, 0.0 }
  0xce   : > { %v1062_v51 = vadd.f32 %v1061_v38, %v1703_v21  ;;  %v1065_v17 = vsel %vm852_vm4, %v995_v37, 0.0 }
  0xd0   : > { %v1826_v2 = vpop.f32.mrf.mxu2 }
  0xd1   : > { %v1770_v43 = vpop.f32.mrf.mxu0  ;;  %v1772_v45 = vpop.f32.mrf.mxu1  ;;  %v762_v4 = vpack.c.bf16 %v1826_v2, %v1826_v2 }
  0xd2   : > { %v731_v46 = vpack.c.bf16 %v1770_v43, %v1770_v43  ;;  %v747_v47 = vpack.c.bf16 %v1772_v45, %v1772_v45  ;;  %v996_v28 = vmul.f32 %v1770_v43, %v1770_v43  ;;  %v868_v34 = vsel %vm852_vm4, %v1770_v43, 0.0 }
  0xd3   : > { %827 = vst.msk [vmem:[%s1634_s28 + $0x9c] sm:$0xf] %vm787_vm3, %v762_v4  ;;  %v1911_v4 = vpop.f32.mrf.mxu3 }
  0xd4   : > { %796 = vst.msk [vmem:[%s1634_s28 + $0x20] sm:$0xf] %vm787_vm3, %v731_v46  ;;  %v776_v46 = vpack.c.bf16 %v1862_v25, %v1862_v25 }
  0xd5   : > { %812 = vst.msk [vmem:[%s1634_s28 + $0x60] sm:$0xf] %vm787_vm3, %v747_v47  ;;  %v1063_v47 = vsel %vm852_vm4, %v994_v31, 0.0 }
  0xd6   : > { %841 = vst.msk [vmem:[%s1634_s28 + $0xd4] sm:$0xf] %vm787_vm3, %v776_v46  ;;  %v1064_v6 = vadd.f32 %v1063_v47, %v1062_v51 }
  0xd8   : > { %v1846_v12 = vpop.f32.mrf.mxu2 }
  0xd9   : > { %v1794_v52 = vpop.f32.mrf.mxu0  ;;  %v1796_v53 = vpop.f32.mrf.mxu1  ;;  %v763_v27 = vpack.c.bf16 %v1846_v12, %v1846_v12 }
  0xda   : > { %v732_v55 = vpack.c.bf16 %v1794_v52, %v1794_v52  ;;  %v748_v56 = vpack.c.bf16 %v1796_v53, %v1796_v53  ;;  %v997_v60 = vmul.f32 %v1794_v52, %v1794_v52  ;;  %v870_v18 = vsel %vm852_vm4, %v1794_v52, 0.0 }
  0xdb   : > { %828 = vst.msk [vmem:[%s1634_s28 + $0xa0] sm:$0xf] %vm787_vm3, %v763_v27 }
  0xdc   : > { %797 = vst.msk [vmem:[%s1634_s28 + $0x24] sm:$0xf] %vm787_vm3, %v732_v55  ;;  %v865_v55 = vadd.f32 %v864_v22, %v863_v42  ;;  %v1069_v30 = vsel %vm852_vm4, %v997_v60, 0.0 }
  0xdd   : > { %813 = vst.msk [vmem:[%s1634_s28 + $0x64] sm:$0xf] %vm787_vm3, %v748_v56 }
  0xe0   : > { %v1860_v24 = vpop.f32.mrf.mxu2 }
  0xe1   : > { %v1818_v61 = vpop.f32.mrf.mxu0  ;;  %v1820_v62 = vpop.f32.mrf.mxu1  ;;  %v764_v41 = vpack.c.bf16 %v1860_v24, %v1860_v24 }
  0xe2   : > { %v733_v63 = vpack.c.bf16 %v1818_v61, %v1818_v61  ;;  %v749_v1 = vpack.c.bf16 %v1820_v62, %v1820_v62  ;;  %v998_v43 = vmul.f32 %v1818_v61, %v1818_v61  ;;  %v872_v31 = vsel %vm852_vm4, %v1818_v61, 0.0 }
  0xe3   : > { %829 = vst.msk [vmem:[%s1634_s28 + $0xa4] sm:$0xf] %vm787_vm3, %v764_v41 }
  0xe4   : > { %798 = vst.msk [vmem:[%s1634_s28 + $0x28] sm:$0xf] %vm787_vm3, %v733_v63  ;;  %v1071_v38 = vsel %vm852_vm4, %v998_v43, 0.0 }
  0xe5   : > { %814 = vst.msk [vmem:[%s1634_s28 + $0x68] sm:$0xf] %vm787_vm3, %v749_v1 }
  0xe8   : > { %v1909_v1 = vpop.f32.mrf.mxu2 }
  0xe9   : > { %v590_v7 = vpop.f32.mrf.mxu0  ;;  %v1842_v8 = vpop.f32.mrf.mxu1 }
  0xea   : > { %v734_v9 = vpack.c.bf16 %v590_v7, %v590_v7  ;;  %v750_v10 = vpack.c.bf16 %v1842_v8, %v1842_v8  ;;  %v999_v27 = vmul.f32 %v590_v7, %v590_v7  ;;  %v874_v52 = vsel %vm852_vm4, %v590_v7, 0.0  ;;  %v1935_v7 = vpop.f32.mrf.mxu3 }
  0xec   : > { %799 = vst.msk [vmem:[%s1634_s28 + $0x2c] sm:$0xf] %vm787_vm3, %v734_v9  ;;  %v867_v9 = vadd.f32 %v866_v50, %v865_v55  ;;  %v1073_v46 = vsel %vm852_vm4, %v999_v27, 0.0 }
  0xed   : > { %815 = vst.msk [vmem:[%s1634_s28 + $0x6c] sm:$0xf] %vm787_vm3, %v750_v10  ;;  %v1067_v10 = vsel %vm852_vm4, %v996_v28, 0.0 }
  0xf1   : > { %v593_v14 = vpop.f32.mrf.mxu0  ;;  %v1854_v15 = vpop.f32.mrf.mxu1 }
  0xf2   : > { %v735_v19 = vpack.c.bf16 %v593_v14, %v593_v14  ;;  %v751_v20 = vpack.c.bf16 %v1854_v15, %v1854_v15  ;;  %v1000_v22 = vmul.f32 %v593_v14, %v593_v14  ;;  %v876_v28 = vsel %vm852_vm4, %v593_v14, 0.0 }
  0xf4   : > { %800 = vst.msk [vmem:[%s1634_s28 + $0x30] sm:$0xf] %vm787_vm3, %v735_v19  ;;  %v1066_v19 = vadd.f32 %v1065_v17, %v1064_v6  ;;  %v1933_v17 = vpop.f32.mrf.mxu2 }
  0xf5   : > { %816 = vst.msk [vmem:[%s1634_s28 + $0x70] sm:$0xf] %vm787_vm3, %v751_v20  ;;  %v869_v20 = vadd.f32 %v868_v34, %v867_v9  ;;  %v777_v9 = vpack.c.bf16 %v1911_v4, %v1911_v4 }
  0xf6   : > { %v1068_v33 = vadd.f32 %v1067_v10, %v1066_v19 }
  0xf7   : > { %v871_v37 = vadd.f32 %v870_v18, %v869_v20  ;;  %842 = vst.msk [vmem:[%s1634_s28 + $0xd8] sm:$0xf] %vm787_vm3, %v777_v9 }
  0xf8   : > { %v1070_v41 = vadd.f32 %v1069_v30, %v1068_v33  ;;  %v778_v30 = vpack.c.bf16 %v1935_v7, %v1935_v7  ;;  %v1004_v33 = vmul.f32 %v1636_v36, %v1636_v36 }
  0xf9   : > { %v595_v56 = vpop.f32.mrf.mxu0  ;;  %v1899_v59 = vpop.f32.mrf.mxu1  ;;  %v873_v42 = vadd.f32 %v872_v31, %v871_v37 }
  0xfa   : > { %v736_v63 = vpack.c.bf16 %v595_v56, %v595_v56  ;;  %v752_v21 = vpack.c.bf16 %v1899_v59, %v1899_v59  ;;  %v1001_v51 = vmul.f32 %v595_v56, %v595_v56  ;;  %v1072_v34 = vadd.f32 %v1071_v38, %v1070_v41  ;;  %843 = vst.msk [vmem:[%s1634_s28 + $0xdc] sm:$0xf] %vm787_vm3, %v778_v30 }
  0xfb   : > { %v875_v60 = vadd.f32 %v874_v52, %v873_v42  ;;  %v878_v14 = vsel %vm852_vm4, %v595_v56, 0.0  ;;  %v766_v56 = vpack.c.bf16 %v1933_v17, %v1933_v17  ;;  %v1083_v9 = vsel %vm852_vm4, %v1004_v33, 0.0 }
  0xfc   : > { %801 = vst.msk [vmem:[%s1634_s28 + $0x34] sm:$0xf] %vm787_vm3, %v736_v63  ;;  %v765_v63 = vpack.c.bf16 %v1909_v1, %v1909_v1  ;;  %v1074_v10 = vadd.f32 %v1073_v46, %v1072_v34  ;;  %v1077_v43 = vsel %vm852_vm4, %v1001_v51, 0.0  ;;  %v1971_v51 = vpop.f32.mrf.mxu3  ;;  %v884_v34 = vsel %vm852_vm4, %v1636_v36, 0.0 }
  0xfd   : > { %817 = vst.msk [vmem:[%s1634_s28 + $0x74] sm:$0xf] %vm787_vm3, %v752_v21  ;;  %v1075_v21 = vsel %vm852_vm4, %v1000_v22, 0.0  ;;  %v877_v18 = vadd.f32 %v876_v28, %v875_v60  ;;  %v1969_v28 = vpop.f32.mrf.mxu2  ;;  %v1005_v60 = vmul.f32 %v1649_v44, %v1649_v44 }
  0xfe   : > { %830 = vst.msk [vmem:[%s1634_s28 + $0xa8] sm:$0xf] %vm787_vm3, %v765_v63  ;;  %v1076_v20 = vadd.f32 %v1075_v21, %v1074_v10  ;;  %v1006_v21 = vmul.f32 %v1660_v54, %v1660_v54  ;;  %v886_v10 = vsel %vm852_vm4, %v1649_v44, 0.0  ;;  %v1008_v44 = vmul.f32 %v1688_v11, %v1688_v11 }
  0xff   : > { %v879_v27 = vadd.f32 %v878_v14, %v877_v18  ;;  %831 = vst.msk [vmem:[%s1634_s28 + $0xac] sm:$0xf] %vm787_vm3, %v766_v56  ;;  %v1007_v56 = vmul.f32 %v1672_v0, %v1672_v0  ;;  %v767_v33 = vpack.c.bf16 %v1969_v28, %v1969_v28 }
 0x100   : > { %v1078_v37 = vadd.f32 %v1077_v43, %v1076_v20  ;;  %v1085_v43 = vsel %vm852_vm4, %v1005_v60, 0.0  ;;  %v1087_v20 = vsel %vm852_vm4, %v1006_v21, 0.0  ;;  %v1091_v60 = vsel %vm852_vm4, %v1008_v44, 0.0 }
 0x101   : > { %v598_v47 = vpop.f32.mrf.mxu0  ;;  %v1928_v50 = vpop.f32.mrf.mxu1  ;;  %832 = vst.msk [vmem:[%s1634_s28 + $0xb0] sm:$0xf] %vm787_vm3, %v767_v33  ;;  %v1013_v44 = vmul.f32 %v1796_v53, %v1796_v53 }
 0x102   : > { %v737_v61 = vpack.c.bf16 %v598_v47, %v598_v47  ;;  %v753_v55 = vpack.c.bf16 %v1928_v50, %v1928_v50  ;;  %v1002_v6 = vmul.f32 %v598_v47, %v598_v47  ;;  %v880_v19 = vsel %vm852_vm4, %v598_v47, 0.0 }
 0x103   : > { %v881_v38 = vadd.f32 %v880_v19, %v879_v27  ;;  %v888_v19 = vsel %vm852_vm4, %v1660_v54, 0.0  ;;  %v779_v54 = vpack.c.bf16 %v1971_v51, %v1971_v51 }
 0x104   : > { %802 = vst.msk [vmem:[%s1634_s28 + $0x38] sm:$0xf] %vm787_vm3, %v737_v61  ;;  %v1079_v31 = vsel %vm852_vm4, %v1002_v6, 0.0 }
 0x105   : > { %818 = vst.msk [vmem:[%s1634_s28 + $0x78] sm:$0xf] %vm787_vm3, %v753_v55  ;;  %v1080_v61 = vadd.f32 %v1079_v31, %v1078_v37  ;;  %v890_v31 = vsel %vm852_vm4, %v1672_v0, 0.0  ;;  %v2001_v37 = vpop.f32.mrf.mxu2  ;;  %v892_v0 = vsel %vm852_vm4, %v1688_v11, 0.0  ;;  %v894_v11 = vsel %vm852_vm4, %v1712_v23, 0.0 }
 0x106   : > { %844 = vst.msk [vmem:[%s1634_s28 + $0xe0] sm:$0xf] %vm787_vm3, %v779_v54 }
 0x109   : > { %v600_v52 = vpop.f32.mrf.mxu0  ;;  %v1962_v22 = vpop.f32.mrf.mxu1 }
 0x10a   : > { %v738_v41 = vpack.c.bf16 %v600_v52, %v600_v52  ;;  %v882_v42 = vsel %vm852_vm4, %v600_v52, 0.0  ;;  %v1003_v46 = vmul.f32 %v600_v52, %v600_v52  ;;  %v754_v47 = vpack.c.bf16 %v1962_v22, %v1962_v22 }
 0x10b   : > { %v883_v55 = vadd.f32 %v882_v42, %v881_v38  ;;  %v2003_v38 = vpop.f32.mrf.mxu3  ;;  %v1089_v42 = vsel %vm852_vm4, %v1007_v56, 0.0 }
 0x10c   : > { %803 = vst.msk [vmem:[%s1634_s28 + $0x3c] sm:$0xf] %vm787_vm3, %v738_v41  ;;  %v1081_v63 = vsel %vm852_vm4, %v1003_v46, 0.0  ;;  %v1009_v46 = vmul.f32 %v1712_v23, %v1712_v23 }
 0x10d   : > { %v885_v14 = vadd.f32 %v884_v34, %v883_v55  ;;  %v1082_v6 = vadd.f32 %v1081_v63, %v1080_v61  ;;  %819 = vst.msk [vmem:[%s1634_s28 + $0x7c] sm:$0xf] %vm787_vm3, %v754_v47  ;;  %v768_v47 = vpack.c.bf16 %v2001_v37, %v2001_v37  ;;  %v780_v34 = vpack.c.bf16 %v2003_v38, %v2003_v38  ;;  %v2037_v56 = vpop.f32.mrf.mxu2 }
 0x10e   : > { %v1010_v63 = vmul.f32 %v1730_v29, %v1730_v29 }
 0x10f   : > { %v887_v36 = vadd.f32 %v886_v10, %v885_v14  ;;  %v1084_v18 = vadd.f32 %v1083_v9, %v1082_v6  ;;  %833 = vst.msk [vmem:[%s1634_s28 + $0xb4] sm:$0xf] %vm787_vm3, %v768_v47  ;;  %v1093_v6 = vsel %vm852_vm4, %v1009_v46, 0.0  ;;  %v896_v9 = vsel %vm852_vm4, %v1730_v29, 0.0 }
 0x110   : > { %845 = vst.msk [vmem:[%s1634_s28 + $0xe4] sm:$0xf] %vm787_vm3, %v780_v34  ;;  %v1011_v10 = vmul.f32 %v1748_v35, %v1748_v35  ;;  %v1095_v23 = vsel %vm852_vm4, %v1010_v63, 0.0  ;;  %v1101_v46 = vsel %vm852_vm4, %v1013_v44, 0.0  ;;  %v1015_v47 = vmul.f32 %v1842_v8, %v1842_v8 }
 0x111   : > { %v889_v27 = vadd.f32 %v888_v19, %v887_v36  ;;  %v1086_v30 = vadd.f32 %v1085_v43, %v1084_v18  ;;  %v898_v43 = vsel %vm852_vm4, %v1748_v35, 0.0  ;;  %v1012_v19 = vmul.f32 %v1772_v45, %v1772_v45 }
 0x112   : > { %v1097_v29 = vsel %vm852_vm4, %v1011_v10, 0.0  ;;  %v1014_v35 = vmul.f32 %v1820_v62, %v1820_v62  ;;  %v1017_v10 = vmul.f32 %v1899_v59, %v1899_v59  ;;  %v912_v44 = vsel %vm852_vm4, %v1928_v50, 0.0 }
 0x113   : > { %v891_v52 = vadd.f32 %v890_v31, %v889_v27  ;;  %v1088_v41 = vadd.f32 %v1087_v20, %v1086_v30  ;;  %v2039_v20 = vpop.f32.mrf.mxu3  ;;  %v900_v31 = vsel %vm852_vm4, %v1772_v45, 0.0  ;;  %v904_v45 = vsel %vm852_vm4, %v1820_v62, 0.0 }
 0x114   : > { %v781_v62 = vpack.c.bf16 %v2039_v20, %v2039_v20 }
 0x115   : > { %v893_v61 = vadd.f32 %v892_v0, %v891_v52  ;;  %v1090_v55 = vadd.f32 %v1089_v42, %v1088_v41  ;;  %v1099_v52 = vsel %vm852_vm4, %v1012_v19, 0.0  ;;  %v902_v41 = vsel %vm852_vm4, %v1796_v53, 0.0  ;;  %v2065_v63 = vpop.f32.mrf.mxu2 }
 0x116   : > { %v1016_v53 = vmul.f32 %v1854_v15, %v1854_v15  ;;  %846 = vst.msk [vmem:[%s1634_s28 + $0xe8] sm:$0xf] %vm787_vm3, %v781_v62 }
 0x117   : > { %v895_v21 = vadd.f32 %v894_v11, %v893_v61  ;;  %v1092_v14 = vadd.f32 %v1091_v60, %v1090_v55  ;;  %v1103_v61 = vsel %vm852_vm4, %v1014_v35, 0.0  ;;  %v906_v60 = vsel %vm852_vm4, %v1842_v8, 0.0 }
 0x118   : > { %v769_v11 = vpack.c.bf16 %v2037_v56, %v2037_v56  ;;  %v908_v8 = vsel %vm852_vm4, %v1854_v15, 0.0  ;;  %v1107_v19 = vsel %vm852_vm4, %v1016_v53, 0.0  ;;  %v910_v15 = vsel %vm852_vm4, %v1899_v59, 0.0 }
 0x119   : > { %v1094_v36 = vadd.f32 %v1093_v6, %v1092_v14  ;;  %v897_v18 = vadd.f32 %v896_v9, %v895_v21  ;;  %v1105_v9 = vsel %vm852_vm4, %v1015_v47, 0.0  ;;  %v1019_v35 = vmul.f32 %v1962_v22, %v1962_v22 }
 0x11a   : > { %834 = vst.msk [vmem:[%s1634_s28 + $0xb8] sm:$0xf] %vm787_vm3, %v769_v11  ;;  %v1020_v59 = vmul.f32 %v1677_v5, %v1677_v5 }
 0x11b   : > { %v899_v27 = vadd.f32 %v898_v43, %v897_v18  ;;  %v1096_v30 = vadd.f32 %v1095_v23, %v1094_v36  ;;  %v2067_v21 = vpop.f32.mrf.mxu3  ;;  %v770_v36 = vpack.c.bf16 %v2065_v63, %v2065_v63  ;;  %v1113_v47 = vsel %vm852_vm4, %v1019_v35, 0.0 }
 0x11c   : > { %v782_v43 = vpack.c.bf16 %v2067_v21, %v2067_v21 }
 0x11d   : > { %v901_v33 = vadd.f32 %v900_v31, %v899_v27  ;;  %v1098_v54 = vadd.f32 %v1097_v29, %v1096_v30  ;;  %v1018_v27 = vmul.f32 %v1928_v50, %v1928_v50  ;;  %835 = vst.msk [vmem:[%s1634_s28 + $0xbc] sm:$0xf] %vm787_vm3, %v770_v36  ;;  %v1109_v31 = vsel %vm852_vm4, %v1017_v10, 0.0 }
 0x11e   : > { %847 = vst.msk [vmem:[%s1634_s28 + $0xec] sm:$0xf] %vm787_vm3, %v782_v43  ;;  %v916_v50 = vsel %vm852_vm4, %v1677_v5, 0.0  ;;  %v920_v5 = vsel %vm852_vm4, %v1718_v26, 0.0  ;;  %v1024_v10 = vmul.f32 %v1754_v39, %v1754_v39 }
 0x11f   : > { %v903_v42 = vadd.f32 %v902_v41, %v901_v33  ;;  %v1100_v0 = vadd.f32 %v1099_v52, %v1098_v54  ;;  %v1111_v52 = vsel %vm852_vm4, %v1018_v27, 0.0  ;;  %v914_v41 = vsel %vm852_vm4, %v1962_v22, 0.0 }
 0x120   : > { %v1022_v22 = vmul.f32 %v1718_v26, %v1718_v26 }
 0x121   : > { %v905_v55 = vadd.f32 %v904_v45, %v903_v42  ;;  %v1102_v34 = vadd.f32 %v1101_v46, %v1100_v0  ;;  %v1021_v45 = vmul.f32 %v1693_v16, %v1693_v16 }
 0x123   : > { %v907_v14 = vadd.f32 %v906_v60, %v905_v55  ;;  %v1104_v6 = vadd.f32 %v1103_v61, %v1102_v34  ;;  %v2101_v42 = vpop.f32.mrf.mxu3  ;;  %v1115_v34 = vsel %vm852_vm4, %v1020_v59, 0.0  ;;  %v918_v60 = vsel %vm852_vm4, %v1693_v16, 0.0 }
 0x124   : > { %v1117_v62 = vsel %vm852_vm4, %v1021_v45, 0.0  ;;  %v922_v16 = vsel %vm852_vm4, %v1736_v32, 0.0  ;;  %v783_v36 = vpack.c.bf16 %v2101_v42, %v2101_v42  ;;  %v1027_v59 = vmul.f32 %v1826_v2, %v1826_v2 }
 0x125   : > { %v909_v18 = vadd.f32 %v908_v8, %v907_v14  ;;  %v1106_v23 = vadd.f32 %v1105_v9, %v1104_v6  ;;  %v1023_v14 = vmul.f32 %v1736_v32, %v1736_v32  ;;  %v1119_v8 = vsel %vm852_vm4, %v1022_v22, 0.0 }
 0x126   : > { %v1025_v32 = vmul.f32 %v1778_v48, %v1778_v48  ;;  %848 = vst.msk [vmem:[%s1634_s28 + $0xf0] sm:$0xf] %vm787_vm3, %v783_v36 }
 0x127   : > { %v1108_v30 = vadd.f32 %v1107_v19, %v1106_v23  ;;  %v911_v29 = vadd.f32 %v910_v15, %v909_v18  ;;  %v1121_v19 = vsel %vm852_vm4, %v1023_v14, 0.0  ;;  %v924_v15 = vsel %vm852_vm4, %v1754_v39, 0.0 }
 0x128   : > { %v1125_v39 = vsel %vm852_vm4, %v1025_v32, 0.0  ;;  %v1031_v14 = vmul.f32 %v1933_v17, %v1933_v17 }
 0x129   : > { %v1110_v33 = vadd.f32 %v1109_v31, %v1108_v30  ;;  %v913_v54 = vadd.f32 %v912_v44, %v911_v29  ;;  %v1123_v29 = vsel %vm852_vm4, %v1024_v10, 0.0  ;;  %v926_v31 = vsel %vm852_vm4, %v1778_v48, 0.0 }
 0x12a   : > { %v1026_v44 = vmul.f32 %v1802_v57, %v1802_v57  ;;  %v930_v48 = vsel %vm852_vm4, %v1826_v2, 0.0  ;;  %v934_v2 = vsel %vm852_vm4, %v1860_v24, 0.0 }
 0x12b   : > { %v1112_v0 = vadd.f32 %v1111_v52, %v1110_v33  ;;  %v915_v46 = vadd.f32 %v914_v41, %v913_v54  ;;  %v2125_v18 = vpop.f32.mrf.mxu3  ;;  %v928_v54 = vsel %vm852_vm4, %v1802_v57, 0.0  ;;  %v932_v57 = vsel %vm852_vm4, %v1846_v12, 0.0 }
 0x12c   : > { %v784_v43 = vpack.c.bf16 %v2125_v18, %v2125_v18 }
 0x12d   : > { %v917_v61 = vadd.f32 %v916_v50, %v915_v46  ;;  %v1114_v55 = vadd.f32 %v1113_v47, %v1112_v0  ;;  %v1127_v0 = vsel %vm852_vm4, %v1026_v44, 0.0  ;;  %v1028_v46 = vmul.f32 %v1846_v12, %v1846_v12 }
 0x12e   : > { %849 = vst.msk [vmem:[%s1634_s28 + $0xf4] sm:$0xf] %vm787_vm3, %v784_v43  ;;  %v936_v12 = vsel %vm852_vm4, %v1909_v1, 0.0  ;;  %v1137_v43 = vsel %vm852_vm4, %v1031_v14, 0.0 }
 0x12f   : > { %v919_v53 = vadd.f32 %v918_v60, %v917_v61  ;;  %v1116_v11 = vadd.f32 %v1115_v34, %v1114_v55  ;;  %v1129_v61 = vsel %vm852_vm4, %v1027_v59, 0.0  ;;  %v1029_v55 = vmul.f32 %v1860_v24, %v1860_v24 }
 0x130   : > { %v1131_v22 = vsel %vm852_vm4, %v1028_v46, 0.0  ;;  %v938_v24 = vsel %vm852_vm4, %v1933_v17, 0.0  ;;  %v1033_v17 = vmul.f32 %v2001_v37, %v2001_v37  ;;  %v1036_v59 = vmul.f32 %v1756_v40, %v1756_v40 }
 0x131   : > { %v921_v6 = vadd.f32 %v920_v5, %v919_v53  ;;  %v1118_v9 = vadd.f32 %v1117_v62, %v1116_v11  ;;  %v1030_v53 = vmul.f32 %v1909_v1, %v1909_v1  ;;  %v1133_v5 = vsel %vm852_vm4, %v1029_v55, 0.0 }
 0x133   : > { %v923_v26 = vadd.f32 %v922_v16, %v921_v6  ;;  %v1120_v23 = vadd.f32 %v1119_v8, %v1118_v9  ;;  %v2153_v50 = vpop.f32.mrf.mxu3  ;;  %v1135_v8 = vsel %vm852_vm4, %v1030_v53, 0.0  ;;  %v1032_v16 = vmul.f32 %v1969_v28, %v1969_v28 }
 0x134   : > { %v785_v10 = vpack.c.bf16 %v2153_v50, %v2153_v50 }
 0x135   : > { %v925_v27 = vadd.f32 %v924_v15, %v923_v26  ;;  %v1122_v30 = vadd.f32 %v1121_v19, %v1120_v23  ;;  %v940_v19 = vsel %vm852_vm4, %v1969_v28, 0.0  ;;  %v1141_v28 = vsel %vm852_vm4, %v1033_v17, 0.0 }
 0x136   : > { %850 = vst.msk [vmem:[%s1634_s28 + $0xf8] sm:$0xf] %vm787_vm3, %v785_v10 }
 0x137   : > { %v927_v35 = vadd.f32 %v926_v31, %v925_v27  ;;  %v1124_v33 = vadd.f32 %v1123_v29, %v1122_v30  ;;  %v1139_v27 = vsel %vm852_vm4, %v1032_v16, 0.0  ;;  %v942_v30 = vsel %vm852_vm4, %v2001_v37, 0.0 }
 0x138   : > { %v1034_v29 = vmul.f32 %v2037_v56, %v2037_v56  ;;  %v1042_v16 = vmul.f32 %v1911_v4, %v1911_v4 }
 0x139   : > { %v1126_v52 = vadd.f32 %v1125_v39, %v1124_v33  ;;  %v929_v41 = vadd.f32 %v928_v54, %v927_v35  ;;  %v944_v35 = vsel %vm852_vm4, %v2037_v56, 0.0  ;;  %v1035_v33 = vmul.f32 %v2065_v63, %v2065_v63 }
 0x13a   : > { %v1143_v37 = vsel %vm852_vm4, %v1034_v29, 0.0  ;;  %v1037_v56 = vmul.f32 %v1780_v49, %v1780_v49  ;;  %v1159_v17 = vsel %vm852_vm4, %v1042_v16, 0.0  ;;  %v1045_v29 = vmul.f32 %v2003_v38, %v2003_v38 }
 0x13b   : > { %v931_v45 = vadd.f32 %v930_v48, %v929_v41  ;;  %v1128_v47 = vadd.f32 %v1127_v0, %v1126_v52  ;;  %v2177_v36 = vpop.f32.mrf.mxu3  ;;  %v946_v52 = vsel %vm852_vm4, %v2065_v63, 0.0  ;;  %v948_v48 = vsel %vm852_vm4, %v1756_v40, 0.0 }
 0x13c   : > { %v786_v23 = vpack.c.bf16 %v2177_v36, %v2177_v36  ;;  %v1145_v46 = vsel %vm852_vm4, %v1035_v33, 0.0  ;;  %v1038_v63 = vmul.f32 %v1804_v58, %v1804_v58  ;;  %v952_v40 = vsel %vm852_vm4, %v1804_v58, 0.0 }
 0x13d   : > { %v933_v34 = vadd.f32 %v932_v57, %v931_v45  ;;  %v1130_v60 = vadd.f32 %v1129_v61, %v1128_v47  ;;  %v1147_v61 = vsel %vm852_vm4, %v1036_v59, 0.0  ;;  %v950_v57 = vsel %vm852_vm4, %v1780_v49, 0.0 }
 0x13e   : > { %851 = vst.msk [vmem:[%s1634_s28 + $0xfc] sm:$0xf] %vm787_vm3, %v786_v23  ;;  %v954_v49 = vsel %vm852_vm4, %v1828_v3, 0.0  ;;  %v956_v58 = vsel %vm852_vm4, %v1848_v13, 0.0  ;;  %v1043_v23 = vmul.f32 %v1935_v7, %v1935_v7  ;;  %v1047_v59 = vmul.f32 %v2067_v21, %v2067_v21 }
 0x13f   : > { %v935_v11 = vadd.f32 %v934_v2, %v933_v34  ;;  %v1132_v62 = vadd.f32 %v1131_v22, %v1130_v60  ;;  %v1149_v60 = vsel %vm852_vm4, %v1037_v56, 0.0  ;;  %v1039_v22 = vmul.f32 %v1828_v3, %v1828_v3 }
 0x140   : > { %v958_v3 = vsel %vm852_vm4, %v1862_v25, 0.0 }
 0x141   : > { %v937_v6 = vadd.f32 %v936_v12, %v935_v11  ;;  %v1134_v9 = vadd.f32 %v1133_v5, %v1132_v62  ;;  %v1151_v11 = vsel %vm852_vm4, %v1038_v63, 0.0  ;;  %v1040_v62 = vmul.f32 %v1848_v13, %v1848_v13 }
 0x142   : > { %v1153_v14 = vsel %vm852_vm4, %v1039_v22, 0.0  ;;  %v960_v13 = vsel %vm852_vm4, %v1911_v4, 0.0  ;;  %v964_v4 = vsel %vm852_vm4, %v1971_v51, 0.0  ;;  %v1050_v63 = vmul.f32 %v2153_v50, %v2153_v50 }
 0x143   : > { %v939_v1 = vadd.f32 %v938_v24, %v937_v6  ;;  %v1136_v26 = vadd.f32 %v1135_v8, %v1134_v9  ;;  %v1041_v6 = vmul.f32 %v1862_v25, %v1862_v25  ;;  %v1155_v24 = vsel %vm852_vm4, %v1040_v62, 0.0 }
 0x144   : > { %v962_v25 = vsel %vm852_vm4, %v1935_v7, 0.0  ;;  %v966_v7 = vsel %vm852_vm4, %v2003_v38, 0.0  ;;  %v970_v38 = vsel %vm852_vm4, %v2067_v21, 0.0  ;;  %v974_v21 = vsel %vm852_vm4, %v2125_v18, 0.0 }
 0x145   : > { %v1138_v15 = vadd.f32 %v1137_v43, %v1136_v26  ;;  %v941_v32 = vadd.f32 %v940_v19, %v939_v1  ;;  %v1157_v26 = vsel %vm852_vm4, %v1041_v6, 0.0 }
 0x147   : > { %v1140_v31 = vadd.f32 %v1139_v27, %v1138_v15  ;;  %v943_v44 = vadd.f32 %v942_v30, %v941_v32  ;;  %v1044_v15 = vmul.f32 %v1971_v51, %v1971_v51  ;;  %v1161_v30 = vsel %vm852_vm4, %v1043_v23, 0.0 }
 0x148   : > { %v968_v51 = vsel %vm852_vm4, %v2039_v20, 0.0 }
 0x149   : > { %v1142_v39 = vadd.f32 %v1141_v28, %v1140_v31  ;;  %v945_v54 = vadd.f32 %v944_v35, %v943_v44  ;;  %v1163_v28 = vsel %vm852_vm4, %v1044_v15, 0.0  ;;  %v1046_v35 = vmul.f32 %v2039_v20, %v2039_v20 }
 0x14a   : > { %v972_v20 = vsel %vm852_vm4, %v2101_v42, 0.0 }
 0x14b   : > { %v1144_v41 = vadd.f32 %v1143_v37, %v1142_v39  ;;  %v947_v0 = vadd.f32 %v946_v52, %v945_v54  ;;  %v1165_v54 = vsel %vm852_vm4, %v1045_v29, 0.0 }
 0x14d   : > { %v949_v45 = vadd.f32 %v948_v48, %v947_v0  ;;  %v1146_v47 = vadd.f32 %v1145_v46, %v1144_v41  ;;  %v1167_v41 = vsel %vm852_vm4, %v1046_v35, 0.0  ;;  %v1048_v0 = vmul.f32 %v2101_v42, %v2101_v42 }
 0x14e   : > { %v1169_v46 = vsel %vm852_vm4, %v1047_v59, 0.0  ;;  %v976_v42 = vsel %vm852_vm4, %v2153_v50, 0.0 }
 0x14f   : > { %v951_v55 = vadd.f32 %v950_v57, %v949_v45  ;;  %v1148_v34 = vadd.f32 %v1147_v61, %v1146_v47  ;;  %v1049_v45 = vmul.f32 %v2125_v18, %v2125_v18  ;;  %v1171_v57 = vsel %vm852_vm4, %v1048_v0, 0.0 }
 0x150   : > { %v978_v18 = vsel %vm852_vm4, %v2177_v36, 0.0 }
 0x151   : > { %v953_v2 = vadd.f32 %v952_v40, %v951_v55  ;;  %v1150_v53 = vadd.f32 %v1149_v60, %v1148_v34  ;;  %v1173_v60 = vsel %vm852_vm4, %v1049_v45, 0.0  ;;  %v1051_v40 = vmul.f32 %v2177_v36, %v2177_v36 }
 0x153   : > { %v955_v5 = vadd.f32 %v954_v49, %v953_v2  ;;  %v1152_v12 = vadd.f32 %v1151_v11, %v1150_v53  ;;  %v1175_v53 = vsel %vm852_vm4, %v1050_v63, 0.0  ;;  %v1177_v62 = vsel %vm852_vm4, %v1051_v40, 0.0 }
 0x155   : > { %v957_v9 = vadd.f32 %v956_v58, %v955_v5  ;;  %v1154_v8 = vadd.f32 %v1153_v14, %v1152_v12 }
 0x157   : > { %v959_v10 = vadd.f32 %v958_v3, %v957_v9  ;;  %v1156_v1 = vadd.f32 %v1155_v24, %v1154_v8 }
 0x159   : > { %v1158_v43 = vadd.f32 %v1157_v26, %v1156_v1  ;;  %v961_v19 = vadd.f32 %v960_v13, %v959_v10 }
 0x15b   : > { %v963_v32 = vadd.f32 %v962_v25, %v961_v19  ;;  %v1160_v27 = vadd.f32 %v1159_v17, %v1158_v43 }
 0x15d   : > { %v965_v31 = vadd.f32 %v964_v4, %v963_v32  ;;  %v1162_v44 = vadd.f32 %v1161_v30, %v1160_v27 }
 0x15f   : > { %v967_v33 = vadd.f32 %v966_v7, %v965_v31  ;;  %v1164_v39 = vadd.f32 %v1163_v28, %v1162_v44 }
 0x161   : > { %v969_v37 = vadd.f32 %v968_v51, %v967_v33  ;;  %v1166_v52 = vadd.f32 %v1165_v54, %v1164_v39 }
 0x163   : > { %v971_v48 = vadd.f32 %v970_v38, %v969_v37  ;;  %v1168_v56 = vadd.f32 %v1167_v41, %v1166_v52 }
 0x165   : > { %v1170_v47 = vadd.f32 %v1169_v46, %v1168_v56  ;;  %v973_v61 = vadd.f32 %v972_v20, %v971_v48 }
 0x167   : > { %v1172_v55 = vadd.f32 %v1171_v57, %v1170_v47  ;;  %v975_v34 = vadd.f32 %v974_v21, %v973_v61 }
 0x169   : > { %v1174_v22 = vadd.f32 %v1173_v60, %v1172_v55  ;;  %v977_v2 = vadd.f32 %v976_v42, %v975_v34 }
 0x16b   : > { %v1176_v11 = vadd.f32 %v1175_v53, %v1174_v22  ;;  %v979_v49 = vadd.f32 %v978_v18, %v977_v2 }
 0x16d   : > { %v980_v5 = vrot.slane %v979_v49, 4  ;;  %v1178_v12 = vadd.f32 %v1177_v62, %v1176_v11 }
 0x16f   : > { %v981_v14 = vadd.f32 %v980_v5, %v979_v49  ;;  %v1179_v50 = vrot.slane %v1178_v12, 4 }
 0x171   : > { %v982_v58 = vrot.slane %v981_v14, 2  ;;  %v1180_v6 = vadd.f32 %v1179_v50, %v1178_v12 }
 0x173   : > { %v983_v9 = vadd.f32 %v982_v58, %v981_v14  ;;  %v1181_v8 = vrot.slane %v1180_v6, 2 }
 0x175   : > { %v984_v24 = vrot.slane %v983_v9, 1  ;;  %v1182_v3 = vadd.f32 %v1181_v8, %v1180_v6 }
 0x177   : > { %v985_v36 = vadd.f32 %v984_v24, %v983_v9  ;;  %v1183_v16 = vrot.slane %v1182_v3, 1 }
 0x179   : > { %987 = vst.msk [vmem:[%s214_s5] sm:$0x1] %vm986_vm5, %v985_v36  ;;  %v1184_v10 = vadd.f32 %v1183_v16, %v1182_v3 }
 0x17b   : > { %1185 = vst.msk [vmem:[%s217_s8] sm:$0x1] %vm986_vm5, %v1184_v10 }
 0x17c PF: > { %s15_s15 = sadd.s32 1, %s1518_s15  }
 0x17d   : > { %p12_p5 = scmp.ge.s32.totalorder %s15_s15, 6  }
 0x17f   :  { %14 = sbr.rel (!%p12_p5) target bundleno = 1 (0x1), region = 82 }

// kernel: xfeat_forward.52
= control target key start
LH: loop header
LB: loop body
LE: loop exit
PB: predicated region body
PF: predicated region fallthrough
CT: control target
= control target key end

     0   :  { %s1005_s15 = smov 0   ;;  %s1381_s0 = inlined_call_operand.vmem [shape: bf16[512,36], index: 0, kind: input, shape index: {}]   ;;  %s1382_s1 = inlined_call_operand.vmem [shape: bf16[36,8], index: 1, kind: input, shape index: {}]   ;;  %s1383_s2 = inlined_call_operand.vmem [shape: bf16[512,8], index: 2, kind: output, shape index: {0}]   ;;  %s1384_s3 = inlined_call_operand.vmem [shape: f32[2,1,8], index: 3, kind: output, shape index: {1}]   ;;  %s1385_s4 = inlined_call_operand.vmem [shape: f32[2,1,8], index: 4, kind: output, shape index: {2}]  }
   0x1 LB: > { %s1011_s16 = sadd.s32 4294967295, %s978_s15   ;;  %p842_p0 = scmp.ge.s32.totalorder %s978_s15, 1  ;;  %s978_s15 = sphi %s1005_s15, %s15_s15  }
   0x2   : > { %p168_p1 = scmp.lt.s32.totalorder %s978_s15, 3 }
   0x4   : > { %p169_p2 = pnand %p842_p0, %p168_p1 }
   0x5   : > { %s843_s19 = sshll.u32 (!%p169_p2), %s1011_s16, 5  ;;  %p212_p4 = scmp.lt.s32.totalorder (!%p169_p2), %s1011_s16, 1 }
   0x6   : > { %172 = sbr.rel (%p169_p2) target bundleno = 276 (0x114), region = 28  ;;  %p201_p3 = scmp.lt.s32.totalorder (!%p169_p2), %s843_s19, 63 }
   0xb   : > { %v255_v0 = vld [vmem:[%s1382_s1 + $0x10] sm:$0x3]  ;;  %vm400_vm0 = vcmask 1041408   ;;  %s1387_s19 = smov (!%p201_p3, %s843_s19), 63  ;;  %v954_v4 = vld [vmem:[%s1382_s1 + $0x8] sm:$0xff]  ;;  %v953_v5 = vld [vmem:[%s1382_s1] sm:$0xff] }
   0xc   : > { %v345_v1 = vunpack.c.l.b16 %v255_v0  ;;  %s844_s22 = sshll.u32 %s1387_s19, 2  ;;  %vm351_vm1 = vcmask 293888   ;;  %vm525_vm2 = vcmask 60416   ;;  %vm558_vm3 = vcmask 64512   ;;  %s1389_s16 = smov (!%p212_p4, %s1011_s16), 1 }
   0xd   : > { %s1033_s27 = scalar_lea.vmem %s1381_s0, %s844_s22  ;;  %s1072_s30 = scalar_lea.vmem %s1383_s2, %s844_s22  ;;  %vm628_vm4 = vcmask 57344  }
   0xe   : > { %v348_v2 = vpack.c.b16 %v345_v1, %v345_v1  ;;  %v937_v6 = vld [vmem:[%s1033_s27] sm:$0xff]  ;;  %v938_v10 = vld [vmem:[%s1033_s27 + $0x8] sm:$0xff]  ;;  %v939_v14 = vld [vmem:[%s1033_s27 + $0x10] sm:$0xff]  ;;  %s214_s7 = scalar_lea.vmem %s1384_s3, %s1389_s16  ;;  %s217_s10 = scalar_lea.vmem %s1385_s4, %s1389_s16 }
   0xf   : > { %v941_v7 = vld [vmem:[%s1033_s27 + $0x20] sm:$0xff]  ;;  %v942_v11 = vld [vmem:[%s1033_s27 + $0x28] sm:$0xff]  ;;  %v943_v15 = vld [vmem:[%s1033_s27 + $0x30] sm:$0xff] }
  0x10   : > { %v402_v3 = vsel %vm400_vm0, %v348_v2, 0  ;;  %v945_v8 = vld [vmem:[%s1033_s27 + $0x40] sm:$0xff]  ;;  %v946_v12 = vld [vmem:[%s1033_s27 + $0x48] sm:$0xff]  ;;  %v947_v16 = vld [vmem:[%s1033_s27 + $0x50] sm:$0xff] }
  0x11   : > { %409 = vmatpush.bf16.msra.mxu0 %v402_v3  ;;  %955 = vmatpush.bf16.msra.mxu1 %v402_v3  ;;  %v949_v9 = vld [vmem:[%s1033_s27 + $0x60] sm:$0xff]  ;;  %v950_v13 = vld [vmem:[%s1033_s27 + $0x68] sm:$0xff]  ;;  %v951_v17 = vld [vmem:[%s1033_s27 + $0x70] sm:$0xff] }
  0x12   : > { %956 = vmatpush.bf16.msra.mxu2 %v402_v3  ;;  %957 = vmatpush.bf16.msra.mxu3 %v402_v3  ;;  %v940_v18 = vld [vmem:[%s1033_s27 + $0x18] sm:$0xff] }
  0x13   : > { %v944_v19 = vld [vmem:[%s1033_s27 + $0x38] sm:$0xff] }
  0x14   : > { %v948_v20 = vld [vmem:[%s1033_s27 + $0x58] sm:$0xff] }
  0x15   : > { %410 = vmatpush.bf16.msra.mxu0 %v954_v4  ;;  %958 = vmatpush.bf16.msra.mxu1 %v954_v4  ;;  %v952_v21 = vld [vmem:[%s1033_s27 + $0x78] sm:$0xff] }
  0x16   : > { %959 = vmatpush.bf16.msra.mxu2 %v954_v4  ;;  %960 = vmatpush.bf16.msra.mxu3 %v954_v4 }
  0x19   : > { %411 = vmatpush.bf16.msra.mxu0 %v953_v5  ;;  %961 = vmatpush.bf16.msra.mxu1 %v953_v5 }
  0x1a   : > { %962 = vmatpush.bf16.msra.mxu2 %v953_v5  ;;  %963 = vmatpush.bf16.msra.mxu3 %v953_v5 }
  0x1c   : > { %919 = vmatmul.msk.bf16.vlgmr.msra.gmra.mxu0 %vm351_vm1, %v937_v6  ;;  %923 = vmatmul.msk.bf16.vlgmr.msra.gmra.mxu1 %vm351_vm1, %v941_v7 }
  0x1d   : > { %927 = vmatmul.msk.bf16.vlgmr.msra.gmra.mxu2 %vm351_vm1, %v945_v8  ;;  %931 = vmatmul.msk.bf16.vlgmr.msra.gmra.mxu3 %vm351_vm1, %v949_v9 }
  0x2c   : > { %920 = vmatmul.msk.bf16.gmra.mxu0 %vm351_vm1, %v938_v10  ;;  %924 = vmatmul.msk.bf16.gmra.mxu1 %vm351_vm1, %v942_v11 }
  0x2d   : > { %928 = vmatmul.msk.bf16.gmra.mxu2 %vm351_vm1, %v946_v12  ;;  %932 = vmatmul.msk.bf16.gmra.mxu3 %vm351_vm1, %v950_v13 }
  0x3c   : > { %921 = vmatmul.msk.bf16.gmra.mxu0 %vm351_vm1, %v939_v14  ;;  %925 = vmatmul.msk.bf16.gmra.mxu1 %vm351_vm1, %v943_v15 }
  0x3d   : > { %929 = vmatmul.msk.bf16.gmra.mxu2 %vm351_vm1, %v947_v16  ;;  %933 = vmatmul.msk.bf16.gmra.mxu3 %vm351_vm1, %v951_v17 }
  0x4c   : > { %922 = vmatmul.msk.bf16.gmra.mxu0 %vm351_vm1, %v940_v18  ;;  %926 = vmatmul.msk.bf16.gmra.mxu1 %vm351_vm1, %v944_v19 }
  0x4d   : > { %930 = vmatmul.msk.bf16.gmra.mxu2 %vm351_vm1, %v948_v20  ;;  %934 = vmatmul.msk.bf16.gmra.mxu3 %vm351_vm1, %v952_v21 }
  0x99   : > { %v1074_v22 = vpop.f32.mrf.mxu0  ;;  %v1076_v23 = vpop.f32.mrf.mxu1 }
  0x9a   : > { %v493_v24 = vpack.c.bf16 %v1074_v22, %v1074_v22  ;;  %v501_v25 = vpack.c.bf16 %v1076_v23, %v1076_v23  ;;  %v630_v2 = vmul.f32 %v1074_v22, %v1074_v22  ;;  %v559_v6 = vsel %vm558_vm3, %v1074_v22, 0.0 }
  0x9c   : > { %526 = vst.msk [vmem:[%s1072_s30] sm:$0xf] %vm525_vm2, %v493_v24  ;;  %v662_v10 = vsel %vm558_vm3, %v630_v2, 0.0 }
  0x9d   : > { %534 = vst.msk [vmem:[%s1072_s30 + $0x20] sm:$0xf] %vm525_vm2, %v501_v25 }
  0xa0   : > { %v1086_v26 = vpop.f32.mrf.mxu2  ;;  %v1094_v32 = vpop.f32.mrf.mxu3 }
  0xa1   : > { %v415_v27 = vpop.f32.mrf.mxu0  ;;  %v1088_v28 = vpop.f32.mrf.mxu1  ;;  %v509_v29 = vpack.c.bf16 %v1086_v26, %v1086_v26  ;;  %v517_v33 = vpack.c.bf16 %v1094_v32, %v1094_v32 }
  0xa2   : > { %v494_v30 = vpack.c.bf16 %v415_v27, %v415_v27  ;;  %v502_v31 = vpack.c.bf16 %v1088_v28, %v1088_v28  ;;  %v631_v62 = vmul.f32 %v415_v27, %v415_v27  ;;  %v560_v3 = vsel %vm558_vm3, %v415_v27, 0.0 }
  0xa3   : > { %542 = vst.msk [vmem:[%s1072_s30 + $0x40] sm:$0xf] %vm525_vm2, %v509_v29  ;;  %v561_v9 = vadd.f32 %v560_v3, %v559_v6  ;;  %v574_v6 = vsel %vm558_vm3, %v1076_v23, 0.0 }
  0xa4   : > { %527 = vst.msk [vmem:[%s1072_s30 + $0x4] sm:$0xf] %vm525_vm2, %v494_v30  ;;  %v663_v7 = vsel %vm558_vm3, %v631_v62, 0.0 }
  0xa5   : > { %535 = vst.msk [vmem:[%s1072_s30 + $0x24] sm:$0xf] %vm525_vm2, %v502_v31  ;;  %v664_v15 = vadd.f32 %v663_v7, %v662_v10  ;;  %v639_v7 = vmul.f32 %v1088_v28, %v1088_v28 }
  0xa6   : > { %550 = vst.msk [vmem:[%s1072_s30 + $0x60] sm:$0xf] %vm525_vm2, %v517_v33 }
  0xa8   : > { %v1106_v34 = vpop.f32.mrf.mxu2  ;;  %v1114_v40 = vpop.f32.mrf.mxu3 }
  0xa9   : > { %v418_v35 = vpop.f32.mrf.mxu0  ;;  %v1108_v36 = vpop.f32.mrf.mxu1  ;;  %v510_v37 = vpack.c.bf16 %v1106_v34, %v1106_v34  ;;  %v518_v41 = vpack.c.bf16 %v1114_v40, %v1114_v40 }
  0xaa   : > { %v495_v38 = vpack.c.bf16 %v418_v35, %v418_v35  ;;  %v503_v39 = vpack.c.bf16 %v1108_v36, %v1108_v36  ;;  %v632_v4 = vmul.f32 %v418_v35, %v418_v35  ;;  %v562_v8 = vsel %vm558_vm3, %v418_v35, 0.0 }
  0xab   : > { %543 = vst.msk [vmem:[%s1072_s30 + $0x44] sm:$0xf] %vm525_vm2, %v510_v37  ;;  %v563_v16 = vadd.f32 %v562_v8, %v561_v9 }
  0xac   : > { %528 = vst.msk [vmem:[%s1072_s30 + $0x8] sm:$0xf] %vm525_vm2, %v495_v38  ;;  %v665_v11 = vsel %vm558_vm3, %v632_v4, 0.0 }
  0xad   : > { %536 = vst.msk [vmem:[%s1072_s30 + $0x28] sm:$0xf] %vm525_vm2, %v503_v39  ;;  %v666_v29 = vadd.f32 %v665_v11, %v664_v15 }
  0xae   : > { %551 = vst.msk [vmem:[%s1072_s30 + $0x64] sm:$0xf] %vm525_vm2, %v518_v41 }
  0xb0   : > { %v1126_v42 = vpop.f32.mrf.mxu2  ;;  %v1134_v48 = vpop.f32.mrf.mxu3 }
  0xb1   : > { %v420_v43 = vpop.f32.mrf.mxu0  ;;  %v1128_v44 = vpop.f32.mrf.mxu1  ;;  %v511_v45 = vpack.c.bf16 %v1126_v42, %v1126_v42  ;;  %v519_v56 = vpack.c.bf16 %v1134_v48, %v1134_v48 }
  0xb2   : > { %v496_v46 = vpack.c.bf16 %v420_v43, %v420_v43  ;;  %v504_v47 = vpack.c.bf16 %v1128_v44, %v1128_v44  ;;  %v633_v5 = vmul.f32 %v420_v43, %v420_v43  ;;  %v564_v12 = vsel %vm558_vm3, %v420_v43, 0.0 }
  0xb3   : > { %544 = vst.msk [vmem:[%s1072_s30 + $0x48] sm:$0xf] %vm525_vm2, %v511_v45  ;;  %v565_v30 = vadd.f32 %v564_v12, %v563_v16  ;;  %v576_v12 = vsel %vm558_vm3, %v1088_v28, 0.0  ;;  %v679_v16 = vsel %vm558_vm3, %v639_v7, 0.0 }
  0xb4   : > { %529 = vst.msk [vmem:[%s1072_s30 + $0xc] sm:$0xf] %vm525_vm2, %v496_v46  ;;  %v667_v17 = vsel %vm558_vm3, %v633_v5, 0.0 }
  0xb5   : > { %537 = vst.msk [vmem:[%s1072_s30 + $0x2c] sm:$0xf] %vm525_vm2, %v504_v47  ;;  %v668_v38 = vadd.f32 %v667_v17, %v666_v29  ;;  %v578_v17 = vsel %vm558_vm3, %v1108_v36, 0.0 }
  0xb6   : > { %552 = vst.msk [vmem:[%s1072_s30 + $0x68] sm:$0xf] %vm525_vm2, %v519_v56 }
  0xb8   : > { %v1142_v49 = vpop.f32.mrf.mxu2  ;;  %v1150_v55 = vpop.f32.mrf.mxu3 }
  0xb9   : > { %v423_v50 = vpop.f32.mrf.mxu0  ;;  %v1144_v51 = vpop.f32.mrf.mxu1  ;;  %v512_v52 = vpack.c.bf16 %v1142_v49, %v1142_v49  ;;  %v520_v57 = vpack.c.bf16 %v1150_v55, %v1150_v55 }
  0xba   : > { %v497_v53 = vpack.c.bf16 %v423_v50, %v423_v50  ;;  %v505_v54 = vpack.c.bf16 %v1144_v51, %v1144_v51  ;;  %v634_v13 = vmul.f32 %v423_v50, %v423_v50  ;;  %v566_v21 = vsel %vm558_vm3, %v423_v50, 0.0 }
  0xbb   : > { %545 = vst.msk [vmem:[%s1072_s30 + $0x4c] sm:$0xf] %vm525_vm2, %v512_v52  ;;  %v567_v39 = vadd.f32 %v566_v21, %v565_v30 }
  0xbc   : > { %530 = vst.msk [vmem:[%s1072_s30 + $0x10] sm:$0xf] %vm525_vm2, %v497_v53  ;;  %v669_v31 = vsel %vm558_vm3, %v634_v13, 0.0  ;;  %v638_v53 = vmul.f32 %v1076_v23, %v1076_v23  ;;  %v640_v13 = vmul.f32 %v1108_v36, %v1108_v36  ;;  %v642_v36 = vmul.f32 %v1144_v51, %v1144_v51 }
  0xbd   : > { %538 = vst.msk [vmem:[%s1072_s30 + $0x30] sm:$0xf] %vm525_vm2, %v505_v54  ;;  %v670_v46 = vadd.f32 %v669_v31, %v668_v38 }
  0xbe   : > { %553 = vst.msk [vmem:[%s1072_s30 + $0x6c] sm:$0xf] %vm525_vm2, %v520_v57  ;;  %v677_v11 = vsel %vm558_vm3, %v638_v53, 0.0 }
  0xc0   : > { %v1166_v58 = vpop.f32.mrf.mxu2  ;;  %v1174_v1 = vpop.f32.mrf.mxu3 }
  0xc1   : > { %v425_v59 = vpop.f32.mrf.mxu0  ;;  %v1168_v60 = vpop.f32.mrf.mxu1  ;;  %v513_v61 = vpack.c.bf16 %v1166_v58, %v1166_v58  ;;  %v521_v37 = vpack.c.bf16 %v1174_v1, %v1174_v1 }
  0xc2   : > { %v498_v63 = vpack.c.bf16 %v425_v59, %v425_v59  ;;  %v506_v0 = vpack.c.bf16 %v1168_v60, %v1168_v60  ;;  %v635_v22 = vmul.f32 %v425_v59, %v425_v59  ;;  %v568_v33 = vsel %vm558_vm3, %v425_v59, 0.0 }
  0xc3   : > { %546 = vst.msk [vmem:[%s1072_s30 + $0x50] sm:$0xf] %vm525_vm2, %v513_v61  ;;  %v569_v47 = vadd.f32 %v568_v33, %v567_v39  ;;  %v643_v38 = vmul.f32 %v1168_v60, %v1168_v60 }
  0xc4   : > { %531 = vst.msk [vmem:[%s1072_s30 + $0x14] sm:$0xf] %vm525_vm2, %v498_v63  ;;  %v671_v43 = vsel %vm558_vm3, %v635_v22, 0.0 }
  0xc5   : > { %539 = vst.msk [vmem:[%s1072_s30 + $0x34] sm:$0xf] %vm525_vm2, %v506_v0  ;;  %v672_v54 = vadd.f32 %v671_v43, %v670_v46  ;;  %v685_v43 = vsel %vm558_vm3, %v642_v36, 0.0 }
  0xc6   : > { %554 = vst.msk [vmem:[%s1072_s30 + $0x70] sm:$0xf] %vm525_vm2, %v521_v37 }
  0xc8   : > { %v1192_v14 = vpop.f32.mrf.mxu2  ;;  %v1202_v27 = vpop.f32.mrf.mxu3 }
  0xc9   : > { %v428_v18 = vpop.f32.mrf.mxu0  ;;  %v1195_v19 = vpop.f32.mrf.mxu1  ;;  %v514_v20 = vpack.c.bf16 %v1192_v14, %v1192_v14  ;;  %v522_v41 = vpack.c.bf16 %v1202_v27, %v1202_v27 }
  0xca   : > { %v499_v24 = vpack.c.bf16 %v428_v18, %v428_v18  ;;  %v507_v25 = vpack.c.bf16 %v1195_v19, %v1195_v19  ;;  %v636_v35 = vmul.f32 %v428_v18, %v428_v18  ;;  %v570_v45 = vsel %vm558_vm3, %v428_v18, 0.0 }
  0xcb   : > { %547 = vst.msk [vmem:[%s1072_s30 + $0x54] sm:$0xf] %vm525_vm2, %v514_v20  ;;  %v571_v56 = vadd.f32 %v570_v45, %v569_v47  ;;  %v641_v18 = vmul.f32 %v1128_v44, %v1128_v44  ;;  %v584_v45 = vsel %vm558_vm3, %v1168_v60, 0.0  ;;  %v644_v46 = vmul.f32 %v1195_v19, %v1195_v19 }
  0xcc   : > { %532 = vst.msk [vmem:[%s1072_s30 + $0x18] sm:$0xf] %vm525_vm2, %v499_v24  ;;  %v673_v50 = vsel %vm558_vm3, %v636_v35, 0.0  ;;  %v681_v24 = vsel %vm558_vm3, %v640_v13, 0.0  ;;  %v586_v53 = vsel %vm558_vm3, %v1195_v19, 0.0 }
  0xcd   : > { %540 = vst.msk [vmem:[%s1072_s30 + $0x38] sm:$0xf] %vm525_vm2, %v507_v25  ;;  %v674_v4 = vadd.f32 %v673_v50, %v672_v54  ;;  %v580_v25 = vsel %vm558_vm3, %v1128_v44, 0.0  ;;  %v683_v37 = vsel %vm558_vm3, %v641_v18, 0.0  ;;  %v582_v44 = vsel %vm558_vm3, %v1144_v51, 0.0 }
  0xce   : > { %555 = vst.msk [vmem:[%s1072_s30 + $0x74] sm:$0xf] %vm525_vm2, %v522_v41  ;;  %v687_v51 = vsel %vm558_vm3, %v643_v38, 0.0  ;;  %v654_v38 = vmul.f32 %v1094_v32, %v1094_v32 }
  0xd0   : > { %v1223_v52 = vpop.f32.mrf.mxu2  ;;  %v1230_v3 = vpop.f32.mrf.mxu3 }
  0xd1   : > { %v430_v57 = vpop.f32.mrf.mxu0  ;;  %v450_v59 = vpop.f32.mrf.mxu1  ;;  %v515_v61 = vpack.c.bf16 %v1223_v52, %v1223_v52  ;;  %v523_v29 = vpack.c.bf16 %v1230_v3, %v1230_v3  ;;  %v652_v36 = vmul.f32 %v1223_v52, %v1223_v52 }
  0xd2   : > { %v500_v62 = vpack.c.bf16 %v430_v57, %v430_v57  ;;  %v572_v63 = vsel %vm558_vm3, %v430_v57, 0.0  ;;  %v637_v0 = vmul.f32 %v430_v57, %v430_v57  ;;  %v508_v2 = vpack.c.bf16 %v450_v59, %v450_v59 }
  0xd3   : > { %v573_v5 = vadd.f32 %v572_v63, %v571_v56  ;;  %548 = vst.msk [vmem:[%s1072_s30 + $0x58] sm:$0xf] %vm525_vm2, %v515_v61  ;;  %v645_v54 = vmul.f32 %v450_v59, %v450_v59  ;;  %v646_v61 = vmul.f32 %v1086_v26, %v1086_v26  ;;  %v588_v60 = vsel %vm558_vm3, %v450_v59, 0.0 }
  0xd4   : > { %533 = vst.msk [vmem:[%s1072_s30 + $0x1c] sm:$0xf] %vm525_vm2, %v500_v62  ;;  %v675_v8 = vsel %vm558_vm3, %v637_v0, 0.0  ;;  %v689_v62 = vsel %vm558_vm3, %v644_v46, 0.0  ;;  %v648_v59 = vmul.f32 %v1126_v42, %v1126_v42 }
  0xd5   : > { %v575_v9 = vadd.f32 %v574_v6, %v573_v5  ;;  %v676_v10 = vadd.f32 %v675_v8, %v674_v4  ;;  %541 = vst.msk [vmem:[%s1072_s30 + $0x3c] sm:$0xf] %vm525_vm2, %v508_v2  ;;  %v590_v2 = vsel %vm558_vm3, %v1086_v26, 0.0  ;;  %v647_v4 = vmul.f32 %v1106_v34, %v1106_v34 }
  0xd6   : > { %556 = vst.msk [vmem:[%s1072_s30 + $0x78] sm:$0xf] %vm525_vm2, %v523_v29  ;;  %v691_v19 = vsel %vm558_vm3, %v645_v54, 0.0  ;;  %v693_v7 = vsel %vm558_vm3, %v646_v61, 0.0  ;;  %v592_v8 = vsel %vm558_vm3, %v1106_v34, 0.0  ;;  %v594_v26 = vsel %vm558_vm3, %v1126_v42, 0.0 }
  0xd7   : > { %v577_v23 = vadd.f32 %v576_v12, %v575_v9  ;;  %v678_v15 = vadd.f32 %v677_v11, %v676_v10  ;;  %v695_v11 = vsel %vm558_vm3, %v647_v4, 0.0  ;;  %v649_v12 = vmul.f32 %v1142_v49, %v1142_v49 }
  0xd8   : > { %v1253_v20 = vpop.f32.mrf.mxu2  ;;  %v1264_v30 = vpop.f32.mrf.mxu3  ;;  %v596_v34 = vsel %vm558_vm3, %v1142_v49, 0.0  ;;  %v598_v42 = vsel %vm558_vm3, %v1166_v58, 0.0  ;;  %v600_v49 = vsel %vm558_vm3, %v1192_v14, 0.0  ;;  %v657_v61 = vmul.f32 %v1150_v55, %v1150_v55 }
  0xd9   : > { %v579_v21 = vadd.f32 %v578_v17, %v577_v23  ;;  %v680_v22 = vadd.f32 %v679_v16, %v678_v15  ;;  %v516_v28 = vpack.c.bf16 %v1253_v20, %v1253_v20  ;;  %v524_v35 = vpack.c.bf16 %v1264_v30, %v1264_v30 }
  0xda   : > { %v697_v15 = vsel %vm558_vm3, %v648_v59, 0.0  ;;  %v650_v16 = vmul.f32 %v1166_v58, %v1166_v58  ;;  %v602_v58 = vsel %vm558_vm3, %v1223_v52, 0.0  ;;  %v655_v52 = vmul.f32 %v1114_v40, %v1114_v40 }
  0xdb   : > { %v682_v31 = vadd.f32 %v681_v24, %v680_v22  ;;  %v581_v33 = vadd.f32 %v580_v25, %v579_v21  ;;  %549 = vst.msk [vmem:[%s1072_s30 + $0x5c] sm:$0xf] %vm525_vm2, %v516_v28  ;;  %v699_v21 = vsel %vm558_vm3, %v649_v12, 0.0  ;;  %v651_v22 = vmul.f32 %v1192_v14, %v1192_v14 }
  0xdc   : > { %557 = vst.msk [vmem:[%s1072_s30 + $0x7c] sm:$0xf] %vm525_vm2, %v524_v35  ;;  %v701_v25 = vsel %vm558_vm3, %v650_v16, 0.0  ;;  %v653_v35 = vmul.f32 %v1253_v20, %v1253_v20  ;;  %v705_v14 = vsel %vm558_vm3, %v652_v36, 0.0  ;;  %v660_v59 = vmul.f32 %v1230_v3, %v1230_v3 }
  0xdd   : > { %v583_v39 = vadd.f32 %v582_v44, %v581_v33  ;;  %v684_v41 = vadd.f32 %v683_v37, %v682_v31  ;;  %v703_v33 = vsel %vm558_vm3, %v651_v22, 0.0 }
  0xde   : > { %v707_v46 = vsel %vm558_vm3, %v653_v35, 0.0 }
  0xdf   : > { %v585_v47 = vadd.f32 %v584_v45, %v583_v39  ;;  %v686_v50 = vadd.f32 %v685_v43, %v684_v41  ;;  %v604_v39 = vsel %vm558_vm3, %v1253_v20, 0.0  ;;  %v606_v45 = vsel %vm558_vm3, %v1094_v32, 0.0 }
  0xe0   : > { %v656_v20 = vmul.f32 %v1134_v48, %v1134_v48  ;;  %v610_v32 = vsel %vm558_vm3, %v1134_v48, 0.0  ;;  %v614_v48 = vsel %vm558_vm3, %v1174_v1, 0.0 }
  0xe1   : > { %v587_v56 = vadd.f32 %v586_v53, %v585_v47  ;;  %v688_v57 = vadd.f32 %v687_v51, %v686_v50  ;;  %v709_v51 = vsel %vm558_vm3, %v654_v38, 0.0  ;;  %v608_v53 = vsel %vm558_vm3, %v1114_v40, 0.0 }
  0xe2   : > { %v612_v40 = vsel %vm558_vm3, %v1150_v55, 0.0  ;;  %v616_v55 = vsel %vm558_vm3, %v1202_v27, 0.0 }
  0xe3   : > { %v690_v63 = vadd.f32 %v689_v62, %v688_v57  ;;  %v589_v0 = vadd.f32 %v588_v60, %v587_v56  ;;  %v711_v57 = vsel %vm558_vm3, %v655_v52, 0.0 }
  0xe5   : > { %v591_v5 = vadd.f32 %v590_v2, %v589_v0  ;;  %v692_v6 = vadd.f32 %v691_v19, %v690_v63  ;;  %v713_v63 = vsel %vm558_vm3, %v656_v20, 0.0  ;;  %v658_v0 = vmul.f32 %v1174_v1, %v1174_v1 }
  0xe6   : > { %v715_v19 = vsel %vm558_vm3, %v657_v61, 0.0  ;;  %v618_v1 = vsel %vm558_vm3, %v1230_v3, 0.0 }
  0xe7   : > { %v593_v9 = vadd.f32 %v592_v8, %v591_v5  ;;  %v694_v10 = vadd.f32 %v693_v7, %v692_v6  ;;  %v659_v5 = vmul.f32 %v1202_v27, %v1202_v27  ;;  %v717_v8 = vsel %vm558_vm3, %v658_v0, 0.0 }
  0xe8   : > { %v620_v27 = vsel %vm558_vm3, %v1264_v30, 0.0 }
  0xe9   : > { %v595_v13 = vadd.f32 %v594_v26, %v593_v9  ;;  %v696_v23 = vadd.f32 %v695_v11, %v694_v10  ;;  %v719_v11 = vsel %vm558_vm3, %v659_v5, 0.0  ;;  %v661_v26 = vmul.f32 %v1264_v30, %v1264_v30 }
  0xeb   : > { %v698_v17 = vadd.f32 %v697_v15, %v696_v23  ;;  %v597_v18 = vadd.f32 %v596_v34, %v595_v13  ;;  %v721_v23 = vsel %vm558_vm3, %v660_v59, 0.0  ;;  %v723_v16 = vsel %vm558_vm3, %v661_v26, 0.0 }
  0xed   : > { %v599_v28 = vadd.f32 %v598_v42, %v597_v18  ;;  %v700_v24 = vadd.f32 %v699_v21, %v698_v17 }
  0xef   : > { %v601_v29 = vadd.f32 %v600_v49, %v599_v28  ;;  %v702_v31 = vadd.f32 %v701_v25, %v700_v24 }
  0xf1   : > { %v704_v37 = vadd.f32 %v703_v33, %v702_v31  ;;  %v603_v44 = vadd.f32 %v602_v58, %v601_v29 }
  0xf3   : > { %v706_v41 = vadd.f32 %v705_v14, %v704_v37  ;;  %v605_v43 = vadd.f32 %v604_v39, %v603_v44 }
  0xf5   : > { %v607_v47 = vadd.f32 %v606_v45, %v605_v43  ;;  %v708_v50 = vadd.f32 %v707_v46, %v706_v41 }
  0xf7   : > { %v609_v54 = vadd.f32 %v608_v53, %v607_v47  ;;  %v710_v56 = vadd.f32 %v709_v51, %v708_v50 }
  0xf9   : > { %v611_v62 = vadd.f32 %v610_v32, %v609_v54  ;;  %v712_v60 = vadd.f32 %v711_v57, %v710_v56 }
  0xfb   : > { %v714_v2 = vadd.f32 %v713_v63, %v712_v60  ;;  %v613_v4 = vadd.f32 %v612_v40, %v611_v62 }
  0xfd   : > { %v615_v6 = vadd.f32 %v614_v48, %v613_v4  ;;  %v716_v7 = vadd.f32 %v715_v19, %v714_v2 }
  0xff   : > { %v617_v9 = vadd.f32 %v616_v55, %v615_v6  ;;  %v718_v10 = vadd.f32 %v717_v8, %v716_v7 }
 0x101   : > { %v720_v12 = vadd.f32 %v719_v11, %v718_v10  ;;  %v619_v13 = vadd.f32 %v618_v1, %v617_v9 }
 0x103   : > { %v722_v15 = vadd.f32 %v721_v23, %v720_v12  ;;  %v621_v34 = vadd.f32 %v620_v27, %v619_v13 }
 0x105   : > { %v622_v17 = vrot.slane %v621_v34, 4  ;;  %v724_v18 = vadd.f32 %v723_v16, %v722_v15 }
 0x107   : > { %v623_v21 = vadd.f32 %v622_v17, %v621_v34  ;;  %v725_v3 = vrot.slane %v724_v18, 4 }
 0x109   : > { %v624_v42 = vrot.slane %v623_v21, 2  ;;  %v726_v22 = vadd.f32 %v725_v3, %v724_v18 }
 0x10b   : > { %v625_v28 = vadd.f32 %v624_v42, %v623_v21  ;;  %v727_v24 = vrot.slane %v726_v22, 2 }
 0x10d   : > { %v626_v25 = vrot.slane %v625_v28, 1  ;;  %v728_v49 = vadd.f32 %v727_v24, %v726_v22 }
 0x10f   : > { %v627_v30 = vadd.f32 %v626_v25, %v625_v28  ;;  %v729_v36 = vrot.slane %v728_v49, 1 }
 0x111   : > { %629 = vst.msk [vmem:[%s214_s7] sm:$0x1] %vm628_vm4, %v627_v30  ;;  %v730_v29 = vadd.f32 %v729_v36, %v728_v49 }
 0x113   : > { %731 = vst.msk [vmem:[%s217_s10] sm:$0x1] %vm628_vm4, %v730_v29 }
 0x114 PF: > { %s15_s15 = sadd.s32 1, %s978_s15  }
 0x115   : > { %p12_p5 = scmp.ge.s32.totalorder %s15_s15, 4  }
 0x117   :  { %14 = sbr.rel (!%p12_p5) target bundleno = 1 (0x1), region = 82 }

// kernel: xfeat_forward.53
= control target key start
LH: loop header
LB: loop body
LE: loop exit
PB: predicated region body
PF: predicated region fallthrough
CT: control target
= control target key end

     0   :  { %s591_s12 = smov 0   ;;  %s773_s0 = inlined_call_operand.vmem [shape: bf16[512,8], index: 0, kind: input, shape index: {}]   ;;  %s774_s1 = inlined_call_operand.vmem [shape: f32[1,8], index: 1, kind: input, shape index: {}]   ;;  %s775_s2 = inlined_call_operand.vmem [shape: f32[1,8], index: 2, kind: input, shape index: {}]   ;;  %s776_s3 = inlined_call_operand.vmem [shape: bf16[512,8], index: 3, kind: output, shape index: {}]  }
   0x1 LB: > { %s463_s13 = sadd.s32 4294967295, %s569_s12   ;;  %p467_p0 = scmp.ge.s32.totalorder %s569_s12, 1  ;;  %s569_s12 = sphi %s591_s12, %s13_s12  }
   0x2   : > { %p138_p1 = scmp.lt.s32.totalorder %s569_s12, 3 }
   0x4   : > { %p139_p2 = pnand %p467_p0, %p138_p1 }
   0x5   : > { %s468_s14 = sshll.u32 (!%p139_p2), %s463_s13, 5 }
   0x6   : > { %142 = sbr.rel (%p139_p2) target bundleno = 63 (0x3f), region = 32  ;;  %p163_p3 = scmp.lt.s32.totalorder (!%p139_p2), %s468_s14, 63 }
   0xb   : > { %s778_s14 = smov (!%p163_p3, %s468_s14), 63  ;;  %v612_v0 = vld [vmem:[%s774_s1] ss:$0 sm:$0xff]  ;;  %vm374_vm0 = vcmask 60416  }
   0xc   : > { %s469_s15 = sshll.u32 %s778_s14, 2  ;;  %v620_v5 = vld [vmem:[%s775_s2] ss:$0 sm:$0xff] }
   0xd   : > { %s607_s18 = scalar_lea.vmem %s773_s0, %s469_s15  ;;  %s644_s25 = scalar_lea.vmem %s776_s3, %s469_s15 }
   0xe   : > { %v475_v1 = vld [vmem:[%s607_s18] sm:$0xff]   ;;  %v538_v2 = vld [vmem:[%s607_s18 + $0x8] sm:$0xff]   ;;  %v539_v3 = vld [vmem:[%s607_s18 + $0x10] sm:$0xff]  }
   0xf   : > { %v476_v4 = vunpack.c.l.bf16 %v475_v1  ;;  %v477_v6 = vunpack.c.h.bf16 %v475_v1  ;;  %v480_v7 = vunpack.c.l.bf16 %v538_v2  ;;  %v481_v8 = vunpack.c.h.bf16 %v538_v2  ;;  %v540_v9 = vld [vmem:[%s607_s18 + $0x18] sm:$0xff]   ;;  %v541_v38 = vld [vmem:[%s607_s18 + $0x20] sm:$0xff]   ;;  %v542_v39 = vld [vmem:[%s607_s18 + $0x28] sm:$0xff]  }
  0x10   : > { %v484_v10 = vunpack.c.l.bf16 %v539_v3  ;;  %v485_v11 = vunpack.c.h.bf16 %v539_v3  ;;  %v488_v12 = vunpack.c.l.bf16 %v540_v9  ;;  %v489_v13 = vunpack.c.h.bf16 %v540_v9  ;;  %v543_v44 = vld [vmem:[%s607_s18 + $0x30] sm:$0xff]   ;;  %v544_v45 = vld [vmem:[%s607_s18 + $0x38] sm:$0xff]  }
  0x11   : > { %v242_v14 = vmul.f32 %v612_v0, %v476_v4  ;;  %v243_v15 = vmul.f32 %v612_v0, %v477_v6  ;;  %v244_v16 = vmul.f32 %v612_v0, %v480_v7  ;;  %v245_v17 = vmul.f32 %v612_v0, %v481_v8 }
  0x12   : > { %v246_v18 = vmul.f32 %v612_v0, %v484_v10  ;;  %v247_v19 = vmul.f32 %v612_v0, %v485_v11  ;;  %v248_v20 = vmul.f32 %v612_v0, %v488_v12  ;;  %v249_v21 = vmul.f32 %v612_v0, %v489_v13  ;;  %v545_v12 = vld [vmem:[%s607_s18 + $0x40] sm:$0xff]   ;;  %v546_v13 = vld [vmem:[%s607_s18 + $0x48] sm:$0xff]  }
  0x13   : > { %v278_v22 = vadd.f32 %v620_v5, %v242_v14  ;;  %v279_v23 = vadd.f32 %v620_v5, %v243_v15  ;;  %v280_v24 = vadd.f32 %v620_v5, %v244_v16  ;;  %v281_v25 = vadd.f32 %v620_v5, %v245_v17 }
  0x14   : > { %v282_v26 = vadd.f32 %v620_v5, %v246_v18  ;;  %v283_v27 = vadd.f32 %v620_v5, %v247_v19  ;;  %v284_v28 = vadd.f32 %v620_v5, %v248_v20  ;;  %v285_v29 = vadd.f32 %v620_v5, %v249_v21 }
  0x15   : > { %v310_v30 = vmax.f32 %v278_v22, 0.0  ;;  %v311_v31 = vmax.f32 %v279_v23, 0.0  ;;  %v312_v32 = vmax.f32 %v280_v24, 0.0  ;;  %v313_v33 = vmax.f32 %v281_v25, 0.0 }
  0x16   : > { %v314_v34 = vmax.f32 %v282_v26, 0.0  ;;  %v315_v35 = vmax.f32 %v283_v27, 0.0  ;;  %v316_v36 = vmax.f32 %v284_v28, 0.0  ;;  %v317_v37 = vmax.f32 %v285_v29, 0.0  ;;  %v547_v26 = vld [vmem:[%s607_s18 + $0x50] sm:$0xff]   ;;  %v548_v27 = vld [vmem:[%s607_s18 + $0x58] sm:$0xff]  }
  0x17   : > { %v342_v40 = vpack.c.bf16 %v310_v30, %v310_v30  ;;  %v343_v41 = vpack.c.bf16 %v311_v31, %v311_v31  ;;  %v344_v42 = vpack.c.bf16 %v312_v32, %v312_v32  ;;  %v345_v43 = vpack.c.bf16 %v313_v33, %v313_v33 }
  0x18   : > { %v346_v46 = vpack.c.bf16 %v314_v34, %v314_v34  ;;  %v347_v47 = vpack.c.bf16 %v315_v35, %v315_v35  ;;  %v348_v48 = vpack.c.bf16 %v316_v36, %v316_v36  ;;  %v349_v49 = vpack.c.bf16 %v317_v37, %v317_v37 }
  0x19   : > { %375 = vst.msk [vmem:[%s644_s25] sm:$0xf] %vm374_vm0, %v342_v40  ;;  %v492_v50 = vunpack.c.l.bf16 %v541_v38  ;;  %v493_v51 = vunpack.c.h.bf16 %v541_v38  ;;  %v496_v52 = vunpack.c.l.bf16 %v542_v39  ;;  %v497_v53 = vunpack.c.h.bf16 %v542_v39 }
  0x1a   : > { %376 = vst.msk [vmem:[%s644_s25 + $0x4] sm:$0xf] %vm374_vm0, %v343_v41  ;;  %v500_v54 = vunpack.c.l.bf16 %v543_v44  ;;  %v501_v55 = vunpack.c.h.bf16 %v543_v44  ;;  %v504_v56 = vunpack.c.l.bf16 %v544_v45  ;;  %v505_v57 = vunpack.c.h.bf16 %v544_v45 }
  0x1b   : > { %377 = vst.msk [vmem:[%s644_s25 + $0x8] sm:$0xf] %vm374_vm0, %v344_v42  ;;  %v250_v58 = vmul.f32 %v612_v0, %v492_v50  ;;  %v251_v59 = vmul.f32 %v612_v0, %v493_v51  ;;  %v252_v60 = vmul.f32 %v612_v0, %v496_v52  ;;  %v253_v61 = vmul.f32 %v612_v0, %v497_v53 }
  0x1c   : > { %378 = vst.msk [vmem:[%s644_s25 + $0xc] sm:$0xf] %vm374_vm0, %v345_v43  ;;  %v254_v62 = vmul.f32 %v612_v0, %v500_v54  ;;  %v255_v63 = vmul.f32 %v612_v0, %v501_v55  ;;  %v256_v1 = vmul.f32 %v612_v0, %v504_v56  ;;  %v257_v2 = vmul.f32 %v612_v0, %v505_v57  ;;  %v549_v56 = vld [vmem:[%s607_s18 + $0x60] sm:$0xff]   ;;  %v550_v57 = vld [vmem:[%s607_s18 + $0x68] sm:$0xff]  }
  0x1d   : > { %379 = vst.msk [vmem:[%s644_s25 + $0x10] sm:$0xf] %vm374_vm0, %v346_v46  ;;  %v286_v3 = vadd.f32 %v620_v5, %v250_v58  ;;  %v287_v4 = vadd.f32 %v620_v5, %v251_v59  ;;  %v288_v6 = vadd.f32 %v620_v5, %v252_v60  ;;  %v289_v7 = vadd.f32 %v620_v5, %v253_v61 }
  0x1e   : > { %380 = vst.msk [vmem:[%s644_s25 + $0x14] sm:$0xf] %vm374_vm0, %v347_v47  ;;  %v290_v8 = vadd.f32 %v620_v5, %v254_v62  ;;  %v291_v9 = vadd.f32 %v620_v5, %v255_v63  ;;  %v292_v10 = vadd.f32 %v620_v5, %v256_v1  ;;  %v293_v11 = vadd.f32 %v620_v5, %v257_v2 }
  0x1f   : > { %381 = vst.msk [vmem:[%s644_s25 + $0x18] sm:$0xf] %vm374_vm0, %v348_v48  ;;  %v318_v14 = vmax.f32 %v286_v3, 0.0  ;;  %v319_v15 = vmax.f32 %v287_v4, 0.0  ;;  %v320_v16 = vmax.f32 %v288_v6, 0.0  ;;  %v321_v17 = vmax.f32 %v289_v7, 0.0 }
  0x20   : > { %382 = vst.msk [vmem:[%s644_s25 + $0x1c] sm:$0xf] %vm374_vm0, %v349_v49  ;;  %v322_v18 = vmax.f32 %v290_v8, 0.0  ;;  %v323_v19 = vmax.f32 %v291_v9, 0.0  ;;  %v324_v20 = vmax.f32 %v292_v10, 0.0  ;;  %v325_v21 = vmax.f32 %v293_v11, 0.0 }
  0x21   : > { %v350_v22 = vpack.c.bf16 %v318_v14, %v318_v14  ;;  %v351_v23 = vpack.c.bf16 %v319_v15, %v319_v15  ;;  %v352_v24 = vpack.c.bf16 %v320_v16, %v320_v16  ;;  %v353_v25 = vpack.c.bf16 %v321_v17, %v321_v17  ;;  %v551_v8 = vld [vmem:[%s607_s18 + $0x70] sm:$0xff]   ;;  %v552_v9 = vld [vmem:[%s607_s18 + $0x78] sm:$0xff]  }
  0x22   : > { %v354_v28 = vpack.c.bf16 %v322_v18, %v322_v18  ;;  %v355_v29 = vpack.c.bf16 %v323_v19, %v323_v19  ;;  %v356_v30 = vpack.c.bf16 %v324_v20, %v324_v20  ;;  %v357_v31 = vpack.c.bf16 %v325_v21, %v325_v21 }
  0x23   : > { %383 = vst.msk [vmem:[%s644_s25 + $0x20] sm:$0xf] %vm374_vm0, %v350_v22  ;;  %v508_v32 = vunpack.c.l.bf16 %v545_v12  ;;  %v509_v33 = vunpack.c.h.bf16 %v545_v12  ;;  %v512_v34 = vunpack.c.l.bf16 %v546_v13  ;;  %v513_v35 = vunpack.c.h.bf16 %v546_v13 }
  0x24   : > { %384 = vst.msk [vmem:[%s644_s25 + $0x24] sm:$0xf] %vm374_vm0, %v351_v23  ;;  %v516_v36 = vunpack.c.l.bf16 %v547_v26  ;;  %v517_v37 = vunpack.c.h.bf16 %v547_v26  ;;  %v520_v38 = vunpack.c.l.bf16 %v548_v27  ;;  %v521_v39 = vunpack.c.h.bf16 %v548_v27 }
  0x25   : > { %385 = vst.msk [vmem:[%s644_s25 + $0x28] sm:$0xf] %vm374_vm0, %v352_v24  ;;  %v258_v40 = vmul.f32 %v612_v0, %v508_v32  ;;  %v259_v41 = vmul.f32 %v612_v0, %v509_v33  ;;  %v260_v42 = vmul.f32 %v612_v0, %v512_v34  ;;  %v261_v43 = vmul.f32 %v612_v0, %v513_v35 }
  0x26   : > { %386 = vst.msk [vmem:[%s644_s25 + $0x2c] sm:$0xf] %vm374_vm0, %v353_v25  ;;  %v262_v44 = vmul.f32 %v612_v0, %v516_v36  ;;  %v263_v45 = vmul.f32 %v612_v0, %v517_v37  ;;  %v264_v46 = vmul.f32 %v612_v0, %v520_v38  ;;  %v265_v47 = vmul.f32 %v612_v0, %v521_v39 }
  0x27   : > { %387 = vst.msk [vmem:[%s644_s25 + $0x30] sm:$0xf] %vm374_vm0, %v354_v28  ;;  %v294_v48 = vadd.f32 %v620_v5, %v258_v40  ;;  %v295_v49 = vadd.f32 %v620_v5, %v259_v41  ;;  %v296_v50 = vadd.f32 %v620_v5, %v260_v42  ;;  %v297_v51 = vadd.f32 %v620_v5, %v261_v43 }
  0x28   : > { %388 = vst.msk [vmem:[%s644_s25 + $0x34] sm:$0xf] %vm374_vm0, %v355_v29  ;;  %v298_v52 = vadd.f32 %v620_v5, %v262_v44  ;;  %v299_v53 = vadd.f32 %v620_v5, %v263_v45  ;;  %v300_v54 = vadd.f32 %v620_v5, %v264_v46  ;;  %v301_v55 = vadd.f32 %v620_v5, %v265_v47 }
  0x29   : > { %389 = vst.msk [vmem:[%s644_s25 + $0x38] sm:$0xf] %vm374_vm0, %v356_v30  ;;  %v326_v58 = vmax.f32 %v294_v48, 0.0  ;;  %v327_v59 = vmax.f32 %v295_v49, 0.0  ;;  %v328_v60 = vmax.f32 %v296_v50, 0.0  ;;  %v329_v61 = vmax.f32 %v297_v51, 0.0 }
  0x2a   : > { %390 = vst.msk [vmem:[%s644_s25 + $0x3c] sm:$0xf] %vm374_vm0, %v357_v31  ;;  %v330_v62 = vmax.f32 %v298_v52, 0.0  ;;  %v331_v63 = vmax.f32 %v299_v53, 0.0  ;;  %v332_v1 = vmax.f32 %v300_v54, 0.0  ;;  %v333_v2 = vmax.f32 %v301_v55, 0.0 }
  0x2b   : > { %v358_v3 = vpack.c.bf16 %v326_v58, %v326_v58  ;;  %v359_v4 = vpack.c.bf16 %v327_v59, %v327_v59  ;;  %v360_v6 = vpack.c.bf16 %v328_v60, %v328_v60  ;;  %v361_v7 = vpack.c.bf16 %v329_v61, %v329_v61 }
  0x2c   : > { %v362_v10 = vpack.c.bf16 %v330_v62, %v330_v62  ;;  %v363_v11 = vpack.c.bf16 %v331_v63, %v331_v63  ;;  %v364_v12 = vpack.c.bf16 %v332_v1, %v332_v1  ;;  %v365_v13 = vpack.c.bf16 %v333_v2, %v333_v2 }
  0x2d   : > { %391 = vst.msk [vmem:[%s644_s25 + $0x40] sm:$0xf] %vm374_vm0, %v358_v3  ;;  %v524_v14 = vunpack.c.l.bf16 %v549_v56  ;;  %v525_v15 = vunpack.c.h.bf16 %v549_v56  ;;  %v528_v16 = vunpack.c.l.bf16 %v550_v57  ;;  %v529_v17 = vunpack.c.h.bf16 %v550_v57 }
  0x2e   : > { %392 = vst.msk [vmem:[%s644_s25 + $0x44] sm:$0xf] %vm374_vm0, %v359_v4  ;;  %v532_v18 = vunpack.c.l.bf16 %v551_v8  ;;  %v533_v19 = vunpack.c.h.bf16 %v551_v8  ;;  %v536_v20 = vunpack.c.l.bf16 %v552_v9  ;;  %v537_v21 = vunpack.c.h.bf16 %v552_v9 }
  0x2f   : > { %393 = vst.msk [vmem:[%s644_s25 + $0x48] sm:$0xf] %vm374_vm0, %v360_v6  ;;  %v266_v22 = vmul.f32 %v612_v0, %v524_v14  ;;  %v267_v23 = vmul.f32 %v612_v0, %v525_v15  ;;  %v268_v24 = vmul.f32 %v612_v0, %v528_v16  ;;  %v269_v25 = vmul.f32 %v612_v0, %v529_v17 }
  0x30   : > { %394 = vst.msk [vmem:[%s644_s25 + $0x4c] sm:$0xf] %vm374_vm0, %v361_v7  ;;  %v270_v26 = vmul.f32 %v612_v0, %v532_v18  ;;  %v271_v27 = vmul.f32 %v612_v0, %v533_v19  ;;  %v272_v28 = vmul.f32 %v612_v0, %v536_v20  ;;  %v273_v29 = vmul.f32 %v612_v0, %v537_v21 }
  0x31   : > { %395 = vst.msk [vmem:[%s644_s25 + $0x50] sm:$0xf] %vm374_vm0, %v362_v10  ;;  %v302_v30 = vadd.f32 %v620_v5, %v266_v22  ;;  %v303_v31 = vadd.f32 %v620_v5, %v267_v23  ;;  %v304_v32 = vadd.f32 %v620_v5, %v268_v24  ;;  %v305_v33 = vadd.f32 %v620_v5, %v269_v25 }
  0x32   : > { %396 = vst.msk [vmem:[%s644_s25 + $0x54] sm:$0xf] %vm374_vm0, %v363_v11  ;;  %v306_v34 = vadd.f32 %v620_v5, %v270_v26  ;;  %v307_v35 = vadd.f32 %v620_v5, %v271_v27  ;;  %v308_v36 = vadd.f32 %v620_v5, %v272_v28  ;;  %v309_v0 = vadd.f32 %v620_v5, %v273_v29 }
  0x33   : > { %397 = vst.msk [vmem:[%s644_s25 + $0x58] sm:$0xf] %vm374_vm0, %v364_v12  ;;  %v334_v37 = vmax.f32 %v302_v30, 0.0  ;;  %v335_v38 = vmax.f32 %v303_v31, 0.0  ;;  %v336_v39 = vmax.f32 %v304_v32, 0.0  ;;  %v337_v40 = vmax.f32 %v305_v33, 0.0 }
  0x34   : > { %398 = vst.msk [vmem:[%s644_s25 + $0x5c] sm:$0xf] %vm374_vm0, %v365_v13  ;;  %v338_v41 = vmax.f32 %v306_v34, 0.0  ;;  %v339_v42 = vmax.f32 %v307_v35, 0.0  ;;  %v340_v45 = vmax.f32 %v308_v36, 0.0  ;;  %v341_v47 = vmax.f32 %v309_v0, 0.0 }
  0x35   : > { %v366_v43 = vpack.c.bf16 %v334_v37, %v334_v37  ;;  %v367_v44 = vpack.c.bf16 %v335_v38, %v335_v38  ;;  %v368_v5 = vpack.c.bf16 %v336_v39, %v336_v39  ;;  %v369_v46 = vpack.c.bf16 %v337_v40, %v337_v40 }
  0x36   : > { %v370_v48 = vpack.c.bf16 %v338_v41, %v338_v41  ;;  %v371_v49 = vpack.c.bf16 %v339_v42, %v339_v42  ;;  %v372_v50 = vpack.c.bf16 %v340_v45, %v340_v45  ;;  %v373_v51 = vpack.c.bf16 %v341_v47, %v341_v47 }
  0x37   : > { %399 = vst.msk [vmem:[%s644_s25 + $0x60] sm:$0xf] %vm374_vm0, %v366_v43 }
  0x38   : > { %400 = vst.msk [vmem:[%s644_s25 + $0x64] sm:$0xf] %vm374_vm0, %v367_v44 }
  0x39   : > { %401 = vst.msk [vmem:[%s644_s25 + $0x68] sm:$0xf] %vm374_vm0, %v368_v5 }
  0x3a   : > { %402 = vst.msk [vmem:[%s644_s25 + $0x6c] sm:$0xf] %vm374_vm0, %v369_v46 }
  0x3b   : > { %403 = vst.msk [vmem:[%s644_s25 + $0x70] sm:$0xf] %vm374_vm0, %v370_v48 }
  0x3c   : > { %404 = vst.msk [vmem:[%s644_s25 + $0x74] sm:$0xf] %vm374_vm0, %v371_v49 }
  0x3d   : > { %405 = vst.msk [vmem:[%s644_s25 + $0x78] sm:$0xf] %vm374_vm0, %v372_v50 }
  0x3e   : > { %406 = vst.msk [vmem:[%s644_s25 + $0x7c] sm:$0xf] %vm374_vm0, %v373_v51 }
  0x3f PF: > { %s13_s12 = sadd.s32 1, %s569_s12  }
  0x40   : > { %p10_p4 = scmp.ge.s32.totalorder %s13_s12, 4  }
  0x42   :  { %12 = sbr.rel (!%p10_p4) target bundleno = 1 (0x1), region = 62 }

// kernel: xfeat_forward.54
= control target key start
LH: loop header
LB: loop body
LE: loop exit
PB: predicated region body
PF: predicated region fallthrough
CT: control target
= control target key end

     0   :  { %s1037_s15 = smov 0   ;;  %s1419_s0 = inlined_call_operand.vmem [shape: bf16[512,72], index: 0, kind: input, shape index: {}]   ;;  %s1420_s1 = inlined_call_operand.vmem [shape: bf16[72,8], index: 1, kind: input, shape index: {}]   ;;  %s1421_s2 = inlined_call_operand.vmem [shape: bf16[512,8], index: 2, kind: output, shape index: {0}]   ;;  %s1422_s3 = inlined_call_operand.vmem [shape: f32[2,1,8], index: 3, kind: output, shape index: {1}]   ;;  %s1423_s4 = inlined_call_operand.vmem [shape: f32[2,1,8], index: 4, kind: output, shape index: {2}]  }
   0x1 LB: > { %s1043_s16 = sadd.s32 4294967295, %s1010_s15   ;;  %p858_p0 = scmp.ge.s32.totalorder %s1010_s15, 1  ;;  %s1010_s15 = sphi %s1037_s15, %s15_s15  }
   0x2   : > { %p168_p1 = scmp.lt.s32.totalorder %s1010_s15, 3 }
   0x4   : > { %p169_p2 = pnand %p858_p0, %p168_p1 }
   0x5   : > { %s859_s19 = sshll.u32 (!%p169_p2), %s1043_s16, 5  ;;  %p212_p4 = scmp.lt.s32.totalorder (!%p169_p2), %s1043_s16, 1 }
   0x6   : > { %172 = sbr.rel (%p169_p2) target bundleno = 284 (0x11c), region = 28  ;;  %p201_p3 = scmp.lt.s32.totalorder (!%p169_p2), %s859_s19, 63 }
   0xb   : > { %v259_v0 = vld [vmem:[%s1420_s1 + $0x20] sm:$0xf]  ;;  %vm416_vm0 = vcmask 1043456   ;;  %v980_v4 = vld [vmem:[%s1420_s1 + $0x18] sm:$0xff]  ;;  %v979_v5 = vld [vmem:[%s1420_s1 + $0x10] sm:$0xff]  ;;  %s1425_s19 = smov (!%p201_p3, %s859_s19), 63 }
   0xc   : > { %v357_v1 = vunpack.c.l.b16 %v259_v0  ;;  %v978_v6 = vld [vmem:[%s1420_s1 + $0x8] sm:$0xff]  ;;  %s860_s26 = sshll.u32 %s1425_s19, 2  ;;  %v977_v7 = vld [vmem:[%s1420_s1] sm:$0xff]  ;;  %vm367_vm1 = vcmask 588800   ;;  %vm541_vm2 = vcmask 60416   ;;  %vm574_vm3 = vcmask 64512  }
   0xd   : > { %s1071_s5 = scalar_lea.vmem %s1419_s0, %s860_s26  ;;  %s1110_s8 = scalar_lea.vmem %s1421_s2, %s860_s26  ;;  %vm644_vm4 = vcmask 57344  }
   0xe   : > { %v362_v2 = vpack.c.b16 %v357_v1, %v357_v1  ;;  %v961_v8 = vld [vmem:[%s1071_s5] sm:$0xff]  ;;  %v962_v12 = vld [vmem:[%s1071_s5 + $0x8] sm:$0xff]  ;;  %v963_v16 = vld [vmem:[%s1071_s5 + $0x10] sm:$0xff]  ;;  %s1427_s16 = smov (!%p212_p4, %s1043_s16), 1 }
   0xf   : > { %v965_v9 = vld [vmem:[%s1071_s5 + $0x20] sm:$0xff]  ;;  %v966_v13 = vld [vmem:[%s1071_s5 + $0x28] sm:$0xff]  ;;  %v967_v17 = vld [vmem:[%s1071_s5 + $0x30] sm:$0xff]  ;;  %s214_s11 = scalar_lea.vmem %s1422_s3, %s1427_s16  ;;  %s217_s14 = scalar_lea.vmem %s1423_s4, %s1427_s16 }
  0x10   : > { %v418_v3 = vsel %vm416_vm0, %v362_v2, 0  ;;  %v969_v10 = vld [vmem:[%s1071_s5 + $0x40] sm:$0xff]  ;;  %v970_v14 = vld [vmem:[%s1071_s5 + $0x48] sm:$0xff]  ;;  %v971_v18 = vld [vmem:[%s1071_s5 + $0x50] sm:$0xff] }
  0x11   : > { %423 = vmatpush.bf16.msra.mxu0 %v418_v3  ;;  %981 = vmatpush.bf16.msra.mxu1 %v418_v3  ;;  %v973_v11 = vld [vmem:[%s1071_s5 + $0x60] sm:$0xff]  ;;  %v974_v15 = vld [vmem:[%s1071_s5 + $0x68] sm:$0xff]  ;;  %v975_v19 = vld [vmem:[%s1071_s5 + $0x70] sm:$0xff] }
  0x12   : > { %982 = vmatpush.bf16.msra.mxu2 %v418_v3  ;;  %983 = vmatpush.bf16.msra.mxu3 %v418_v3  ;;  %v964_v20 = vld [vmem:[%s1071_s5 + $0x18] sm:$0xff] }
  0x13   : > { %v968_v21 = vld [vmem:[%s1071_s5 + $0x38] sm:$0xff] }
  0x14   : > { %v972_v22 = vld [vmem:[%s1071_s5 + $0x58] sm:$0xff] }
  0x15   : > { %424 = vmatpush.bf16.msra.mxu0 %v980_v4  ;;  %984 = vmatpush.bf16.msra.mxu1 %v980_v4  ;;  %v976_v23 = vld [vmem:[%s1071_s5 + $0x78] sm:$0xff] }
  0x16   : > { %985 = vmatpush.bf16.msra.mxu2 %v980_v4  ;;  %986 = vmatpush.bf16.msra.mxu3 %v980_v4 }
  0x19   : > { %425 = vmatpush.bf16.msra.mxu0 %v979_v5  ;;  %987 = vmatpush.bf16.msra.mxu1 %v979_v5 }
  0x1a   : > { %988 = vmatpush.bf16.msra.mxu2 %v979_v5  ;;  %989 = vmatpush.bf16.msra.mxu3 %v979_v5 }
  0x1d   : > { %426 = vmatpush.bf16.msra.mxu0 %v978_v6  ;;  %990 = vmatpush.bf16.msra.mxu1 %v978_v6 }
  0x1e   : > { %991 = vmatpush.bf16.msra.mxu2 %v978_v6  ;;  %992 = vmatpush.bf16.msra.mxu3 %v978_v6 }
  0x21   : > { %427 = vmatpush.bf16.msra.mxu0 %v977_v7  ;;  %993 = vmatpush.bf16.msra.mxu1 %v977_v7 }
  0x22   : > { %994 = vmatpush.bf16.msra.mxu2 %v977_v7  ;;  %995 = vmatpush.bf16.msra.mxu3 %v977_v7 }
  0x24   : > { %943 = vmatmul.msk.bf16.vlgmr.msra.gmra.mxu0 %vm367_vm1, %v961_v8  ;;  %947 = vmatmul.msk.bf16.vlgmr.msra.gmra.mxu1 %vm367_vm1, %v965_v9 }
  0x25   : > { %951 = vmatmul.msk.bf16.vlgmr.msra.gmra.mxu2 %vm367_vm1, %v969_v10  ;;  %955 = vmatmul.msk.bf16.vlgmr.msra.gmra.mxu3 %vm367_vm1, %v973_v11 }
  0x34   : > { %944 = vmatmul.msk.bf16.gmra.mxu0 %vm367_vm1, %v962_v12  ;;  %948 = vmatmul.msk.bf16.gmra.mxu1 %vm367_vm1, %v966_v13 }
  0x35   : > { %952 = vmatmul.msk.bf16.gmra.mxu2 %vm367_vm1, %v970_v14  ;;  %956 = vmatmul.msk.bf16.gmra.mxu3 %vm367_vm1, %v974_v15 }
  0x44   : > { %945 = vmatmul.msk.bf16.gmra.mxu0 %vm367_vm1, %v963_v16  ;;  %949 = vmatmul.msk.bf16.gmra.mxu1 %vm367_vm1, %v967_v17 }
  0x45   : > { %953 = vmatmul.msk.bf16.gmra.mxu2 %vm367_vm1, %v971_v18  ;;  %957 = vmatmul.msk.bf16.gmra.mxu3 %vm367_vm1, %v975_v19 }
  0x54   : > { %946 = vmatmul.msk.bf16.gmra.mxu0 %vm367_vm1, %v964_v20  ;;  %950 = vmatmul.msk.bf16.gmra.mxu1 %vm367_vm1, %v968_v21 }
  0x55   : > { %954 = vmatmul.msk.bf16.gmra.mxu2 %vm367_vm1, %v972_v22  ;;  %958 = vmatmul.msk.bf16.gmra.mxu3 %vm367_vm1, %v976_v23 }
  0xa1   : > { %v1112_v24 = vpop.f32.mrf.mxu0  ;;  %v1114_v25 = vpop.f32.mrf.mxu1 }
  0xa2   : > { %v509_v26 = vpack.c.bf16 %v1112_v24, %v1112_v24  ;;  %v517_v27 = vpack.c.bf16 %v1114_v25, %v1114_v25  ;;  %v646_v4 = vmul.f32 %v1112_v24, %v1112_v24  ;;  %v575_v8 = vsel %vm574_vm3, %v1112_v24, 0.0 }
  0xa4   : > { %542 = vst.msk [vmem:[%s1110_s8] sm:$0xf] %vm541_vm2, %v509_v26  ;;  %v678_v12 = vsel %vm574_vm3, %v646_v4, 0.0 }
  0xa5   : > { %550 = vst.msk [vmem:[%s1110_s8 + $0x20] sm:$0xf] %vm541_vm2, %v517_v27 }
  0xa8   : > { %v1124_v28 = vpop.f32.mrf.mxu2  ;;  %v1132_v34 = vpop.f32.mrf.mxu3 }
  0xa9   : > { %v431_v29 = vpop.f32.mrf.mxu0  ;;  %v1126_v30 = vpop.f32.mrf.mxu1  ;;  %v525_v31 = vpack.c.bf16 %v1124_v28, %v1124_v28  ;;  %v533_v35 = vpack.c.bf16 %v1132_v34, %v1132_v34 }
  0xaa   : > { %v510_v32 = vpack.c.bf16 %v431_v29, %v431_v29  ;;  %v518_v33 = vpack.c.bf16 %v1126_v30, %v1126_v30  ;;  %v647_v0 = vmul.f32 %v431_v29, %v431_v29  ;;  %v576_v5 = vsel %vm574_vm3, %v431_v29, 0.0 }
  0xab   : > { %558 = vst.msk [vmem:[%s1110_s8 + $0x40] sm:$0xf] %vm541_vm2, %v525_v31  ;;  %v577_v11 = vadd.f32 %v576_v5, %v575_v8  ;;  %v590_v8 = vsel %vm574_vm3, %v1114_v25, 0.0 }
  0xac   : > { %543 = vst.msk [vmem:[%s1110_s8 + $0x4] sm:$0xf] %vm541_vm2, %v510_v32  ;;  %v679_v9 = vsel %vm574_vm3, %v647_v0, 0.0 }
  0xad   : > { %551 = vst.msk [vmem:[%s1110_s8 + $0x24] sm:$0xf] %vm541_vm2, %v518_v33  ;;  %v680_v17 = vadd.f32 %v679_v9, %v678_v12  ;;  %v655_v9 = vmul.f32 %v1126_v30, %v1126_v30 }
  0xae   : > { %566 = vst.msk [vmem:[%s1110_s8 + $0x60] sm:$0xf] %vm541_vm2, %v533_v35 }
  0xb0   : > { %v1144_v36 = vpop.f32.mrf.mxu2  ;;  %v1152_v42 = vpop.f32.mrf.mxu3 }
  0xb1   : > { %v434_v37 = vpop.f32.mrf.mxu0  ;;  %v1146_v38 = vpop.f32.mrf.mxu1  ;;  %v526_v39 = vpack.c.bf16 %v1144_v36, %v1144_v36  ;;  %v534_v43 = vpack.c.bf16 %v1152_v42, %v1152_v42 }
  0xb2   : > { %v511_v40 = vpack.c.bf16 %v434_v37, %v434_v37  ;;  %v519_v41 = vpack.c.bf16 %v1146_v38, %v1146_v38  ;;  %v648_v6 = vmul.f32 %v434_v37, %v434_v37  ;;  %v578_v10 = vsel %vm574_vm3, %v434_v37, 0.0 }
  0xb3   : > { %559 = vst.msk [vmem:[%s1110_s8 + $0x44] sm:$0xf] %vm541_vm2, %v526_v39  ;;  %v579_v18 = vadd.f32 %v578_v10, %v577_v11 }
  0xb4   : > { %544 = vst.msk [vmem:[%s1110_s8 + $0x8] sm:$0xf] %vm541_vm2, %v511_v40  ;;  %v681_v13 = vsel %vm574_vm3, %v648_v6, 0.0 }
  0xb5   : > { %552 = vst.msk [vmem:[%s1110_s8 + $0x28] sm:$0xf] %vm541_vm2, %v519_v41  ;;  %v682_v31 = vadd.f32 %v681_v13, %v680_v17 }
  0xb6   : > { %567 = vst.msk [vmem:[%s1110_s8 + $0x64] sm:$0xf] %vm541_vm2, %v534_v43 }
  0xb8   : > { %v1164_v44 = vpop.f32.mrf.mxu2  ;;  %v1172_v50 = vpop.f32.mrf.mxu3 }
  0xb9   : > { %v436_v45 = vpop.f32.mrf.mxu0  ;;  %v1166_v46 = vpop.f32.mrf.mxu1  ;;  %v527_v47 = vpack.c.bf16 %v1164_v44, %v1164_v44  ;;  %v535_v58 = vpack.c.bf16 %v1172_v50, %v1172_v50 }
  0xba   : > { %v512_v48 = vpack.c.bf16 %v436_v45, %v436_v45  ;;  %v520_v49 = vpack.c.bf16 %v1166_v46, %v1166_v46  ;;  %v649_v7 = vmul.f32 %v436_v45, %v436_v45  ;;  %v580_v14 = vsel %vm574_vm3, %v436_v45, 0.0 }
  0xbb   : > { %560 = vst.msk [vmem:[%s1110_s8 + $0x48] sm:$0xf] %vm541_vm2, %v527_v47  ;;  %v581_v32 = vadd.f32 %v580_v14, %v579_v18  ;;  %v592_v14 = vsel %vm574_vm3, %v1126_v30, 0.0  ;;  %v695_v18 = vsel %vm574_vm3, %v655_v9, 0.0 }
  0xbc   : > { %545 = vst.msk [vmem:[%s1110_s8 + $0xc] sm:$0xf] %vm541_vm2, %v512_v48  ;;  %v683_v19 = vsel %vm574_vm3, %v649_v7, 0.0 }
  0xbd   : > { %553 = vst.msk [vmem:[%s1110_s8 + $0x2c] sm:$0xf] %vm541_vm2, %v520_v49  ;;  %v684_v40 = vadd.f32 %v683_v19, %v682_v31  ;;  %v594_v19 = vsel %vm574_vm3, %v1146_v38, 0.0 }
  0xbe   : > { %568 = vst.msk [vmem:[%s1110_s8 + $0x68] sm:$0xf] %vm541_vm2, %v535_v58 }
  0xc0   : > { %v1180_v51 = vpop.f32.mrf.mxu2  ;;  %v1188_v57 = vpop.f32.mrf.mxu3 }
  0xc1   : > { %v439_v52 = vpop.f32.mrf.mxu0  ;;  %v1182_v53 = vpop.f32.mrf.mxu1  ;;  %v528_v54 = vpack.c.bf16 %v1180_v51, %v1180_v51  ;;  %v536_v59 = vpack.c.bf16 %v1188_v57, %v1188_v57 }
  0xc2   : > { %v513_v55 = vpack.c.bf16 %v439_v52, %v439_v52  ;;  %v521_v56 = vpack.c.bf16 %v1182_v53, %v1182_v53  ;;  %v650_v15 = vmul.f32 %v439_v52, %v439_v52  ;;  %v582_v23 = vsel %vm574_vm3, %v439_v52, 0.0 }
  0xc3   : > { %561 = vst.msk [vmem:[%s1110_s8 + $0x4c] sm:$0xf] %vm541_vm2, %v528_v54  ;;  %v583_v41 = vadd.f32 %v582_v23, %v581_v32 }
  0xc4   : > { %546 = vst.msk [vmem:[%s1110_s8 + $0x10] sm:$0xf] %vm541_vm2, %v513_v55  ;;  %v685_v33 = vsel %vm574_vm3, %v650_v15, 0.0  ;;  %v654_v55 = vmul.f32 %v1114_v25, %v1114_v25  ;;  %v656_v15 = vmul.f32 %v1146_v38, %v1146_v38  ;;  %v658_v38 = vmul.f32 %v1182_v53, %v1182_v53 }
  0xc5   : > { %554 = vst.msk [vmem:[%s1110_s8 + $0x30] sm:$0xf] %vm541_vm2, %v521_v56  ;;  %v686_v48 = vadd.f32 %v685_v33, %v684_v40 }
  0xc6   : > { %569 = vst.msk [vmem:[%s1110_s8 + $0x6c] sm:$0xf] %vm541_vm2, %v536_v59  ;;  %v693_v13 = vsel %vm574_vm3, %v654_v55, 0.0 }
  0xc8   : > { %v1204_v60 = vpop.f32.mrf.mxu2  ;;  %v1212_v3 = vpop.f32.mrf.mxu3 }
  0xc9   : > { %v441_v61 = vpop.f32.mrf.mxu0  ;;  %v1206_v62 = vpop.f32.mrf.mxu1  ;;  %v529_v63 = vpack.c.bf16 %v1204_v60, %v1204_v60  ;;  %v537_v39 = vpack.c.bf16 %v1212_v3, %v1212_v3 }
  0xca   : > { %v514_v1 = vpack.c.bf16 %v441_v61, %v441_v61  ;;  %v522_v2 = vpack.c.bf16 %v1206_v62, %v1206_v62  ;;  %v651_v24 = vmul.f32 %v441_v61, %v441_v61  ;;  %v584_v35 = vsel %vm574_vm3, %v441_v61, 0.0 }
  0xcb   : > { %562 = vst.msk [vmem:[%s1110_s8 + $0x50] sm:$0xf] %vm541_vm2, %v529_v63  ;;  %v585_v49 = vadd.f32 %v584_v35, %v583_v41  ;;  %v659_v40 = vmul.f32 %v1206_v62, %v1206_v62 }
  0xcc   : > { %547 = vst.msk [vmem:[%s1110_s8 + $0x14] sm:$0xf] %vm541_vm2, %v514_v1  ;;  %v687_v45 = vsel %vm574_vm3, %v651_v24, 0.0 }
  0xcd   : > { %555 = vst.msk [vmem:[%s1110_s8 + $0x34] sm:$0xf] %vm541_vm2, %v522_v2  ;;  %v688_v56 = vadd.f32 %v687_v45, %v686_v48  ;;  %v701_v45 = vsel %vm574_vm3, %v658_v38, 0.0 }
  0xce   : > { %570 = vst.msk [vmem:[%s1110_s8 + $0x70] sm:$0xf] %vm541_vm2, %v537_v39 }
  0xd0   : > { %v1230_v16 = vpop.f32.mrf.mxu2  ;;  %v1240_v29 = vpop.f32.mrf.mxu3 }
  0xd1   : > { %v444_v20 = vpop.f32.mrf.mxu0  ;;  %v1233_v21 = vpop.f32.mrf.mxu1  ;;  %v530_v22 = vpack.c.bf16 %v1230_v16, %v1230_v16  ;;  %v538_v43 = vpack.c.bf16 %v1240_v29, %v1240_v29 }
  0xd2   : > { %v515_v26 = vpack.c.bf16 %v444_v20, %v444_v20  ;;  %v523_v27 = vpack.c.bf16 %v1233_v21, %v1233_v21  ;;  %v652_v37 = vmul.f32 %v444_v20, %v444_v20  ;;  %v586_v47 = vsel %vm574_vm3, %v444_v20, 0.0 }
  0xd3   : > { %563 = vst.msk [vmem:[%s1110_s8 + $0x54] sm:$0xf] %vm541_vm2, %v530_v22  ;;  %v587_v58 = vadd.f32 %v586_v47, %v585_v49  ;;  %v657_v20 = vmul.f32 %v1166_v46, %v1166_v46  ;;  %v600_v47 = vsel %vm574_vm3, %v1206_v62, 0.0  ;;  %v660_v48 = vmul.f32 %v1233_v21, %v1233_v21 }
  0xd4   : > { %548 = vst.msk [vmem:[%s1110_s8 + $0x18] sm:$0xf] %vm541_vm2, %v515_v26  ;;  %v689_v52 = vsel %vm574_vm3, %v652_v37, 0.0  ;;  %v697_v26 = vsel %vm574_vm3, %v656_v15, 0.0  ;;  %v602_v55 = vsel %vm574_vm3, %v1233_v21, 0.0 }
  0xd5   : > { %556 = vst.msk [vmem:[%s1110_s8 + $0x38] sm:$0xf] %vm541_vm2, %v523_v27  ;;  %v690_v6 = vadd.f32 %v689_v52, %v688_v56  ;;  %v596_v27 = vsel %vm574_vm3, %v1166_v46, 0.0  ;;  %v699_v39 = vsel %vm574_vm3, %v657_v20, 0.0  ;;  %v598_v46 = vsel %vm574_vm3, %v1182_v53, 0.0 }
  0xd6   : > { %571 = vst.msk [vmem:[%s1110_s8 + $0x74] sm:$0xf] %vm541_vm2, %v538_v43  ;;  %v703_v53 = vsel %vm574_vm3, %v659_v40, 0.0  ;;  %v670_v40 = vmul.f32 %v1132_v34, %v1132_v34 }
  0xd8   : > { %v1261_v54 = vpop.f32.mrf.mxu2  ;;  %v1268_v5 = vpop.f32.mrf.mxu3 }
  0xd9   : > { %v446_v59 = vpop.f32.mrf.mxu0  ;;  %v466_v61 = vpop.f32.mrf.mxu1  ;;  %v531_v63 = vpack.c.bf16 %v1261_v54, %v1261_v54  ;;  %v539_v31 = vpack.c.bf16 %v1268_v5, %v1268_v5  ;;  %v668_v38 = vmul.f32 %v1261_v54, %v1261_v54 }
  0xda   : > { %v516_v0 = vpack.c.bf16 %v446_v59, %v446_v59  ;;  %v588_v1 = vsel %vm574_vm3, %v446_v59, 0.0  ;;  %v653_v2 = vmul.f32 %v446_v59, %v446_v59  ;;  %v524_v4 = vpack.c.bf16 %v466_v61, %v466_v61 }
  0xdb   : > { %v589_v7 = vadd.f32 %v588_v1, %v587_v58  ;;  %564 = vst.msk [vmem:[%s1110_s8 + $0x58] sm:$0xf] %vm541_vm2, %v531_v63  ;;  %v661_v56 = vmul.f32 %v466_v61, %v466_v61  ;;  %v662_v63 = vmul.f32 %v1124_v28, %v1124_v28  ;;  %v604_v62 = vsel %vm574_vm3, %v466_v61, 0.0 }
  0xdc   : > { %549 = vst.msk [vmem:[%s1110_s8 + $0x1c] sm:$0xf] %vm541_vm2, %v516_v0  ;;  %v691_v10 = vsel %vm574_vm3, %v653_v2, 0.0  ;;  %v705_v0 = vsel %vm574_vm3, %v660_v48, 0.0  ;;  %v664_v61 = vmul.f32 %v1164_v44, %v1164_v44 }
  0xdd   : > { %v591_v11 = vadd.f32 %v590_v8, %v589_v7  ;;  %v692_v12 = vadd.f32 %v691_v10, %v690_v6  ;;  %557 = vst.msk [vmem:[%s1110_s8 + $0x3c] sm:$0xf] %vm541_vm2, %v524_v4  ;;  %v606_v4 = vsel %vm574_vm3, %v1124_v28, 0.0  ;;  %v663_v6 = vmul.f32 %v1144_v36, %v1144_v36 }
  0xde   : > { %572 = vst.msk [vmem:[%s1110_s8 + $0x78] sm:$0xf] %vm541_vm2, %v539_v31  ;;  %v707_v21 = vsel %vm574_vm3, %v661_v56, 0.0  ;;  %v709_v9 = vsel %vm574_vm3, %v662_v63, 0.0  ;;  %v608_v10 = vsel %vm574_vm3, %v1144_v36, 0.0  ;;  %v610_v28 = vsel %vm574_vm3, %v1164_v44, 0.0 }
  0xdf   : > { %v593_v25 = vadd.f32 %v592_v14, %v591_v11  ;;  %v694_v17 = vadd.f32 %v693_v13, %v692_v12  ;;  %v711_v13 = vsel %vm574_vm3, %v663_v6, 0.0  ;;  %v665_v14 = vmul.f32 %v1180_v51, %v1180_v51 }
  0xe0   : > { %v1291_v22 = vpop.f32.mrf.mxu2  ;;  %v1302_v32 = vpop.f32.mrf.mxu3  ;;  %v612_v36 = vsel %vm574_vm3, %v1180_v51, 0.0  ;;  %v614_v44 = vsel %vm574_vm3, %v1204_v60, 0.0  ;;  %v616_v51 = vsel %vm574_vm3, %v1230_v16, 0.0  ;;  %v673_v63 = vmul.f32 %v1188_v57, %v1188_v57 }
  0xe1   : > { %v595_v23 = vadd.f32 %v594_v19, %v593_v25  ;;  %v696_v24 = vadd.f32 %v695_v18, %v694_v17  ;;  %v532_v30 = vpack.c.bf16 %v1291_v22, %v1291_v22  ;;  %v540_v37 = vpack.c.bf16 %v1302_v32, %v1302_v32 }
  0xe2   : > { %v713_v17 = vsel %vm574_vm3, %v664_v61, 0.0  ;;  %v666_v18 = vmul.f32 %v1204_v60, %v1204_v60  ;;  %v618_v60 = vsel %vm574_vm3, %v1261_v54, 0.0  ;;  %v671_v54 = vmul.f32 %v1152_v42, %v1152_v42 }
  0xe3   : > { %v698_v33 = vadd.f32 %v697_v26, %v696_v24  ;;  %v597_v35 = vadd.f32 %v596_v27, %v595_v23  ;;  %565 = vst.msk [vmem:[%s1110_s8 + $0x5c] sm:$0xf] %vm541_vm2, %v532_v30  ;;  %v715_v23 = vsel %vm574_vm3, %v665_v14, 0.0  ;;  %v667_v24 = vmul.f32 %v1230_v16, %v1230_v16 }
  0xe4   : > { %573 = vst.msk [vmem:[%s1110_s8 + $0x7c] sm:$0xf] %vm541_vm2, %v540_v37  ;;  %v717_v27 = vsel %vm574_vm3, %v666_v18, 0.0  ;;  %v669_v37 = vmul.f32 %v1291_v22, %v1291_v22  ;;  %v721_v16 = vsel %vm574_vm3, %v668_v38, 0.0  ;;  %v676_v61 = vmul.f32 %v1268_v5, %v1268_v5 }
  0xe5   : > { %v599_v41 = vadd.f32 %v598_v46, %v597_v35  ;;  %v700_v43 = vadd.f32 %v699_v39, %v698_v33  ;;  %v719_v35 = vsel %vm574_vm3, %v667_v24, 0.0 }
  0xe6   : > { %v723_v48 = vsel %vm574_vm3, %v669_v37, 0.0 }
  0xe7   : > { %v601_v49 = vadd.f32 %v600_v47, %v599_v41  ;;  %v702_v52 = vadd.f32 %v701_v45, %v700_v43  ;;  %v620_v41 = vsel %vm574_vm3, %v1291_v22, 0.0  ;;  %v622_v47 = vsel %vm574_vm3, %v1132_v34, 0.0 }
  0xe8   : > { %v672_v22 = vmul.f32 %v1172_v50, %v1172_v50  ;;  %v626_v34 = vsel %vm574_vm3, %v1172_v50, 0.0  ;;  %v630_v50 = vsel %vm574_vm3, %v1212_v3, 0.0 }
  0xe9   : > { %v603_v58 = vadd.f32 %v602_v55, %v601_v49  ;;  %v704_v59 = vadd.f32 %v703_v53, %v702_v52  ;;  %v725_v53 = vsel %vm574_vm3, %v670_v40, 0.0  ;;  %v624_v55 = vsel %vm574_vm3, %v1152_v42, 0.0 }
  0xea   : > { %v628_v42 = vsel %vm574_vm3, %v1188_v57, 0.0  ;;  %v632_v57 = vsel %vm574_vm3, %v1240_v29, 0.0 }
  0xeb   : > { %v706_v1 = vadd.f32 %v705_v0, %v704_v59  ;;  %v605_v2 = vadd.f32 %v604_v62, %v603_v58  ;;  %v727_v59 = vsel %vm574_vm3, %v671_v54, 0.0 }
  0xed   : > { %v607_v7 = vadd.f32 %v606_v4, %v605_v2  ;;  %v708_v8 = vadd.f32 %v707_v21, %v706_v1  ;;  %v729_v1 = vsel %vm574_vm3, %v672_v22, 0.0  ;;  %v674_v2 = vmul.f32 %v1212_v3, %v1212_v3 }
  0xee   : > { %v731_v21 = vsel %vm574_vm3, %v673_v63, 0.0  ;;  %v634_v3 = vsel %vm574_vm3, %v1268_v5, 0.0 }
  0xef   : > { %v609_v11 = vadd.f32 %v608_v10, %v607_v7  ;;  %v710_v12 = vadd.f32 %v709_v9, %v708_v8  ;;  %v675_v7 = vmul.f32 %v1240_v29, %v1240_v29  ;;  %v733_v10 = vsel %vm574_vm3, %v674_v2, 0.0 }
  0xf0   : > { %v636_v29 = vsel %vm574_vm3, %v1302_v32, 0.0 }
  0xf1   : > { %v611_v15 = vadd.f32 %v610_v28, %v609_v11  ;;  %v712_v25 = vadd.f32 %v711_v13, %v710_v12  ;;  %v735_v13 = vsel %vm574_vm3, %v675_v7, 0.0  ;;  %v677_v28 = vmul.f32 %v1302_v32, %v1302_v32 }
  0xf3   : > { %v714_v19 = vadd.f32 %v713_v17, %v712_v25  ;;  %v613_v20 = vadd.f32 %v612_v36, %v611_v15  ;;  %v737_v25 = vsel %vm574_vm3, %v676_v61, 0.0  ;;  %v739_v18 = vsel %vm574_vm3, %v677_v28, 0.0 }
  0xf5   : > { %v615_v30 = vadd.f32 %v614_v44, %v613_v20  ;;  %v716_v26 = vadd.f32 %v715_v23, %v714_v19 }
  0xf7   : > { %v617_v31 = vadd.f32 %v616_v51, %v615_v30  ;;  %v718_v33 = vadd.f32 %v717_v27, %v716_v26 }
  0xf9   : > { %v720_v39 = vadd.f32 %v719_v35, %v718_v33  ;;  %v619_v46 = vadd.f32 %v618_v60, %v617_v31 }
  0xfb   : > { %v722_v43 = vadd.f32 %v721_v16, %v720_v39  ;;  %v621_v45 = vadd.f32 %v620_v41, %v619_v46 }
  0xfd   : > { %v623_v49 = vadd.f32 %v622_v47, %v621_v45  ;;  %v724_v52 = vadd.f32 %v723_v48, %v722_v43 }
  0xff   : > { %v625_v56 = vadd.f32 %v624_v55, %v623_v49  ;;  %v726_v58 = vadd.f32 %v725_v53, %v724_v52 }
 0x101   : > { %v627_v0 = vadd.f32 %v626_v34, %v625_v56  ;;  %v728_v62 = vadd.f32 %v727_v59, %v726_v58 }
 0x103   : > { %v730_v4 = vadd.f32 %v729_v1, %v728_v62  ;;  %v629_v6 = vadd.f32 %v628_v42, %v627_v0 }
 0x105   : > { %v631_v8 = vadd.f32 %v630_v50, %v629_v6  ;;  %v732_v9 = vadd.f32 %v731_v21, %v730_v4 }
 0x107   : > { %v633_v11 = vadd.f32 %v632_v57, %v631_v8  ;;  %v734_v12 = vadd.f32 %v733_v10, %v732_v9 }
 0x109   : > { %v736_v14 = vadd.f32 %v735_v13, %v734_v12  ;;  %v635_v15 = vadd.f32 %v634_v3, %v633_v11 }
 0x10b   : > { %v738_v17 = vadd.f32 %v737_v25, %v736_v14  ;;  %v637_v36 = vadd.f32 %v636_v29, %v635_v15 }
 0x10d   : > { %v638_v19 = vrot.slane %v637_v36, 4  ;;  %v740_v20 = vadd.f32 %v739_v18, %v738_v17 }
 0x10f   : > { %v639_v23 = vadd.f32 %v638_v19, %v637_v36  ;;  %v741_v5 = vrot.slane %v740_v20, 4 }
 0x111   : > { %v640_v44 = vrot.slane %v639_v23, 2  ;;  %v742_v24 = vadd.f32 %v741_v5, %v740_v20 }
 0x113   : > { %v641_v30 = vadd.f32 %v640_v44, %v639_v23  ;;  %v743_v26 = vrot.slane %v742_v24, 2 }
 0x115   : > { %v642_v27 = vrot.slane %v641_v30, 1  ;;  %v744_v51 = vadd.f32 %v743_v26, %v742_v24 }
 0x117   : > { %v643_v32 = vadd.f32 %v642_v27, %v641_v30  ;;  %v745_v38 = vrot.slane %v744_v51, 1 }
 0x119   : > { %645 = vst.msk [vmem:[%s214_s11] sm:$0x1] %vm644_vm4, %v643_v32  ;;  %v746_v31 = vadd.f32 %v745_v38, %v744_v51 }
 0x11b   : > { %747 = vst.msk [vmem:[%s217_s14] sm:$0x1] %vm644_vm4, %v746_v31 }
 0x11c PF: > { %s15_s15 = sadd.s32 1, %s1010_s15  }
 0x11d   : > { %p12_p5 = scmp.ge.s32.totalorder %s15_s15, 4  }
 0x11f   :  { %14 = sbr.rel (!%p12_p5) target bundleno = 1 (0x1), region = 82 }

// kernel: xfeat_forward.56
= control target key start
LH: loop header
LB: loop body
LE: loop exit
PB: predicated region body
PF: predicated region fallthrough
CT: control target
= control target key end

     0   :  { %s617_s15 = smov 0   ;;  %s694_s0 = inlined_call_operand.vmem [shape: bf16[128,72], index: 0, kind: input, shape index: {}]   ;;  %s695_s1 = inlined_call_operand.vmem [shape: bf16[72,24], index: 1, kind: input, shape index: {}]   ;;  %s696_s2 = inlined_call_operand.vmem [shape: bf16[128,24], index: 2, kind: output, shape index: {0}]   ;;  %s697_s3 = inlined_call_operand.vmem [shape: f32[2,1,24], index: 3, kind: output, shape index: {1}]   ;;  %s698_s4 = inlined_call_operand.vmem [shape: f32[2,1,24], index: 4, kind: output, shape index: {2}]  }
   0x1 LB: > { %s623_s16 = sadd.s32 4294967295, %s590_s15   ;;  %p510_p0 = scmp.ge.s32.totalorder %s590_s15, 1  ;;  %s590_s15 = sphi %s617_s15, %s15_s15  }
   0x2   : > { %p168_p1 = scmp.lt.s32.totalorder %s590_s15, 3 }
   0x4   : > { %p169_p2 = pnand %p510_p0, %p168_p1 }
   0x5   : > { %s511_s19 = sshll.u32 (!%p169_p2), %s623_s16, 3  ;;  %p212_p4 = scmp.lt.s32.totalorder (!%p169_p2), %s623_s16, 1 }
   0x6   : > { %172 = sbr.rel (%p169_p2) target bundleno = 200 (0xc8), region = 28  ;;  %p201_p3 = scmp.lt.s32.totalorder (!%p169_p2), %s511_s19, 15 }
   0xb   : > { %v235_v0 = vld [vmem:[%s695_s1 + $0x20] sm:$0xf]  ;;  %vm296_vm0 = vcmask 1043456   ;;  %v560_v4 = vld [vmem:[%s695_s1 + $0x18] sm:$0xff]  ;;  %v559_v5 = vld [vmem:[%s695_s1 + $0x10] sm:$0xff]  ;;  %s700_s19 = smov (!%p201_p3, %s511_s19), 15 }
   0xc   : > { %v273_v1 = vunpack.c.l.b16 %v235_v0  ;;  %v558_v6 = vld [vmem:[%s695_s1 + $0x8] sm:$0xff]  ;;  %s512_s26 = sshll.u32 %s700_s19, 2  ;;  %v557_v7 = vld [vmem:[%s695_s1] sm:$0xff]  ;;  %vm283_vm1 = vcmask 588800   ;;  %vm337_vm2 = vcmask 191488   ;;  %vm346_vm3 = vcmask 195584  }
   0xd   : > { %s204_s5 = scalar_lea.vmem %s694_s0, %s512_s26  ;;  %s649_s8 = scalar_lea.vmem %s696_s2, %s512_s26  ;;  %vm368_vm4 = vcmask 188416  }
   0xe   : > { %v278_v2 = vpack.c.b16 %v273_v1, %v273_v1  ;;  %v553_v8 = vld [vmem:[%s204_s5] sm:$0xff]  ;;  %v554_v9 = vld [vmem:[%s204_s5 + $0x8] sm:$0xff]  ;;  %v555_v10 = vld [vmem:[%s204_s5 + $0x10] sm:$0xff]  ;;  %s702_s16 = smov (!%p212_p4, %s623_s16), 1 }
   0xf   : > { %v556_v11 = vld [vmem:[%s204_s5 + $0x18] sm:$0xff]  ;;  %s214_s11 = scalar_lea.vmem %s697_s3, %s702_s16  ;;  %s217_s14 = scalar_lea.vmem %s698_s4, %s702_s16 }
  0x10   : > { %v298_v3 = vsel %vm296_vm0, %v278_v2, 0 }
  0x11   : > { %303 = vmatpush.bf16.msra.mxu0 %v298_v3  ;;  %561 = vmatpush.bf16.msra.mxu1 %v298_v3 }
  0x12   : > { %562 = vmatpush.bf16.msra.mxu2 %v298_v3  ;;  %563 = vmatpush.bf16.msra.mxu3 %v298_v3 }
  0x15   : > { %304 = vmatpush.bf16.msra.mxu0 %v560_v4  ;;  %564 = vmatpush.bf16.msra.mxu1 %v560_v4 }
  0x16   : > { %565 = vmatpush.bf16.msra.mxu2 %v560_v4  ;;  %566 = vmatpush.bf16.msra.mxu3 %v560_v4 }
  0x19   : > { %305 = vmatpush.bf16.msra.mxu0 %v559_v5  ;;  %567 = vmatpush.bf16.msra.mxu1 %v559_v5 }
  0x1a   : > { %568 = vmatpush.bf16.msra.mxu2 %v559_v5  ;;  %569 = vmatpush.bf16.msra.mxu3 %v559_v5 }
  0x1d   : > { %306 = vmatpush.bf16.msra.mxu0 %v558_v6  ;;  %570 = vmatpush.bf16.msra.mxu1 %v558_v6 }
  0x1e   : > { %571 = vmatpush.bf16.msra.mxu2 %v558_v6  ;;  %572 = vmatpush.bf16.msra.mxu3 %v558_v6 }
  0x21   : > { %307 = vmatpush.bf16.msra.mxu0 %v557_v7  ;;  %573 = vmatpush.bf16.msra.mxu1 %v557_v7 }
  0x22   : > { %574 = vmatpush.bf16.msra.mxu2 %v557_v7  ;;  %575 = vmatpush.bf16.msra.mxu3 %v557_v7 }
  0x24   : > { %547 = vmatmul.msk.bf16.vlgmr.msra.gmra.mxu0 %vm283_vm1, %v553_v8  ;;  %548 = vmatmul.msk.bf16.vlgmr.msra.gmra.mxu1 %vm283_vm1, %v554_v9 }
  0x25   : > { %549 = vmatmul.msk.bf16.vlgmr.msra.gmra.mxu2 %vm283_vm1, %v555_v10  ;;  %550 = vmatmul.msk.bf16.vlgmr.msra.gmra.mxu3 %vm283_vm1, %v556_v11 }
  0xa1   : > { %v309_v12 = vpop.f32.mrf.mxu0  ;;  %v314_v13 = vpop.f32.mrf.mxu1 }
  0xa2   : > { %v329_v14 = vpack.c.bf16 %v309_v12, %v309_v12  ;;  %v331_v15 = vpack.c.bf16 %v314_v13, %v314_v13  ;;  %v370_v18 = vmul.f32 %v309_v12, %v309_v12  ;;  %v347_v23 = vsel %vm346_vm3, %v309_v12, 0.0 }
  0xa3   : > { %v372_v26 = vmul.f32 %v314_v13, %v314_v13  ;;  %v350_v30 = vsel %vm346_vm3, %v314_v13, 0.0 }
  0xa4   : > { %338 = vst.msk [vmem:[%s649_s8] sm:$0xf] %vm337_vm2, %v329_v14  ;;  %v378_v31 = vsel %vm346_vm3, %v370_v18, 0.0 }
  0xa5   : > { %340 = vst.msk [vmem:[%s649_s8 + $0x8] sm:$0xf] %vm337_vm2, %v331_v15  ;;  %v381_v37 = vsel %vm346_vm3, %v372_v26, 0.0 }
  0xa8   : > { %v319_v16 = vpop.f32.mrf.mxu2  ;;  %v324_v17 = vpop.f32.mrf.mxu3 }
  0xa9   : > { %v333_v19 = vpack.c.bf16 %v319_v16, %v319_v16  ;;  %v335_v20 = vpack.c.bf16 %v324_v17, %v324_v17  ;;  %v311_v21 = vpop.f32.mrf.mxu0  ;;  %v316_v22 = vpop.f32.mrf.mxu1  ;;  %v374_v38 = vmul.f32 %v319_v16, %v319_v16  ;;  %v354_v40 = vsel %vm346_vm3, %v319_v16, 0.0 }
  0xaa   : > { %v330_v24 = vpack.c.bf16 %v311_v21, %v311_v21  ;;  %v348_v25 = vsel %vm346_vm3, %v311_v21, 0.0  ;;  %v371_v28 = vmul.f32 %v311_v21, %v311_v21  ;;  %v332_v29 = vpack.c.bf16 %v316_v22, %v316_v22 }
  0xab   : > { %342 = vst.msk [vmem:[%s649_s8 + $0x10] sm:$0xf] %vm337_vm2, %v333_v19  ;;  %v349_v27 = vadd.f32 %v348_v25, %v347_v23  ;;  %v373_v34 = vmul.f32 %v316_v22, %v316_v22  ;;  %v352_v36 = vsel %vm346_vm3, %v316_v22, 0.0  ;;  %v385_v51 = vsel %vm346_vm3, %v374_v38, 0.0 }
  0xac   : > { %344 = vst.msk [vmem:[%s649_s8 + $0x18] sm:$0xf] %vm337_vm2, %v335_v20  ;;  %v379_v32 = vsel %vm346_vm3, %v371_v28, 0.0  ;;  %v376_v52 = vmul.f32 %v324_v17, %v324_v17  ;;  %v358_v54 = vsel %vm346_vm3, %v324_v17, 0.0 }
  0xad   : > { %339 = vst.msk [vmem:[%s649_s8 + $0x4] sm:$0xf] %vm337_vm2, %v330_v24  ;;  %v351_v33 = vadd.f32 %v350_v30, %v349_v27  ;;  %v380_v35 = vadd.f32 %v379_v32, %v378_v31  ;;  %v383_v44 = vsel %vm346_vm3, %v373_v34, 0.0 }
  0xae   : > { %341 = vst.msk [vmem:[%s649_s8 + $0xc] sm:$0xf] %vm337_vm2, %v332_v29  ;;  %v389_v61 = vsel %vm346_vm3, %v376_v52, 0.0 }
  0xaf   : > { %v353_v39 = vadd.f32 %v352_v36, %v351_v33  ;;  %v382_v41 = vadd.f32 %v381_v37, %v380_v35 }
  0xb0   : > { %v321_v42 = vpop.f32.mrf.mxu2  ;;  %v326_v43 = vpop.f32.mrf.mxu3 }
  0xb1   : > { %v334_v45 = vpack.c.bf16 %v321_v42, %v321_v42  ;;  %v355_v46 = vadd.f32 %v354_v40, %v353_v39  ;;  %v375_v47 = vmul.f32 %v321_v42, %v321_v42  ;;  %v384_v48 = vadd.f32 %v383_v44, %v382_v41 }
  0xb2   : > { %v356_v49 = vsel %vm346_vm3, %v321_v42, 0.0  ;;  %v336_v50 = vpack.c.bf16 %v326_v43, %v326_v43  ;;  %v377_v58 = vmul.f32 %v326_v43, %v326_v43  ;;  %v360_v60 = vsel %vm346_vm3, %v326_v43, 0.0 }
  0xb3   : > { %343 = vst.msk [vmem:[%s649_s8 + $0x14] sm:$0xf] %vm337_vm2, %v334_v45  ;;  %v357_v53 = vadd.f32 %v356_v49, %v355_v46  ;;  %v386_v55 = vadd.f32 %v385_v51, %v384_v48  ;;  %v387_v56 = vsel %vm346_vm3, %v375_v47, 0.0 }
  0xb4   : > { %345 = vst.msk [vmem:[%s649_s8 + $0x1c] sm:$0xf] %vm337_vm2, %v336_v50  ;;  %v391_v1 = vsel %vm346_vm3, %v377_v58, 0.0 }
  0xb5   : > { %v359_v57 = vadd.f32 %v358_v54, %v357_v53  ;;  %v388_v59 = vadd.f32 %v387_v56, %v386_v55 }
  0xb7   : > { %v361_v62 = vadd.f32 %v360_v60, %v359_v57  ;;  %v390_v63 = vadd.f32 %v389_v61, %v388_v59 }
  0xb9   : > { %v362_v0 = vrot.slane %v361_v62, 4  ;;  %v392_v2 = vadd.f32 %v391_v1, %v390_v63 }
  0xbb   : > { %v363_v3 = vadd.f32 %v362_v0, %v361_v62  ;;  %v393_v4 = vrot.slane %v392_v2, 4 }
  0xbd   : > { %v364_v5 = vrot.slane %v363_v3, 2  ;;  %v394_v6 = vadd.f32 %v393_v4, %v392_v2 }
  0xbf   : > { %v365_v7 = vadd.f32 %v364_v5, %v363_v3  ;;  %v395_v8 = vrot.slane %v394_v6, 2 }
  0xc1   : > { %v366_v9 = vrot.slane %v365_v7, 1  ;;  %v396_v10 = vadd.f32 %v395_v8, %v394_v6 }
  0xc3   : > { %v367_v11 = vadd.f32 %v366_v9, %v365_v7  ;;  %v397_v12 = vrot.slane %v396_v10, 1 }
  0xc5   : > { %369 = vst.msk [vmem:[%s214_s11] sm:$0x1] %vm368_vm4, %v367_v11  ;;  %v398_v13 = vadd.f32 %v397_v12, %v396_v10 }
  0xc7   : > { %399 = vst.msk [vmem:[%s217_s14] sm:$0x1] %vm368_vm4, %v398_v13 }
  0xc8 PF: > { %s15_s15 = sadd.s32 1, %s590_s15  }
  0xc9   : > { %p12_p5 = scmp.ge.s32.totalorder %s15_s15, 4  }
  0xcb   :  { %14 = sbr.rel (!%p12_p5) target bundleno = 1 (0x1), region = 82 }

// kernel: xfeat_forward.57
= control target key start
LH: loop header
LB: loop body
LE: loop exit
PB: predicated region body
PF: predicated region fallthrough
CT: control target
= control target key end

     0   :  { %s363_s12 = smov 0   ;;  %s401_s0 = inlined_call_operand.vmem [shape: bf16[128,24], index: 0, kind: input, shape index: {}]   ;;  %s402_s1 = inlined_call_operand.vmem [shape: f32[1,24], index: 1, kind: input, shape index: {}]   ;;  %s403_s2 = inlined_call_operand.vmem [shape: f32[1,24], index: 2, kind: input, shape index: {}]   ;;  %s404_s3 = inlined_call_operand.vmem [shape: bf16[128,24], index: 3, kind: output, shape index: {}]  }
   0x1 LB: > { %s295_s13 = sadd.s32 4294967295, %s341_s12   ;;  %p299_p0 = scmp.ge.s32.totalorder %s341_s12, 1  ;;  %s341_s12 = sphi %s363_s12, %s13_s12  }
   0x2   : > { %p138_p1 = scmp.lt.s32.totalorder %s341_s12, 3 }
   0x4   : > { %p139_p2 = pnand %p299_p0, %p138_p1 }
   0x5   : > { %s300_s14 = sshll.u32 (!%p139_p2), %s295_s13, 3 }
   0x6   : > { %142 = sbr.rel (%p139_p2) target bundleno = 33 (0x21), region = 32  ;;  %p163_p3 = scmp.lt.s32.totalorder (!%p139_p2), %s300_s14, 15 }
   0xb   : > { %s406_s14 = smov (!%p163_p3, %s300_s14), 15  ;;  %v333_v0 = vld [vmem:[%s402_s1] ss:$0 sm:$0xff]  ;;  %vm230_vm0 = vcmask 191488  }
   0xc   : > { %s301_s15 = sshll.u32 %s406_s14, 2  ;;  %v334_v5 = vld [vmem:[%s403_s2] ss:$0 sm:$0xff] }
   0xd   : > { %s166_s18 = scalar_lea.vmem %s401_s0, %s301_s15  ;;  %s172_s25 = scalar_lea.vmem %s404_s3, %s301_s15 }
   0xe   : > { %v307_v1 = vld [vmem:[%s166_s18] sm:$0xff]   ;;  %v322_v2 = vld [vmem:[%s166_s18 + $0x8] sm:$0xff]   ;;  %v323_v3 = vld [vmem:[%s166_s18 + $0x10] sm:$0xff]  }
   0xf   : > { %v308_v4 = vunpack.c.l.bf16 %v307_v1  ;;  %v309_v6 = vunpack.c.h.bf16 %v307_v1  ;;  %v312_v7 = vunpack.c.l.bf16 %v322_v2  ;;  %v313_v8 = vunpack.c.h.bf16 %v322_v2  ;;  %v324_v9 = vld [vmem:[%s166_s18 + $0x18] sm:$0xff]  }
  0x10   : > { %v316_v10 = vunpack.c.l.bf16 %v323_v3  ;;  %v317_v11 = vunpack.c.h.bf16 %v323_v3  ;;  %v320_v12 = vunpack.c.l.bf16 %v324_v9  ;;  %v321_v13 = vunpack.c.h.bf16 %v324_v9 }
  0x11   : > { %v194_v14 = vmul.f32 %v333_v0, %v308_v4  ;;  %v195_v15 = vmul.f32 %v333_v0, %v309_v6  ;;  %v196_v16 = vmul.f32 %v333_v0, %v312_v7  ;;  %v197_v17 = vmul.f32 %v333_v0, %v313_v8 }
  0x12   : > { %v198_v18 = vmul.f32 %v333_v0, %v316_v10  ;;  %v199_v19 = vmul.f32 %v333_v0, %v317_v11  ;;  %v200_v20 = vmul.f32 %v333_v0, %v320_v12  ;;  %v201_v21 = vmul.f32 %v333_v0, %v321_v13 }
  0x13   : > { %v206_v22 = vadd.f32 %v334_v5, %v194_v14  ;;  %v207_v23 = vadd.f32 %v334_v5, %v195_v15  ;;  %v208_v24 = vadd.f32 %v334_v5, %v196_v16  ;;  %v209_v25 = vadd.f32 %v334_v5, %v197_v17 }
  0x14   : > { %v210_v26 = vadd.f32 %v334_v5, %v198_v18  ;;  %v211_v27 = vadd.f32 %v334_v5, %v199_v19  ;;  %v212_v28 = vadd.f32 %v334_v5, %v200_v20  ;;  %v213_v29 = vadd.f32 %v334_v5, %v201_v21 }
  0x15   : > { %v214_v30 = vmax.f32 %v206_v22, 0.0  ;;  %v215_v31 = vmax.f32 %v207_v23, 0.0  ;;  %v216_v32 = vmax.f32 %v208_v24, 0.0  ;;  %v217_v33 = vmax.f32 %v209_v25, 0.0 }
  0x16   : > { %v218_v34 = vmax.f32 %v210_v26, 0.0  ;;  %v219_v35 = vmax.f32 %v211_v27, 0.0  ;;  %v220_v39 = vmax.f32 %v212_v28, 0.0  ;;  %v221_v41 = vmax.f32 %v213_v29, 0.0 }
  0x17   : > { %v222_v36 = vpack.c.bf16 %v214_v30, %v214_v30  ;;  %v223_v37 = vpack.c.bf16 %v215_v31, %v215_v31  ;;  %v224_v38 = vpack.c.bf16 %v216_v32, %v216_v32  ;;  %v225_v40 = vpack.c.bf16 %v217_v33, %v217_v33 }
  0x18   : > { %v226_v42 = vpack.c.bf16 %v218_v34, %v218_v34  ;;  %v227_v43 = vpack.c.bf16 %v219_v35, %v219_v35  ;;  %v228_v44 = vpack.c.bf16 %v220_v39, %v220_v39  ;;  %v229_v45 = vpack.c.bf16 %v221_v41, %v221_v41 }
  0x19   : > { %231 = vst.msk [vmem:[%s172_s25] sm:$0xf] %vm230_vm0, %v222_v36 }
  0x1a   : > { %232 = vst.msk [vmem:[%s172_s25 + $0x4] sm:$0xf] %vm230_vm0, %v223_v37 }
  0x1b   : > { %233 = vst.msk [vmem:[%s172_s25 + $0x8] sm:$0xf] %vm230_vm0, %v224_v38 }
  0x1c   : > { %234 = vst.msk [vmem:[%s172_s25 + $0xc] sm:$0xf] %vm230_vm0, %v225_v40 }
  0x1d   : > { %235 = vst.msk [vmem:[%s172_s25 + $0x10] sm:$0xf] %vm230_vm0, %v226_v42 }
  0x1e   : > { %236 = vst.msk [vmem:[%s172_s25 + $0x14] sm:$0xf] %vm230_vm0, %v227_v43 }
  0x1f   : > { %237 = vst.msk [vmem:[%s172_s25 + $0x18] sm:$0xf] %vm230_vm0, %v228_v44 }
  0x20   : > { %238 = vst.msk [vmem:[%s172_s25 + $0x1c] sm:$0xf] %vm230_vm0, %v229_v45 }
  0x21 PF: > { %s13_s12 = sadd.s32 1, %s341_s12  }
  0x22   : > { %p10_p4 = scmp.ge.s32.totalorder %s13_s12, 4  }
  0x24   :  { %12 = sbr.rel (!%p10_p4) target bundleno = 1 (0x1), region = 62 }

// kernel: xfeat_forward.58
= control target key start
LH: loop header
LB: loop body
LE: loop exit
PB: predicated region body
PF: predicated region fallthrough
CT: control target
= control target key end

     0   :  { %s402_s12 = smov 0   ;;  %s433_s0 = inlined_call_operand.vmem [shape: bf16[128,8], index: 0, kind: input, shape index: {}]   ;;  %s434_s1 = inlined_call_operand.vmem [shape: bf16[8,24], index: 1, kind: input, shape index: {}]   ;;  %s435_s2 = inlined_call_operand.vmem [shape: f32[1,24], index: 2, kind: input, shape index: {}]   ;;  %s436_s3 = inlined_call_operand.vmem [shape: bf16[128,24], index: 3, kind: output, shape index: {}]  }
   0x1 LB: > { %s327_s13 = sadd.s32 4294967295, %s380_s12   ;;  %p331_p0 = scmp.ge.s32.totalorder %s380_s12, 1  ;;  %s380_s12 = sphi %s402_s12, %s13_s12  }
   0x2   : > { %p138_p1 = scmp.lt.s32.totalorder %s380_s12, 3 }
   0x4   : > { %p139_p2 = pnand %p331_p0, %p138_p1 }
   0x5   : > { %s332_s16 = sshll.u32 (!%p139_p2), %s327_s13, 3 }
   0x6   : > { %142 = sbr.rel (%p139_p2) target bundleno = 163 (0xa3), region = 32  ;;  %p163_p3 = scmp.lt.s32.totalorder (!%p139_p2), %s332_s16, 15 }
   0xb   : > { %v183_v0 = vld [vmem:[%s434_s1] sm:$0xf]  ;;  %vm221_vm0 = vcmask 1043456   ;;  %s438_s16 = smov (!%p163_p3, %s332_s16), 15  ;;  %vm208_vm1 = vcmask 64512   ;;  %vm262_vm2 = vcmask 191488  }
   0xc   : > { %v223_v1 = vsel %vm221_vm0, %v183_v0, 0  ;;  %s333_s17 = sshll.u32 %s438_s16, 2  ;;  %v373_v6 = vld [vmem:[%s435_s2] ss:$0 sm:$0xff] }
   0xd   : > { %232 = vmatpush.bf16.msra.mxu0 %v223_v1  ;;  %362 = vmatpush.bf16.msra.mxu1 %v223_v1  ;;  %s166_s20 = scalar_lea.vmem %s433_s0, %s333_s17  ;;  %s172_s25 = scalar_lea.vmem %s436_s3, %s333_s17 }
   0xe   : > { %363 = vmatpush.bf16.msra.mxu2 %v223_v1  ;;  %364 = vmatpush.bf16.msra.mxu3 %v223_v1  ;;  %v358_v2 = vld [vmem:[%s166_s20] sm:$0xff]  ;;  %v359_v3 = vld [vmem:[%s166_s20 + $0x8] sm:$0xff]  ;;  %v360_v4 = vld [vmem:[%s166_s20 + $0x10] sm:$0xff] }
   0xf   : > { %v361_v5 = vld [vmem:[%s166_s20 + $0x18] sm:$0xff] }
  0x10   : > { %352 = vmatmul.msk.bf16.vlgmr.msra.gmra.mxu0 %vm208_vm1, %v358_v2  ;;  %353 = vmatmul.msk.bf16.vlgmr.msra.gmra.mxu1 %vm208_vm1, %v359_v3 }
  0x11   : > { %354 = vmatmul.msk.bf16.vlgmr.msra.gmra.mxu2 %vm208_vm1, %v360_v4  ;;  %355 = vmatmul.msk.bf16.vlgmr.msra.gmra.mxu3 %vm208_vm1, %v361_v5 }
  0x8d   : > { %v234_v7 = vpop.f32.mrf.mxu0  ;;  %v239_v8 = vpop.f32.mrf.mxu1 }
  0x8e   : > { %v235_v9 = vadd.f32 %v373_v6, %v234_v7  ;;  %v240_v10 = vadd.f32 %v373_v6, %v239_v8 }
  0x90   : > { %v254_v11 = vpack.c.bf16 %v235_v9, %v235_v9  ;;  %v256_v12 = vpack.c.bf16 %v240_v10, %v240_v10 }
  0x92   : > { %263 = vst.msk [vmem:[%s172_s25] sm:$0xf] %vm262_vm2, %v254_v11 }
  0x93   : > { %265 = vst.msk [vmem:[%s172_s25 + $0x8] sm:$0xf] %vm262_vm2, %v256_v12 }
  0x94   : > { %v244_v13 = vpop.f32.mrf.mxu2  ;;  %v249_v14 = vpop.f32.mrf.mxu3 }
  0x95   : > { %v245_v15 = vadd.f32 %v373_v6, %v244_v13  ;;  %v250_v16 = vadd.f32 %v373_v6, %v249_v14  ;;  %v236_v17 = vpop.f32.mrf.mxu0  ;;  %v241_v18 = vpop.f32.mrf.mxu1 }
  0x96   : > { %v237_v19 = vadd.f32 %v373_v6, %v236_v17  ;;  %v242_v20 = vadd.f32 %v373_v6, %v241_v18 }
  0x97   : > { %v258_v21 = vpack.c.bf16 %v245_v15, %v245_v15  ;;  %v260_v22 = vpack.c.bf16 %v250_v16, %v250_v16 }
  0x98   : > { %v255_v23 = vpack.c.bf16 %v237_v19, %v237_v19  ;;  %v257_v24 = vpack.c.bf16 %v242_v20, %v242_v20 }
  0x99   : > { %267 = vst.msk [vmem:[%s172_s25 + $0x10] sm:$0xf] %vm262_vm2, %v258_v21 }
  0x9a   : > { %269 = vst.msk [vmem:[%s172_s25 + $0x18] sm:$0xf] %vm262_vm2, %v260_v22 }
  0x9b   : > { %264 = vst.msk [vmem:[%s172_s25 + $0x4] sm:$0xf] %vm262_vm2, %v255_v23 }
  0x9c   : > { %266 = vst.msk [vmem:[%s172_s25 + $0xc] sm:$0xf] %vm262_vm2, %v257_v24  ;;  %v246_v25 = vpop.f32.mrf.mxu2  ;;  %v251_v26 = vpop.f32.mrf.mxu3 }
  0x9d   : > { %v247_v27 = vadd.f32 %v373_v6, %v246_v25  ;;  %v252_v28 = vadd.f32 %v373_v6, %v251_v26 }
  0x9f   : > { %v259_v29 = vpack.c.bf16 %v247_v27, %v247_v27  ;;  %v261_v30 = vpack.c.bf16 %v252_v28, %v252_v28 }
  0xa1   : > { %268 = vst.msk [vmem:[%s172_s25 + $0x14] sm:$0xf] %vm262_vm2, %v259_v29 }
  0xa2   : > { %270 = vst.msk [vmem:[%s172_s25 + $0x1c] sm:$0xf] %vm262_vm2, %v261_v30 }
  0xa3 PF: > { %s13_s12 = sadd.s32 1, %s380_s12  }
  0xa4   : > { %p10_p4 = scmp.ge.s32.totalorder %s13_s12, 4  }
  0xa6   :  { %12 = sbr.rel (!%p10_p4) target bundleno = 1 (0x1), region = 62 }

// kernel: xfeat_forward.59
= control target key start
LH: loop header
LB: loop body
LE: loop exit
PB: predicated region body
PF: predicated region fallthrough
CT: control target
= control target key end

     0   :  { %s803_s15 = smov 0   ;;  %s933_s0 = inlined_call_operand.vmem [shape: bf16[128,216], index: 0, kind: input, shape index: {}]   ;;  %s934_s1 = inlined_call_operand.vmem [shape: bf16[216,24], index: 1, kind: input, shape index: {}]   ;;  %s935_s2 = inlined_call_operand.vmem [shape: bf16[128,24], index: 2, kind: output, shape index: {0}]   ;;  %s936_s3 = inlined_call_operand.vmem [shape: f32[2,1,24], index: 3, kind: output, shape index: {1}]   ;;  %s937_s4 = inlined_call_operand.vmem [shape: f32[2,1,24], index: 4, kind: output, shape index: {2}]  }
   0x1 LB: > { %s809_s16 = sadd.s32 4294967295, %s776_s15   ;;  %p630_p0 = scmp.ge.s32.totalorder %s776_s15, 1  ;;  %s776_s15 = sphi %s803_s15, %s15_s15  }
   0x2   : > { %p169_p1 = scmp.lt.s32.totalorder %s776_s15, 3 }
   0x4   : > { %p170_p2 = pnand %p630_p0, %p169_p1 }
   0x5   : > { %s631_s23 = sshll.u32 (!%p170_p2), %s809_s16, 3  ;;  %p215_p4 = scmp.lt.s32.totalorder (!%p170_p2), %s809_s16, 1 }
   0x6   : > { %173 = sbr.rel (%p170_p2) target bundleno = 232 (0xe8), region = 28  ;;  %p203_p3 = scmp.lt.s32.totalorder (!%p170_p2), %s631_s23, 15 }
   0xb   : > { %v742_v0 = vld [vmem:[%s934_s1 + $0x38] sm:$0xff]  ;;  %v256_v1 = vld [vmem:[%s934_s1 + $0x68] sm:$0xf]  ;;  %vm387_vm0 = vcmask 1043456   ;;  %v741_v3 = vld [vmem:[%s934_s1 + $0x30] sm:$0xff]  ;;  %s939_s23 = smov (!%p203_p3, %s631_s23), 15 }
   0xc   : > { %v346_v2 = vunpack.c.l.b16 %v256_v1  ;;  %391 = vmatpush.bf16.msra.mxu0 %v742_v0  ;;  %748 = vmatpush.bf16.msra.mxu2 %v742_v0  ;;  %v747_v6 = vld [vmem:[%s934_s1 + $0x60] sm:$0xff]  ;;  %v740_v7 = vld [vmem:[%s934_s1 + $0x28] sm:$0xff]  ;;  %v746_v8 = vld [vmem:[%s934_s1 + $0x58] sm:$0xff]  ;;  %s726_s10 = sshll.u32 %s939_s23, 3  ;;  %vm374_vm1 = vcmask 719872   ;;  %s635_s27 = sshll.u32 %s939_s23, 2 }
   0xd   : > { %v739_v9 = vld [vmem:[%s934_s1 + $0x20] sm:$0xff]  ;;  %v745_v10 = vld [vmem:[%s934_s1 + $0x50] sm:$0xff]  ;;  %v738_v11 = vld [vmem:[%s934_s1 + $0x18] sm:$0xff]  ;;  %s853_s19 = scalar_lea.vmem %s933_s0, %s726_s10  ;;  %s888_s30 = scalar_lea.vmem %s935_s2, %s635_s27  ;;  %vm457_vm2 = vcmask 191488   ;;  %vm466_vm3 = vcmask 195584   ;;  %vm488_vm4 = vcmask 188416  }
   0xe   : > { %v360_v4 = vpack.c.b16 %v346_v2, %v346_v2  ;;  %v744_v12 = vld [vmem:[%s934_s1 + $0x48] sm:$0xff]  ;;  %v737_v13 = vld [vmem:[%s934_s1 + $0x10] sm:$0xff]  ;;  %v743_v14 = vld [vmem:[%s934_s1 + $0x40] sm:$0xff]  ;;  %s941_s16 = smov (!%p215_p4, %s809_s16), 1 }
   0xf   : > { %v736_v15 = vld [vmem:[%s934_s1 + $0x8] sm:$0xff]  ;;  %v729_v16 = vld [vmem:[%s853_s19 + $0x14] sm:$0xf]  ;;  %v648_v17 = vld [vmem:[%s853_s19 + $0x18] sm:$0xf0]  ;;  %s217_s6 = scalar_lea.vmem %s936_s3, %s941_s16  ;;  %s220_s9 = scalar_lea.vmem %s937_s4, %s941_s16 }
  0x10   : > { %v389_v5 = vsel %vm387_vm0, %v360_v4, 0  ;;  %392 = vmatpush.bf16.msra.mxu0 %v741_v3  ;;  %749 = vmatpush.bf16.msra.mxu2 %v741_v3  ;;  %v727_v18 = vld [vmem:[%s853_s19 + $0x4] sm:$0xf]  ;;  %v640_v19 = vld [vmem:[%s853_s19 + $0x8] sm:$0xf0]  ;;  %v651_v20 = vor.u32 %v729_v16, %v648_v17 }
  0x11   : > { %756 = vmatpush.bf16.msra.mxu3 %v389_v5  ;;  %422 = vmatpush.bf16.msra.mxu1 %v389_v5  ;;  %v735_v21 = vld [vmem:[%s934_s1] sm:$0xff]  ;;  %v728_v23 = vld [vmem:[%s853_s19 + $0x4] sm:$0xf0]  ;;  %v643_v24 = vor.u32 %v727_v18, %v640_v19  ;;  %v656_v30 = vld [vmem:[%s853_s19 + $0x28] sm:$0xf0] }
  0x12   : > { %v638_v22 = vld [vmem:[%s853_s19] sm:$0xf]  ;;  %v732_v26 = vld [vmem:[%s853_s19 + $0x24] sm:$0xf0]  ;;  %v731_v29 = vld [vmem:[%s853_s19 + $0x24] sm:$0xf] }
  0x13   : > { %v654_v25 = vld [vmem:[%s853_s19 + $0x20] sm:$0xf]  ;;  %v639_v27 = vor.u32 %v728_v23, %v638_v22  ;;  %v659_v31 = vor.u32 %v731_v29, %v656_v30  ;;  %v646_v32 = vld [vmem:[%s853_s19 + $0x10] sm:$0xf]  ;;  %v730_v33 = vld [vmem:[%s853_s19 + $0x14] sm:$0xf0] }
  0x14   : > { %393 = vmatpush.bf16.msra.mxu0 %v740_v7  ;;  %750 = vmatpush.bf16.msra.mxu2 %v740_v7  ;;  %v655_v28 = vor.u32 %v732_v26, %v654_v25  ;;  %v662_v34 = vld [vmem:[%s853_s19 + $0x30] sm:$0xf]  ;;  %v734_v35 = vld [vmem:[%s853_s19 + $0x34] sm:$0xf0]  ;;  %v647_v36 = vor.u32 %v730_v33, %v646_v32  ;;  %v733_v38 = vld [vmem:[%s853_s19 + $0x34] sm:$0xf] }
  0x15   : > { %757 = vmatpush.bf16.msra.mxu3 %v747_v6  ;;  %423 = vmatpush.bf16.msra.mxu1 %v747_v6  ;;  %v663_v37 = vor.u32 %v734_v35, %v662_v34  ;;  %v664_v39 = vld [vmem:[%s853_s19 + $0x38] sm:$0xf0] }
  0x16   : > { %v667_v40 = vor.u32 %v733_v38, %v664_v39 }
  0x18   : > { %394 = vmatpush.bf16.msra.mxu0 %v739_v9  ;;  %751 = vmatpush.bf16.msra.mxu2 %v739_v9 }
  0x19   : > { %758 = vmatpush.bf16.msra.mxu3 %v746_v8  ;;  %424 = vmatpush.bf16.msra.mxu1 %v746_v8 }
  0x1c   : > { %395 = vmatpush.bf16.msra.mxu0 %v738_v11  ;;  %752 = vmatpush.bf16.msra.mxu2 %v738_v11 }
  0x1d   : > { %759 = vmatpush.bf16.msra.mxu3 %v745_v10  ;;  %425 = vmatpush.bf16.msra.mxu1 %v745_v10 }
  0x20   : > { %396 = vmatpush.bf16.msra.mxu0 %v737_v13  ;;  %753 = vmatpush.bf16.msra.mxu2 %v737_v13 }
  0x21   : > { %760 = vmatpush.bf16.msra.mxu3 %v744_v12  ;;  %426 = vmatpush.bf16.msra.mxu1 %v744_v12 }
  0x24   : > { %397 = vmatpush.bf16.msra.mxu0 %v736_v15  ;;  %754 = vmatpush.bf16.msra.mxu2 %v736_v15 }
  0x25   : > { %761 = vmatpush.bf16.msra.mxu3 %v743_v14  ;;  %427 = vmatpush.bf16.msra.mxu1 %v743_v14 }
  0x28   : > { %721 = vmatmul.msk.bf16.vlgmr.msra.gmra.mxu3 %vm374_vm1, %v651_v20  ;;  %398 = vmatpush.bf16.msra.mxu0 %v735_v21 }
  0x29   : > { %720 = vmatmul.msk.bf16.vlgmr.msra.gmra.mxu1 %vm374_vm1, %v643_v24  ;;  %755 = vmatpush.bf16.msra.mxu2 %v735_v21 }
  0x2b   : > { %399 = vmatmul.bf16.vlgmr.msra.gmra.mxu0 %v639_v27 }
  0x2c   : > { %409 = vmatmul.bf16.vlgmr.msra.gmra.mxu2 %v655_v28 }
  0x38   : > { %722 = vmatmul.msk.bf16.gmra.mxu3 %vm374_vm1, %v659_v31 }
  0x3b   : > { %404 = vmatmul.bf16.gmra.mxu0 %v647_v36 }
  0x3c   : > { %414 = vmatmul.bf16.gmra.mxu2 %v663_v37 }
  0x48   : > { %723 = vmatmul.msk.bf16.gmra.mxu3 %vm374_vm1, %v667_v40 }
  0xa6   : > { %v429_v41 = vpop.f32.mrf.mxu1 }
  0xa8   : > { %v400_v42 = vpop.f32.mrf.mxu0 }
  0xa9   : > { %v430_v43 = vadd.f32 %v429_v41, %v400_v42 }
  0xab   : > { %v434_v44 = vpop.f32.mrf.mxu3  ;;  %v449_v45 = vpack.c.bf16 %v430_v43, %v430_v43  ;;  %v490_v59 = vmul.f32 %v430_v43, %v430_v43  ;;  %v467_v63 = vsel %vm466_vm3, %v430_v43, 0.0 }
  0xad   : > { %458 = vst.msk [vmem:[%s888_s30] sm:$0xf] %vm457_vm2, %v449_v45  ;;  %v498_v5 = vsel %vm466_vm3, %v490_v59, 0.0 }
  0xae   : > { %v431_v46 = vpop.f32.mrf.mxu1 }
  0xaf   : > { %v410_v51 = vpop.f32.mrf.mxu2 }
  0xb0   : > { %v402_v47 = vpop.f32.mrf.mxu0 }
  0xb1   : > { %v432_v48 = vadd.f32 %v431_v46, %v402_v47 }
  0xb3   : > { %v436_v49 = vpop.f32.mrf.mxu3  ;;  %v450_v50 = vpack.c.bf16 %v432_v48, %v432_v48  ;;  %v491_v61 = vmul.f32 %v432_v48, %v432_v48  ;;  %v468_v1 = vsel %vm466_vm3, %v432_v48, 0.0 }
  0xb4   : > { %v469_v10 = vadd.f32 %v468_v1, %v467_v63 }
  0xb5   : > { %459 = vst.msk [vmem:[%s888_s30 + $0x4] sm:$0xf] %vm457_vm2, %v450_v50  ;;  %v499_v6 = vsel %vm466_vm3, %v491_v61, 0.0 }
  0xb6   : > { %v500_v13 = vadd.f32 %v499_v6, %v498_v5 }
  0xb7   : > { %v412_v58 = vpop.f32.mrf.mxu2 }
  0xb8   : > { %v405_v52 = vpop.f32.mrf.mxu0 }
  0xb9   : > { %v435_v53 = vadd.f32 %v434_v44, %v405_v52 }
  0xbb   : > { %v439_v54 = vpop.f32.mrf.mxu3  ;;  %v451_v55 = vpack.c.bf16 %v435_v53, %v435_v53  ;;  %v492_v2 = vmul.f32 %v435_v53, %v435_v53  ;;  %v470_v7 = vsel %vm466_vm3, %v435_v53, 0.0 }
  0xbc   : > { %v440_v56 = vadd.f32 %v439_v54, %v410_v51  ;;  %v471_v14 = vadd.f32 %v470_v7, %v469_v10 }
  0xbd   : > { %460 = vst.msk [vmem:[%s888_s30 + $0x8] sm:$0xf] %vm457_vm2, %v451_v55  ;;  %v501_v11 = vsel %vm466_vm3, %v492_v2, 0.0 }
  0xbe   : > { %v453_v57 = vpack.c.bf16 %v440_v56, %v440_v56  ;;  %v502_v17 = vadd.f32 %v501_v11, %v500_v13  ;;  %v494_v20 = vmul.f32 %v440_v56, %v440_v56  ;;  %v474_v23 = vsel %vm466_vm3, %v440_v56, 0.0 }
  0xbf   : > { %v415_v15 = vpop.f32.mrf.mxu2 }
  0xc0   : > { %462 = vst.msk [vmem:[%s888_s30 + $0x10] sm:$0xf] %vm457_vm2, %v453_v57  ;;  %v407_v60 = vpop.f32.mrf.mxu0  ;;  %v505_v26 = vsel %vm466_vm3, %v494_v20, 0.0 }
  0xc1   : > { %v437_v62 = vadd.f32 %v436_v49, %v407_v60 }
  0xc3   : > { %v441_v0 = vpop.f32.mrf.mxu3  ;;  %v452_v3 = vpack.c.bf16 %v437_v62, %v437_v62  ;;  %v493_v8 = vmul.f32 %v437_v62, %v437_v62  ;;  %v472_v12 = vsel %vm466_vm3, %v437_v62, 0.0 }
  0xc4   : > { %v442_v4 = vadd.f32 %v441_v0, %v412_v58  ;;  %v473_v18 = vadd.f32 %v472_v12, %v471_v14 }
  0xc5   : > { %461 = vst.msk [vmem:[%s888_s30 + $0xc] sm:$0xf] %vm457_vm2, %v452_v3  ;;  %v503_v16 = vsel %vm466_vm3, %v493_v8, 0.0 }
  0xc6   : > { %v454_v9 = vpack.c.bf16 %v442_v4, %v442_v4  ;;  %v504_v22 = vadd.f32 %v503_v16, %v502_v17  ;;  %v475_v25 = vadd.f32 %v474_v23, %v473_v18  ;;  %v495_v27 = vmul.f32 %v442_v4, %v442_v4 }
  0xc7   : > { %v476_v30 = vsel %vm466_vm3, %v442_v4, 0.0  ;;  %v417_v33 = vpop.f32.mrf.mxu2 }
  0xc8   : > { %463 = vst.msk [vmem:[%s888_s30 + $0x14] sm:$0xf] %vm457_vm2, %v454_v9  ;;  %v506_v29 = vadd.f32 %v505_v26, %v504_v22  ;;  %v477_v32 = vadd.f32 %v476_v30, %v475_v25  ;;  %v507_v35 = vsel %vm466_vm3, %v495_v27, 0.0 }
  0xca   : > { %v508_v38 = vadd.f32 %v507_v35, %v506_v29 }
  0xcb   : > { %v444_v19 = vpop.f32.mrf.mxu3 }
  0xcc   : > { %v445_v21 = vadd.f32 %v444_v19, %v415_v15 }
  0xce   : > { %v455_v24 = vpack.c.bf16 %v445_v21, %v445_v21  ;;  %v496_v28 = vmul.f32 %v445_v21, %v445_v21  ;;  %v478_v31 = vsel %vm466_vm3, %v445_v21, 0.0 }
  0xcf   : > { %v479_v39 = vadd.f32 %v478_v31, %v477_v32 }
  0xd0   : > { %464 = vst.msk [vmem:[%s888_s30 + $0x18] sm:$0xf] %vm457_vm2, %v455_v24  ;;  %v509_v36 = vsel %vm466_vm3, %v496_v28, 0.0 }
  0xd1   : > { %v510_v43 = vadd.f32 %v509_v36, %v508_v38 }
  0xd3   : > { %v446_v34 = vpop.f32.mrf.mxu3 }
  0xd4   : > { %v447_v37 = vadd.f32 %v446_v34, %v417_v33 }
  0xd6   : > { %v456_v40 = vpack.c.bf16 %v447_v37, %v447_v37  ;;  %v480_v41 = vsel %vm466_vm3, %v447_v37, 0.0  ;;  %v497_v42 = vmul.f32 %v447_v37, %v447_v37 }
  0xd7   : > { %v481_v44 = vadd.f32 %v480_v41, %v479_v39 }
  0xd8   : > { %465 = vst.msk [vmem:[%s888_s30 + $0x1c] sm:$0xf] %vm457_vm2, %v456_v40  ;;  %v511_v45 = vsel %vm466_vm3, %v497_v42, 0.0 }
  0xd9   : > { %v482_v46 = vrot.slane %v481_v44, 4  ;;  %v512_v47 = vadd.f32 %v511_v45, %v510_v43 }
  0xdb   : > { %v483_v48 = vadd.f32 %v482_v46, %v481_v44  ;;  %v513_v49 = vrot.slane %v512_v47, 4 }
  0xdd   : > { %v484_v50 = vrot.slane %v483_v48, 2  ;;  %v514_v51 = vadd.f32 %v513_v49, %v512_v47 }
  0xdf   : > { %v485_v52 = vadd.f32 %v484_v50, %v483_v48  ;;  %v515_v53 = vrot.slane %v514_v51, 2 }
  0xe1   : > { %v486_v54 = vrot.slane %v485_v52, 1  ;;  %v516_v55 = vadd.f32 %v515_v53, %v514_v51 }
  0xe3   : > { %v487_v56 = vadd.f32 %v486_v54, %v485_v52  ;;  %v517_v57 = vrot.slane %v516_v55, 1 }
  0xe5   : > { %489 = vst.msk [vmem:[%s217_s6] sm:$0x1] %vm488_vm4, %v487_v56  ;;  %v518_v58 = vadd.f32 %v517_v57, %v516_v55 }
  0xe7   : > { %519 = vst.msk [vmem:[%s220_s9] sm:$0x1] %vm488_vm4, %v518_v58 }
  0xe8 PF: > { %s15_s15 = sadd.s32 1, %s776_s15  }
  0xe9   : > { %p12_p5 = scmp.ge.s32.totalorder %s15_s15, 4  }
  0xeb   :  { %14 = sbr.rel (!%p12_p5) target bundleno = 1 (0x1), region = 82 }

// kernel: xfeat_forward.64
= control target key start
LH: loop header
LB: loop body
LE: loop exit
PB: predicated region body
PF: predicated region fallthrough
CT: control target
= control target key end

     0   :  { %s306_s12 = smov 0   ;;  %s329_s0 = inlined_call_operand.vmem [shape: bf16[32,64], index: 0, kind: input, shape index: {}]   ;;  %s330_s1 = inlined_call_operand.vmem [shape: f32[1,64], index: 1, kind: input, shape index: {}]   ;;  %s331_s2 = inlined_call_operand.vmem [shape: f32[1,64], index: 2, kind: input, shape index: {}]   ;;  %s332_s3 = inlined_call_operand.vmem [shape: bf16[32,64], index: 3, kind: output, shape index: {}]  }
   0x1 LB: > { %s253_s13 = sadd.s32 4294967295, %s284_s12   ;;  %p257_p0 = scmp.ge.s32.totalorder %s284_s12, 1  ;;  %s284_s12 = sphi %s306_s12, %s13_s12  }
   0x2   : > { %p138_p1 = scmp.lt.s32.totalorder %s284_s12, 3 }
   0x4   : > { %p139_p2 = pnand %p257_p0, %p138_p1 }
   0x5   : > { %s258_s14 = sshll.u32 (!%p139_p2), %s253_s13, 1 }
   0x6   : > { %142 = sbr.rel (%p139_p2) target bundleno = 27 (0x1b), region = 32  ;;  %p163_p3 = scmp.lt.s32.totalorder (!%p139_p2), %s258_s14, 3 }
   0xb   : > { %s334_s14 = smov (!%p163_p3, %s258_s14), 3  ;;  %v276_v0 = vld [vmem:[%s330_s1] ss:$0 sm:$0xff]  ;;  %vm194_vm0 = vcmask 519168  }
   0xc   : > { %s259_s15 = sshll.u32 %s334_s14, 2  ;;  %v277_v4 = vld [vmem:[%s331_s2] ss:$0 sm:$0xff] }
   0xd   : > { %s166_s18 = scalar_lea.vmem %s329_s0, %s259_s15  ;;  %s172_s25 = scalar_lea.vmem %s332_s3, %s259_s15 }
   0xe   : > { %v265_v1 = vld [vmem:[%s166_s18] sm:$0xff]  }
   0xf   : > { %v266_v2 = vunpack.c.l.bf16 %v265_v1  ;;  %v267_v3 = vunpack.c.h.bf16 %v265_v1 }
  0x11   : > { %v182_v5 = vmul.f32 %v276_v0, %v266_v2  ;;  %v183_v6 = vmul.f32 %v276_v0, %v267_v3 }
  0x13   : > { %v188_v7 = vadd.f32 %v277_v4, %v182_v5  ;;  %v189_v8 = vadd.f32 %v277_v4, %v183_v6 }
  0x15   : > { %v190_v9 = vmax.f32 %v188_v7, 0.0  ;;  %v191_v10 = vmax.f32 %v189_v8, 0.0 }
  0x17   : > { %v192_v11 = vpack.c.bf16 %v190_v9, %v190_v9  ;;  %v193_v12 = vpack.c.bf16 %v191_v10, %v191_v10 }
  0x19   : > { %195 = vst.msk [vmem:[%s172_s25] sm:$0xf] %vm194_vm0, %v192_v11 }
  0x1a   : > { %196 = vst.msk [vmem:[%s172_s25 + $0x4] sm:$0xf] %vm194_vm0, %v193_v12 }
  0x1b PF: > { %s13_s12 = sadd.s32 1, %s284_s12  }
  0x1c   : > { %p10_p4 = scmp.ge.s32.totalorder %s13_s12, 4  }
  0x1e   :  { %12 = sbr.rel (!%p10_p4) target bundleno = 1 (0x1), region = 62 }

// kernel: xfeat_forward.63
= control target key start
LH: loop header
LB: loop body
LE: loop exit
PB: predicated region body
PF: predicated region fallthrough
CT: control target
= control target key end

     0   :  { %s642_s15 = smov 0   ;;  %s716_s0 = inlined_call_operand.vmem [shape: bf16[32,216], index: 0, kind: input, shape index: {}]   ;;  %s717_s1 = inlined_call_operand.vmem [shape: bf16[216,64], index: 1, kind: input, shape index: {}]   ;;  %s718_s2 = inlined_call_operand.vmem [shape: bf16[32,64], index: 2, kind: output, shape index: {0}]   ;;  %s719_s3 = inlined_call_operand.vmem [shape: f32[2,1,64], index: 3, kind: output, shape index: {1}]   ;;  %s720_s4 = inlined_call_operand.vmem [shape: f32[2,1,64], index: 4, kind: output, shape index: {2}]  }
   0x1 LB: > { %s648_s16 = sadd.s32 4294967295, %s615_s15   ;;  %p516_p0 = scmp.ge.s32.totalorder %s615_s15, 1  ;;  %s615_s15 = sphi %s642_s15, %s15_s15  }
   0x2   : > { %p169_p1 = scmp.lt.s32.totalorder %s615_s15, 3 }
   0x4   : > { %p170_p2 = pnand %p516_p0, %p169_p1 }
   0x5   : > { %s517_s23 = sshll.u32 (!%p170_p2), %s648_s16, 1  ;;  %p215_p4 = scmp.lt.s32.totalorder (!%p170_p2), %s648_s16, 1 }
   0x6   : > { %173 = sbr.rel (%p170_p2) target bundleno = 197 (0xc5), region = 28  ;;  %p203_p3 = scmp.lt.s32.totalorder (!%p170_p2), %s517_s23, 3 }
   0xb   : > { %v595_v0 = vld [vmem:[%s717_s1 + $0x38] sm:$0xff]  ;;  %v250_v1 = vld [vmem:[%s717_s1 + $0x68] sm:$0xf]  ;;  %vm345_vm0 = vcmask 1043456   ;;  %v594_v3 = vld [vmem:[%s717_s1 + $0x30] sm:$0xff]  ;;  %s722_s23 = smov (!%p203_p3, %s517_s23), 3 }
   0xc   : > { %v313_v2 = vunpack.c.l.b16 %v250_v1  ;;  %349 = vmatpush.bf16.msra.mxu0 %v595_v0  ;;  %v600_v6 = vld [vmem:[%s717_s1 + $0x60] sm:$0xff]  ;;  %v593_v7 = vld [vmem:[%s717_s1 + $0x28] sm:$0xff]  ;;  %v599_v8 = vld [vmem:[%s717_s1 + $0x58] sm:$0xff]  ;;  %s585_s10 = sshll.u32 %s722_s23, 3  ;;  %vm341_vm1 = vcmask 719872   ;;  %s521_s27 = sshll.u32 %s722_s23, 2 }
   0xd   : > { %v592_v9 = vld [vmem:[%s717_s1 + $0x20] sm:$0xff]  ;;  %v598_v10 = vld [vmem:[%s717_s1 + $0x50] sm:$0xff]  ;;  %v591_v11 = vld [vmem:[%s717_s1 + $0x18] sm:$0xff]  ;;  %s207_s19 = scalar_lea.vmem %s716_s0, %s585_s10  ;;  %s213_s30 = scalar_lea.vmem %s718_s2, %s521_s27  ;;  %vm379_vm2 = vcmask 519168   ;;  %vm382_vm3 = vcmask 523264   ;;  %vm392_vm4 = vcmask 516096  }
   0xe   : > { %v327_v4 = vpack.c.b16 %v313_v2, %v313_v2  ;;  %v597_v12 = vld [vmem:[%s717_s1 + $0x48] sm:$0xff]  ;;  %v590_v13 = vld [vmem:[%s717_s1 + $0x10] sm:$0xff]  ;;  %v596_v14 = vld [vmem:[%s717_s1 + $0x40] sm:$0xff]  ;;  %s724_s16 = smov (!%p215_p4, %s648_s16), 1 }
   0xf   : > { %v589_v15 = vld [vmem:[%s717_s1 + $0x8] sm:$0xff]  ;;  %v586_v16 = vld [vmem:[%s207_s19 + $0x4] sm:$0xf]  ;;  %v524_v20 = vld [vmem:[%s207_s19] sm:$0xf]  ;;  %s217_s6 = scalar_lea.vmem %s719_s3, %s724_s16  ;;  %s220_s9 = scalar_lea.vmem %s720_s4, %s724_s16 }
  0x10   : > { %v347_v5 = vsel %vm345_vm0, %v327_v4, 0  ;;  %350 = vmatpush.bf16.msra.mxu0 %v594_v3  ;;  %v526_v17 = vld [vmem:[%s207_s19 + $0x8] sm:$0xf0]  ;;  %v588_v19 = vld [vmem:[%s717_s1] sm:$0xff]  ;;  %v587_v21 = vld [vmem:[%s207_s19 + $0x4] sm:$0xf0] }
  0x11   : > { %365 = vmatpush.bf16.msra.mxu1 %v347_v5  ;;  %v529_v18 = vor.u32 %v586_v16, %v526_v17  ;;  %v525_v22 = vor.u32 %v587_v21, %v524_v20 }
  0x14   : > { %351 = vmatpush.bf16.msra.mxu0 %v593_v7 }
  0x15   : > { %366 = vmatpush.bf16.msra.mxu1 %v600_v6 }
  0x18   : > { %352 = vmatpush.bf16.msra.mxu0 %v592_v9 }
  0x19   : > { %367 = vmatpush.bf16.msra.mxu1 %v599_v8 }
  0x1c   : > { %353 = vmatpush.bf16.msra.mxu0 %v591_v11 }
  0x1d   : > { %368 = vmatpush.bf16.msra.mxu1 %v598_v10 }
  0x20   : > { %354 = vmatpush.bf16.msra.mxu0 %v590_v13 }
  0x21   : > { %369 = vmatpush.bf16.msra.mxu1 %v597_v12 }
  0x24   : > { %355 = vmatpush.bf16.msra.mxu0 %v589_v15 }
  0x25   : > { %370 = vmatpush.bf16.msra.mxu1 %v596_v14 }
  0x28   : > { %582 = vmatmul.msk.bf16.vlgmr.msra.gmra.mxu1 %vm341_vm1, %v529_v18  ;;  %356 = vmatpush.bf16.msra.mxu0 %v588_v19 }
  0x2b   : > { %357 = vmatmul.bf16.vlgmr.msra.gmra.mxu0 %v525_v22 }
  0xa5   : > { %v372_v23 = vpop.f32.mrf.mxu1 }
  0xa8   : > { %v358_v24 = vpop.f32.mrf.mxu0 }
  0xa9   : > { %v373_v25 = vadd.f32 %v372_v23, %v358_v24 }
  0xab   : > { %v377_v26 = vpack.c.bf16 %v373_v25, %v373_v25  ;;  %v394_v29 = vmul.f32 %v373_v25, %v373_v25  ;;  %v383_v31 = vsel %vm382_vm3, %v373_v25, 0.0 }
  0xad   : > { %380 = vst.msk [vmem:[%s213_s30] sm:$0xf] %vm379_vm2, %v377_v26  ;;  %v374_v27 = vpop.f32.mrf.mxu1  ;;  %v396_v36 = vsel %vm382_vm3, %v394_v29, 0.0 }
  0xb0   : > { %v360_v28 = vpop.f32.mrf.mxu0 }
  0xb1   : > { %v375_v30 = vadd.f32 %v374_v27, %v360_v28 }
  0xb3   : > { %v378_v32 = vpack.c.bf16 %v375_v30, %v375_v30  ;;  %v384_v33 = vsel %vm382_vm3, %v375_v30, 0.0  ;;  %v395_v34 = vmul.f32 %v375_v30, %v375_v30 }
  0xb4   : > { %v385_v35 = vadd.f32 %v384_v33, %v383_v31 }
  0xb5   : > { %381 = vst.msk [vmem:[%s213_s30 + $0x4] sm:$0xf] %vm379_vm2, %v378_v32  ;;  %v397_v37 = vsel %vm382_vm3, %v395_v34, 0.0 }
  0xb6   : > { %v386_v38 = vrot.slane %v385_v35, 4  ;;  %v398_v39 = vadd.f32 %v397_v37, %v396_v36 }
  0xb8   : > { %v387_v40 = vadd.f32 %v386_v38, %v385_v35  ;;  %v399_v41 = vrot.slane %v398_v39, 4 }
  0xba   : > { %v388_v42 = vrot.slane %v387_v40, 2  ;;  %v400_v43 = vadd.f32 %v399_v41, %v398_v39 }
  0xbc   : > { %v389_v44 = vadd.f32 %v388_v42, %v387_v40  ;;  %v401_v45 = vrot.slane %v400_v43, 2 }
  0xbe   : > { %v390_v46 = vrot.slane %v389_v44, 1  ;;  %v402_v47 = vadd.f32 %v401_v45, %v400_v43 }
  0xc0   : > { %v391_v48 = vadd.f32 %v390_v46, %v389_v44  ;;  %v403_v49 = vrot.slane %v402_v47, 1 }
  0xc2   : > { %393 = vst.msk [vmem:[%s217_s6] sm:$0x1] %vm392_vm4, %v391_v48  ;;  %v404_v50 = vadd.f32 %v403_v49, %v402_v47 }
  0xc4   : > { %405 = vst.msk [vmem:[%s220_s9] sm:$0x1] %vm392_vm4, %v404_v50 }
  0xc5 PF: > { %s15_s15 = sadd.s32 1, %s615_s15  }
  0xc6   : > { %p12_p5 = scmp.ge.s32.totalorder %s15_s15, 4  }
  0xc8   :  { %14 = sbr.rel (!%p12_p5) target bundleno = 1 (0x1), region = 82 }

// kernel: xfeat_forward.67
= control target key start
LH: loop header
LB: loop body
LE: loop exit
PB: predicated region body
PF: predicated region fallthrough
CT: control target
= control target key end

     0   :  { %s488_s15 = smov 0   ;;  %s533_s0 = inlined_call_operand.vmem [shape: bf16[32,64], index: 0, kind: input, shape index: {}]   ;;  %s534_s1 = inlined_call_operand.vmem [shape: bf16[64,64], index: 1, kind: input, shape index: {}]   ;;  %s535_s2 = inlined_call_operand.vmem [shape: bf16[32,64], index: 2, kind: output, shape index: {0}]   ;;  %s536_s3 = inlined_call_operand.vmem [shape: f32[2,1,64], index: 3, kind: output, shape index: {1}]   ;;  %s537_s4 = inlined_call_operand.vmem [shape: f32[2,1,64], index: 4, kind: output, shape index: {2}]  }
   0x1 LB: > { %s494_s16 = sadd.s32 4294967295, %s461_s15   ;;  %p414_p0 = scmp.ge.s32.totalorder %s461_s15, 1  ;;  %s461_s15 = sphi %s488_s15, %s15_s15  }
   0x2   : > { %p168_p1 = scmp.lt.s32.totalorder %s461_s15, 3 }
   0x4   : > { %p169_p2 = pnand %p414_p0, %p168_p1 }
   0x5   : > { %s415_s19 = sshll.u32 (!%p169_p2), %s494_s16, 1  ;;  %p212_p4 = scmp.lt.s32.totalorder (!%p169_p2), %s494_s16, 1 }
   0x6   : > { %172 = sbr.rel (%p169_p2) target bundleno = 179 (0xb3), region = 28  ;;  %p201_p3 = scmp.lt.s32.totalorder (!%p169_p2), %s415_s19, 3 }
   0xb   : > { %v446_v0 = vld [vmem:[%s534_s1 + $0x18] sm:$0xff]  ;;  %v445_v1 = vld [vmem:[%s534_s1 + $0x10] sm:$0xff]  ;;  %s539_s19 = smov (!%p201_p3, %s415_s19), 3  ;;  %v444_v2 = vld [vmem:[%s534_s1 + $0x8] sm:$0xff]  ;;  %vm258_vm0 = vcmask 523264   ;;  %vm278_vm1 = vcmask 519168  }
   0xc   : > { %266 = vmatpush.bf16.msra.mxu0 %v446_v0  ;;  %s416_s24 = sshll.u32 %s539_s19, 2  ;;  %v443_v3 = vld [vmem:[%s534_s1] sm:$0xff]  ;;  %s541_s16 = smov (!%p212_p4, %s494_s16), 1  ;;  %vm290_vm2 = vcmask 516096  }
   0xd   : > { %s204_s29 = scalar_lea.vmem %s533_s0, %s416_s24  ;;  %s210_s6 = scalar_lea.vmem %s535_s2, %s416_s24 }
   0xe   : > { %v442_v4 = vld [vmem:[%s204_s29] sm:$0xff]  ;;  %s214_s9 = scalar_lea.vmem %s536_s3, %s541_s16  ;;  %s217_s12 = scalar_lea.vmem %s537_s4, %s541_s16 }
  0x10   : > { %267 = vmatpush.bf16.msra.mxu0 %v445_v1 }
  0x14   : > { %268 = vmatpush.bf16.msra.mxu0 %v444_v2 }
  0x18   : > { %269 = vmatpush.bf16.msra.mxu0 %v443_v3 }
  0x1b   : > { %439 = vmatmul.msk.bf16.vlgmr.msra.gmra.mxu0 %vm258_vm0, %v442_v4 }
  0x98   : > { %v271_v5 = vpop.f32.mrf.mxu0 }
  0x99   : > { %v276_v6 = vpack.c.bf16 %v271_v5, %v271_v5  ;;  %v292_v7 = vmul.f32 %v271_v5, %v271_v5  ;;  %v281_v9 = vsel %vm258_vm0, %v271_v5, 0.0 }
  0x9b   : > { %279 = vst.msk [vmem:[%s210_s6] sm:$0xf] %vm278_vm1, %v276_v6  ;;  %v294_v14 = vsel %vm258_vm0, %v292_v7, 0.0 }
  0xa0   : > { %v273_v8 = vpop.f32.mrf.mxu0 }
  0xa1   : > { %v277_v10 = vpack.c.bf16 %v273_v8, %v273_v8  ;;  %v282_v11 = vsel %vm258_vm0, %v273_v8, 0.0  ;;  %v293_v12 = vmul.f32 %v273_v8, %v273_v8 }
  0xa2   : > { %v283_v13 = vadd.f32 %v282_v11, %v281_v9 }
  0xa3   : > { %280 = vst.msk [vmem:[%s210_s6 + $0x4] sm:$0xf] %vm278_vm1, %v277_v10  ;;  %v295_v15 = vsel %vm258_vm0, %v293_v12, 0.0 }
  0xa4   : > { %v284_v16 = vrot.slane %v283_v13, 4  ;;  %v296_v17 = vadd.f32 %v295_v15, %v294_v14 }
  0xa6   : > { %v285_v18 = vadd.f32 %v284_v16, %v283_v13  ;;  %v297_v19 = vrot.slane %v296_v17, 4 }
  0xa8   : > { %v286_v20 = vrot.slane %v285_v18, 2  ;;  %v298_v21 = vadd.f32 %v297_v19, %v296_v17 }
  0xaa   : > { %v287_v22 = vadd.f32 %v286_v20, %v285_v18  ;;  %v299_v23 = vrot.slane %v298_v21, 2 }
  0xac   : > { %v288_v24 = vrot.slane %v287_v22, 1  ;;  %v300_v25 = vadd.f32 %v299_v23, %v298_v21 }
  0xae   : > { %v289_v26 = vadd.f32 %v288_v24, %v287_v22  ;;  %v301_v27 = vrot.slane %v300_v25, 1 }
  0xb0   : > { %291 = vst.msk [vmem:[%s214_s9] sm:$0x1] %vm290_vm2, %v289_v26  ;;  %v302_v28 = vadd.f32 %v301_v27, %v300_v25 }
  0xb2   : > { %303 = vst.msk [vmem:[%s217_s12] sm:$0x1] %vm290_vm2, %v302_v28 }
  0xb3 PF: > { %s15_s15 = sadd.s32 1, %s461_s15  }
  0xb4   : > { %p12_p5 = scmp.ge.s32.totalorder %s15_s15, 4  }
  0xb6   :  { %14 = sbr.rel (!%p12_p5) target bundleno = 1 (0x1), region = 82 }

// kernel: xfeat_forward.65
= control target key start
LH: loop header
LB: loop body
LE: loop exit
PB: predicated region body
PF: predicated region fallthrough
CT: control target
= control target key end

     0   :  { %s1008_s15 = smov 0   ;;  %s1165_s0 = inlined_call_operand.vmem [shape: bf16[32,576], index: 0, kind: input, shape index: {}]   ;;  %s1166_s1 = inlined_call_operand.vmem [shape: bf16[576,64], index: 1, kind: input, shape index: {}]   ;;  %s1167_s2 = inlined_call_operand.vmem [shape: bf16[32,64], index: 2, kind: output, shape index: {0}]   ;;  %s1168_s3 = inlined_call_operand.vmem [shape: f32[2,1,64], index: 3, kind: output, shape index: {1}]   ;;  %s1169_s4 = inlined_call_operand.vmem [shape: f32[2,1,64], index: 4, kind: output, shape index: {2}]  }
   0x1 LB: > { %s1014_s16 = sadd.s32 4294967295, %s981_s15   ;;  %p753_p0 = scmp.ge.s32.totalorder %s981_s15, 1  ;;  %s981_s15 = sphi %s1008_s15, %s15_s15  }
   0x2   : > { %p169_p1 = scmp.lt.s32.totalorder %s981_s15, 3 }
   0x4   : > { %p170_p2 = pnand %p753_p0, %p169_p1 }
   0x5   : > { %s754_s17 = sshll.u32 (!%p170_p2), %s1014_s16, 1  ;;  %p215_p4 = scmp.lt.s32.totalorder (!%p170_p2), %s1014_s16, 1 }
   0x6   : > { %173 = sbr.rel (%p170_p2) target bundleno = 213 (0xd5), region = 28  ;;  %p203_p3 = scmp.lt.s32.totalorder (!%p170_p2), %s754_s17, 3 }
   0xb   : > { %v937_v0 = vld [vmem:[%s1166_s1 + $0x38] sm:$0xff]  ;;  %v936_v4 = vld [vmem:[%s1166_s1 + $0x30] sm:$0xff]  ;;  %v935_v8 = vld [vmem:[%s1166_s1 + $0x28] sm:$0xff]  ;;  %s1171_s17 = smov (!%p203_p3, %s754_s17), 3  ;;  %vm541_vm0 = vcmask 523264   ;;  %vm617_vm1 = vcmask 519168  }
   0xc   : > { %v945_v1 = vld [vmem:[%s1166_s1 + $0x78] sm:$0xff]  ;;  %545 = vmatpush.bf16.msra.mxu0 %v937_v0  ;;  %v944_v5 = vld [vmem:[%s1166_s1 + $0x70] sm:$0xff]  ;;  %v943_v9 = vld [vmem:[%s1166_s1 + $0x68] sm:$0xff]  ;;  %s966_s12 = smul.u32 20, %s1171_s17  ;;  %s757_s24 = sshll.u32 %s1171_s17, 2  ;;  %vm629_vm2 = vcmask 516096  }
   0xd   : > { %v953_v2 = vld [vmem:[%s1166_s1 + $0xb8] sm:$0xff]  ;;  %559 = vmatpush.bf16.msra.mxu1 %v945_v1  ;;  %v952_v6 = vld [vmem:[%s1166_s1 + $0xb0] sm:$0xff]  ;;  %v951_v10 = vld [vmem:[%s1166_s1 + $0xa8] sm:$0xff]  ;;  %s213_s27 = scalar_lea.vmem %s1167_s2, %s757_s24  ;;  %s1173_s16 = smov (!%p215_p4, %s1014_s16), 1 }
   0xe   : > { %v961_v3 = vld [vmem:[%s1166_s1 + $0xf8] sm:$0xff]  ;;  %573 = vmatpush.bf16.msra.mxu2 %v953_v2  ;;  %v960_v7 = vld [vmem:[%s1166_s1 + $0xf0] sm:$0xff]  ;;  %v959_v11 = vld [vmem:[%s1166_s1 + $0xe8] sm:$0xff]  ;;  %s1103_s26 = scalar_lea.vmem %s1165_s0, %s966_s12  ;;  %s217_s29 = scalar_lea.vmem %s1168_s3, %s1173_s16 }
   0xf   : > { %587 = vmatpush.bf16.msra.mxu3 %v961_v3  ;;  %v934_v12 = vld [vmem:[%s1166_s1 + $0x20] sm:$0xff]  ;;  %v933_v16 = vld [vmem:[%s1166_s1 + $0x18] sm:$0xff]  ;;  %v932_v20 = vld [vmem:[%s1166_s1 + $0x10] sm:$0xff]  ;;  %s220_s6 = scalar_lea.vmem %s1169_s4, %s1173_s16 }
  0x10   : > { %546 = vmatpush.bf16.msra.mxu0 %v936_v4  ;;  %v942_v13 = vld [vmem:[%s1166_s1 + $0x60] sm:$0xff]  ;;  %v941_v17 = vld [vmem:[%s1166_s1 + $0x58] sm:$0xff]  ;;  %v940_v21 = vld [vmem:[%s1166_s1 + $0x50] sm:$0xff] }
  0x11   : > { %560 = vmatpush.bf16.msra.mxu1 %v944_v5  ;;  %v950_v14 = vld [vmem:[%s1166_s1 + $0xa0] sm:$0xff]  ;;  %v949_v18 = vld [vmem:[%s1166_s1 + $0x98] sm:$0xff]  ;;  %v948_v22 = vld [vmem:[%s1166_s1 + $0x90] sm:$0xff] }
  0x12   : > { %574 = vmatpush.bf16.msra.mxu2 %v952_v6  ;;  %v958_v15 = vld [vmem:[%s1166_s1 + $0xe0] sm:$0xff]  ;;  %v957_v19 = vld [vmem:[%s1166_s1 + $0xd8] sm:$0xff]  ;;  %v956_v23 = vld [vmem:[%s1166_s1 + $0xd0] sm:$0xff] }
  0x13   : > { %588 = vmatpush.bf16.msra.mxu3 %v960_v7  ;;  %v931_v24 = vld [vmem:[%s1166_s1 + $0x8] sm:$0xff]  ;;  %v930_v28 = vld [vmem:[%s1166_s1] sm:$0xff]  ;;  %v927_v33 = vld [vmem:[%s1103_s26 + $0x10] sm:$0xf0] }
  0x14   : > { %547 = vmatpush.bf16.msra.mxu0 %v935_v8  ;;  %v939_v25 = vld [vmem:[%s1166_s1 + $0x48] sm:$0xff]  ;;  %v938_v29 = vld [vmem:[%s1166_s1 + $0x40] sm:$0xff]  ;;  %v762_v35 = vld [vmem:[%s1103_s26 + $0x14] sm:$0xf0] }
  0x15   : > { %561 = vmatpush.bf16.msra.mxu1 %v943_v9  ;;  %v947_v26 = vld [vmem:[%s1166_s1 + $0x88] sm:$0xff]  ;;  %v946_v30 = vld [vmem:[%s1166_s1 + $0x80] sm:$0xff]  ;;  %v928_v37 = vld [vmem:[%s1103_s26 + $0x18] sm:$0xf0] }
  0x16   : > { %575 = vmatpush.bf16.msra.mxu2 %v951_v10  ;;  %v955_v27 = vld [vmem:[%s1166_s1 + $0xc8] sm:$0xff]  ;;  %v954_v31 = vld [vmem:[%s1166_s1 + $0xc0] sm:$0xff]  ;;  %v965_v40 = vld [vmem:[%s1166_s1 + $0x118] sm:$0xff] }
  0x17   : > { %589 = vmatpush.bf16.msra.mxu3 %v959_v11  ;;  %v760_v32 = vld [vmem:[%s1103_s26] sm:$0xf]  ;;  %v925_v34 = vld [vmem:[%s1103_s26 + $0x4] sm:$0xf]  ;;  %v768_v36 = vld [vmem:[%s1103_s26 + $0x8] sm:$0xf] }
  0x18   : > { %548 = vmatpush.bf16.msra.mxu0 %v934_v12  ;;  %v926_v38 = vld [vmem:[%s1103_s26 + $0xc] sm:$0xf]  ;;  %v770_v39 = vld [vmem:[%s1103_s26 + $0x1c] sm:$0xf0]  ;;  %v761_v41 = vor.u32 %v927_v33, %v760_v32  ;;  %v765_v42 = vor.u32 %v925_v34, %v762_v35  ;;  %v769_v43 = vor.u32 %v928_v37, %v768_v36  ;;  %v964_v45 = vld [vmem:[%s1166_s1 + $0x110] sm:$0xff] }
  0x19   : > { %562 = vmatpush.bf16.msra.mxu1 %v942_v13  ;;  %v773_v44 = vor.u32 %v926_v38, %v770_v39  ;;  %v963_v46 = vld [vmem:[%s1166_s1 + $0x108] sm:$0xff]  ;;  %v962_v47 = vld [vmem:[%s1166_s1 + $0x100] sm:$0xff]  ;;  %v776_v48 = vld [vmem:[%s1103_s26 + $0x10] sm:$0xf] }
  0x1a   : > { %576 = vmatpush.bf16.msra.mxu2 %v950_v14  ;;  %v929_v49 = vld [vmem:[%s1103_s26 + $0x20] sm:$0xf0] }
  0x1b   : > { %590 = vmatpush.bf16.msra.mxu3 %v958_v15  ;;  %v777_v50 = vor.u32 %v929_v49, %v776_v48 }
  0x1c   : > { %549 = vmatpush.bf16.msra.mxu0 %v933_v16 }
  0x1d   : > { %563 = vmatpush.bf16.msra.mxu1 %v941_v17 }
  0x1e   : > { %577 = vmatpush.bf16.msra.mxu2 %v949_v18 }
  0x1f   : > { %591 = vmatpush.bf16.msra.mxu3 %v957_v19 }
  0x20   : > { %550 = vmatpush.bf16.msra.mxu0 %v932_v20 }
  0x21   : > { %564 = vmatpush.bf16.msra.mxu1 %v940_v21 }
  0x22   : > { %578 = vmatpush.bf16.msra.mxu2 %v948_v22 }
  0x23   : > { %592 = vmatpush.bf16.msra.mxu3 %v956_v23 }
  0x24   : > { %551 = vmatpush.bf16.msra.mxu0 %v931_v24 }
  0x25   : > { %565 = vmatpush.bf16.msra.mxu1 %v939_v25 }
  0x26   : > { %579 = vmatpush.bf16.msra.mxu2 %v947_v26 }
  0x27   : > { %593 = vmatpush.bf16.msra.mxu3 %v955_v27 }
  0x28   : > { %552 = vmatpush.bf16.msra.mxu0 %v930_v28 }
  0x29   : > { %566 = vmatpush.bf16.msra.mxu1 %v938_v29 }
  0x2a   : > { %580 = vmatpush.bf16.msra.mxu2 %v946_v30 }
  0x2b   : > { %594 = vmatpush.bf16.msra.mxu3 %v954_v31  ;;  %553 = vmatmul.bf16.vlgmr.msra.gmra.mxu0 %v761_v41 }
  0x2c   : > { %605 = vmatpush.bf16.msrb.mxu0 %v965_v40  ;;  %567 = vmatmul.bf16.vlgmr.msra.gmra.mxu1 %v765_v42 }
  0x2d   : > { %581 = vmatmul.bf16.vlgmr.msra.gmra.mxu2 %v769_v43 }
  0x2e   : > { %595 = vmatmul.bf16.vlgmr.msra.gmra.mxu3 %v773_v44 }
  0x30   : > { %606 = vmatpush.bf16.msrb.mxu0 %v964_v45 }
  0x34   : > { %607 = vmatpush.bf16.msrb.mxu0 %v963_v46 }
  0x38   : > { %608 = vmatpush.bf16.msrb.mxu0 %v962_v47 }
  0x3b   : > { %922 = vmatmul.msk.bf16.vlgmr.msrb.gmra.mxu0 %vm541_vm0, %v777_v50 }
  0xa8   : > { %v554_v51 = vpop.f32.mrf.mxu0 }
  0xa9   : > { %v568_v52 = vpop.f32.mrf.mxu1 }
  0xaa   : > { %v569_v55 = vadd.f32 %v568_v52, %v554_v51 }
  0xb0   : > { %v582_v53 = vpop.f32.mrf.mxu2  ;;  %v556_v54 = vpop.f32.mrf.mxu0 }
  0xb1   : > { %v583_v56 = vadd.f32 %v582_v53, %v569_v55  ;;  %v596_v57 = vpop.f32.mrf.mxu3  ;;  %v570_v58 = vpop.f32.mrf.mxu1 }
  0xb2   : > { %v571_v62 = vadd.f32 %v570_v58, %v556_v54 }
  0xb3   : > { %v597_v59 = vadd.f32 %v596_v57, %v583_v56 }
  0xb8   : > { %v584_v60 = vpop.f32.mrf.mxu2  ;;  %v610_v61 = vpop.f32.mrf.mxu0 }
  0xb9   : > { %v611_v63 = vadd.f32 %v610_v61, %v597_v59  ;;  %v585_v0 = vadd.f32 %v584_v60, %v571_v62  ;;  %v598_v2 = vpop.f32.mrf.mxu3 }
  0xbb   : > { %v615_v1 = vpack.c.bf16 %v611_v63, %v611_v63  ;;  %v599_v3 = vadd.f32 %v598_v2, %v585_v0  ;;  %v631_v5 = vmul.f32 %v611_v63, %v611_v63  ;;  %v620_v7 = vsel %vm541_vm0, %v611_v63, 0.0 }
  0xbd   : > { %618 = vst.msk [vmem:[%s213_s27] sm:$0xf] %vm617_vm1, %v615_v1  ;;  %v633_v12 = vsel %vm541_vm0, %v631_v5, 0.0 }
  0xc0   : > { %v612_v4 = vpop.f32.mrf.mxu0 }
  0xc1   : > { %v613_v6 = vadd.f32 %v612_v4, %v599_v3 }
  0xc3   : > { %v616_v8 = vpack.c.bf16 %v613_v6, %v613_v6  ;;  %v621_v9 = vsel %vm541_vm0, %v613_v6, 0.0  ;;  %v632_v10 = vmul.f32 %v613_v6, %v613_v6 }
  0xc4   : > { %v622_v11 = vadd.f32 %v621_v9, %v620_v7 }
  0xc5   : > { %619 = vst.msk [vmem:[%s213_s27 + $0x4] sm:$0xf] %vm617_vm1, %v616_v8  ;;  %v634_v13 = vsel %vm541_vm0, %v632_v10, 0.0 }
  0xc6   : > { %v623_v14 = vrot.slane %v622_v11, 4  ;;  %v635_v15 = vadd.f32 %v634_v13, %v633_v12 }
  0xc8   : > { %v624_v16 = vadd.f32 %v623_v14, %v622_v11  ;;  %v636_v17 = vrot.slane %v635_v15, 4 }
  0xca   : > { %v625_v18 = vrot.slane %v624_v16, 2  ;;  %v637_v19 = vadd.f32 %v636_v17, %v635_v15 }
  0xcc   : > { %v626_v20 = vadd.f32 %v625_v18, %v624_v16  ;;  %v638_v21 = vrot.slane %v637_v19, 2 }
  0xce   : > { %v627_v22 = vrot.slane %v626_v20, 1  ;;  %v639_v23 = vadd.f32 %v638_v21, %v637_v19 }
  0xd0   : > { %v628_v24 = vadd.f32 %v627_v22, %v626_v20  ;;  %v640_v25 = vrot.slane %v639_v23, 1 }
  0xd2   : > { %630 = vst.msk [vmem:[%s217_s29] sm:$0x1] %vm629_vm2, %v628_v24  ;;  %v641_v26 = vadd.f32 %v640_v25, %v639_v23 }
  0xd4   : > { %642 = vst.msk [vmem:[%s220_s6] sm:$0x1] %vm629_vm2, %v641_v26 }
  0xd5 PF: > { %s15_s15 = sadd.s32 1, %s981_s15  }
  0xd6   : > { %p12_p5 = scmp.ge.s32.totalorder %s15_s15, 4  }
  0xd8   :  { %14 = sbr.rel (!%p12_p5) target bundleno = 1 (0x1), region = 82 }

// kernel: xfeat_forward.69
= control target key start
LH: loop header
LB: loop body
LE: loop exit
PB: predicated region body
PF: predicated region fallthrough
CT: control target
= control target key end

     0   :  { %vm323_vm0 = vcmask 523264   ;;  %vm393_vm1 = vcmask 519168   ;;  %vm402_vm2 = vcmask 516096   ;;  %s760_s1 = inlined_call_operand.vmem [shape: bf16[576,64], index: 1, kind: input, shape index: {}]   ;;  %s761_s0 = inlined_call_operand.vmem [shape: bf16[8,576], index: 0, kind: input, shape index: {}]   ;;  %s762_s2 = inlined_call_operand.vmem [shape: bf16[8,64], index: 2, kind: output, shape index: {0}]   ;;  %s763_s3 = inlined_call_operand.vmem [shape: f32[1,1,64], index: 3, kind: output, shape index: {1}]   ;;  %s764_s4 = inlined_call_operand.vmem [shape: f32[1,1,64], index: 4, kind: output, shape index: {2}]  }
   0x1   :  { %v577_v0 = vld [vmem:[%s760_s1 + $0x38] sm:$0xff]  ;;  %v576_v4 = vld [vmem:[%s760_s1 + $0x30] sm:$0xff]  ;;  %v575_v8 = vld [vmem:[%s760_s1 + $0x28] sm:$0xff] }
   0x2   :  { %v585_v1 = vld [vmem:[%s760_s1 + $0x78] sm:$0xff]  ;;  %327 = vmatpush.bf16.msra.mxu0 %v577_v0  ;;  %v584_v5 = vld [vmem:[%s760_s1 + $0x70] sm:$0xff]  ;;  %v583_v9 = vld [vmem:[%s760_s1 + $0x68] sm:$0xff] }
   0x3   :  { %v593_v2 = vld [vmem:[%s760_s1 + $0xb8] sm:$0xff]  ;;  %340 = vmatpush.bf16.msra.mxu1 %v585_v1  ;;  %v592_v6 = vld [vmem:[%s760_s1 + $0xb0] sm:$0xff]  ;;  %v591_v10 = vld [vmem:[%s760_s1 + $0xa8] sm:$0xff] }
   0x4   :  { %v601_v3 = vld [vmem:[%s760_s1 + $0xf8] sm:$0xff]  ;;  %353 = vmatpush.bf16.msra.mxu2 %v593_v2  ;;  %v600_v7 = vld [vmem:[%s760_s1 + $0xf0] sm:$0xff]  ;;  %v599_v11 = vld [vmem:[%s760_s1 + $0xe8] sm:$0xff] }
   0x5   :  { %366 = vmatpush.bf16.msra.mxu3 %v601_v3  ;;  %v574_v12 = vld [vmem:[%s760_s1 + $0x20] sm:$0xff]  ;;  %v573_v16 = vld [vmem:[%s760_s1 + $0x18] sm:$0xff]  ;;  %v572_v20 = vld [vmem:[%s760_s1 + $0x10] sm:$0xff] }
   0x6   :  { %328 = vmatpush.bf16.msra.mxu0 %v576_v4  ;;  %v582_v13 = vld [vmem:[%s760_s1 + $0x60] sm:$0xff]  ;;  %v581_v17 = vld [vmem:[%s760_s1 + $0x58] sm:$0xff]  ;;  %v580_v21 = vld [vmem:[%s760_s1 + $0x50] sm:$0xff] }
   0x7   :  { %341 = vmatpush.bf16.msra.mxu1 %v584_v5  ;;  %v590_v14 = vld [vmem:[%s760_s1 + $0xa0] sm:$0xff]  ;;  %v589_v18 = vld [vmem:[%s760_s1 + $0x98] sm:$0xff]  ;;  %v588_v22 = vld [vmem:[%s760_s1 + $0x90] sm:$0xff] }
   0x8   :  { %354 = vmatpush.bf16.msra.mxu2 %v592_v6  ;;  %v598_v15 = vld [vmem:[%s760_s1 + $0xe0] sm:$0xff]  ;;  %v597_v19 = vld [vmem:[%s760_s1 + $0xd8] sm:$0xff]  ;;  %v596_v23 = vld [vmem:[%s760_s1 + $0xd0] sm:$0xff] }
   0x9   :  { %367 = vmatpush.bf16.msra.mxu3 %v600_v7  ;;  %v571_v24 = vld [vmem:[%s760_s1 + $0x8] sm:$0xff]  ;;  %v15_v26 = vld [vmem:[%s761_s0] sm:$0xff]  ;;  %v605_v38 = vld [vmem:[%s760_s1 + $0x118] sm:$0xff] }
   0xa   :  { %329 = vmatpush.bf16.msra.mxu0 %v575_v8  ;;  %v579_v25 = vld [vmem:[%s760_s1 + $0x48] sm:$0xff]  ;;  %v93_v30 = vunpack.c.l.b16 %v15_v26  ;;  %v94_v31 = vunpack.c.h.b16 %v15_v26  ;;  %v570_v32 = vld [vmem:[%s760_s1] sm:$0xff]  ;;  %v604_v43 = vld [vmem:[%s760_s1 + $0x110] sm:$0xff] }
   0xb   :  { %342 = vmatpush.bf16.msra.mxu1 %v583_v9  ;;  %v587_v27 = vld [vmem:[%s760_s1 + $0x88] sm:$0xff]  ;;  %v578_v33 = vld [vmem:[%s760_s1 + $0x40] sm:$0xff]  ;;  %v17_v45 = vld [vmem:[%s761_s0 + $0x10] sm:$0xf] }
   0xc   :  { %355 = vmatpush.bf16.msra.mxu2 %v591_v10  ;;  %v595_v28 = vld [vmem:[%s760_s1 + $0xc8] sm:$0xff]  ;;  %v586_v36 = vld [vmem:[%s760_s1 + $0x80] sm:$0xff]  ;;  %v98_v39 = vpack.c.b16 %v93_v30, %v93_v30  ;;  %v99_v40 = vpack.c.b16 %v94_v31, %v94_v31  ;;  %v97_v47 = vunpack.c.l.b16 %v17_v45 }
   0xd   :  { %368 = vmatpush.bf16.msra.mxu3 %v599_v11  ;;  %v16_v29 = vld [vmem:[%s761_s0 + $0x8] sm:$0xff]  ;;  %v594_v37 = vld [vmem:[%s760_s1 + $0xc0] sm:$0xff] }
   0xe   :  { %330 = vmatpush.bf16.msra.mxu0 %v574_v12  ;;  %v95_v34 = vunpack.c.l.b16 %v16_v29  ;;  %v96_v35 = vunpack.c.h.b16 %v16_v29  ;;  %v603_v44 = vld [vmem:[%s760_s1 + $0x108] sm:$0xff]  ;;  %v602_v46 = vld [vmem:[%s760_s1 + $0x100] sm:$0xff]  ;;  %v102_v48 = vpack.c.b16 %v97_v47, %v97_v47 }
   0xf   :  { %343 = vmatpush.bf16.msra.mxu1 %v582_v13 }
  0x10   :  { %356 = vmatpush.bf16.msra.mxu2 %v590_v14  ;;  %v100_v41 = vpack.c.b16 %v95_v34, %v95_v34  ;;  %v101_v42 = vpack.c.b16 %v96_v35, %v96_v35 }
  0x11   :  { %369 = vmatpush.bf16.msra.mxu3 %v598_v15 }
  0x12   :  { %331 = vmatpush.bf16.msra.mxu0 %v573_v16 }
  0x13   :  { %344 = vmatpush.bf16.msra.mxu1 %v581_v17 }
  0x14   :  { %357 = vmatpush.bf16.msra.mxu2 %v589_v18 }
  0x15   :  { %370 = vmatpush.bf16.msra.mxu3 %v597_v19 }
  0x16   :  { %332 = vmatpush.bf16.msra.mxu0 %v572_v20 }
  0x17   :  { %345 = vmatpush.bf16.msra.mxu1 %v580_v21 }
  0x18   :  { %358 = vmatpush.bf16.msra.mxu2 %v588_v22 }
  0x19   :  { %371 = vmatpush.bf16.msra.mxu3 %v596_v23 }
  0x1a   :  { %333 = vmatpush.bf16.msra.mxu0 %v571_v24 }
  0x1b   :  { %346 = vmatpush.bf16.msra.mxu1 %v579_v25 }
  0x1c   :  { %359 = vmatpush.bf16.msra.mxu2 %v587_v27 }
  0x1d   :  { %372 = vmatpush.bf16.msra.mxu3 %v595_v28 }
  0x1e   :  { %334 = vmatpush.bf16.msra.mxu0 %v570_v32 }
  0x1f   :  { %347 = vmatpush.bf16.msra.mxu1 %v578_v33 }
  0x20   :  { %360 = vmatpush.bf16.msra.mxu2 %v586_v36 }
  0x21   :  { %373 = vmatpush.bf16.msra.mxu3 %v594_v37  ;;  %335 = vmatmul.bf16.vlgmr.msra.gmra.mxu0 %v98_v39 }
  0x22   :  { %383 = vmatpush.bf16.msrb.mxu0 %v605_v38  ;;  %348 = vmatmul.bf16.vlgmr.msra.gmra.mxu1 %v99_v40 }
  0x23   :  { %361 = vmatmul.bf16.vlgmr.msra.gmra.mxu2 %v100_v41 }
  0x24   :  { %374 = vmatmul.bf16.vlgmr.msra.gmra.mxu3 %v101_v42 }
  0x26   :  { %384 = vmatpush.bf16.msrb.mxu0 %v604_v43 }
  0x2a   :  { %385 = vmatpush.bf16.msrb.mxu0 %v603_v44 }
  0x2e   :  { %386 = vmatpush.bf16.msrb.mxu0 %v602_v46 }
  0x31   :  { %569 = vmatmul.msk.bf16.vlgmr.msrb.gmra.mxu0 %vm323_vm0, %v102_v48 }
  0x9e   :  { %v336_v49 = vpop.f32.mrf.mxu0 }
  0x9f   :  { %v349_v50 = vpop.f32.mrf.mxu1 }
  0xa0   :  { %v350_v55 = vadd.f32 %v349_v50, %v336_v49 }
  0xa6   :  { %v362_v51 = vpop.f32.mrf.mxu2  ;;  %v338_v53 = vpop.f32.mrf.mxu0 }
  0xa7   :  { %v375_v52 = vpop.f32.mrf.mxu3  ;;  %v351_v54 = vpop.f32.mrf.mxu1  ;;  %v363_v56 = vadd.f32 %v362_v51, %v350_v55 }
  0xa9   :  { %v376_v57 = vadd.f32 %v375_v52, %v363_v56 }
  0xae   :  { %v364_v58 = vpop.f32.mrf.mxu2  ;;  %v388_v60 = vpop.f32.mrf.mxu0 }
  0xaf   :  { %v377_v59 = vpop.f32.mrf.mxu3  ;;  %v389_v61 = vadd.f32 %v388_v60, %v376_v57 }
  0xb1   :  { %v392_v62 = vpack.c.bf16 %v389_v61, %v389_v61  ;;  %v395_v63 = vsel %vm323_vm0, %v389_v61, 0.0  ;;  %v404_v0 = vmul.f32 %v389_v61, %v389_v61 }
  0xb2   :  { %v396_v1 = vrot.slane %v395_v63, 4 }
  0xb3   :  { %394 = vst.msk [vmem:[%s762_s2] sm:$0xf] %vm393_vm1, %v392_v62  ;;  %v405_v2 = vsel %vm323_vm0, %v404_v0, 0.0 }
  0xb4   :  { %v397_v3 = vadd.f32 %v396_v1, %v395_v63  ;;  %v406_v4 = vrot.slane %v405_v2, 4 }
  0xb6   :  { %v398_v5 = vrot.slane %v397_v3, 2  ;;  %v407_v6 = vadd.f32 %v406_v4, %v405_v2  ;;  %v390_v7 = vpop.f32.mrf.mxu0 }
  0xb8   :  { %v399_v8 = vadd.f32 %v398_v5, %v397_v3  ;;  %v408_v9 = vrot.slane %v407_v6, 2 }
  0xba   :  { %v400_v10 = vrot.slane %v399_v8, 1  ;;  %v409_v11 = vadd.f32 %v408_v9, %v407_v6 }
  0xbc   :  { %v401_v12 = vadd.f32 %v400_v10, %v399_v8  ;;  %v410_v13 = vrot.slane %v409_v11, 1 }
  0xbe   :  { %403 = vst.msk [vmem:[%s763_s3] sm:$0x1] %vm402_vm2, %v401_v12  ;;  %v411_v14 = vadd.f32 %v410_v13, %v409_v11 }
  0xc0   :  { %412 = vst.msk [vmem:[%s764_s4] sm:$0x1] %vm402_vm2, %v411_v14 }

// kernel: xfeat_forward.70
= control target key start
LH: loop header
LB: loop body
LE: loop exit
PB: predicated region body
PF: predicated region fallthrough
CT: control target
= control target key end

     0   :  { %vm28_vm0 = vcmask 519168   ;;  %s68_s0 = inlined_call_operand.vmem [shape: bf16[8,64], index: 0, kind: input, shape index: {}]   ;;  %s69_s1 = inlined_call_operand.vmem [shape: f32[1,64], index: 1, kind: input, shape index: {}]   ;;  %s70_s2 = inlined_call_operand.vmem [shape: f32[1,64], index: 2, kind: input, shape index: {}]   ;;  %s71_s3 = inlined_call_operand.vmem [shape: bf16[8,64], index: 3, kind: output, shape index: {}]  }
   0x1   :  { %v14_v0 = vld [vmem:[%s68_s0] sm:$0xf] }
   0x2   :  { %v34_v1 = vld [vmem:[%s69_s1] ss:$0 sm:$0xff]  ;;  %v15_v2 = vunpack.c.l.bf16 %v14_v0 }
   0x3   :  { %v35_v3 = vld [vmem:[%s70_s2] ss:$0 sm:$0xff] }
   0x4   :  { %v20_v4 = vmul.f32 %v34_v1, %v15_v2 }
   0x6   :  { %v25_v5 = vadd.f32 %v35_v3, %v20_v4 }
   0x8   :  { %v26_v6 = vmax.f32 %v25_v5, 0.0 }
   0xa   :  { %v27_v7 = vpack.c.bf16 %v26_v6, %v26_v6 }
   0xc   :  { %29 = vst.msk [vmem:[%s71_s3] sm:$0xf] %vm28_vm0, %v27_v7 }

// kernel: xfeat_forward.76
= control target key start
LH: loop header
LB: loop body
LE: loop exit
PB: predicated region body
PF: predicated region fallthrough
CT: control target
= control target key end

     0   :  { %s67_s0 = inlined_call_operand.vmem [shape: bf16[2,128], index: 0, kind: input, shape index: {}]   ;;  %s68_s1 = inlined_call_operand.vmem [shape: f32[1,128], index: 1, kind: input, shape index: {}]   ;;  %s69_s2 = inlined_call_operand.vmem [shape: f32[1,128], index: 2, kind: input, shape index: {}]   ;;  %s70_s3 = inlined_call_operand.vmem [shape: bf16[2,128], index: 3, kind: output, shape index: {}]  }
   0x1   :  { %v14_v0 = vld [vmem:[%s67_s0] sm:$0x1] }
   0x2   :  { %v33_v1 = vld [vmem:[%s68_s1] ss:$0 sm:$0xff]  ;;  %v15_v2 = vunpack.c.l.bf16 %v14_v0 }
   0x3   :  { %v34_v3 = vld [vmem:[%s69_s2] ss:$0 sm:$0xff] }
   0x4   :  { %v20_v4 = vmul.f32 %v33_v1, %v15_v2 }
   0x6   :  { %v25_v5 = vadd.f32 %v34_v3, %v20_v4 }
   0x8   :  { %v26_v6 = vmax.f32 %v25_v5, 0.0 }
   0xa   :  { %v27_v7 = vpack.c.bf16 %v26_v6, %v26_v6 }
   0xc   :  { %28 = vst [vmem:[%s70_s3] sm:$0x1] %v27_v7 }

// kernel: xfeat_forward.75
= control target key start
LH: loop header
LB: loop body
LE: loop exit
PB: predicated region body
PF: predicated region fallthrough
CT: control target
= control target key end

     0   :  { %vm315_vm0 = vcmask 523264   ;;  %vm385_vm1 = vcmask 1041408   ;;  %s741_s1 = inlined_call_operand.vmem [shape: bf16[576,128], index: 1, kind: input, shape index: {}]   ;;  %s742_s0 = inlined_call_operand.vmem [shape: bf16[2,576], index: 0, kind: input, shape index: {}]   ;;  %s743_s2 = inlined_call_operand.vmem [shape: bf16[2,128], index: 2, kind: output, shape index: {0}]   ;;  %s744_s3 = inlined_call_operand.vmem [shape: f32[1,1,128], index: 3, kind: output, shape index: {1}]   ;;  %s745_s4 = inlined_call_operand.vmem [shape: f32[1,1,128], index: 4, kind: output, shape index: {2}]  }
   0x1   :  { %v567_v0 = vld [vmem:[%s741_s1 + $0x38] sm:$0xff]  ;;  %v566_v4 = vld [vmem:[%s741_s1 + $0x30] sm:$0xff]  ;;  %v565_v8 = vld [vmem:[%s741_s1 + $0x28] sm:$0xff] }
   0x2   :  { %v575_v1 = vld [vmem:[%s741_s1 + $0x78] sm:$0xff]  ;;  %318 = vmatpush.bf16.msra.mxu0 %v567_v0  ;;  %v574_v5 = vld [vmem:[%s741_s1 + $0x70] sm:$0xff]  ;;  %v573_v9 = vld [vmem:[%s741_s1 + $0x68] sm:$0xff] }
   0x3   :  { %v583_v2 = vld [vmem:[%s741_s1 + $0xb8] sm:$0xff]  ;;  %331 = vmatpush.bf16.msra.mxu1 %v575_v1  ;;  %v582_v6 = vld [vmem:[%s741_s1 + $0xb0] sm:$0xff]  ;;  %v581_v10 = vld [vmem:[%s741_s1 + $0xa8] sm:$0xff] }
   0x4   :  { %v591_v3 = vld [vmem:[%s741_s1 + $0xf8] sm:$0xff]  ;;  %344 = vmatpush.bf16.msra.mxu2 %v583_v2  ;;  %v590_v7 = vld [vmem:[%s741_s1 + $0xf0] sm:$0xff]  ;;  %v589_v11 = vld [vmem:[%s741_s1 + $0xe8] sm:$0xff] }
   0x5   :  { %357 = vmatpush.bf16.msra.mxu3 %v591_v3  ;;  %v564_v12 = vld [vmem:[%s741_s1 + $0x20] sm:$0xff]  ;;  %v563_v17 = vld [vmem:[%s741_s1 + $0x18] sm:$0xff]  ;;  %v562_v21 = vld [vmem:[%s741_s1 + $0x10] sm:$0xff] }
   0x6   :  { %319 = vmatpush.bf16.msra.mxu0 %v566_v4  ;;  %v572_v13 = vld [vmem:[%s741_s1 + $0x60] sm:$0xff]  ;;  %v571_v18 = vld [vmem:[%s741_s1 + $0x58] sm:$0xff]  ;;  %v570_v22 = vld [vmem:[%s741_s1 + $0x50] sm:$0xff] }
   0x7   :  { %332 = vmatpush.bf16.msra.mxu1 %v574_v5  ;;  %v15_v14 = vld [vmem:[%s742_s0] sm:$0x1f]  ;;  %v579_v19 = vld [vmem:[%s741_s1 + $0x98] sm:$0xff]  ;;  %v578_v23 = vld [vmem:[%s741_s1 + $0x90] sm:$0xff] }
   0x8   :  { %345 = vmatpush.bf16.msra.mxu2 %v582_v6  ;;  %v580_v15 = vld [vmem:[%s741_s1 + $0xa0] sm:$0xff]  ;;  %89 = vst [vmem:[#allocation1] ss:$9 sm:$0xff] %v15_v14  ;;  %v587_v20 = vld [vmem:[%s741_s1 + $0xd8] sm:$0xff]  ;;  %v586_v24 = vld [vmem:[%s741_s1 + $0xd0] sm:$0xff] }
   0x9   :  { %358 = vmatpush.bf16.msra.mxu3 %v590_v7  ;;  %v588_v16 = vld [vmem:[%s741_s1 + $0xe0] sm:$0xff]  ;;  %v561_v25 = vld [vmem:[%s741_s1 + $0x8] sm:$0xff]  ;;  %v595_v33 = vld [vmem:[%s741_s1 + $0x118] sm:$0xff] }
   0xa   :  { %320 = vmatpush.bf16.msra.mxu0 %v565_v8  ;;  %v569_v26 = vld [vmem:[%s741_s1 + $0x48] sm:$0xff]  ;;  %v560_v29 = vld [vmem:[%s741_s1] sm:$0xff]  ;;  %v594_v38 = vld [vmem:[%s741_s1 + $0x110] sm:$0xff] }
   0xb   :  { %333 = vmatpush.bf16.msra.mxu1 %v573_v9  ;;  %v577_v27 = vld [vmem:[%s741_s1 + $0x88] sm:$0xff]  ;;  %v568_v30 = vld [vmem:[%s741_s1 + $0x40] sm:$0xff] }
   0xc   :  { %346 = vmatpush.bf16.msra.mxu2 %v581_v10  ;;  %v585_v28 = vld [vmem:[%s741_s1 + $0xc8] sm:$0xff]  ;;  %v576_v31 = vld [vmem:[%s741_s1 + $0x80] sm:$0xff] }
   0xd   :  { %359 = vmatpush.bf16.msra.mxu3 %v589_v11  ;;  %v584_v32 = vld [vmem:[%s741_s1 + $0xc0] sm:$0xff]  ;;  %v593_v39 = vld [vmem:[%s741_s1 + $0x108] sm:$0xff] }
   0xe   :  { %321 = vmatpush.bf16.msra.mxu0 %v564_v12  ;;  %v592_v40 = vld [vmem:[%s741_s1 + $0x100] sm:$0xff] }
   0xf   :  { %334 = vmatpush.bf16.msra.mxu1 %v572_v13  ;;  %v90_v34 = vld [vmem:[#allocation1] sm:$0xff]  ;;  %v91_v35 = vld [vmem:[#allocation1 + $0x9] sm:$0xff]  ;;  %v92_v36 = vld [vmem:[#allocation1 + $0x12] sm:$0xff] }
  0x10   :  { %347 = vmatpush.bf16.msra.mxu2 %v580_v15  ;;  %v93_v37 = vld [vmem:[#allocation1 + $0x1b] sm:$0xff]  ;;  %v94_v41 = vld [vmem:[#allocation1 + $0x24] sm:$0xff] }
  0x11   :  { %360 = vmatpush.bf16.msra.mxu3 %v588_v16 }
  0x12   :  { %322 = vmatpush.bf16.msra.mxu0 %v563_v17 }
  0x13   :  { %335 = vmatpush.bf16.msra.mxu1 %v571_v18 }
  0x14   :  { %348 = vmatpush.bf16.msra.mxu2 %v579_v19 }
  0x15   :  { %361 = vmatpush.bf16.msra.mxu3 %v587_v20 }
  0x16   :  { %323 = vmatpush.bf16.msra.mxu0 %v562_v21 }
  0x17   :  { %336 = vmatpush.bf16.msra.mxu1 %v570_v22 }
  0x18   :  { %349 = vmatpush.bf16.msra.mxu2 %v578_v23 }
  0x19   :  { %362 = vmatpush.bf16.msra.mxu3 %v586_v24 }
  0x1a   :  { %324 = vmatpush.bf16.msra.mxu0 %v561_v25 }
  0x1b   :  { %337 = vmatpush.bf16.msra.mxu1 %v569_v26 }
  0x1c   :  { %350 = vmatpush.bf16.msra.mxu2 %v577_v27 }
  0x1d   :  { %363 = vmatpush.bf16.msra.mxu3 %v585_v28 }
  0x1e   :  { %325 = vmatpush.bf16.msra.mxu0 %v560_v29 }
  0x1f   :  { %338 = vmatpush.bf16.msra.mxu1 %v568_v30 }
  0x20   :  { %351 = vmatpush.bf16.msra.mxu2 %v576_v31 }
  0x21   :  { %364 = vmatpush.bf16.msra.mxu3 %v584_v32  ;;  %326 = vmatmul.bf16.vlgmr.msra.gmra.mxu0 %v90_v34 }
  0x22   :  { %374 = vmatpush.bf16.msrb.mxu0 %v595_v33  ;;  %339 = vmatmul.bf16.vlgmr.msra.gmra.mxu1 %v91_v35 }
  0x23   :  { %352 = vmatmul.bf16.vlgmr.msra.gmra.mxu2 %v92_v36 }
  0x24   :  { %365 = vmatmul.bf16.vlgmr.msra.gmra.mxu3 %v93_v37 }
  0x26   :  { %375 = vmatpush.bf16.msrb.mxu0 %v594_v38 }
  0x2a   :  { %376 = vmatpush.bf16.msrb.mxu0 %v593_v39 }
  0x2e   :  { %377 = vmatpush.bf16.msrb.mxu0 %v592_v40 }
  0x31   :  { %559 = vmatmul.msk.bf16.vlgmr.msrb.gmra.mxu0 %vm315_vm0, %v94_v41 }
  0x9e   :  { %v327_v42 = vpop.f32.mrf.mxu0 }
  0x9f   :  { %v340_v43 = vpop.f32.mrf.mxu1 }
  0xa0   :  { %v341_v48 = vadd.f32 %v340_v43, %v327_v42 }
  0xa6   :  { %v353_v44 = vpop.f32.mrf.mxu2  ;;  %v329_v46 = vpop.f32.mrf.mxu0 }
  0xa7   :  { %v366_v45 = vpop.f32.mrf.mxu3  ;;  %v342_v47 = vpop.f32.mrf.mxu1  ;;  %v354_v49 = vadd.f32 %v353_v44, %v341_v48 }
  0xa9   :  { %v367_v50 = vadd.f32 %v366_v45, %v354_v49 }
  0xae   :  { %v355_v51 = vpop.f32.mrf.mxu2  ;;  %v379_v53 = vpop.f32.mrf.mxu0 }
  0xaf   :  { %v368_v52 = vpop.f32.mrf.mxu3  ;;  %v380_v54 = vadd.f32 %v379_v53, %v367_v50 }
  0xb1   :  { %v383_v55 = vpack.c.bf16 %v380_v54, %v380_v54  ;;  %v386_v56 = vsel %vm385_vm1, %v380_v54, 0.0  ;;  %v394_v57 = vmul.f32 %v380_v54, %v380_v54 }
  0xb2   :  { %v387_v58 = vrot.slane %v386_v56, 4 }
  0xb3   :  { %384 = vst [vmem:[%s743_s2] sm:$0x1] %v383_v55  ;;  %v395_v59 = vsel %vm385_vm1, %v394_v57, 0.0 }
  0xb4   :  { %v388_v60 = vadd.f32 %v387_v58, %v386_v56  ;;  %v396_v61 = vrot.slane %v395_v59, 4 }
  0xb6   :  { %v389_v62 = vrot.slane %v388_v60, 2  ;;  %v397_v63 = vadd.f32 %v396_v61, %v395_v59  ;;  %v381_v0 = vpop.f32.mrf.mxu0 }
  0xb8   :  { %v390_v1 = vadd.f32 %v389_v62, %v388_v60  ;;  %v398_v2 = vrot.slane %v397_v63, 2 }
  0xba   :  { %v391_v3 = vrot.slane %v390_v1, 1  ;;  %v399_v4 = vadd.f32 %v398_v2, %v397_v63 }
  0xbc   :  { %v392_v5 = vadd.f32 %v391_v3, %v390_v1  ;;  %v400_v6 = vrot.slane %v399_v4, 1 }
  0xbe   :  { %393 = vst [vmem:[%s744_s3] sm:$0x1] %v392_v5  ;;  %v401_v7 = vadd.f32 %v400_v6, %v399_v4 }
  0xc0   :  { %402 = vst [vmem:[%s745_s4] sm:$0x1] %v401_v7 }

// kernel: xfeat_forward.81
= control target key start
LH: loop header
LB: loop body
LE: loop exit
PB: predicated region body
PF: predicated region fallthrough
CT: control target
= control target key end

     0   :  { %vm95_vm0 = vcmask 517120   ;;  %vm93_vm1 = vcmask 516096   ;;  %s229_s1 = inlined_call_operand.vmem [shape: bf16[128,64], index: 1, kind: input, shape index: {}]   ;;  %s230_s0 = inlined_call_operand.vmem [shape: bf16[2,128], index: 0, kind: input, shape index: {}]   ;;  %s231_s2 = inlined_call_operand.vmem [shape: bf16[2,64], index: 2, kind: output, shape index: {0}]   ;;  %s232_s3 = inlined_call_operand.vmem [shape: f32[1,1,64], index: 3, kind: output, shape index: {1}]   ;;  %s233_s4 = inlined_call_operand.vmem [shape: f32[1,1,64], index: 4, kind: output, shape index: {2}]  }
   0x1   :  { %v164_v0 = vld [vmem:[%s229_s1 + $0x38] sm:$0xff]  ;;  %v163_v1 = vld [vmem:[%s229_s1 + $0x30] sm:$0xff]  ;;  %v162_v2 = vld [vmem:[%s229_s1 + $0x28] sm:$0xff] }
   0x2   :  { %79 = vmatpush.bf16.msra.mxu0 %v164_v0  ;;  %v161_v3 = vld [vmem:[%s229_s1 + $0x20] sm:$0xff]  ;;  %v160_v4 = vld [vmem:[%s229_s1 + $0x18] sm:$0xff]  ;;  %v159_v5 = vld [vmem:[%s229_s1 + $0x10] sm:$0xff] }
   0x3   :  { %v158_v6 = vld [vmem:[%s229_s1 + $0x8] sm:$0xff]  ;;  %v157_v7 = vld [vmem:[%s229_s1] sm:$0xff] }
   0x4   :  { %v14_v8 = vld [vmem:[%s230_s0] sm:$0x1] }
   0x6   :  { %80 = vmatpush.bf16.msra.mxu0 %v163_v1 }
   0xa   :  { %81 = vmatpush.bf16.msra.mxu0 %v162_v2 }
   0xe   :  { %82 = vmatpush.bf16.msra.mxu0 %v161_v3 }
  0x12   :  { %83 = vmatpush.bf16.msra.mxu0 %v160_v4 }
  0x16   :  { %84 = vmatpush.bf16.msra.mxu0 %v159_v5 }
  0x1a   :  { %85 = vmatpush.bf16.msra.mxu0 %v158_v6 }
  0x1e   :  { %86 = vmatpush.bf16.msra.mxu0 %v157_v7 }
  0x21   :  { %87 = vmatmul.bf16.vlgmr.msra.gmra.mxu0 %v14_v8 }
  0x9e   :  { %v88_v9 = vpop.f32.mrf.mxu0 }
  0x9f   :  { %v92_v10 = vpack.c.bf16 %v88_v9, %v88_v9  ;;  %v96_v11 = vsel %vm95_vm0, %v88_v9, 0.0  ;;  %v104_v12 = vmul.f32 %v88_v9, %v88_v9 }
  0xa0   :  { %v97_v13 = vrot.slane %v96_v11, 4 }
  0xa1   :  { %94 = vst.msk [vmem:[%s231_s2] sm:$0x1] %vm93_vm1, %v92_v10  ;;  %v105_v14 = vsel %vm95_vm0, %v104_v12, 0.0 }
  0xa2   :  { %v98_v15 = vadd.f32 %v97_v13, %v96_v11  ;;  %v106_v16 = vrot.slane %v105_v14, 4 }
  0xa4   :  { %v99_v17 = vrot.slane %v98_v15, 2  ;;  %v107_v18 = vadd.f32 %v106_v16, %v105_v14 }
  0xa6   :  { %v100_v19 = vadd.f32 %v99_v17, %v98_v15  ;;  %v108_v20 = vrot.slane %v107_v18, 2  ;;  %v90_v21 = vpop.f32.mrf.mxu0 }
  0xa8   :  { %v101_v22 = vrot.slane %v100_v19, 1  ;;  %v109_v23 = vadd.f32 %v108_v20, %v107_v18 }
  0xaa   :  { %v102_v24 = vadd.f32 %v101_v22, %v100_v19  ;;  %v110_v25 = vrot.slane %v109_v23, 1 }
  0xac   :  { %103 = vst.msk [vmem:[%s232_s3] sm:$0x1] %vm93_vm1, %v102_v24  ;;  %v111_v26 = vadd.f32 %v110_v25, %v109_v23 }
  0xae   :  { %112 = vst.msk [vmem:[%s233_s4] sm:$0x1] %vm93_vm1, %v111_v26 }

// kernel: xfeat_forward.82
= control target key start
LH: loop header
LB: loop body
LE: loop exit
PB: predicated region body
PF: predicated region fallthrough
CT: control target
= control target key end

     0   :  { %vm28_vm0 = vcmask 516096   ;;  %s68_s0 = inlined_call_operand.vmem [shape: bf16[2,64], index: 0, kind: input, shape index: {}]   ;;  %s69_s1 = inlined_call_operand.vmem [shape: f32[1,64], index: 1, kind: input, shape index: {}]   ;;  %s70_s2 = inlined_call_operand.vmem [shape: f32[1,64], index: 2, kind: input, shape index: {}]   ;;  %s71_s3 = inlined_call_operand.vmem [shape: bf16[2,64], index: 3, kind: output, shape index: {}]  }
   0x1   :  { %v14_v0 = vld [vmem:[%s68_s0] sm:$0x1] }
   0x2   :  { %v34_v1 = vld [vmem:[%s69_s1] ss:$0 sm:$0xff]  ;;  %v15_v2 = vunpack.c.l.bf16 %v14_v0 }
   0x3   :  { %v35_v3 = vld [vmem:[%s70_s2] ss:$0 sm:$0xff] }
   0x4   :  { %v20_v4 = vmul.f32 %v34_v1, %v15_v2 }
   0x6   :  { %v25_v5 = vadd.f32 %v35_v3, %v20_v4 }
   0x8   :  { %v26_v6 = vmax.f32 %v25_v5, 0.0 }
   0xa   :  { %v27_v7 = vpack.c.bf16 %v26_v6, %v26_v6 }
   0xc   :  { %29 = vst.msk [vmem:[%s71_s3] sm:$0x1] %vm28_vm0, %v27_v7 }

// kernel: xfeat_forward.77
= control target key start
LH: loop header
LB: loop body
LE: loop exit
PB: predicated region body
PF: predicated region fallthrough
CT: control target
= control target key end

     0   :  { %vm733_vm0 = vcmask 1041408   ;;  %s1391_s1 = inlined_call_operand.vmem [shape: bf16[1152,128], index: 1, kind: input, shape index: {}]   ;;  %s1392_s0 = inlined_call_operand.vmem [shape: bf16[2,1152], index: 0, kind: input, shape index: {}]   ;;  %s1393_s2 = inlined_call_operand.vmem [shape: bf16[2,128], index: 2, kind: output, shape index: {0}]   ;;  %s1394_s3 = inlined_call_operand.vmem [shape: f32[1,1,128], index: 3, kind: output, shape index: {1}]   ;;  %s1395_s4 = inlined_call_operand.vmem [shape: f32[1,1,128], index: 4, kind: output, shape index: {2}]  }
   0x1   :  { %v1058_v0 = vld [vmem:[%s1391_s1 + $0x38] sm:$0xff]  ;;  %v1057_v4 = vld [vmem:[%s1391_s1 + $0x30] sm:$0xff]  ;;  %v1056_v8 = vld [vmem:[%s1391_s1 + $0x28] sm:$0xff] }
   0x2   :  { %v1074_v1 = vld [vmem:[%s1391_s1 + $0xb8] sm:$0xff]  ;;  %614 = vmatpush.bf16.msra.mxu0 %v1058_v0  ;;  %v1073_v5 = vld [vmem:[%s1391_s1 + $0xb0] sm:$0xff]  ;;  %v1072_v9 = vld [vmem:[%s1391_s1 + $0xa8] sm:$0xff] }
   0x3   :  { %v1082_v2 = vld [vmem:[%s1391_s1 + $0xf8] sm:$0xff]  ;;  %640 = vmatpush.bf16.msra.mxu2 %v1074_v1  ;;  %v1081_v6 = vld [vmem:[%s1391_s1 + $0xf0] sm:$0xff]  ;;  %v1080_v10 = vld [vmem:[%s1391_s1 + $0xe8] sm:$0xff] }
   0x4   :  { %v1066_v3 = vld [vmem:[%s1391_s1 + $0x78] sm:$0xff]  ;;  %653 = vmatpush.bf16.msra.mxu3 %v1082_v2  ;;  %v1065_v7 = vld [vmem:[%s1391_s1 + $0x70] sm:$0xff]  ;;  %v1064_v11 = vld [vmem:[%s1391_s1 + $0x68] sm:$0xff] }
   0x5   :  { %627 = vmatpush.bf16.msra.mxu1 %v1066_v3  ;;  %v1055_v12 = vld [vmem:[%s1391_s1 + $0x20] sm:$0xff]  ;;  %v1054_v16 = vld [vmem:[%s1391_s1 + $0x18] sm:$0xff]  ;;  %v1053_v21 = vld [vmem:[%s1391_s1 + $0x10] sm:$0xff] }
   0x6   :  { %615 = vmatpush.bf16.msra.mxu0 %v1057_v4  ;;  %v1071_v13 = vld [vmem:[%s1391_s1 + $0xa0] sm:$0xff]  ;;  %v1070_v17 = vld [vmem:[%s1391_s1 + $0x98] sm:$0xff]  ;;  %v1069_v22 = vld [vmem:[%s1391_s1 + $0x90] sm:$0xff] }
   0x7   :  { %641 = vmatpush.bf16.msra.mxu2 %v1073_v5  ;;  %v1079_v14 = vld [vmem:[%s1391_s1 + $0xe0] sm:$0xff]  ;;  %v1078_v18 = vld [vmem:[%s1391_s1 + $0xd8] sm:$0xff]  ;;  %v1077_v23 = vld [vmem:[%s1391_s1 + $0xd0] sm:$0xff] }
   0x8   :  { %654 = vmatpush.bf16.msra.mxu3 %v1081_v6  ;;  %v1063_v15 = vld [vmem:[%s1391_s1 + $0x60] sm:$0xff]  ;;  %v1062_v19 = vld [vmem:[%s1391_s1 + $0x58] sm:$0xff]  ;;  %v1061_v24 = vld [vmem:[%s1391_s1 + $0x50] sm:$0xff] }
   0x9   :  { %628 = vmatpush.bf16.msra.mxu1 %v1065_v7  ;;  %v14_v20 = vld [vmem:[%s1392_s0] sm:$0xff]  ;;  %v1052_v25 = vld [vmem:[%s1391_s1 + $0x8] sm:$0xff]  ;;  %v1090_v31 = vld [vmem:[%s1391_s1 + $0x138] sm:$0xff] }
   0xa   :  { %616 = vmatpush.bf16.msra.mxu0 %v1056_v8  ;;  %161 = vst [vmem:[#allocation1] ss:$9 sm:$0xff] %v14_v20  ;;  %v1068_v26 = vld [vmem:[%s1391_s1 + $0x88] sm:$0xff]  ;;  %v1051_v29 = vld [vmem:[%s1391_s1] sm:$0xff]  ;;  %v1106_v32 = vld [vmem:[%s1391_s1 + $0x1b8] sm:$0xff] }
   0xb   :  { %642 = vmatpush.bf16.msra.mxu2 %v1072_v9  ;;  %v1076_v27 = vld [vmem:[%s1391_s1 + $0xc8] sm:$0xff]  ;;  %v1067_v30 = vld [vmem:[%s1391_s1 + $0x80] sm:$0xff]  ;;  %v1114_v34 = vld [vmem:[%s1391_s1 + $0x1f8] sm:$0xff] }
   0xc   :  { %655 = vmatpush.bf16.msra.mxu3 %v1080_v10  ;;  %v1060_v28 = vld [vmem:[%s1391_s1 + $0x48] sm:$0xff]  ;;  %v1075_v33 = vld [vmem:[%s1391_s1 + $0xc0] sm:$0xff]  ;;  %v1089_v36 = vld [vmem:[%s1391_s1 + $0x130] sm:$0xff] }
   0xd   :  { %629 = vmatpush.bf16.msra.mxu1 %v1064_v11  ;;  %v1059_v35 = vld [vmem:[%s1391_s1 + $0x40] sm:$0xff]  ;;  %v1098_v37 = vld [vmem:[%s1391_s1 + $0x178] sm:$0xff]  ;;  %v1105_v38 = vld [vmem:[%s1391_s1 + $0x1b0] sm:$0xff] }
   0xe   :  { %617 = vmatpush.bf16.msra.mxu0 %v1055_v12  ;;  %v15_v39 = vld [vmem:[%s1392_s0 + $0x8] sm:$0x1]  ;;  %v1113_v48 = vld [vmem:[%s1391_s1 + $0x1f0] sm:$0xff]  ;;  %v1087_v54 = vld [vmem:[%s1391_s1 + $0x120] sm:$0xff] }
   0xf   :  { %643 = vmatpush.bf16.msra.mxu2 %v1071_v13  ;;  %v1097_v49 = vld [vmem:[%s1391_s1 + $0x170] sm:$0xff]  ;;  %v1088_v50 = vld [vmem:[%s1391_s1 + $0x128] sm:$0xff]  ;;  %v1103_v55 = vld [vmem:[%s1391_s1 + $0x1a0] sm:$0xff] }
  0x10   :  { %656 = vmatpush.bf16.msra.mxu3 %v1079_v14  ;;  %v1104_v51 = vld [vmem:[%s1391_s1 + $0x1a8] sm:$0xff]  ;;  %v1111_v56 = vld [vmem:[%s1391_s1 + $0x1e0] sm:$0xff]  ;;  %v1086_v58 = vld [vmem:[%s1391_s1 + $0x118] sm:$0xff] }
  0x11   :  { %630 = vmatpush.bf16.msra.mxu1 %v1063_v15  ;;  %v164_v40 = vld [vmem:[#allocation1 + $0x12] sm:$0xff]  ;;  %v162_v41 = vld [vmem:[#allocation1] sm:$0xff]  ;;  %v163_v43 = vld [vmem:[#allocation1 + $0x9] sm:$0xff] }
  0x12   :  { %618 = vmatpush.bf16.msra.mxu0 %v1054_v16  ;;  %v165_v42 = vld [vmem:[#allocation1 + $0x1b] sm:$0xff]  ;;  %v1270_v45 = vld [vmem:[#allocation1 + $0x24] sm:$0xff]  ;;  %v1274_v47 = vld [vmem:[#allocation1 + $0x2d] sm:$0xff] }
  0x13   :  { %644 = vmatpush.bf16.msra.mxu2 %v1070_v17  ;;  %v1268_v44 = vld [vmem:[#allocation1 + $0x36] sm:$0xff]  ;;  %v1272_v46 = vld [vmem:[#allocation1 + $0x3f] sm:$0xff]  ;;  %v1112_v52 = vld [vmem:[%s1391_s1 + $0x1e8] sm:$0xff] }
  0x14   :  { %657 = vmatpush.bf16.msra.mxu3 %v1078_v18  ;;  %171 = vst [vmem:[#allocation1] ss:$9 sm:$0xff] %v15_v39  ;;  %v1096_v53 = vld [vmem:[%s1391_s1 + $0x168] sm:$0xff]  ;;  %v1095_v57 = vld [vmem:[%s1391_s1 + $0x160] sm:$0xff]  ;;  %v1102_v59 = vld [vmem:[%s1391_s1 + $0x198] sm:$0xff] }
  0x15   :  { %631 = vmatpush.bf16.msra.mxu1 %v1062_v19  ;;  %v1110_v60 = vld [vmem:[%s1391_s1 + $0x1d8] sm:$0xff]  ;;  %v1085_v62 = vld [vmem:[%s1391_s1 + $0x110] sm:$0xff]  ;;  %v1084_v2 = vld [vmem:[%s1391_s1 + $0x108] sm:$0xff] }
  0x16   :  { %619 = vmatpush.bf16.msra.mxu0 %v1053_v21  ;;  %v1094_v61 = vld [vmem:[%s1391_s1 + $0x158] sm:$0xff]  ;;  %v1101_v63 = vld [vmem:[%s1391_s1 + $0x190] sm:$0xff]  ;;  %v1100_v3 = vld [vmem:[%s1391_s1 + $0x188] sm:$0xff] }
  0x17   :  { %645 = vmatpush.bf16.msra.mxu2 %v1069_v22  ;;  %v1109_v0 = vld [vmem:[%s1391_s1 + $0x1d0] sm:$0xff]  ;;  %v1108_v4 = vld [vmem:[%s1391_s1 + $0x1c8] sm:$0xff]  ;;  %v1083_v6 = vld [vmem:[%s1391_s1 + $0x100] sm:$0xff] }
  0x18   :  { %658 = vmatpush.bf16.msra.mxu3 %v1077_v23  ;;  %v1093_v1 = vld [vmem:[%s1391_s1 + $0x150] sm:$0xff]  ;;  %v1092_v5 = vld [vmem:[%s1391_s1 + $0x148] sm:$0xff]  ;;  %v1099_v7 = vld [vmem:[%s1391_s1 + $0x180] sm:$0xff] }
  0x19   :  { %632 = vmatpush.bf16.msra.mxu1 %v1061_v24  ;;  %v1122_v8 = vld [vmem:[%s1391_s1 + $0x238] sm:$0xff]  ;;  %v1107_v9 = vld [vmem:[%s1391_s1 + $0x1c0] sm:$0xff]  ;;  %v1121_v11 = vld [vmem:[%s1391_s1 + $0x230] sm:$0xff] }
  0x1a   :  { %620 = vmatpush.bf16.msra.mxu0 %v1052_v25  ;;  %v1091_v10 = vld [vmem:[%s1391_s1 + $0x140] sm:$0xff]  ;;  %v1120_v12 = vld [vmem:[%s1391_s1 + $0x228] sm:$0xff]  ;;  %v1118_v14 = vld [vmem:[%s1391_s1 + $0x218] sm:$0xff] }
  0x1b   :  { %646 = vmatpush.bf16.msra.mxu2 %v1068_v26  ;;  %v1119_v13 = vld [vmem:[%s1391_s1 + $0x220] sm:$0xff]  ;;  %v1117_v15 = vld [vmem:[%s1391_s1 + $0x210] sm:$0xff]  ;;  %v1116_v16 = vld [vmem:[%s1391_s1 + $0x208] sm:$0xff] }
  0x1c   :  { %659 = vmatpush.bf16.msra.mxu3 %v1076_v27  ;;  %v1115_v17 = vld [vmem:[%s1391_s1 + $0x200] sm:$0xff] }
  0x1d   :  { %633 = vmatpush.bf16.msra.mxu1 %v1060_v28  ;;  %v172_v18 = vld [vmem:[#allocation1] sm:$0xff] }
  0x1e   :  { %621 = vmatpush.bf16.msra.mxu0 %v1051_v29 }
  0x1f   :  { %647 = vmatpush.bf16.msra.mxu2 %v1067_v30 }
  0x20   :  { %660 = vmatpush.bf16.msra.mxu3 %v1075_v33 }
  0x21   :  { %634 = vmatpush.bf16.msra.mxu1 %v1059_v35  ;;  %622 = vmatmul.bf16.vlgmr.msra.gmra.mxu0 %v162_v41 }
  0x22   :  { %666 = vmatpush.bf16.msrb.mxu0 %v1090_v31  ;;  %648 = vmatmul.bf16.vlgmr.msra.gmra.mxu2 %v164_v40 }
  0x23   :  { %692 = vmatpush.bf16.msrb.mxu2 %v1106_v32  ;;  %661 = vmatmul.bf16.vlgmr.msra.gmra.mxu3 %v165_v42 }
  0x24   :  { %705 = vmatpush.bf16.msrb.mxu3 %v1114_v34  ;;  %635 = vmatmul.bf16.vlgmr.msra.gmra.mxu1 %v163_v43 }
  0x25   :  { %679 = vmatpush.bf16.msrb.mxu1 %v1098_v37 }
  0x26   :  { %667 = vmatpush.bf16.msrb.mxu0 %v1089_v36 }
  0x27   :  { %693 = vmatpush.bf16.msrb.mxu2 %v1105_v38 }
  0x28   :  { %706 = vmatpush.bf16.msrb.mxu3 %v1113_v48 }
  0x29   :  { %680 = vmatpush.bf16.msrb.mxu1 %v1097_v49 }
  0x2a   :  { %668 = vmatpush.bf16.msrb.mxu0 %v1088_v50 }
  0x2b   :  { %694 = vmatpush.bf16.msrb.mxu2 %v1104_v51 }
  0x2c   :  { %707 = vmatpush.bf16.msrb.mxu3 %v1112_v52 }
  0x2d   :  { %681 = vmatpush.bf16.msrb.mxu1 %v1096_v53 }
  0x2e   :  { %669 = vmatpush.bf16.msrb.mxu0 %v1087_v54 }
  0x2f   :  { %695 = vmatpush.bf16.msrb.mxu2 %v1103_v55 }
  0x30   :  { %708 = vmatpush.bf16.msrb.mxu3 %v1111_v56 }
  0x31   :  { %682 = vmatpush.bf16.msrb.mxu1 %v1095_v57 }
  0x32   :  { %670 = vmatpush.bf16.msrb.mxu0 %v1086_v58 }
  0x33   :  { %696 = vmatpush.bf16.msrb.mxu2 %v1102_v59 }
  0x34   :  { %709 = vmatpush.bf16.msrb.mxu3 %v1110_v60 }
  0x35   :  { %683 = vmatpush.bf16.msrb.mxu1 %v1094_v61 }
  0x36   :  { %671 = vmatpush.bf16.msrb.mxu0 %v1085_v62 }
  0x37   :  { %697 = vmatpush.bf16.msrb.mxu2 %v1101_v63 }
  0x38   :  { %710 = vmatpush.bf16.msrb.mxu3 %v1109_v0 }
  0x39   :  { %684 = vmatpush.bf16.msrb.mxu1 %v1093_v1 }
  0x3a   :  { %672 = vmatpush.bf16.msrb.mxu0 %v1084_v2 }
  0x3b   :  { %698 = vmatpush.bf16.msrb.mxu2 %v1100_v3 }
  0x3c   :  { %711 = vmatpush.bf16.msrb.mxu3 %v1108_v4 }
  0x3d   :  { %685 = vmatpush.bf16.msrb.mxu1 %v1092_v5 }
  0x3e   :  { %673 = vmatpush.bf16.msrb.mxu0 %v1083_v6 }
  0x3f   :  { %699 = vmatpush.bf16.msrb.mxu2 %v1099_v7 }
  0x40   :  { %712 = vmatpush.bf16.msrb.mxu3 %v1107_v9 }
  0x41   :  { %686 = vmatpush.bf16.msrb.mxu1 %v1091_v10  ;;  %674 = vmatmul.bf16.vlgmr.msrb.gmra.mxu0 %v1270_v45 }
  0x42   :  { %718 = vmatpush.bf16.msra.mxu0 %v1122_v8  ;;  %700 = vmatmul.bf16.vlgmr.msrb.gmra.mxu2 %v1268_v44 }
  0x43   :  { %713 = vmatmul.bf16.vlgmr.msrb.gmra.mxu3 %v1272_v46 }
  0x44   :  { %687 = vmatmul.bf16.vlgmr.msrb.gmra.mxu1 %v1274_v47 }
  0x46   :  { %719 = vmatpush.bf16.msra.mxu0 %v1121_v11 }
  0x4a   :  { %720 = vmatpush.bf16.msra.mxu0 %v1120_v12 }
  0x4e   :  { %721 = vmatpush.bf16.msra.mxu0 %v1119_v13 }
  0x52   :  { %722 = vmatpush.bf16.msra.mxu0 %v1118_v14 }
  0x56   :  { %723 = vmatpush.bf16.msra.mxu0 %v1117_v15 }
  0x5a   :  { %724 = vmatpush.bf16.msra.mxu0 %v1116_v16 }
  0x5e   :  { %725 = vmatpush.bf16.msra.mxu0 %v1115_v17 }
  0x61   :  { %726 = vmatmul.bf16.vlgmr.msra.gmra.mxu0 %v172_v18 }
  0x9e   :  { %v623_v19 = vpop.f32.mrf.mxu0 }
  0xa1   :  { %v636_v20 = vpop.f32.mrf.mxu1 }
  0xa2   :  { %v637_v29 = vadd.f32 %v636_v20, %v623_v19 }
  0xa5   :  { %v649_v21 = vpop.f32.mrf.mxu2 }
  0xa6   :  { %v662_v22 = vpop.f32.mrf.mxu3  ;;  %v625_v23 = vpop.f32.mrf.mxu0  ;;  %v650_v31 = vadd.f32 %v649_v21, %v637_v29 }
  0xa8   :  { %v663_v35 = vadd.f32 %v662_v22, %v650_v31 }
  0xa9   :  { %v638_v24 = vpop.f32.mrf.mxu1 }
  0xad   :  { %v651_v25 = vpop.f32.mrf.mxu2 }
  0xae   :  { %v664_v26 = vpop.f32.mrf.mxu3 }
  0xbe   :  { %v675_v27 = vpop.f32.mrf.mxu0 }
  0xbf   :  { %v676_v37 = vadd.f32 %v675_v27, %v663_v35 }
  0xc1   :  { %v688_v28 = vpop.f32.mrf.mxu1 }
  0xc2   :  { %v689_v39 = vadd.f32 %v688_v28, %v676_v37 }
  0xc5   :  { %v701_v30 = vpop.f32.mrf.mxu2 }
  0xc6   :  { %v714_v32 = vpop.f32.mrf.mxu3  ;;  %v677_v33 = vpop.f32.mrf.mxu0  ;;  %v702_v40 = vadd.f32 %v701_v30, %v689_v39 }
  0xc8   :  { %v715_v41 = vadd.f32 %v714_v32, %v702_v40 }
  0xc9   :  { %v690_v34 = vpop.f32.mrf.mxu1 }
  0xcd   :  { %v703_v36 = vpop.f32.mrf.mxu2 }
  0xce   :  { %v716_v38 = vpop.f32.mrf.mxu3 }
  0xde   :  { %v727_v42 = vpop.f32.mrf.mxu0 }
  0xdf   :  { %v728_v43 = vadd.f32 %v727_v42, %v715_v41 }
  0xe1   :  { %v731_v44 = vpack.c.bf16 %v728_v43, %v728_v43  ;;  %v734_v45 = vsel %vm733_vm0, %v728_v43, 0.0  ;;  %v742_v46 = vmul.f32 %v728_v43, %v728_v43 }
  0xe2   :  { %v735_v47 = vrot.slane %v734_v45, 4 }
  0xe3   :  { %732 = vst [vmem:[%s1393_s2] sm:$0x1] %v731_v44  ;;  %v743_v48 = vsel %vm733_vm0, %v742_v46, 0.0 }
  0xe4   :  { %v736_v49 = vadd.f32 %v735_v47, %v734_v45  ;;  %v744_v50 = vrot.slane %v743_v48, 4 }
  0xe6   :  { %v737_v51 = vrot.slane %v736_v49, 2  ;;  %v745_v52 = vadd.f32 %v744_v50, %v743_v48  ;;  %v729_v53 = vpop.f32.mrf.mxu0 }
  0xe8   :  { %v738_v54 = vadd.f32 %v737_v51, %v736_v49  ;;  %v746_v55 = vrot.slane %v745_v52, 2 }
  0xea   :  { %v739_v56 = vrot.slane %v738_v54, 1  ;;  %v747_v57 = vadd.f32 %v746_v55, %v745_v52 }
  0xec   :  { %v740_v58 = vadd.f32 %v739_v56, %v738_v54  ;;  %v748_v59 = vrot.slane %v747_v57, 1 }
  0xee   :  { %741 = vst [vmem:[%s1394_s3] sm:$0x1] %v740_v58  ;;  %v749_v60 = vadd.f32 %v748_v59, %v747_v57 }
  0xf0   :  { %750 = vst [vmem:[%s1395_s4] sm:$0x1] %v749_v60 }

// kernel: xfeat_forward.87
= control target key start
LH: loop header
LB: loop body
LE: loop exit
PB: predicated region body
PF: predicated region fallthrough
CT: control target
= control target key end

     0   :  { %s368_s12 = smov 0   ;;  %s400_s0 = inlined_call_operand.vmem [shape: bf16[32,64], index: 0, kind: input, shape index: {}]   ;;  %s401_s1 = inlined_call_operand.vmem [shape: bf16[64,64], index: 1, kind: input, shape index: {}]   ;;  %s402_s2 = inlined_call_operand.vmem [shape: f32[1,64], index: 2, kind: input, shape index: {}]   ;;  %s403_s3 = inlined_call_operand.vmem [shape: f32[32,64], index: 3, kind: output, shape index: {}]  }
   0x1 LB: > { %s294_s13 = sadd.s32 4294967295, %s346_s12   ;;  %p298_p0 = scmp.ge.s32.totalorder %s346_s12, 1  ;;  %s346_s12 = sphi %s368_s12, %s13_s12  }
   0x2   : > { %p138_p1 = scmp.lt.s32.totalorder %s346_s12, 3 }
   0x4   : > { %p139_p2 = pnand %p298_p0, %p138_p1 }
   0x5   : > { %s299_s16 = sshll.u32 (!%p139_p2), %s294_s13, 1 }
   0x6   : > { %142 = sbr.rel (%p139_p2) target bundleno = 164 (0xa4), region = 32  ;;  %p163_p3 = scmp.lt.s32.totalorder (!%p139_p2), %s299_s16, 3 }
   0xb   : > { %v330_v0 = vld [vmem:[%s401_s1 + $0x18] sm:$0xff]  ;;  %v329_v1 = vld [vmem:[%s401_s1 + $0x10] sm:$0xff]  ;;  %s405_s16 = smov (!%p163_p3, %s299_s16), 3  ;;  %v328_v2 = vld [vmem:[%s401_s1 + $0x8] sm:$0xff]  ;;  %vm218_vm0 = vcmask 523264  }
   0xc   : > { %226 = vmatpush.bf16.msra.mxu0 %v330_v0  ;;  %s300_s21 = sshll.u32 %s405_s16, 2  ;;  %v327_v3 = vld [vmem:[%s401_s1] sm:$0xff]  ;;  %s302_s27 = sshll.u32 %s405_s16, 3 }
   0xd   : > { %s166_s26 = scalar_lea.vmem %s400_s0, %s300_s21  ;;  %v339_v5 = vld [vmem:[%s402_s2] ss:$0 sm:$0xff]  ;;  %s172_s5 = scalar_lea.vmem %s403_s3, %s302_s27 }
   0xe   : > { %v326_v4 = vld [vmem:[%s166_s26] sm:$0xff] }
  0x10   : > { %227 = vmatpush.bf16.msra.mxu0 %v329_v1 }
  0x14   : > { %228 = vmatpush.bf16.msra.mxu0 %v328_v2 }
  0x18   : > { %229 = vmatpush.bf16.msra.mxu0 %v327_v3 }
  0x1b   : > { %323 = vmatmul.msk.bf16.vlgmr.msra.gmra.mxu0 %vm218_vm0, %v326_v4 }
  0x98   : > { %v231_v6 = vpop.f32.mrf.mxu0 }
  0x99   : > { %v232_v7 = vadd.f32 %v339_v5, %v231_v6 }
  0x9b   : > { %236 = vst.msk [vmem:[%s172_s5] sm:$0xff] %vm218_vm0, %v232_v7 }
  0xa0   : > { %v233_v8 = vpop.f32.mrf.mxu0 }
  0xa1   : > { %v234_v9 = vadd.f32 %v339_v5, %v233_v8 }
  0xa3   : > { %237 = vst.msk [vmem:[%s172_s5 + $0x8] sm:$0xff] %vm218_vm0, %v234_v9 }
  0xa4 PF: > { %s13_s12 = sadd.s32 1, %s346_s12  }
  0xa5   : > { %p10_p4 = scmp.ge.s32.totalorder %s13_s12, 4  }
  0xa7   :  { %12 = sbr.rel (!%p10_p4) target bundleno = 1 (0x1), region = 62 }

// kernel: xfeat_forward.92
= control target key start
LH: loop header
LB: loop body
LE: loop exit
PB: predicated region body
PF: predicated region fallthrough
CT: control target
= control target key end

     0   :  { %s422_s14 = smov 0   ;;  %s457_s0 = inlined_call_operand.vmem [shape: bf16[32,64], index: 0, kind: input, shape index: {}]   ;;  %s458_s1 = inlined_call_operand.vmem [shape: bf16[64,1], index: 1, kind: input, shape index: {}]   ;;  %s459_s2 = inlined_call_operand.<no memory space> [shape: f32[1,1], index: 2, kind: input, shape index: {}]   ;;  %s460_s3 = inlined_call_operand.vmem [shape: f32[32,1], index: 3, kind: output, shape index: {}]  }
   0x1   :  { %v8_v0 = vstv %s459_s2 }
   0x2   :  { %9 = vst [vmem:[#allocation2] sm:$0x1] %v8_v0 }
   0x3 LB: > { %s335_s15 = sadd.s32 4294967295, %s397_s14   ;;  %p339_p0 = scmp.ge.s32.totalorder %s397_s14, 1  ;;  %s397_s14 = sphi %s422_s14, %s15_s14  }
   0x4   : > { %p140_p1 = scmp.lt.s32.totalorder %s397_s14, 3 }
   0x6   : > { %p141_p2 = pnand %p339_p0, %p140_p1 }
   0x7   : > { %s340_s2 = sshll.u32 (!%p141_p2), %s335_s15, 1 }
   0x8   : > { %144 = sbr.rel (%p141_p2) target bundleno = 194 (0xc2), region = 32  ;;  %p165_p3 = scmp.lt.s32.totalorder (!%p141_p2), %s340_s2, 3 }
   0xd   : > { %v373_v1 = vld [vmem:[%s458_s1 + $0x18] sm:$0xff]  ;;  %v372_v2 = vld [vmem:[%s458_s1 + $0x10] sm:$0xff]  ;;  %s462_s2 = smov (!%p165_p3, %s340_s2), 3  ;;  %v371_v3 = vld [vmem:[%s458_s1 + $0x8] sm:$0xff]  ;;  %vm220_vm0 = vcmask 523264   ;;  %vm276_vm4 = vcmask 7168  }
   0xe   : > { %228 = vmatpush.bf16.msra.mxu0 %v373_v1  ;;  %s341_s22 = sshll.u32 %s462_s2, 2  ;;  %v370_v4 = vld [vmem:[%s458_s1] sm:$0xff]  ;;  %s343_s28 = sshll.u32 %s462_s2, 3 }
   0xf   : > { %s168_s27 = scalar_lea.vmem %s457_s0, %s341_s22  ;;  %v382_v6 = vld [vmem:[#allocation2] ss:$0 sm:$0xff]  ;;  %s174_s4 = scalar_lea.vmem %s460_s3, %s343_s28 }
  0x10   : > { %v369_v5 = vld [vmem:[%s168_s27] sm:$0xff] }
  0x12   : > { %229 = vmatpush.bf16.msra.mxu0 %v372_v2 }
  0x16   : > { %230 = vmatpush.bf16.msra.mxu0 %v371_v3 }
  0x1a   : > { %231 = vmatpush.bf16.msra.mxu0 %v370_v4 }
  0x1d   : > { %364 = vmatmul.msk.bf16.vlgmr.msra.gmra.mxu0 %vm220_vm0, %v369_v5 }
  0x9a   : > { %v233_v7 = vpop.f32.mrf.mxu0 }
  0x9b   : > { %v234_v8 = vadd.f32 %v382_v6, %v233_v7 }
  0x9d   : > { %v365_v9 = vmul.f32 -1.442695, %v234_v8 }
  0x9f   : > { %383 = vpow2.f32 %v365_v9 }
  0xa2   : > { %v235_v10 = vpop.f32.mrf.mxu0 }
  0xa3   : > { %v236_v11 = vadd.f32 %v382_v6, %v235_v10 }
  0xa5   : > { %v384_v12 = vpop.eup %383  ;;  %v366_v13 = vmul.f32 -1.442695, %v236_v11 }
  0xa6   : > { %v244_v14 = vadd.f32 1.0, %v384_v12 }
  0xa7   : > { %385 = vpow2.f32 %v366_v13 }
  0xa8   : > { %387 = vrcp.f32 %v244_v14  ;;  %v257_v20 = vand.u32 2147483648, %v244_v14  ;;  %v255_v22 = vand.u32 2147483647, %v244_v14  ;;  %vm251_vm2 = vweird.f32 %v244_v14 }
  0xaa   : > { %v258_v25 = vor.u32 1.1754944e-38, %v257_v20  ;;  %vm256_vm5 = vcmp.eq.f32.partialorder %v255_v22, 8.507059e+37 }
  0xad   : > { %v386_v15 = vpop.eup %385 }
  0xae   : > { %v388_v16 = vpop.eup %387  ;;  %v245_v17 = vadd.f32 1.0, %v386_v15 }
  0xaf   : > { %v247_v18 = vmul.f32 %v388_v16, %v244_v14  ;;  %vm252_vm1 = vweird.f32 %v388_v16 }
  0xb0   : > { %389 = vrcp.f32 %v245_v17  ;;  %vm253_vm3 = vmor %vm251_vm2, %vm252_vm1  ;;  %v272_v30 = vand.u32 2147483648, %v245_v17  ;;  %v270_v32 = vand.u32 2147483647, %v245_v17  ;;  %vm266_vm7 = vweird.f32 %v245_v17 }
  0xb1   : > { %v248_v19 = vsub.f32 1.0, %v247_v18 }
  0xb2   : > { %v273_v34 = vor.u32 1.1754944e-38, %v272_v30  ;;  %vm271_vm9 = vcmp.eq.f32.partialorder %v270_v32, 8.507059e+37 }
  0xb3   : > { %v249_v21 = vmul.f32 %v388_v16, %v248_v19 }
  0xb5   : > { %v250_v23 = vadd.f32 %v388_v16, %v249_v21 }
  0xb6   : > { %v390_v24 = vpop.eup %389 }
  0xb7   : > { %v254_v26 = vsel %vm253_vm3, %v388_v16, %v250_v23  ;;  %v262_v27 = vmul.f32 %v390_v24, %v245_v17  ;;  %vm267_vm6 = vweird.f32 %v390_v24 }
  0xb8   : > { %v259_v28 = vsel %vm256_vm5, %v258_v25, %v254_v26  ;;  %vm268_vm8 = vmor %vm266_vm7, %vm267_vm6 }
  0xb9   : > { %277 = vst.msk [vmem:[%s174_s4] sm:$0xff] %vm276_vm4, %v259_v28  ;;  %v263_v29 = vsub.f32 1.0, %v262_v27 }
  0xbb   : > { %v264_v31 = vmul.f32 %v390_v24, %v263_v29 }
  0xbd   : > { %v265_v33 = vadd.f32 %v390_v24, %v264_v31 }
  0xbf   : > { %v269_v35 = vsel %vm268_vm8, %v390_v24, %v265_v33 }
  0xc0   : > { %v274_v36 = vsel %vm271_vm9, %v273_v34, %v269_v35 }
  0xc1   : > { %278 = vst.msk [vmem:[%s174_s4 + $0x8] sm:$0xff] %vm276_vm4, %v274_v36 }
  0xc2 PF: > { %s15_s14 = sadd.s32 1, %s397_s14  }
  0xc3   : > { %p12_p4 = scmp.ge.s32.totalorder %s15_s14, 4  }
  0xc5   :  { %14 = sbr.rel (!%p12_p4) target bundleno = 3 (0x3), region = 62 }

// kernel: xfeat_forward.99
= control target key start
LH: loop header
LB: loop body
LE: loop exit
PB: predicated region body
PF: predicated region fallthrough
CT: control target
= control target key end

     0   :  { %8 = vsyncpa [#allocation3], 0  ;;  %s581_s0 = inlined_call_operand.vmem [shape: bf16[32,64], index: 0, kind: input, shape index: {}]   ;;  %s582_s1 = inlined_call_operand.vmem [shape: bf16[64,65], index: 1, kind: input, shape index: {}]   ;;  %s583_s2 = inlined_call_operand.vmem [shape: f32[1,65], index: 2, kind: input, shape index: {}]   ;;  %s584_s3 = inlined_call_operand.hbm [shape: f32[32,65], index: 3, kind: output, shape index: {}]  }
   0x1   :  { %10 = vsyncpa [#allocation3 + $0x1], 0  ;;  %s482_s12 = smov 0   ;;  %s484_s13 = smov 0  }
   0x2   :  { %s486_s14 = smov 0   ;;  %s488_s15 = smov 0  }
   0x3 LB: > { %s503_s16 = sadd.s32 4294967295, %s458_s15   ;;  %s315_s17 = sadd.s32 4294967294, %s458_s15   ;;  %s458_s15 = sphi %s488_s15, %s590_s15   ;;  %s454_s14 = sphi %s486_s14, %s589_s14   ;;  %s450_s13 = sphi %s484_s13, %s588_s13   ;;  %s446_s12 = sphi %s482_s12, %s587_s12  }
   0x4   : > { %s507_s18 = sadd.s32 1, %s458_s15   ;;  %s91_s19 = sadd.s32 1, %s454_s14 }
   0x5   : > { %s88_s20 = ssub.s32 %s458_s15, %s507_s18  ;;  %p101_p0 = scmp.ne.s32.totalorder %s454_s14, %s450_s13 }
   0x6   : > { %p89_p1 = scmp.eq.s32.totalorder %s88_s20, 0  ;;  %p102_p2 = scmp.eq.s32.totalorder %s503_s16, 1 }
   0x7   : > { %p107_p3 = scmp.ne.s32.totalorder %s450_s13, %s446_s12  ;;  %p108_p4 = scmp.eq.s32.totalorder %s315_s17, 1 }
   0x8   : > { %s518_s21 = scalar_select %p89_p1, %s454_s14, %s91_s19  }
   0x9   : > { %p520_p5 = por %p102_p2, %p101_p0  ;;  %p524_p6 = por %p108_p4, %p107_p3 }
   0xa   : > { %p318_p7 = scmp.ge.s32.totalorder %s458_s15, 1  ;;  %p141_p8 = scmp.lt.s32.totalorder %s458_s15, 3 }
   0xc   : > { %p142_p9 = pnand %p318_p7, %p141_p8 }
   0xd   : > { %s320_s26 = sshll.u32 (!%p142_p9), %s503_s16, 1  ;;  %s162_s10 = sand.u32 (!%p142_p9), 1, %s450_s13  }
   0xe   : > { %145 = sbr.rel (%p142_p9) target bundleno = 175 (0xaf), region = 32  ;;  %p166_p10 = scmp.lt.s32.totalorder (!%p142_p9), %s320_s26, 3 }
   0xf   : > { %s319_s11 = sshll.u32 (!%p142_p9), %s162_s10, 4  ;;  %s353_s20 = sshll.u32 (!%p142_p9), %s503_s16, 4 }
  0x10   : > { %s164_s27 = scalar_lea.vmem (!%p142_p9), [#allocation2], %s319_s11  ;;  %s238_s30 = scalar_lea.sflag (!%p142_p9), [#allocation3], %s162_s10 }
  0x11   : > { %s250_s28 = sshll.u32 (!%p142_p9), %s164_s27, 4  ;;  %s416_s7 = scalar_lea.hbm (!%p142_p9), %s584_s3, 32  ;;  %s251_s28 = int_to_ptr.vmem [resolvable:$true] %s250_s28 }
  0x13   : > { %v352_v0 = vld [vmem:[%s582_s1 + $0x18] sm:$0xff]  ;;  %v351_v1 = vld [vmem:[%s582_s1 + $0x10] sm:$0xff]  ;;  %s592_s26 = smov (!%p166_p10, %s320_s26), 3  ;;  %v350_v2 = vld [vmem:[%s582_s1 + $0x8] sm:$0xff]  ;;  %vm216_vm0 = vcmask 523264   ;;  %vm234_vm1 = vcmask 531456  }
  0x14   : > { %224 = vmatpush.bf16.msra.mxu0 %v352_v0  ;;  %s321_s4 = sshll.u32 %s592_s26, 2  ;;  %v349_v3 = vld [vmem:[%s582_s1] sm:$0xff]  ;;  %s249_s26 = scalar_lea.hbm %s584_s3, %s353_s20 }
  0x15   : > { %s169_s9 = scalar_lea.vmem %s581_s0, %s321_s4  ;;  %v395_v5 = vld [vmem:[%s583_s2] ss:$0 sm:$0xff]  ;;  %s252_s29 = sshll.u32 %s249_s26, 4  ;;  %s253_s29 = int_to_ptr.hbm [resolvable:$true] %s252_s29 }
  0x16   : > { %v348_v4 = vld [vmem:[%s169_s9] sm:$0xff]  ;;  %s410_s4 = sshra.s32 %s253_s29, 4  ;;  %s411_s4 = int_to_ptr.hbm [resolvable:$true] %s410_s4 }
  0x17   : > { %s412_s16 = scalar_lea.hbm %s411_s4, 16  ;;  %p417_p0 = scmp.lt.s32.totalorder %s411_s4, %s584_s3 }
  0x18   : > { %225 = vmatpush.bf16.msra.mxu0 %v351_v1  ;;  %p413_p11 = scmp.ne.s32.totalorder %s411_s4, %s412_s16  ;;  %p418_p1 = scmp.lt.s32.totalorder %s416_s7, %s412_s16 }
  0x1a   : > { %p414_p12 = pnand %p413_p11, %p520_p5  ;;  %p419_p2 = por %p418_p1, %p417_p0 }
  0x1c   : > { %226 = vmatpush.bf16.msra.mxu0 %v350_v2  ;;  %p415_p13 = pneg %p414_p12 }
  0x1e   : > { %p420_p3 = pnand %p419_p2, %p415_p13 }
  0x20   : > { %227 = vmatpush.bf16.msra.mxu0 %v349_v3 }
  0x23   : > { %342 = vmatmul.msk.bf16.vlgmr.msra.gmra.mxu0 %vm216_vm0, %v348_v4 }
  0xa0   : > { %v229_v6 = vpop.f32.mrf.mxu0 }
  0xa1   : > { %v230_v7 = vadd.f32 %v395_v5, %v229_v6 }
  0xa3   : > { %235 = vst.msk [vmem:[%s164_s27] sm:$0xff] %vm234_vm1, %v230_v7 }
  0xa8   : > { %v231_v8 = vpop.f32.mrf.mxu0 }
  0xa9   : > { %v232_v9 = vadd.f32 %v395_v5, %v231_v8 }
  0xab   : > { %236 = vst.msk [vmem:[%s164_s27 + $0x8] sm:$0xff] %vm234_vm1, %v232_v9 }
  0xac   : > { %423 = shalt.err (!%p420_p3)
}
  0xad   : > { %s460_s10 = smov 128   ;;  %s461_s11 = smov 8  }
  0xae   : > { %354 = dma.vmem_to_hbm [thread:$0]  (%p520_p5), %s251_s28, 256, %s253_s29, %s238_s30, %s460_s10, %s460_s10, %s461_s11  }
  0xaf PF: > { %p360_p4 = scmp.ge.s32.totalorder %s458_s15, 2  ;;  %s267_s17 = sand.u32 1, %s446_s12  }
  0xb0   : > { %s268_s19 = scalar_lea.sflag [#allocation3], %s267_s17 }
  0xb1   : > { %p357_p7 = pnand %p360_p4, %p524_p6 }
  0xb3   : > { %p358_p8 = pneg %p357_p7 }
  0xb5   : > { %441 = dma.done.wait (%p358_p8), %s268_s19, 256  }
  0xb6   : > { %443 = vsyncadd (%p358_p8), %s268_s19, 4294967040  ;;  %p13_p9 = scmp.ge.s32.totalorder %s507_s18, 4   ;;  %s587_s12 = smov %s450_s13 }
  0xb7   : > { %s588_s13 = smov %s454_s14  ;;  %s589_s14 = smov %s518_s21 }
  0xb8   : > { %s590_s15 = smov %s507_s18  ;;  %15 = sbr.rel (!%p13_p9) target bundleno = 3 (0x3), region = 67 }
  0xbd   :  { %274 = vsyncpa [#allocation3], 1 }
  0xbe   :  { %276 = vsyncpa [#allocation3 + $0x1], 1 }

</bundles_post_ra>
